<compile_context>
chip_gen: v7x
topology: tpu7x:2x2x1
jax: 0.10.0
libtpu: 0.0.40
codegen_flags: <defaults>
</compile_context>

<pallas_src>
import functools

import jax
import jax.numpy as jnp
from jax.experimental import pallas as pl
from jax.experimental.pallas import tpu as pltpu


C1, C2, C3 = 128, 64, 32


def _largest_divisor(n, cap):
    """Largest d <= cap with d | n (0 if none)."""
    best = 0
    for d in range(1, min(n, cap) + 1):
        if n % d == 0:
            best = d
    return best


# ---------------------------------------------------------------------------
# Linear (+ bias) that also emits per-column sum / sum-of-squares so the
# following BatchNorm needs no second pass over its input activation.
# ---------------------------------------------------------------------------
def _linear_kernel(x_ref, w_ref, b_ref, o_ref, st_ref):
    y = jnp.dot(x_ref[...], w_ref[...], preferred_element_type=jnp.float32)
    y = y + b_ref[...]
    st_ref[pl.ds(0, 1), :] = jnp.sum(y, axis=0, keepdims=True)
    st_ref[pl.ds(1, 1), :] = jnp.sum(y * y, axis=0, keepdims=True)
    o_ref[...] = y.astype(o_ref.dtype)


def linear_bias_stats(x, w, b, out_dtype=jnp.bfloat16):
    M, K = x.shape
    N = w.shape[1]
    return pl.pallas_call(
        _linear_kernel,
        out_shape=(jax.ShapeDtypeStruct((M, N), out_dtype),
                   jax.ShapeDtypeStruct((2, N), jnp.float32)),
        grid=(1,),                                 # whole weight fits VMEM easily
        in_specs=[
            pl.BlockSpec((M, K), lambda i: (0, 0)),
            pl.BlockSpec((K, N), lambda i: (0, 0)),
            pl.BlockSpec((1, N), lambda i: (0, 0)),
        ],
        out_specs=[
            pl.BlockSpec((M, N), lambda i: (0, 0)),
            pl.BlockSpec((2, N), lambda i: (0, 0)),
        ],
        compiler_params=pltpu.CompilerParams(dimension_semantics=("arbitrary",)),
    )(x, w, b)


# ---------------------------------------------------------------------------
# Fused  BN-affine (+LeakyReLU) -> nearest 2x upsample -> zero-pad -> 3x3 conv
# (+bias, optional tanh), with per-block BN partial stats for the *next* BN.
# ---------------------------------------------------------------------------
def _fused_conv_kernel(x_ref, ss_ref, w_ref, b_ref, o_ref, st_ref, xpad_ref,
                       *, tr, upsample, slope, apply_tanh):
    h_in, w_in, cin = x_ref.shape
    cout = o_ref.shape[-1]
    h = 2 * h_in if upsample else h_in
    w = 2 * w_in if upsample else w_in
    r = pl.program_id(1)

    # --- 1. BN affine (+ LeakyReLU) on the raw input (VPU, hidden under MXU) -
    scale = ss_ref[pl.ds(0, 1), :].reshape(1, 1, cin)
    shift = ss_ref[pl.ds(1, 1), :].reshape(1, 1, cin)
    xn = x_ref[...].astype(jnp.float32) * scale + shift
    if slope is not None:
        xn = jnp.where(xn > 0, xn, slope * xn)
    xn = xn.astype(jnp.bfloat16)                               # (h_in, w_in, cin)

    # --- 2. nearest 2x upsample -----------------------------------------------
    # rows: pure leading-dim broadcast + merge (no sublane relayout)
    if upsample:
        xr = jnp.broadcast_to(xn[:, None, :, :], (h_in, 2, w_in, cin))
        xr = xr.reshape(h, w_in, cin)
    else:
        xr = xn
    # cols (+ 1px zero pad): tiny 0/1 selection matmul on the MXU, avoiding
    # sublane-interleave relayouts entirely.
    q = jax.lax.broadcasted_iota(jnp.int32, (w + 2, w_in), 0)
    j = jax.lax.broadcasted_iota(jnp.int32, (w + 2, w_in), 1)
    if upsample:
        hit = (q == 2 * j + 1) | (q == 2 * j + 2)
    else:
        hit = q == j + 1
    sel = ((q >= 1) & (q <= w) & hit).astype(jnp.bfloat16)      # (w+2, w_in)
    sel_b = jnp.broadcast_to(sel[None, :, :], (h, w + 2, w_in))
    xw = jax.lax.dot_general(
        sel_b, xr, dimension_numbers=(((2,), (1,)), ((0,), (0,))),
        preferred_element_type=jnp.float32).astype(jnp.bfloat16)  # (h, w+2, cin)

    # --- 3. padded image into VMEM scratch (rebuilt every step so both grid
    #        axes stay "parallel"-safe under any megacore split) ---------------
    zrow = jnp.zeros((w + 2, cin), jnp.bfloat16)
    xpad_ref[0] = zrow
    xpad_ref[h + 1] = zrow
    xpad_ref[pl.ds(1, h), :, :] = xw

    # --- 4. 3x3 conv: 3 deep matmuls (K = 3*cin), back-to-back f32 accumulation
    row0 = pl.multiple_of(r * tr, tr)
    acc = jnp.zeros((tr * w, cout), jnp.float32)
    for dy in range(3):
        t0 = xpad_ref[pl.ds(row0 + dy, tr), pl.ds(0, w), :]
        t1 = xpad_ref[pl.ds(row0 + dy, tr), pl.ds(1, w), :]
        t2 = xpad_ref[pl.ds(row0 + dy, tr), pl.ds(2, w), :]
        band = jnp.concatenate([t0, t1, t2], axis=-1)            # (tr, w, 3*cin)
        band = band.reshape(tr * w, 3 * cin)
        acc = acc + jnp.dot(band, w_ref[dy],
                            preferred_element_type=jnp.float32)

    y = acc + b_ref[...]                                         # (tr*w, cout)
    if apply_tanh:
        y = jnp.tanh(y)

    # --- 5. partial BN stats of this block's output (for the next layer) ------
    st_ref[pl.ds(0, 1), :] = jnp.sum(y, axis=0, keepdims=True)
    st_ref[pl.ds(1, 1), :] = jnp.sum(y * y, axis=0, keepdims=True)

    # TODO(synk): a lane-dense (tr, w*cout) / NCHW output layout would avoid the
    # masked vst for cout < 128.
    o_ref[...] = y.reshape(tr, w, cout).astype(o_ref.dtype)


def fused_bn_upsample_conv3x3(x, ss, w, b, *, upsample, slope,
                              apply_tanh=False, out_dtype=jnp.bfloat16):
    """y = Conv3x3_pad1( Upsample2x?( LeakyReLU?( x*scale + shift ) ) ) + bias.

    x:  (B, Hin, Win, Cin) bf16 NHWC;  ss: (2, Cin) f32 [scale; shift];
    w:  (3, 3, Cin, Cout) bf16 HWIO;   b: (1, Cout) f32.
    Returns (y, stats): y (B, H, W, Cout); stats (B, n_r, 2, Cout) per-block
    partial [sum; sum-of-squares] of y for the next BatchNorm.
    """
    B, Hin, Win, Cin = x.shape
    H = 2 * Hin if upsample else Hin
    W = 2 * Win if upsample else Win
    Cout = w.shape[-1]
    w3 = w.reshape(3, 3 * Cin, Cout)             # (dy, dx*Cin + ci, co): free view

    # <=512 rows per matmul and >=2 row blocks per image (DMA/compute overlap
    # on both v7x cores; smaller f32 accumulator).
    cap = min(max(H // 2, 1), max(1, 512 // W))
    tr = _largest_divisor(H, cap) or H
    n_r = H // tr

    kernel = functools.partial(_fused_conv_kernel, tr=tr, upsample=upsample,
                               slope=slope, apply_tanh=apply_tanh)
    return pl.pallas_call(
        kernel,
        out_shape=(jax.ShapeDtypeStruct((B, H, W, Cout), out_dtype),
                   jax.ShapeDtypeStruct((B, n_r, 2, Cout), jnp.float32)),
        grid=(B, n_r),
        in_specs=[
            # raw image resident per batch element (no re-DMA across r steps)
            pl.BlockSpec((None, Hin, Win, Cin), lambda bb, rr: (bb, 0, 0, 0)),
            pl.BlockSpec((2, Cin), lambda bb, rr: (0, 0)),
            pl.BlockSpec((3, 3 * Cin, Cout), lambda bb, rr: (0, 0, 0)),
            pl.BlockSpec((1, Cout), lambda bb, rr: (0, 0)),
        ],
        out_specs=[
            pl.BlockSpec((None, tr, W, Cout), lambda bb, rr: (bb, rr, 0, 0)),
            pl.BlockSpec((None, None, 2, Cout), lambda bb, rr: (bb, rr, 0, 0)),
        ],
        scratch_shapes=[pltpu.VMEM((H + 2, W + 2, Cin), jnp.bfloat16)],
        compiler_params=pltpu.CompilerParams(
            dimension_semantics=("parallel", "parallel")),
    )(x, ss, w3, b)


# ---------------------------------------------------------------------------
# Tiny (2, C)-sized BN finalize: batch-stat sums -> per-channel scale/shift.
# ---------------------------------------------------------------------------
def _bn_from_stats(st, count, gamma, beta, eps):
    mean = st[0:1, :] / count
    var = jnp.maximum(st[1:2, :] / count - mean * mean, 0.0)   # clamp cancellation
    scale = gamma * jax.lax.rsqrt(var + eps)
    shift = beta - mean * scale
    return jnp.concatenate([scale, shift], axis=0)             # (2, C) f32


# ---------------------------------------------------------------------------
# GeneratorInfo parameters + forward
# ---------------------------------------------------------------------------
def init_params(key, latent_dim, n_classes, code_dim, img_shape):
    input_dim = latent_dim + n_classes + code_dim
    s = img_shape[2] // 4
    ks = jax.random.split(key, 8)

    def uinit(k, fan_in, shape, dtype=jnp.float32):
        bound = 1.0 / float(fan_in) ** 0.5
        return jax.random.uniform(k, shape, jnp.float32, -bound, bound).astype(dtype)

    return {
        # Linear(input_dim, C1*s*s); columns stored NHWC-ordered (h, w, c) so
        # the kernel output reshapes straight to (B, s, s, C1) with no relayout
        # (a fixed permutation of randomly-initialized output features).
        "l1_w": uinit(ks[0], input_dim, (input_dim, s * s * C1), jnp.bfloat16),
        "l1_b": uinit(ks[1], input_dim, (1, s * s * C1)),
        "bn1_g": jnp.ones((1, C1), jnp.float32),
        "bn1_b": jnp.zeros((1, C1), jnp.float32),
        "conv1_w": uinit(ks[2], C1 * 9, (3, 3, C1, C2), jnp.bfloat16),
        "conv1_b": uinit(ks[3], C1 * 9, (1, C2)),
        "bn2_g": jnp.ones((1, C2), jnp.float32),
        "bn2_b": jnp.zeros((1, C2), jnp.float32),
        "conv2_w": uinit(ks[4], C2 * 9, (3, 3, C2, C3), jnp.bfloat16),
        "conv2_b": uinit(ks[5], C2 * 9, (1, C3)),
        "bn3_g": jnp.ones((1, C3), jnp.float32),
        "bn3_b": jnp.zeros((1, C3), jnp.float32),
        "conv3_w": uinit(ks[6], C3 * 9, (3, 3, C3, img_shape[0]), jnp.bfloat16),
        "conv3_b": uinit(ks[7], C3 * 9, (1, img_shape[0])),
    }


@functools.partial(jax.jit, static_argnames=("img_shape",))
def generator_info_forward(params, noise, labels, code, img_shape):
    s = img_shape[2] // 4
    B = noise.shape[0]

    # gen_input = cat((noise, labels, code), -1); out = l1(gen_input)
    gen_input = jnp.concatenate([noise, labels, code], axis=-1)
    out, l1_stats = linear_bias_stats(
        gen_input.astype(jnp.bfloat16), params["l1_w"], params["l1_b"])
    x = out.reshape(B, s, s, C1)              # free NHWC view (NHWC-ordered cols)

    # BatchNorm2d(128) -> Upsample x2 -> Conv(128, 64)   [BN1 stats from l1]
    ss1 = _bn_from_stats(l1_stats.reshape(2, s * s, C1).sum(axis=1),
                         B * s * s, params["bn1_g"], params["bn1_b"], 1e-5)
    y1, st1 = fused_bn_upsample_conv3x3(
        x, ss1, params["conv1_w"], params["conv1_b"], upsample=True, slope=None)

    # BatchNorm2d(64, eps=0.8) -> LeakyReLU(0.2) -> Upsample x2 -> Conv(64, 32)
    # (eps=0.8 faithfully matches the reference module's positional arg.)
    ss2 = _bn_from_stats(st1.sum(axis=(0, 1)), B * (2 * s) ** 2,
                         params["bn2_g"], params["bn2_b"], 0.8)
    y2, st2 = fused_bn_upsample_conv3x3(
        y1, ss2, params["conv2_w"], params["conv2_b"], upsample=True, slope=0.2)

    # BatchNorm2d(32, eps=0.8) -> LeakyReLU(0.2) -> Conv(32, img_c) -> Tanh
    ss3 = _bn_from_stats(st2.sum(axis=(0, 1)), B * (4 * s) ** 2,
                         params["bn3_g"], params["bn3_b"], 0.8)
    img, _ = fused_bn_upsample_conv3x3(
        y2, ss3, params["conv3_w"], params["conv3_b"], upsample=False,
        slope=0.2, apply_tanh=True, out_dtype=jnp.float32)

    # TODO(synk): emit NCHW (B, C, H*W) directly from the last conv (lane-dense
    # store) to drop this tiny relayout.
    return jnp.transpose(img, (0, 3, 1, 2))


# ---------------------------------------------------------------------------
if __name__ == "__main__":
    latent_dim, n_classes, code_dim = 8, 4, 2
    img_shape = (3, 16, 16)   # (channels, H, W)
    batch = 2

    key = jax.random.PRNGKey(0)
    k_p, k_n, k_l, k_c = jax.random.split(key, 4)

    params = init_params(k_p, latent_dim, n_classes, code_dim, img_shape)
    noise = jax.random.normal(k_n, (batch, latent_dim), jnp.float32)
    labels = jax.nn.one_hot(
        jax.random.randint(k_l, (batch,), 0, n_classes), n_classes,
        dtype=jnp.float32)
    code = jax.random.uniform(k_c, (batch, code_dim), jnp.float32, -1.0, 1.0)

    img = generator_info_forward(params, noise, labels, code, img_shape=img_shape)
    img = jax.block_until_ready(img)

    assert img.shape == (batch, img_shape[0], img_shape[1], img_shape[2])
    assert bool(jnp.all(jnp.isfinite(img)))
    assert bool(jnp.all(jnp.abs(img) <= 1.0))  # tanh output range
    print("KERNEL_OK")
</pallas_src>

<mosaic_0001>
module attributes {stable_mosaic.version = 11 : i64} {
  func.func @_linear_kernel(%arg0: i32, %arg1: memref<2x14xbf16, #tpu.memory_space<vmem>>, %arg2: memref<14x2048xbf16, #tpu.memory_space<vmem>>, %arg3: memref<1x2048xf32, #tpu.memory_space<vmem>>, %arg4: memref<2x2048xbf16, #tpu.memory_space<vmem>>, %arg5: memref<2x2048xf32, #tpu.memory_space<vmem>>) attributes {dimension_semantics = [#tpu.dimension_semantics<arbitrary>], iteration_bounds = array<i64: 1>, scalar_prefetch = 0 : i64, scratch_operands = 0 : i64, tpu.core_type = #tpu.core_type<tc>, window_params = [{pipeline_mode = #tpu.pipeline_mode<synchronous>, transform_indices = @transform_0, window_bounds = array<i64: 2, 14>}, {pipeline_mode = #tpu.pipeline_mode<synchronous>, transform_indices = @transform_1, window_bounds = array<i64: 14, 2048>}, {pipeline_mode = #tpu.pipeline_mode<synchronous>, transform_indices = @transform_2, window_bounds = array<i64: 1, 2048>}, {pipeline_mode = #tpu.pipeline_mode<synchronous>, transform_indices = @transform_3, window_bounds = array<i64: 2, 2048>}, {pipeline_mode = #tpu.pipeline_mode<synchronous>, transform_indices = @transform_4, window_bounds = array<i64: 2, 2048>}]} {
    %c0 = arith.constant 0 : index
    %c0_0 = arith.constant 0 : index
    %0 = vector.load %arg1[%c0, %c0_0] : memref<2x14xbf16, #tpu.memory_space<vmem>>, vector<2x14xbf16>
    %c0_1 = arith.constant 0 : index
    %c0_2 = arith.constant 0 : index
    %1 = vector.load %arg2[%c0_1, %c0_2] : memref<14x2048xbf16, #tpu.memory_space<vmem>>, vector<14x2048xbf16>
    %cst = arith.constant dense<0.000000e+00> : vector<2x2048xf32>
    %2 = tpu.matmul %0, %1, %cst {dimension_numbers = #tpu.dot_dimension_numbers<[1], [0], [0], [1], [0, 0, 1, 1], [], []>} : vector<2x14xbf16>, vector<14x2048xbf16>, vector<2x2048xf32> -> vector<2x2048xf32>
    %c0_3 = arith.constant 0 : index
    %c0_4 = arith.constant 0 : index
    %3 = vector.load %arg3[%c0_3, %c0_4] : memref<1x2048xf32, #tpu.memory_space<vmem>>, vector<1x2048xf32>
    %4 = vector.broadcast %3 : vector<1x2048xf32> to vector<2x2048xf32>
    %5 = arith.addf %2, %4 : vector<2x2048xf32>
    %cst_5 = arith.constant dense<0.000000e+00> : vector<2048xf32>
    %6 = vector.multi_reduction <add>, %5, %cst_5 [0] : vector<2x2048xf32> to vector<2048xf32>
    %7 = vector.shape_cast %6 : vector<2048xf32> to vector<1x2048xf32>
    %c0_6 = arith.constant 0 : index
    %c0_7 = arith.constant 0 : index
    %8 = vector.load %arg5[%c0_6, %c0_7] : memref<2x2048xf32, #tpu.memory_space<vmem>>, vector<1x2048xf32>
    tpu.vector_store %arg5[%c0_6, %c0_7], %7 {strides = array<i32>} : memref<2x2048xf32, #tpu.memory_space<vmem>>, vector<1x2048xf32>,
    %9 = arith.mulf %5, %5 : vector<2x2048xf32>
    %cst_8 = arith.constant dense<0.000000e+00> : vector<2048xf32>
    %10 = vector.multi_reduction <add>, %9, %cst_8 [0] : vector<2x2048xf32> to vector<2048xf32>
    %11 = vector.shape_cast %10 : vector<2048xf32> to vector<1x2048xf32>
    %c1 = arith.constant 1 : index
    %c0_9 = arith.constant 0 : index
    %12 = vector.load %arg5[%c1, %c0_9] : memref<2x2048xf32, #tpu.memory_space<vmem>>, vector<1x2048xf32>
    tpu.vector_store %arg5[%c1, %c0_9], %11 {strides = array<i32>} : memref<2x2048xf32, #tpu.memory_space<vmem>>, vector<1x2048xf32>,
    %13 = arith.truncf %5 : vector<2x2048xf32> to vector<2x2048xbf16>
    %c0_10 = arith.constant 0 : index
    %c0_11 = arith.constant 0 : index
    %14 = vector.load %arg4[%c0_10, %c0_11] : memref<2x2048xbf16, #tpu.memory_space<vmem>>, vector<2x2048xbf16>
    tpu.vector_store %arg4[%c0_10, %c0_11], %13 {strides = array<i32>} : memref<2x2048xbf16, #tpu.memory_space<vmem>>, vector<2x2048xbf16>,
    return
  }
  func.func @transform_0(%arg0: i32) -> (i32, i32) {
    %c0_i32 = arith.constant 0 : i32
    %c0_i32_0 = arith.constant 0 : i32
    %c0_i32_1 = arith.constant 0 : i32
    return %c0_i32, %c0_i32_0 : i32, i32
  }
  func.func @transform_1(%arg0: i32) -> (i32, i32) {
    %c0_i32 = arith.constant 0 : i32
    %c0_i32_0 = arith.constant 0 : i32
    %c0_i32_1 = arith.constant 0 : i32
    return %c0_i32, %c0_i32_0 : i32, i32
  }
  func.func @transform_2(%arg0: i32) -> (i32, i32) {
    %c0_i32 = arith.constant 0 : i32
    %c0_i32_0 = arith.constant 0 : i32
    %c0_i32_1 = arith.constant 0 : i32
    return %c0_i32, %c0_i32_0 : i32, i32
  }
  func.func @transform_3(%arg0: i32) -> (i32, i32) {
    %c0_i32 = arith.constant 0 : i32
    %c0_i32_0 = arith.constant 0 : i32
    %c0_i32_1 = arith.constant 0 : i32
    return %c0_i32, %c0_i32_0 : i32, i32
  }
  func.func @transform_4(%arg0: i32) -> (i32, i32) {
    %c0_i32 = arith.constant 0 : i32
    %c0_i32_0 = arith.constant 0 : i32
    %c0_i32_1 = arith.constant 0 : i32
    return %c0_i32, %c0_i32_0 : i32, i32
  }
}

module attributes {stable_mosaic.version = 11 : i64} {
  func.func @_fused_conv_kernel(%arg0: i32, %arg1: i32, %arg2: memref<1x4x4x128xbf16, #tpu.memory_space<vmem>>, %arg3: memref<2x128xf32, #tpu.memory_space<vmem>>, %arg4: memref<3x384x64xbf16, #tpu.memory_space<vmem>>, %arg5: memref<1x64xf32, #tpu.memory_space<vmem>>, %arg6: memref<1x4x8x64xbf16, #tpu.memory_space<vmem>>, %arg7: memref<1x1x2x64xf32, #tpu.memory_space<vmem>>, %arg8: memref<10x10x128xbf16, #tpu.memory_space<vmem>>) attributes {dimension_semantics = [#tpu.dimension_semantics<parallel>, #tpu.dimension_semantics<parallel>], iteration_bounds = array<i64: 2, 2>, scalar_prefetch = 0 : i64, scratch_operands = 1 : i64, tpu.core_type = #tpu.core_type<tc>, window_params = [{transform_indices = @transform_0, window_bounds = array<i64: 1, 4, 4, 128>}, {pipeline_mode = #tpu.pipeline_mode<synchronous>, transform_indices = @transform_1, window_bounds = array<i64: 2, 128>}, {pipeline_mode = #tpu.pipeline_mode<synchronous>, transform_indices = @transform_2, window_bounds = array<i64: 3, 384, 64>}, {pipeline_mode = #tpu.pipeline_mode<synchronous>, transform_indices = @transform_3, window_bounds = array<i64: 1, 64>}, {transform_indices = @transform_4, window_bounds = array<i64: 1, 4, 8, 64>}, {transform_indices = @transform_5, window_bounds = array<i64: 1, 1, 2, 64>}]} {
    %c0 = arith.constant 0 : index
    %c0_0 = arith.constant 0 : index
    %0 = vector.load %arg3[%c0, %c0_0] : memref<2x128xf32, #tpu.memory_space<vmem>>, vector<1x128xf32>
    %1 = vector.shape_cast %0 : vector<1x128xf32> to vector<1x1x128xf32>
    %c1 = arith.constant 1 : index
    %c0_1 = arith.constant 0 : index
    %2 = vector.load %arg3[%c1, %c0_1] : memref<2x128xf32, #tpu.memory_space<vmem>>, vector<1x128xf32>
    %3 = vector.shape_cast %2 : vector<1x128xf32> to vector<1x1x128xf32>
    %c0_2 = arith.constant 0 : index
    %c0_3 = arith.constant 0 : index
    %c0_4 = arith.constant 0 : index
    %c0_5 = arith.constant 0 : index
    %4 = vector.load %arg2[%c0_2, %c0_3, %c0_4, %c0_5] : memref<1x4x4x128xbf16, #tpu.memory_space<vmem>>, vector<1x4x4x128xbf16>
    %5 = vector.shape_cast %4 : vector<1x4x4x128xbf16> to vector<4x4x128xbf16>
    %6 = arith.extf %5 : vector<4x4x128xbf16> to vector<4x4x128xf32>
    %7 = vector.broadcast %1 : vector<1x1x128xf32> to vector<4x4x128xf32>
    %8 = arith.mulf %6, %7 : vector<4x4x128xf32>
    %9 = vector.broadcast %3 : vector<1x1x128xf32> to vector<4x4x128xf32>
    %10 = arith.addf %8, %9 : vector<4x4x128xf32>
    %11 = arith.truncf %10 : vector<4x4x128xf32> to vector<4x4x128xbf16>
    %12 = vector.shape_cast %11 : vector<4x4x128xbf16> to vector<4x1x4x128xbf16>
    %13 = vector.shape_cast %12 : vector<4x1x4x128xbf16> to vector<4x1x4x128xbf16>
    %14 = vector.broadcast %13 : vector<4x1x4x128xbf16> to vector<4x2x4x128xbf16>
    %15 = vector.shape_cast %14 : vector<4x2x4x128xbf16> to vector<8x4x128xbf16>
    %16 = tpu.iota {dimensions = array<i32: 0>} : vector<10x4xi32>
    %17 = tpu.iota {dimensions = array<i32: 1>} : vector<10x4xi32>
    %c2_i32 = arith.constant 2 : i32
    %18 = vector.broadcast %c2_i32 : i32 to vector<10x4xi32>
    %19 = arith.muli %18, %17 : vector<10x4xi32>
    %c1_i32 = arith.constant 1 : i32
    %20 = vector.broadcast %c1_i32 : i32 to vector<10x4xi32>
    %21 = arith.addi %19, %20 : vector<10x4xi32>
    %22 = arith.cmpi eq, %16, %21 : vector<10x4xi32>
    %c2_i32_6 = arith.constant 2 : i32
    %23 = vector.broadcast %c2_i32_6 : i32 to vector<10x4xi32>
    %24 = arith.muli %23, %17 : vector<10x4xi32>
    %c2_i32_7 = arith.constant 2 : i32
    %25 = vector.broadcast %c2_i32_7 : i32 to vector<10x4xi32>
    %26 = arith.addi %24, %25 : vector<10x4xi32>
    %27 = arith.cmpi eq, %16, %26 : vector<10x4xi32>
    %28 = arith.ori %22, %27 : vector<10x4xi1>
    %c1_i32_8 = arith.constant 1 : i32
    %29 = vector.broadcast %c1_i32_8 : i32 to vector<10x4xi32>
    %30 = arith.cmpi sge, %16, %29 : vector<10x4xi32>
    %c8_i32 = arith.constant 8 : i32
    %31 = vector.broadcast %c8_i32 : i32 to vector<10x4xi32>
    %32 = arith.cmpi sle, %16, %31 : vector<10x4xi32>
    %33 = arith.andi %30, %32 : vector<10x4xi1>
    %34 = arith.andi %33, %28 : vector<10x4xi1>
    %35 = arith.extui %34 : vector<10x4xi1> to vector<10x4xi32>
    %36 = arith.sitofp %35 : vector<10x4xi32> to vector<10x4xf32>
    %37 = arith.truncf %36 : vector<10x4xf32> to vector<10x4xbf16>
    %38 = vector.shape_cast %37 : vector<10x4xbf16> to vector<1x10x4xbf16>
    %39 = vector.shape_cast %38 : vector<1x10x4xbf16> to vector<1x10x4xbf16>
    %40 = vector.broadcast %39 : vector<1x10x4xbf16> to vector<8x10x4xbf16>
    %cst = arith.constant dense<0.000000e+00> : vector<8x10x128xf32>
    %41 = tpu.matmul %40, %15, %cst {dimension_numbers = #tpu.dot_dimension_numbers<[2], [1], [1], [2], [0, 0, 0, 1, 1, 2], [0], [0]>} : vector<8x10x4xbf16>, vector<8x4x128xbf16>, vector<8x10x128xf32> -> vector<8x10x128xf32>
    %42 = arith.truncf %41 : vector<8x10x128xf32> to vector<8x10x128xbf16>
    %cst_9 = arith.constant 0.000000e+00 : bf16
    %43 = vector.broadcast %cst_9 : bf16 to vector<10x128xbf16>
    %c0_10 = arith.constant 0 : index
    %c0_11 = arith.constant 0 : index
    %c0_12 = arith.constant 0 : index
    %44 = vector.load %arg8[%c0_10, %c0_11, %c0_12] : memref<10x10x128xbf16, #tpu.memory_space<vmem>>, vector<1x10x128xbf16>
    %45 = vector.shape_cast %44 : vector<1x10x128xbf16> to vector<10x128xbf16>
    %46 = vector.shape_cast %43 : vector<10x128xbf16> to vector<1x10x128xbf16>
    tpu.vector_store %arg8[%c0_10, %c0_11, %c0_12], %46 {strides = array<i32>} : memref<10x10x128xbf16, #tpu.memory_space<vmem>>, vector<1x10x128xbf16>,
    %c9 = arith.constant 9 : index
    %c0_13 = arith.constant 0 : index
    %c0_14 = arith.constant 0 : index
    %47 = vector.load %arg8[%c9, %c0_13, %c0_14] : memref<10x10x128xbf16, #tpu.memory_space<vmem>>, vector<1x10x128xbf16>
    %48 = vector.shape_cast %47 : vector<1x10x128xbf16> to vector<10x128xbf16>
    %49 = vector.shape_cast %43 : vector<10x128xbf16> to vector<1x10x128xbf16>
    tpu.vector_store %arg8[%c9, %c0_13, %c0_14], %49 {strides = array<i32>} : memref<10x10x128xbf16, #tpu.memory_space<vmem>>, vector<1x10x128xbf16>,
    %c1_15 = arith.constant 1 : index
    %c0_16 = arith.constant 0 : index
    %c0_17 = arith.constant 0 : index
    %50 = vector.load %arg8[%c1_15, %c0_16, %c0_17] : memref<10x10x128xbf16, #tpu.memory_space<vmem>>, vector<8x10x128xbf16>
    tpu.vector_store %arg8[%c1_15, %c0_16, %c0_17], %42 {strides = array<i32>} : memref<10x10x128xbf16, #tpu.memory_space<vmem>>, vector<8x10x128xbf16>,
    %c4_i32 = arith.constant 4 : i32
    %51 = arith.muli %arg1, %c4_i32 : i32
    %52 = tpu.assume_multiple %51, 4 : i32
    %cst_18 = arith.constant 0.000000e+00 : f32
    %53 = vector.broadcast %cst_18 : f32 to vector<32x64xf32>
    %c0_i32 = arith.constant 0 : i32
    %54 = arith.addi %52, %c0_i32 : i32
    %55 = arith.index_cast %54 : i32 to index
    %c0_19 = arith.constant 0 : index
    %c0_20 = arith.constant 0 : index
    %56 = vector.load %arg8[%55, %c0_19, %c0_20] : memref<10x10x128xbf16, #tpu.memory_space<vmem>>, vector<4x8x128xbf16>
    %c0_i32_21 = arith.constant 0 : i32
    %57 = arith.addi %52, %c0_i32_21 : i32
    %58 = arith.index_cast %57 : i32 to index
    %c1_22 = arith.constant 1 : index
    %c0_23 = arith.constant 0 : index
    %59 = vector.load %arg8[%58, %c1_22, %c0_23] : memref<10x10x128xbf16, #tpu.memory_space<vmem>>, vector<4x8x128xbf16>
    %c0_i32_24 = arith.constant 0 : i32
    %60 = arith.addi %52, %c0_i32_24 : i32
    %61 = arith.index_cast %60 : i32 to index
    %c2 = arith.constant 2 : index
    %c0_25 = arith.constant 0 : index
    %62 = vector.load %arg8[%61, %c2, %c0_25] : memref<10x10x128xbf16, #tpu.memory_space<vmem>>, vector<4x8x128xbf16>
    %63 = tpu.concatenate %56, %59, %62 in 2 : vector<4x8x128xbf16>, vector<4x8x128xbf16>, vector<4x8x128xbf16> -> vector<4x8x384xbf16>
    %64 = vector.shape_cast %63 : vector<4x8x384xbf16> to vector<32x384xbf16>
    %c0_26 = arith.constant 0 : index
    %c0_27 = arith.constant 0 : index
    %c0_28 = arith.constant 0 : index
    %65 = vector.load %arg4[%c0_26, %c0_27, %c0_28] : memref<3x384x64xbf16, #tpu.memory_space<vmem>>, vector<1x384x64xbf16>
    %66 = vector.shape_cast %65 : vector<1x384x64xbf16> to vector<384x64xbf16>
    %cst_29 = arith.constant dense<0.000000e+00> : vector<32x64xf32>
    %67 = tpu.matmul %64, %66, %cst_29 {dimension_numbers = #tpu.dot_dimension_numbers<[1], [0], [0], [1], [0, 0, 1, 1], [], []>} : vector<32x384xbf16>, vector<384x64xbf16>, vector<32x64xf32> -> vector<32x64xf32>
    %68 = arith.addf %53, %67 : vector<32x64xf32>
    %c1_i32_30 = arith.constant 1 : i32
    %69 = arith.addi %52, %c1_i32_30 : i32
    %70 = arith.index_cast %69 : i32 to index
    %c0_31 = arith.constant 0 : index
    %c0_32 = arith.constant 0 : index
    %71 = vector.load %arg8[%70, %c0_31, %c0_32] : memref<10x10x128xbf16, #tpu.memory_space<vmem>>, vector<4x8x128xbf16>
    %c1_i32_33 = arith.constant 1 : i32
    %72 = arith.addi %52, %c1_i32_33 : i32
    %73 = arith.index_cast %72 : i32 to index
    %c1_34 = arith.constant 1 : index
    %c0_35 = arith.constant 0 : index
    %74 = vector.load %arg8[%73, %c1_34, %c0_35] : memref<10x10x128xbf16, #tpu.memory_space<vmem>>, vector<4x8x128xbf16>
    %c1_i32_36 = arith.constant 1 : i32
    %75 = arith.addi %52, %c1_i32_36 : i32
    %76 = arith.index_cast %75 : i32 to index
    %c2_37 = arith.constant 2 : index
    %c0_38 = arith.constant 0 : index
    %77 = vector.load %arg8[%76, %c2_37, %c0_38] : memref<10x10x128xbf16, #tpu.memory_space<vmem>>, vector<4x8x128xbf16>
    %78 = tpu.concatenate %71, %74, %77 in 2 : vector<4x8x128xbf16>, vector<4x8x128xbf16>, vector<4x8x128xbf16> -> vector<4x8x384xbf16>
    %79 = vector.shape_cast %78 : vector<4x8x384xbf16> to vector<32x384xbf16>
    %c1_39 = arith.constant 1 : index
    %c0_40 = arith.constant 0 : index
    %c0_41 = arith.constant 0 : index
    %80 = vector.load %arg4[%c1_39, %c0_40, %c0_41] : memref<3x384x64xbf16, #tpu.memory_space<vmem>>, vector<1x384x64xbf16>
    %81 = vector.shape_cast %80 : vector<1x384x64xbf16> to vector<384x64xbf16>
    %cst_42 = arith.constant dense<0.000000e+00> : vector<32x64xf32>
    %82 = tpu.matmul %79, %81, %cst_42 {dimension_numbers = #tpu.dot_dimension_numbers<[1], [0], [0], [1], [0, 0, 1, 1], [], []>} : vector<32x384xbf16>, vector<384x64xbf16>, vector<32x64xf32> -> vector<32x64xf32>
    %83 = arith.addf %68, %82 : vector<32x64xf32>
    %c2_i32_43 = arith.constant 2 : i32
    %84 = arith.addi %52, %c2_i32_43 : i32
    %85 = arith.index_cast %84 : i32 to index
    %c0_44 = arith.constant 0 : index
    %c0_45 = arith.constant 0 : index
    %86 = vector.load %arg8[%85, %c0_44, %c0_45] : memref<10x10x128xbf16, #tpu.memory_space<vmem>>, vector<4x8x128xbf16>
    %c2_i32_46 = arith.constant 2 : i32
    %87 = arith.addi %52, %c2_i32_46 : i32
    %88 = arith.index_cast %87 : i32 to index
    %c1_47 = arith.constant 1 : index
    %c0_48 = arith.constant 0 : index
    %89 = vector.load %arg8[%88, %c1_47, %c0_48] : memref<10x10x128xbf16, #tpu.memory_space<vmem>>, vector<4x8x128xbf16>
    %c2_i32_49 = arith.constant 2 : i32
    %90 = arith.addi %52, %c2_i32_49 : i32
    %91 = arith.index_cast %90 : i32 to index
    %c2_50 = arith.constant 2 : index
    %c0_51 = arith.constant 0 : index
    %92 = vector.load %arg8[%91, %c2_50, %c0_51] : memref<10x10x128xbf16, #tpu.memory_space<vmem>>, vector<4x8x128xbf16>
    %93 = tpu.concatenate %86, %89, %92 in 2 : vector<4x8x128xbf16>, vector<4x8x128xbf16>, vector<4x8x128xbf16> -> vector<4x8x384xbf16>
    %94 = vector.shape_cast %93 : vector<4x8x384xbf16> to vector<32x384xbf16>
    %c2_52 = arith.constant 2 : index
    %c0_53 = arith.constant 0 : index
    %c0_54 = arith.constant 0 : index
    %95 = vector.load %arg4[%c2_52, %c0_53, %c0_54] : memref<3x384x64xbf16, #tpu.memory_space<vmem>>, vector<1x384x64xbf16>
    %96 = vector.shape_cast %95 : vector<1x384x64xbf16> to vector<384x64xbf16>
    %cst_55 = arith.constant dense<0.000000e+00> : vector<32x64xf32>
    %97 = tpu.matmul %94, %96, %cst_55 {dimension_numbers = #tpu.dot_dimension_numbers<[1], [0], [0], [1], [0, 0, 1, 1], [], []>} : vector<32x384xbf16>, vector<384x64xbf16>, vector<32x64xf32> -> vector<32x64xf32>
    %98 = arith.addf %83, %97 : vector<32x64xf32>
    %c0_56 = arith.constant 0 : index
    %c0_57 = arith.constant 0 : index
    %99 = vector.load %arg5[%c0_56, %c0_57] : memref<1x64xf32, #tpu.memory_space<vmem>>, vector<1x64xf32>
    %100 = vector.broadcast %99 : vector<1x64xf32> to vector<32x64xf32>
    %101 = arith.addf %98, %100 : vector<32x64xf32>
    %cst_58 = arith.constant dense<0.000000e+00> : vector<64xf32>
    %102 = vector.multi_reduction <add>, %101, %cst_58 [0] : vector<32x64xf32> to vector<64xf32>
    %103 = vector.shape_cast %102 : vector<64xf32> to vector<1x64xf32>
    %c0_59 = arith.constant 0 : index
    %c0_60 = arith.constant 0 : index
    %c0_61 = arith.constant 0 : index
    %c0_62 = arith.constant 0 : index
    %104 = vector.load %arg7[%c0_59, %c0_60, %c0_61, %c0_62] : memref<1x1x2x64xf32, #tpu.memory_space<vmem>>, vector<1x1x1x64xf32>
    %105 = vector.shape_cast %104 : vector<1x1x1x64xf32> to vector<1x64xf32>
    %106 = vector.shape_cast %103 : vector<1x64xf32> to vector<1x1x1x64xf32>
    tpu.vector_store %arg7[%c0_59, %c0_60, %c0_61, %c0_62], %106 {strides = array<i32>} : memref<1x1x2x64xf32, #tpu.memory_space<vmem>>, vector<1x1x1x64xf32>,
    %107 = arith.mulf %101, %101 : vector<32x64xf32>
    %cst_63 = arith.constant dense<0.000000e+00> : vector<64xf32>
    %108 = vector.multi_reduction <add>, %107, %cst_63 [0] : vector<32x64xf32> to vector<64xf32>
    %109 = vector.shape_cast %108 : vector<64xf32> to vector<1x64xf32>
    %c0_64 = arith.constant 0 : index
    %c0_65 = arith.constant 0 : index
    %c1_66 = arith.constant 1 : index
    %c0_67 = arith.constant 0 : index
    %110 = vector.load %arg7[%c0_64, %c0_65, %c1_66, %c0_67] : memref<1x1x2x64xf32, #tpu.memory_space<vmem>>, vector<1x1x1x64xf32>
    %111 = vector.shape_cast %110 : vector<1x1x1x64xf32> to vector<1x64xf32>
    %112 = vector.shape_cast %109 : vector<1x64xf32> to vector<1x1x1x64xf32>
    tpu.vector_store %arg7[%c0_64, %c0_65, %c1_66, %c0_67], %112 {strides = array<i32>} : memref<1x1x2x64xf32, #tpu.memory_space<vmem>>, vector<1x1x1x64xf32>,
    %113 = vector.shape_cast %101 : vector<32x64xf32> to vector<4x8x64xf32>
    %114 = arith.truncf %113 : vector<4x8x64xf32> to vector<4x8x64xbf16>
    %c0_68 = arith.constant 0 : index
    %c0_69 = arith.constant 0 : index
    %c0_70 = arith.constant 0 : index
    %c0_71 = arith.constant 0 : index
    %115 = vector.load %arg6[%c0_68, %c0_69, %c0_70, %c0_71] : memref<1x4x8x64xbf16, #tpu.memory_space<vmem>>, vector<1x4x8x64xbf16>
    %116 = vector.shape_cast %115 : vector<1x4x8x64xbf16> to vector<4x8x64xbf16>
    %117 = vector.shape_cast %114 : vector<4x8x64xbf16> to vector<1x4x8x64xbf16>
    tpu.vector_store %arg6[%c0_68, %c0_69, %c0_70, %c0_71], %117 {strides = array<i32>} : memref<1x4x8x64xbf16, #tpu.memory_space<vmem>>, vector<1x4x8x64xbf16>,
    return
  }
  func.func @transform_0(%arg0: i32, %arg1: i32) -> (i32, i32, i32, i32) {
    %c0_i32 = arith.constant 0 : i32
    %c0_i32_0 = arith.constant 0 : i32
    %c0_i32_1 = arith.constant 0 : i32
    %c0_i32_2 = arith.constant 0 : i32
    return %arg0, %c0_i32, %c0_i32_0, %c0_i32_1 : i32, i32, i32, i32
  }
  func.func @transform_1(%arg0: i32, %arg1: i32) -> (i32, i32) {
    %c0_i32 = arith.constant 0 : i32
    %c0_i32_0 = arith.constant 0 : i32
    %c0_i32_1 = arith.constant 0 : i32
    return %c0_i32, %c0_i32_0 : i32, i32
  }
  func.func @transform_2(%arg0: i32, %arg1: i32) -> (i32, i32, i32) {
    %c0_i32 = arith.constant 0 : i32
    %c0_i32_0 = arith.constant 0 : i32
    %c0_i32_1 = arith.constant 0 : i32
    %c0_i32_2 = arith.constant 0 : i32
    return %c0_i32, %c0_i32_0, %c0_i32_1 : i32, i32, i32
  }
  func.func @transform_3(%arg0: i32, %arg1: i32) -> (i32, i32) {
    %c0_i32 = arith.constant 0 : i32
    %c0_i32_0 = arith.constant 0 : i32
    %c0_i32_1 = arith.constant 0 : i32
    return %c0_i32, %c0_i32_0 : i32, i32
  }
  func.func @transform_4(%arg0: i32, %arg1: i32) -> (i32, i32, i32, i32) {
    %c0_i32 = arith.constant 0 : i32
    %c0_i32_0 = arith.constant 0 : i32
    %c0_i32_1 = arith.constant 0 : i32
    return %arg0, %arg1, %c0_i32, %c0_i32_0 : i32, i32, i32, i32
  }
  func.func @transform_5(%arg0: i32, %arg1: i32) -> (i32, i32, i32, i32) {
    %c0_i32 = arith.constant 0 : i32
    %c0_i32_0 = arith.constant 0 : i32
    %c0_i32_1 = arith.constant 0 : i32
    return %arg0, %arg1, %c0_i32, %c0_i32_0 : i32, i32, i32, i32
  }
}

module attributes {stable_mosaic.version = 11 : i64} {
  func.func @_fused_conv_kernel(%arg0: i32, %arg1: i32, %arg2: memref<1x8x8x64xbf16, #tpu.memory_space<vmem>>, %arg3: memref<2x64xf32, #tpu.memory_space<vmem>>, %arg4: memref<3x192x32xbf16, #tpu.memory_space<vmem>>, %arg5: memref<1x32xf32, #tpu.memory_space<vmem>>, %arg6: memref<1x8x16x32xbf16, #tpu.memory_space<vmem>>, %arg7: memref<1x1x2x32xf32, #tpu.memory_space<vmem>>, %arg8: memref<18x18x64xbf16, #tpu.memory_space<vmem>>) attributes {dimension_semantics = [#tpu.dimension_semantics<parallel>, #tpu.dimension_semantics<parallel>], iteration_bounds = array<i64: 2, 2>, scalar_prefetch = 0 : i64, scratch_operands = 1 : i64, tpu.core_type = #tpu.core_type<tc>, window_params = [{transform_indices = @transform_0, window_bounds = array<i64: 1, 8, 8, 64>}, {pipeline_mode = #tpu.pipeline_mode<synchronous>, transform_indices = @transform_1, window_bounds = array<i64: 2, 64>}, {pipeline_mode = #tpu.pipeline_mode<synchronous>, transform_indices = @transform_2, window_bounds = array<i64: 3, 192, 32>}, {pipeline_mode = #tpu.pipeline_mode<synchronous>, transform_indices = @transform_3, window_bounds = array<i64: 1, 32>}, {transform_indices = @transform_4, window_bounds = array<i64: 1, 8, 16, 32>}, {transform_indices = @transform_5, window_bounds = array<i64: 1, 1, 2, 32>}]} {
    %c0 = arith.constant 0 : index
    %c0_0 = arith.constant 0 : index
    %0 = vector.load %arg3[%c0, %c0_0] : memref<2x64xf32, #tpu.memory_space<vmem>>, vector<1x64xf32>
    %1 = vector.shape_cast %0 : vector<1x64xf32> to vector<1x1x64xf32>
    %c1 = arith.constant 1 : index
    %c0_1 = arith.constant 0 : index
    %2 = vector.load %arg3[%c1, %c0_1] : memref<2x64xf32, #tpu.memory_space<vmem>>, vector<1x64xf32>
    %3 = vector.shape_cast %2 : vector<1x64xf32> to vector<1x1x64xf32>
    %c0_2 = arith.constant 0 : index
    %c0_3 = arith.constant 0 : index
    %c0_4 = arith.constant 0 : index
    %c0_5 = arith.constant 0 : index
    %4 = vector.load %arg2[%c0_2, %c0_3, %c0_4, %c0_5] : memref<1x8x8x64xbf16, #tpu.memory_space<vmem>>, vector<1x8x8x64xbf16>
    %5 = vector.shape_cast %4 : vector<1x8x8x64xbf16> to vector<8x8x64xbf16>
    %6 = arith.extf %5 : vector<8x8x64xbf16> to vector<8x8x64xf32>
    %7 = vector.broadcast %1 : vector<1x1x64xf32> to vector<8x8x64xf32>
    %8 = arith.mulf %6, %7 : vector<8x8x64xf32>
    %9 = vector.broadcast %3 : vector<1x1x64xf32> to vector<8x8x64xf32>
    %10 = arith.addf %8, %9 : vector<8x8x64xf32>
    %cst = arith.constant 0.000000e+00 : f32
    %11 = vector.broadcast %cst : f32 to vector<8x8x64xf32>
    %12 = arith.cmpf ogt, %10, %11 : vector<8x8x64xf32>
    %cst_6 = arith.constant 2.000000e-01 : f32
    %13 = vector.broadcast %cst_6 : f32 to vector<8x8x64xf32>
    %14 = arith.mulf %13, %10 : vector<8x8x64xf32>
    %15 = arith.select %12, %10, %14 : vector<8x8x64xi1>, vector<8x8x64xf32>
    %16 = arith.truncf %15 : vector<8x8x64xf32> to vector<8x8x64xbf16>
    %17 = vector.shape_cast %16 : vector<8x8x64xbf16> to vector<8x1x8x64xbf16>
    %18 = vector.shape_cast %17 : vector<8x1x8x64xbf16> to vector<8x1x8x64xbf16>
    %19 = vector.broadcast %18 : vector<8x1x8x64xbf16> to vector<8x2x8x64xbf16>
    %20 = vector.shape_cast %19 : vector<8x2x8x64xbf16> to vector<16x8x64xbf16>
    %21 = tpu.iota {dimensions = array<i32: 0>} : vector<18x8xi32>
    %22 = tpu.iota {dimensions = array<i32: 1>} : vector<18x8xi32>
    %c2_i32 = arith.constant 2 : i32
    %23 = vector.broadcast %c2_i32 : i32 to vector<18x8xi32>
    %24 = arith.muli %23, %22 : vector<18x8xi32>
    %c1_i32 = arith.constant 1 : i32
    %25 = vector.broadcast %c1_i32 : i32 to vector<18x8xi32>
    %26 = arith.addi %24, %25 : vector<18x8xi32>
    %27 = arith.cmpi eq, %21, %26 : vector<18x8xi32>
    %c2_i32_7 = arith.constant 2 : i32
    %28 = vector.broadcast %c2_i32_7 : i32 to vector<18x8xi32>
    %29 = arith.muli %28, %22 : vector<18x8xi32>
    %c2_i32_8 = arith.constant 2 : i32
    %30 = vector.broadcast %c2_i32_8 : i32 to vector<18x8xi32>
    %31 = arith.addi %29, %30 : vector<18x8xi32>
    %32 = arith.cmpi eq, %21, %31 : vector<18x8xi32>
    %33 = arith.ori %27, %32 : vector<18x8xi1>
    %c1_i32_9 = arith.constant 1 : i32
    %34 = vector.broadcast %c1_i32_9 : i32 to vector<18x8xi32>
    %35 = arith.cmpi sge, %21, %34 : vector<18x8xi32>
    %c16_i32 = arith.constant 16 : i32
    %36 = vector.broadcast %c16_i32 : i32 to vector<18x8xi32>
    %37 = arith.cmpi sle, %21, %36 : vector<18x8xi32>
    %38 = arith.andi %35, %37 : vector<18x8xi1>
    %39 = arith.andi %38, %33 : vector<18x8xi1>
    %40 = arith.extui %39 : vector<18x8xi1> to vector<18x8xi32>
    %41 = arith.sitofp %40 : vector<18x8xi32> to vector<18x8xf32>
    %42 = arith.truncf %41 : vector<18x8xf32> to vector<18x8xbf16>
    %43 = vector.shape_cast %42 : vector<18x8xbf16> to vector<1x18x8xbf16>
    %44 = vector.shape_cast %43 : vector<1x18x8xbf16> to vector<1x18x8xbf16>
    %45 = vector.broadcast %44 : vector<1x18x8xbf16> to vector<16x18x8xbf16>
    %cst_10 = arith.constant dense<0.000000e+00> : vector<16x18x64xf32>
    %46 = tpu.matmul %45, %20, %cst_10 {dimension_numbers = #tpu.dot_dimension_numbers<[2], [1], [1], [2], [0, 0, 0, 1, 1, 2], [0], [0]>} : vector<16x18x8xbf16>, vector<16x8x64xbf16>, vector<16x18x64xf32> -> vector<16x18x64xf32>
    %47 = arith.truncf %46 : vector<16x18x64xf32> to vector<16x18x64xbf16>
    %cst_11 = arith.constant 0.000000e+00 : bf16
    %48 = vector.broadcast %cst_11 : bf16 to vector<18x64xbf16>
    %c0_12 = arith.constant 0 : index
    %c0_13 = arith.constant 0 : index
    %c0_14 = arith.constant 0 : index
    %49 = vector.load %arg8[%c0_12, %c0_13, %c0_14] : memref<18x18x64xbf16, #tpu.memory_space<vmem>>, vector<1x18x64xbf16>
    %50 = vector.shape_cast %49 : vector<1x18x64xbf16> to vector<18x64xbf16>
    %51 = vector.shape_cast %48 : vector<18x64xbf16> to vector<1x18x64xbf16>
    tpu.vector_store %arg8[%c0_12, %c0_13, %c0_14], %51 {strides = array<i32>} : memref<18x18x64xbf16, #tpu.memory_space<vmem>>, vector<1x18x64xbf16>,
    %c17 = arith.constant 17 : index
    %c0_15 = arith.constant 0 : index
    %c0_16 = arith.constant 0 : index
    %52 = vector.load %arg8[%c17, %c0_15, %c0_16] : memref<18x18x64xbf16, #tpu.memory_space<vmem>>, vector<1x18x64xbf16>
    %53 = vector.shape_cast %52 : vector<1x18x64xbf16> to vector<18x64xbf16>
    %54 = vector.shape_cast %48 : vector<18x64xbf16> to vector<1x18x64xbf16>
    tpu.vector_store %arg8[%c17, %c0_15, %c0_16], %54 {strides = array<i32>} : memref<18x18x64xbf16, #tpu.memory_space<vmem>>, vector<1x18x64xbf16>,
    %c1_17 = arith.constant 1 : index
    %c0_18 = arith.constant 0 : index
    %c0_19 = arith.constant 0 : index
    %55 = vector.load %arg8[%c1_17, %c0_18, %c0_19] : memref<18x18x64xbf16, #tpu.memory_space<vmem>>, vector<16x18x64xbf16>
    tpu.vector_store %arg8[%c1_17, %c0_18, %c0_19], %47 {strides = array<i32>} : memref<18x18x64xbf16, #tpu.memory_space<vmem>>, vector<16x18x64xbf16>,
    %c8_i32 = arith.constant 8 : i32
    %56 = arith.muli %arg1, %c8_i32 : i32
    %57 = tpu.assume_multiple %56, 8 : i32
    %cst_20 = arith.constant 0.000000e+00 : f32
    %58 = vector.broadcast %cst_20 : f32 to vector<128x32xf32>
    %c0_i32 = arith.constant 0 : i32
    %59 = arith.addi %57, %c0_i32 : i32
    %60 = arith.index_cast %59 : i32 to index
    %c0_21 = arith.constant 0 : index
    %c0_22 = arith.constant 0 : index
    %61 = vector.load %arg8[%60, %c0_21, %c0_22] : memref<18x18x64xbf16, #tpu.memory_space<vmem>>, vector<8x16x64xbf16>
    %c0_i32_23 = arith.constant 0 : i32
    %62 = arith.addi %57, %c0_i32_23 : i32
    %63 = arith.index_cast %62 : i32 to index
    %c1_24 = arith.constant 1 : index
    %c0_25 = arith.constant 0 : index
    %64 = vector.load %arg8[%63, %c1_24, %c0_25] : memref<18x18x64xbf16, #tpu.memory_space<vmem>>, vector<8x16x64xbf16>
    %c0_i32_26 = arith.constant 0 : i32
    %65 = arith.addi %57, %c0_i32_26 : i32
    %66 = arith.index_cast %65 : i32 to index
    %c2 = arith.constant 2 : index
    %c0_27 = arith.constant 0 : index
    %67 = vector.load %arg8[%66, %c2, %c0_27] : memref<18x18x64xbf16, #tpu.memory_space<vmem>>, vector<8x16x64xbf16>
    %68 = tpu.concatenate %61, %64, %67 in 2 : vector<8x16x64xbf16>, vector<8x16x64xbf16>, vector<8x16x64xbf16> -> vector<8x16x192xbf16>
    %69 = vector.shape_cast %68 : vector<8x16x192xbf16> to vector<128x192xbf16>
    %c0_28 = arith.constant 0 : index
    %c0_29 = arith.constant 0 : index
    %c0_30 = arith.constant 0 : index
    %70 = vector.load %arg4[%c0_28, %c0_29, %c0_30] : memref<3x192x32xbf16, #tpu.memory_space<vmem>>, vector<1x192x32xbf16>
    %71 = vector.shape_cast %70 : vector<1x192x32xbf16> to vector<192x32xbf16>
    %cst_31 = arith.constant dense<0.000000e+00> : vector<128x32xf32>
    %72 = tpu.matmul %69, %71, %cst_31 {dimension_numbers = #tpu.dot_dimension_numbers<[1], [0], [0], [1], [0, 0, 1, 1], [], []>} : vector<128x192xbf16>, vector<192x32xbf16>, vector<128x32xf32> -> vector<128x32xf32>
    %73 = arith.addf %58, %72 : vector<128x32xf32>
    %c1_i32_32 = arith.constant 1 : i32
    %74 = arith.addi %57, %c1_i32_32 : i32
    %75 = arith.index_cast %74 : i32 to index
    %c0_33 = arith.constant 0 : index
    %c0_34 = arith.constant 0 : index
    %76 = vector.load %arg8[%75, %c0_33, %c0_34] : memref<18x18x64xbf16, #tpu.memory_space<vmem>>, vector<8x16x64xbf16>
    %c1_i32_35 = arith.constant 1 : i32
    %77 = arith.addi %57, %c1_i32_35 : i32
    %78 = arith.index_cast %77 : i32 to index
    %c1_36 = arith.constant 1 : index
    %c0_37 = arith.constant 0 : index
    %79 = vector.load %arg8[%78, %c1_36, %c0_37] : memref<18x18x64xbf16, #tpu.memory_space<vmem>>, vector<8x16x64xbf16>
    %c1_i32_38 = arith.constant 1 : i32
    %80 = arith.addi %57, %c1_i32_38 : i32
    %81 = arith.index_cast %80 : i32 to index
    %c2_39 = arith.constant 2 : index
    %c0_40 = arith.constant 0 : index
    %82 = vector.load %arg8[%81, %c2_39, %c0_40] : memref<18x18x64xbf16, #tpu.memory_space<vmem>>, vector<8x16x64xbf16>
    %83 = tpu.concatenate %76, %79, %82 in 2 : vector<8x16x64xbf16>, vector<8x16x64xbf16>, vector<8x16x64xbf16> -> vector<8x16x192xbf16>
    %84 = vector.shape_cast %83 : vector<8x16x192xbf16> to vector<128x192xbf16>
    %c1_41 = arith.constant 1 : index
    %c0_42 = arith.constant 0 : index
    %c0_43 = arith.constant 0 : index
    %85 = vector.load %arg4[%c1_41, %c0_42, %c0_43] : memref<3x192x32xbf16, #tpu.memory_space<vmem>>, vector<1x192x32xbf16>
    %86 = vector.shape_cast %85 : vector<1x192x32xbf16> to vector<192x32xbf16>
    %cst_44 = arith.constant dense<0.000000e+00> : vector<128x32xf32>
    %87 = tpu.matmul %84, %86, %cst_44 {dimension_numbers = #tpu.dot_dimension_numbers<[1], [0], [0], [1], [0, 0, 1, 1], [], []>} : vector<128x192xbf16>, vector<192x32xbf16>, vector<128x32xf32> -> vector<128x32xf32>
    %88 = arith.addf %73, %87 : vector<128x32xf32>
    %c2_i32_45 = arith.constant 2 : i32
    %89 = arith.addi %57, %c2_i32_45 : i32
    %90 = arith.index_cast %89 : i32 to index
    %c0_46 = arith.constant 0 : index
    %c0_47 = arith.constant 0 : index
    %91 = vector.load %arg8[%90, %c0_46, %c0_47] : memref<18x18x64xbf16, #tpu.memory_space<vmem>>, vector<8x16x64xbf16>
    %c2_i32_48 = arith.constant 2 : i32
    %92 = arith.addi %57, %c2_i32_48 : i32
    %93 = arith.index_cast %92 : i32 to index
    %c1_49 = arith.constant 1 : index
    %c0_50 = arith.constant 0 : index
    %94 = vector.load %arg8[%93, %c1_49, %c0_50] : memref<18x18x64xbf16, #tpu.memory_space<vmem>>, vector<8x16x64xbf16>
    %c2_i32_51 = arith.constant 2 : i32
    %95 = arith.addi %57, %c2_i32_51 : i32
    %96 = arith.index_cast %95 : i32 to index
    %c2_52 = arith.constant 2 : index
    %c0_53 = arith.constant 0 : index
    %97 = vector.load %arg8[%96, %c2_52, %c0_53] : memref<18x18x64xbf16, #tpu.memory_space<vmem>>, vector<8x16x64xbf16>
    %98 = tpu.concatenate %91, %94, %97 in 2 : vector<8x16x64xbf16>, vector<8x16x64xbf16>, vector<8x16x64xbf16> -> vector<8x16x192xbf16>
    %99 = vector.shape_cast %98 : vector<8x16x192xbf16> to vector<128x192xbf16>
    %c2_54 = arith.constant 2 : index
    %c0_55 = arith.constant 0 : index
    %c0_56 = arith.constant 0 : index
    %100 = vector.load %arg4[%c2_54, %c0_55, %c0_56] : memref<3x192x32xbf16, #tpu.memory_space<vmem>>, vector<1x192x32xbf16>
    %101 = vector.shape_cast %100 : vector<1x192x32xbf16> to vector<192x32xbf16>
    %cst_57 = arith.constant dense<0.000000e+00> : vector<128x32xf32>
    %102 = tpu.matmul %99, %101, %cst_57 {dimension_numbers = #tpu.dot_dimension_numbers<[1], [0], [0], [1], [0, 0, 1, 1], [], []>} : vector<128x192xbf16>, vector<192x32xbf16>, vector<128x32xf32> -> vector<128x32xf32>
    %103 = arith.addf %88, %102 : vector<128x32xf32>
    %c0_58 = arith.constant 0 : index
    %c0_59 = arith.constant 0 : index
    %104 = vector.load %arg5[%c0_58, %c0_59] : memref<1x32xf32, #tpu.memory_space<vmem>>, vector<1x32xf32>
    %105 = vector.broadcast %104 : vector<1x32xf32> to vector<128x32xf32>
    %106 = arith.addf %103, %105 : vector<128x32xf32>
    %cst_60 = arith.constant dense<0.000000e+00> : vector<32xf32>
    %107 = vector.multi_reduction <add>, %106, %cst_60 [0] : vector<128x32xf32> to vector<32xf32>
    %108 = vector.shape_cast %107 : vector<32xf32> to vector<1x32xf32>
    %c0_61 = arith.constant 0 : index
    %c0_62 = arith.constant 0 : index
    %c0_63 = arith.constant 0 : index
    %c0_64 = arith.constant 0 : index
    %109 = vector.load %arg7[%c0_61, %c0_62, %c0_63, %c0_64] : memref<1x1x2x32xf32, #tpu.memory_space<vmem>>, vector<1x1x1x32xf32>
    %110 = vector.shape_cast %109 : vector<1x1x1x32xf32> to vector<1x32xf32>
    %111 = vector.shape_cast %108 : vector<1x32xf32> to vector<1x1x1x32xf32>
    tpu.vector_store %arg7[%c0_61, %c0_62, %c0_63, %c0_64], %111 {strides = array<i32>} : memref<1x1x2x32xf32, #tpu.memory_space<vmem>>, vector<1x1x1x32xf32>,
    %112 = arith.mulf %106, %106 : vector<128x32xf32>
    %cst_65 = arith.constant dense<0.000000e+00> : vector<32xf32>
    %113 = vector.multi_reduction <add>, %112, %cst_65 [0] : vector<128x32xf32> to vector<32xf32>
    %114 = vector.shape_cast %113 : vector<32xf32> to vector<1x32xf32>
    %c0_66 = arith.constant 0 : index
    %c0_67 = arith.constant 0 : index
    %c1_68 = arith.constant 1 : index
    %c0_69 = arith.constant 0 : index
    %115 = vector.load %arg7[%c0_66, %c0_67, %c1_68, %c0_69] : memref<1x1x2x32xf32, #tpu.memory_space<vmem>>, vector<1x1x1x32xf32>
    %116 = vector.shape_cast %115 : vector<1x1x1x32xf32> to vector<1x32xf32>
    %117 = vector.shape_cast %114 : vector<1x32xf32> to vector<1x1x1x32xf32>
    tpu.vector_store %arg7[%c0_66, %c0_67, %c1_68, %c0_69], %117 {strides = array<i32>} : memref<1x1x2x32xf32, #tpu.memory_space<vmem>>, vector<1x1x1x32xf32>,
    %118 = vector.shape_cast %106 : vector<128x32xf32> to vector<8x16x32xf32>
    %119 = arith.truncf %118 : vector<8x16x32xf32> to vector<8x16x32xbf16>
    %c0_70 = arith.constant 0 : index
    %c0_71 = arith.constant 0 : index
    %c0_72 = arith.constant 0 : index
    %c0_73 = arith.constant 0 : index
    %120 = vector.load %arg6[%c0_70, %c0_71, %c0_72, %c0_73] : memref<1x8x16x32xbf16, #tpu.memory_space<vmem>>, vector<1x8x16x32xbf16>
    %121 = vector.shape_cast %120 : vector<1x8x16x32xbf16> to vector<8x16x32xbf16>
    %122 = vector.shape_cast %119 : vector<8x16x32xbf16> to vector<1x8x16x32xbf16>
    tpu.vector_store %arg6[%c0_70, %c0_71, %c0_72, %c0_73], %122 {strides = array<i32>} : memref<1x8x16x32xbf16, #tpu.memory_space<vmem>>, vector<1x8x16x32xbf16>,
    return
  }
  func.func @transform_0(%arg0: i32, %arg1: i32) -> (i32, i32, i32, i32) {
    %c0_i32 = arith.constant 0 : i32
    %c0_i32_0 = arith.constant 0 : i32
    %c0_i32_1 = arith.constant 0 : i32
    %c0_i32_2 = arith.constant 0 : i32
    return %arg0, %c0_i32, %c0_i32_0, %c0_i32_1 : i32, i32, i32, i32
  }
  func.func @transform_1(%arg0: i32, %arg1: i32) -> (i32, i32) {
    %c0_i32 = arith.constant 0 : i32
    %c0_i32_0 = arith.constant 0 : i32
    %c0_i32_1 = arith.constant 0 : i32
    return %c0_i32, %c0_i32_0 : i32, i32
  }
  func.func @transform_2(%arg0: i32, %arg1: i32) -> (i32, i32, i32) {
    %c0_i32 = arith.constant 0 : i32
    %c0_i32_0 = arith.constant 0 : i32
    %c0_i32_1 = arith.constant 0 : i32
    %c0_i32_2 = arith.constant 0 : i32
    return %c0_i32, %c0_i32_0, %c0_i32_1 : i32, i32, i32
  }
  func.func @transform_3(%arg0: i32, %arg1: i32) -> (i32, i32) {
    %c0_i32 = arith.constant 0 : i32
    %c0_i32_0 = arith.constant 0 : i32
    %c0_i32_1 = arith.constant 0 : i32
    return %c0_i32, %c0_i32_0 : i32, i32
  }
  func.func @transform_4(%arg0: i32, %arg1: i32) -> (i32, i32, i32, i32) {
    %c0_i32 = arith.constant 0 : i32
    %c0_i32_0 = arith.constant 0 : i32
    %c0_i32_1 = arith.constant 0 : i32
    return %arg0, %arg1, %c0_i32, %c0_i32_0 : i32, i32, i32, i32
  }
  func.func @transform_5(%arg0: i32, %arg1: i32) -> (i32, i32, i32, i32) {
    %c0_i32 = arith.constant 0 : i32
    %c0_i32_0 = arith.constant 0 : i32
    %c0_i32_1 = arith.constant 0 : i32
    return %arg0, %arg1, %c0_i32, %c0_i32_0 : i32, i32, i32, i32
  }
}

module attributes {stable_mosaic.version = 11 : i64} {
  func.func @_fused_conv_kernel(%arg0: i32, %arg1: i32, %arg2: memref<1x16x16x32xbf16, #tpu.memory_space<vmem>>, %arg3: memref<2x32xf32, #tpu.memory_space<vmem>>, %arg4: memref<3x96x3xbf16, #tpu.memory_space<vmem>>, %arg5: memref<1x3xf32, #tpu.memory_space<vmem>>, %arg6: memref<1x8x16x3xf32, #tpu.memory_space<vmem>>, %arg7: memref<1x1x2x3xf32, #tpu.memory_space<vmem>>, %arg8: memref<18x18x32xbf16, #tpu.memory_space<vmem>>) attributes {dimension_semantics = [#tpu.dimension_semantics<parallel>, #tpu.dimension_semantics<parallel>], iteration_bounds = array<i64: 2, 2>, scalar_prefetch = 0 : i64, scratch_operands = 1 : i64, tpu.core_type = #tpu.core_type<tc>, window_params = [{transform_indices = @transform_0, window_bounds = array<i64: 1, 16, 16, 32>}, {pipeline_mode = #tpu.pipeline_mode<synchronous>, transform_indices = @transform_1, window_bounds = array<i64: 2, 32>}, {pipeline_mode = #tpu.pipeline_mode<synchronous>, transform_indices = @transform_2, window_bounds = array<i64: 3, 96, 3>}, {pipeline_mode = #tpu.pipeline_mode<synchronous>, transform_indices = @transform_3, window_bounds = array<i64: 1, 3>}, {transform_indices = @transform_4, window_bounds = array<i64: 1, 8, 16, 3>}, {transform_indices = @transform_5, window_bounds = array<i64: 1, 1, 2, 3>}]} {
    %c0 = arith.constant 0 : index
    %c0_0 = arith.constant 0 : index
    %0 = vector.load %arg3[%c0, %c0_0] : memref<2x32xf32, #tpu.memory_space<vmem>>, vector<1x32xf32>
    %1 = vector.shape_cast %0 : vector<1x32xf32> to vector<1x1x32xf32>
    %c1 = arith.constant 1 : index
    %c0_1 = arith.constant 0 : index
    %2 = vector.load %arg3[%c1, %c0_1] : memref<2x32xf32, #tpu.memory_space<vmem>>, vector<1x32xf32>
    %3 = vector.shape_cast %2 : vector<1x32xf32> to vector<1x1x32xf32>
    %c0_2 = arith.constant 0 : index
    %c0_3 = arith.constant 0 : index
    %c0_4 = arith.constant 0 : index
    %c0_5 = arith.constant 0 : index
    %4 = vector.load %arg2[%c0_2, %c0_3, %c0_4, %c0_5] : memref<1x16x16x32xbf16, #tpu.memory_space<vmem>>, vector<1x16x16x32xbf16>
    %5 = vector.shape_cast %4 : vector<1x16x16x32xbf16> to vector<16x16x32xbf16>
    %6 = arith.extf %5 : vector<16x16x32xbf16> to vector<16x16x32xf32>
    %7 = vector.broadcast %1 : vector<1x1x32xf32> to vector<16x16x32xf32>
    %8 = arith.mulf %6, %7 : vector<16x16x32xf32>
    %9 = vector.broadcast %3 : vector<1x1x32xf32> to vector<16x16x32xf32>
    %10 = arith.addf %8, %9 : vector<16x16x32xf32>
    %cst = arith.constant 0.000000e+00 : f32
    %11 = vector.broadcast %cst : f32 to vector<16x16x32xf32>
    %12 = arith.cmpf ogt, %10, %11 : vector<16x16x32xf32>
    %cst_6 = arith.constant 2.000000e-01 : f32
    %13 = vector.broadcast %cst_6 : f32 to vector<16x16x32xf32>
    %14 = arith.mulf %13, %10 : vector<16x16x32xf32>
    %15 = arith.select %12, %10, %14 : vector<16x16x32xi1>, vector<16x16x32xf32>
    %16 = arith.truncf %15 : vector<16x16x32xf32> to vector<16x16x32xbf16>
    %17 = tpu.iota {dimensions = array<i32: 0>} : vector<18x16xi32>
    %18 = tpu.iota {dimensions = array<i32: 1>} : vector<18x16xi32>
    %c1_i32 = arith.constant 1 : i32
    %19 = vector.broadcast %c1_i32 : i32 to vector<18x16xi32>
    %20 = arith.addi %18, %19 : vector<18x16xi32>
    %21 = arith.cmpi eq, %17, %20 : vector<18x16xi32>
    %c1_i32_7 = arith.constant 1 : i32
    %22 = vector.broadcast %c1_i32_7 : i32 to vector<18x16xi32>
    %23 = arith.cmpi sge, %17, %22 : vector<18x16xi32>
    %c16_i32 = arith.constant 16 : i32
    %24 = vector.broadcast %c16_i32 : i32 to vector<18x16xi32>
    %25 = arith.cmpi sle, %17, %24 : vector<18x16xi32>
    %26 = arith.andi %23, %25 : vector<18x16xi1>
    %27 = arith.andi %26, %21 : vector<18x16xi1>
    %28 = arith.extui %27 : vector<18x16xi1> to vector<18x16xi32>
    %29 = arith.sitofp %28 : vector<18x16xi32> to vector<18x16xf32>
    %30 = arith.truncf %29 : vector<18x16xf32> to vector<18x16xbf16>
    %31 = vector.shape_cast %30 : vector<18x16xbf16> to vector<1x18x16xbf16>
    %32 = vector.shape_cast %31 : vector<1x18x16xbf16> to vector<1x18x16xbf16>
    %33 = vector.broadcast %32 : vector<1x18x16xbf16> to vector<16x18x16xbf16>
    %cst_8 = arith.constant dense<0.000000e+00> : vector<16x18x32xf32>
    %34 = tpu.matmul %33, %16, %cst_8 {dimension_numbers = #tpu.dot_dimension_numbers<[2], [1], [1], [2], [0, 0, 0, 1, 1, 2], [0], [0]>} : vector<16x18x16xbf16>, vector<16x16x32xbf16>, vector<16x18x32xf32> -> vector<16x18x32xf32>
    %35 = arith.truncf %34 : vector<16x18x32xf32> to vector<16x18x32xbf16>
    %cst_9 = arith.constant 0.000000e+00 : bf16
    %36 = vector.broadcast %cst_9 : bf16 to vector<18x32xbf16>
    %c0_10 = arith.constant 0 : index
    %c0_11 = arith.constant 0 : index
    %c0_12 = arith.constant 0 : index
    %37 = vector.load %arg8[%c0_10, %c0_11, %c0_12] : memref<18x18x32xbf16, #tpu.memory_space<vmem>>, vector<1x18x32xbf16>
    %38 = vector.shape_cast %37 : vector<1x18x32xbf16> to vector<18x32xbf16>
    %39 = vector.shape_cast %36 : vector<18x32xbf16> to vector<1x18x32xbf16>
    tpu.vector_store %arg8[%c0_10, %c0_11, %c0_12], %39 {strides = array<i32>} : memref<18x18x32xbf16, #tpu.memory_space<vmem>>, vector<1x18x32xbf16>,
    %c17 = arith.constant 17 : index
    %c0_13 = arith.constant 0 : index
    %c0_14 = arith.constant 0 : index
    %40 = vector.load %arg8[%c17, %c0_13, %c0_14] : memref<18x18x32xbf16, #tpu.memory_space<vmem>>, vector<1x18x32xbf16>
    %41 = vector.shape_cast %40 : vector<1x18x32xbf16> to vector<18x32xbf16>
    %42 = vector.shape_cast %36 : vector<18x32xbf16> to vector<1x18x32xbf16>
    tpu.vector_store %arg8[%c17, %c0_13, %c0_14], %42 {strides = array<i32>} : memref<18x18x32xbf16, #tpu.memory_space<vmem>>, vector<1x18x32xbf16>,
    %c1_15 = arith.constant 1 : index
    %c0_16 = arith.constant 0 : index
    %c0_17 = arith.constant 0 : index
    %43 = vector.load %arg8[%c1_15, %c0_16, %c0_17] : memref<18x18x32xbf16, #tpu.memory_space<vmem>>, vector<16x18x32xbf16>
    tpu.vector_store %arg8[%c1_15, %c0_16, %c0_17], %35 {strides = array<i32>} : memref<18x18x32xbf16, #tpu.memory_space<vmem>>, vector<16x18x32xbf16>,
    %c8_i32 = arith.constant 8 : i32
    %44 = arith.muli %arg1, %c8_i32 : i32
    %45 = tpu.assume_multiple %44, 8 : i32
    %cst_18 = arith.constant 0.000000e+00 : f32
    %46 = vector.broadcast %cst_18 : f32 to vector<128x3xf32>
    %c0_i32 = arith.constant 0 : i32
    %47 = arith.addi %45, %c0_i32 : i32
    %48 = arith.index_cast %47 : i32 to index
    %c0_19 = arith.constant 0 : index
    %c0_20 = arith.constant 0 : index
    %49 = vector.load %arg8[%48, %c0_19, %c0_20] : memref<18x18x32xbf16, #tpu.memory_space<vmem>>, vector<8x16x32xbf16>
    %c0_i32_21 = arith.constant 0 : i32
    %50 = arith.addi %45, %c0_i32_21 : i32
    %51 = arith.index_cast %50 : i32 to index
    %c1_22 = arith.constant 1 : index
    %c0_23 = arith.constant 0 : index
    %52 = vector.load %arg8[%51, %c1_22, %c0_23] : memref<18x18x32xbf16, #tpu.memory_space<vmem>>, vector<8x16x32xbf16>
    %c0_i32_24 = arith.constant 0 : i32
    %53 = arith.addi %45, %c0_i32_24 : i32
    %54 = arith.index_cast %53 : i32 to index
    %c2 = arith.constant 2 : index
    %c0_25 = arith.constant 0 : index
    %55 = vector.load %arg8[%54, %c2, %c0_25] : memref<18x18x32xbf16, #tpu.memory_space<vmem>>, vector<8x16x32xbf16>
    %56 = tpu.concatenate %49, %52, %55 in 2 : vector<8x16x32xbf16>, vector<8x16x32xbf16>, vector<8x16x32xbf16> -> vector<8x16x96xbf16>
    %57 = vector.shape_cast %56 : vector<8x16x96xbf16> to vector<128x96xbf16>
    %c0_26 = arith.constant 0 : index
    %c0_27 = arith.constant 0 : index
    %c0_28 = arith.constant 0 : index
    %58 = vector.load %arg4[%c0_26, %c0_27, %c0_28] : memref<3x96x3xbf16, #tpu.memory_space<vmem>>, vector<1x96x3xbf16>
    %59 = vector.shape_cast %58 : vector<1x96x3xbf16> to vector<96x3xbf16>
    %cst_29 = arith.constant dense<0.000000e+00> : vector<128x3xf32>
    %60 = tpu.matmul %57, %59, %cst_29 {dimension_numbers = #tpu.dot_dimension_numbers<[1], [0], [0], [1], [0, 0, 1, 1], [], []>} : vector<128x96xbf16>, vector<96x3xbf16>, vector<128x3xf32> -> vector<128x3xf32>
    %61 = arith.addf %46, %60 : vector<128x3xf32>
    %c1_i32_30 = arith.constant 1 : i32
    %62 = arith.addi %45, %c1_i32_30 : i32
    %63 = arith.index_cast %62 : i32 to index
    %c0_31 = arith.constant 0 : index
    %c0_32 = arith.constant 0 : index
    %64 = vector.load %arg8[%63, %c0_31, %c0_32] : memref<18x18x32xbf16, #tpu.memory_space<vmem>>, vector<8x16x32xbf16>
    %c1_i32_33 = arith.constant 1 : i32
    %65 = arith.addi %45, %c1_i32_33 : i32
    %66 = arith.index_cast %65 : i32 to index
    %c1_34 = arith.constant 1 : index
    %c0_35 = arith.constant 0 : index
    %67 = vector.load %arg8[%66, %c1_34, %c0_35] : memref<18x18x32xbf16, #tpu.memory_space<vmem>>, vector<8x16x32xbf16>
    %c1_i32_36 = arith.constant 1 : i32
    %68 = arith.addi %45, %c1_i32_36 : i32
    %69 = arith.index_cast %68 : i32 to index
    %c2_37 = arith.constant 2 : index
    %c0_38 = arith.constant 0 : index
    %70 = vector.load %arg8[%69, %c2_37, %c0_38] : memref<18x18x32xbf16, #tpu.memory_space<vmem>>, vector<8x16x32xbf16>
    %71 = tpu.concatenate %64, %67, %70 in 2 : vector<8x16x32xbf16>, vector<8x16x32xbf16>, vector<8x16x32xbf16> -> vector<8x16x96xbf16>
    %72 = vector.shape_cast %71 : vector<8x16x96xbf16> to vector<128x96xbf16>
    %c1_39 = arith.constant 1 : index
    %c0_40 = arith.constant 0 : index
    %c0_41 = arith.constant 0 : index
    %73 = vector.load %arg4[%c1_39, %c0_40, %c0_41] : memref<3x96x3xbf16, #tpu.memory_space<vmem>>, vector<1x96x3xbf16>
    %74 = vector.shape_cast %73 : vector<1x96x3xbf16> to vector<96x3xbf16>
    %cst_42 = arith.constant dense<0.000000e+00> : vector<128x3xf32>
    %75 = tpu.matmul %72, %74, %cst_42 {dimension_numbers = #tpu.dot_dimension_numbers<[1], [0], [0], [1], [0, 0, 1, 1], [], []>} : vector<128x96xbf16>, vector<96x3xbf16>, vector<128x3xf32> -> vector<128x3xf32>
    %76 = arith.addf %61, %75 : vector<128x3xf32>
    %c2_i32 = arith.constant 2 : i32
    %77 = arith.addi %45, %c2_i32 : i32
    %78 = arith.index_cast %77 : i32 to index
    %c0_43 = arith.constant 0 : index
    %c0_44 = arith.constant 0 : index
    %79 = vector.load %arg8[%78, %c0_43, %c0_44] : memref<18x18x32xbf16, #tpu.memory_space<vmem>>, vector<8x16x32xbf16>
    %c2_i32_45 = arith.constant 2 : i32
    %80 = arith.addi %45, %c2_i32_45 : i32
    %81 = arith.index_cast %80 : i32 to index
    %c1_46 = arith.constant 1 : index
    %c0_47 = arith.constant 0 : index
    %82 = vector.load %arg8[%81, %c1_46, %c0_47] : memref<18x18x32xbf16, #tpu.memory_space<vmem>>, vector<8x16x32xbf16>
    %c2_i32_48 = arith.constant 2 : i32
    %83 = arith.addi %45, %c2_i32_48 : i32
    %84 = arith.index_cast %83 : i32 to index
    %c2_49 = arith.constant 2 : index
    %c0_50 = arith.constant 0 : index
    %85 = vector.load %arg8[%84, %c2_49, %c0_50] : memref<18x18x32xbf16, #tpu.memory_space<vmem>>, vector<8x16x32xbf16>
    %86 = tpu.concatenate %79, %82, %85 in 2 : vector<8x16x32xbf16>, vector<8x16x32xbf16>, vector<8x16x32xbf16> -> vector<8x16x96xbf16>
    %87 = vector.shape_cast %86 : vector<8x16x96xbf16> to vector<128x96xbf16>
    %c2_51 = arith.constant 2 : index
    %c0_52 = arith.constant 0 : index
    %c0_53 = arith.constant 0 : index
    %88 = vector.load %arg4[%c2_51, %c0_52, %c0_53] : memref<3x96x3xbf16, #tpu.memory_space<vmem>>, vector<1x96x3xbf16>
    %89 = vector.shape_cast %88 : vector<1x96x3xbf16> to vector<96x3xbf16>
    %cst_54 = arith.constant dense<0.000000e+00> : vector<128x3xf32>
    %90 = tpu.matmul %87, %89, %cst_54 {dimension_numbers = #tpu.dot_dimension_numbers<[1], [0], [0], [1], [0, 0, 1, 1], [], []>} : vector<128x96xbf16>, vector<96x3xbf16>, vector<128x3xf32> -> vector<128x3xf32>
    %91 = arith.addf %76, %90 : vector<128x3xf32>
    %c0_55 = arith.constant 0 : index
    %c0_56 = arith.constant 0 : index
    %92 = vector.load %arg5[%c0_55, %c0_56] : memref<1x3xf32, #tpu.memory_space<vmem>>, vector<1x3xf32>
    %93 = vector.broadcast %92 : vector<1x3xf32> to vector<128x3xf32>
    %94 = arith.addf %91, %93 : vector<128x3xf32>
    %95 = math.tanh %94 : vector<128x3xf32>
    %cst_57 = arith.constant dense<0.000000e+00> : vector<3xf32>
    %96 = vector.multi_reduction <add>, %95, %cst_57 [0] : vector<128x3xf32> to vector<3xf32>
    %97 = vector.shape_cast %96 : vector<3xf32> to vector<1x3xf32>
    %c0_58 = arith.constant 0 : index
    %c0_59 = arith.constant 0 : index
    %c0_60 = arith.constant 0 : index
    %c0_61 = arith.constant 0 : index
    %98 = vector.load %arg7[%c0_58, %c0_59, %c0_60, %c0_61] : memref<1x1x2x3xf32, #tpu.memory_space<vmem>>, vector<1x1x1x3xf32>
    %99 = vector.shape_cast %98 : vector<1x1x1x3xf32> to vector<1x3xf32>
    %100 = vector.shape_cast %97 : vector<1x3xf32> to vector<1x1x1x3xf32>
    tpu.vector_store %arg7[%c0_58, %c0_59, %c0_60, %c0_61], %100 {strides = array<i32>} : memref<1x1x2x3xf32, #tpu.memory_space<vmem>>, vector<1x1x1x3xf32>,
    %101 = arith.mulf %95, %95 : vector<128x3xf32>
    %cst_62 = arith.constant dense<0.000000e+00> : vector<3xf32>
    %102 = vector.multi_reduction <add>, %101, %cst_62 [0] : vector<128x3xf32> to vector<3xf32>
    %103 = vector.shape_cast %102 : vector<3xf32> to vector<1x3xf32>
    %c0_63 = arith.constant 0 : index
    %c0_64 = arith.constant 0 : index
    %c1_65 = arith.constant 1 : index
    %c0_66 = arith.constant 0 : index
    %104 = vector.load %arg7[%c0_63, %c0_64, %c1_65, %c0_66] : memref<1x1x2x3xf32, #tpu.memory_space<vmem>>, vector<1x1x1x3xf32>
    %105 = vector.shape_cast %104 : vector<1x1x1x3xf32> to vector<1x3xf32>
    %106 = vector.shape_cast %103 : vector<1x3xf32> to vector<1x1x1x3xf32>
    tpu.vector_store %arg7[%c0_63, %c0_64, %c1_65, %c0_66], %106 {strides = array<i32>} : memref<1x1x2x3xf32, #tpu.memory_space<vmem>>, vector<1x1x1x3xf32>,
    %107 = vector.shape_cast %95 : vector<128x3xf32> to vector<8x16x3xf32>
    %c0_67 = arith.constant 0 : index
    %c0_68 = arith.constant 0 : index
    %c0_69 = arith.constant 0 : index
    %c0_70 = arith.constant 0 : index
    %108 = vector.load %arg6[%c0_67, %c0_68, %c0_69, %c0_70] : memref<1x8x16x3xf32, #tpu.memory_space<vmem>>, vector<1x8x16x3xf32>
    %109 = vector.shape_cast %108 : vector<1x8x16x3xf32> to vector<8x16x3xf32>
    %110 = vector.shape_cast %107 : vector<8x16x3xf32> to vector<1x8x16x3xf32>
    tpu.vector_store %arg6[%c0_67, %c0_68, %c0_69, %c0_70], %110 {strides = array<i32>} : memref<1x8x16x3xf32, #tpu.memory_space<vmem>>, vector<1x8x16x3xf32>,
    return
  }
  func.func @transform_0(%arg0: i32, %arg1: i32) -> (i32, i32, i32, i32) {
    %c0_i32 = arith.constant 0 : i32
    %c0_i32_0 = arith.constant 0 : i32
    %c0_i32_1 = arith.constant 0 : i32
    %c0_i32_2 = arith.constant 0 : i32
    return %arg0, %c0_i32, %c0_i32_0, %c0_i32_1 : i32, i32, i32, i32
  }
  func.func @transform_1(%arg0: i32, %arg1: i32) -> (i32, i32) {
    %c0_i32 = arith.constant 0 : i32
    %c0_i32_0 = arith.constant 0 : i32
    %c0_i32_1 = arith.constant 0 : i32
    return %c0_i32, %c0_i32_0 : i32, i32
  }
  func.func @transform_2(%arg0: i32, %arg1: i32) -> (i32, i32, i32) {
    %c0_i32 = arith.constant 0 : i32
    %c0_i32_0 = arith.constant 0 : i32
    %c0_i32_1 = arith.constant 0 : i32
    %c0_i32_2 = arith.constant 0 : i32
    return %c0_i32, %c0_i32_0, %c0_i32_1 : i32, i32, i32
  }
  func.func @transform_3(%arg0: i32, %arg1: i32) -> (i32, i32) {
    %c0_i32 = arith.constant 0 : i32
    %c0_i32_0 = arith.constant 0 : i32
    %c0_i32_1 = arith.constant 0 : i32
    return %c0_i32, %c0_i32_0 : i32, i32
  }
  func.func @transform_4(%arg0: i32, %arg1: i32) -> (i32, i32, i32, i32) {
    %c0_i32 = arith.constant 0 : i32
    %c0_i32_0 = arith.constant 0 : i32
    %c0_i32_1 = arith.constant 0 : i32
    return %arg0, %arg1, %c0_i32, %c0_i32_0 : i32, i32, i32, i32
  }
  func.func @transform_5(%arg0: i32, %arg1: i32) -> (i32, i32, i32, i32) {
    %c0_i32 = arith.constant 0 : i32
    %c0_i32_0 = arith.constant 0 : i32
    %c0_i32_1 = arith.constant 0 : i32
    return %arg0, %arg1, %c0_i32, %c0_i32_0 : i32, i32, i32, i32
  }
}

</mosaic_0001>

<bundles_post_ra>
// kernel: generator_info_forward.4
= control target key start
LH: loop header
LB: loop body
LE: loop exit
PB: predicated region body
PF: predicated region fallthrough
CT: control target
= control target key end

     0   :  { %10 = vsyncpa [#allocation3], 0  ;;  %s1272_s15 = smov [#allocation2]   ;;  %s1650_s0 = inlined_call_operand.vmem [shape: bf16[2,14], index: 0, kind: input, shape index: {}]   ;;  %s1651_s1 = inlined_call_operand.hbm [shape: bf16[14,2048], index: 1, kind: input, shape index: {}]   ;;  %s1652_s2 = inlined_call_operand.vmem [shape: f32[1,2048], index: 2, kind: input, shape index: {}]   ;;  %s1653_s3 = inlined_call_operand.vmem [shape: bf16[2,2048], index: 3, kind: output, shape index: {0}]   ;;  %s1654_s4 = inlined_call_operand.vmem [shape: f32[2,2048], index: 4, kind: output, shape index: {1}]  }
   0x1   :  { %s18_s16 = sshll.u32 %s1272_s15, 4  ;;  %s1248_s19 = scalar_lea.hbm %s1651_s1, 2048  ;;  %s19_s16 = int_to_ptr.vmem [resolvable:$true] %s18_s16 }
   0x2   :  { %p1249_p0 = scmp.ne.s32.totalorder %s1651_s1, %s1248_s19  ;;  %p1252_p1 = scmp.lt.u32.totalorder %s1248_s19, %s1651_s1 }
   0x4   :  { %p1254_p2 = pnand %p1252_p1, %p1249_p0 }
   0x6   :  { %1257 = shalt.err (!%p1254_p2)
}
   0x7   :  { %s1258_s24 = scalar_lea.vmem %s19_s16, 2048  ;;  %p1263_p4 = scmp.lt.s32.totalorder %s19_s16, %s19_s16 }
   0x8   :  { %p1259_p3 = scmp.ne.s32.totalorder %s19_s16, %s1258_s24  ;;  %p1264_p5 = scmp.lt.s32.totalorder %s1258_s24, %s1258_s24 }
   0xa   :  { %p1265_p6 = por %p1264_p5, %p1263_p4 }
   0xc   :  { %p1266_p7 = pnand %p1265_p6, %p1259_p3 }
   0xe   :  { %1269 = shalt.err (!%p1266_p7)
}
   0xf   :  { %s1273_s25 = smov 1024   ;;  %s1274_s26 = smov 64  }
  0x10   :  { %24 = dma.hbm_to_vmem [thread:$0]  %s1651_s1, 2048, %s19_s16, [#allocation3], %s1273_s25, %s1273_s25, %s1274_s26  }
  0x11   :  { %1270 = dma.done.wait [#allocation3], 2048  }
  0x12   :  { %1271 = vsyncadd [#allocation3], 4294965248  ;;  %v1275_v0 = vmov 0   ;;  %v32_v1 = vld [vmem:[#allocation2] sm:$0xff]  ;;  %vm200_vm0 = vcmask 1046528   ;;  %v33_v3 = vld [vmem:[#allocation2 + $0x8] sm:$0xff]  ;;  %v52_v42 = vlaneseq }
  0x13   :  { %281 = vmatprep.mubr.bf16.mxu0 %v1275_v0  ;;  %322 = vmatprep.mubr.bf16.mxu1 %v1275_v0  ;;  %v40_v2 = vld [vmem:[#allocation2 + $0x40] sm:$0x77]  ;;  %v41_v5 = vld [vmem:[#allocation2 + $0x48] sm:$0x77]  ;;  %v34_v7 = vld [vmem:[#allocation2 + $0x10] sm:$0xff]  ;;  %vm196_vm1 = vcmask 113664  }
  0x14   :  { %v1201_v4 = vcombine.high %v32_v1, %v40_v2  ;;  %v1200_v6 = vcombine.low %v32_v1, %v40_v2  ;;  %v1203_v8 = vcombine.high %v33_v3, %v41_v5  ;;  %v1202_v9 = vcombine.low %v33_v3, %v41_v5  ;;  %v42_v10 = vld [vmem:[#allocation2 + $0x50] sm:$0x77]  ;;  %v35_v11 = vld [vmem:[#allocation2 + $0x18] sm:$0xff]  ;;  %v36_v17 = vld [vmem:[#allocation2 + $0x20] sm:$0xff] }
  0x15   :  { %v43_v12 = vld [vmem:[#allocation2 + $0x58] sm:$0x77]  ;;  %v1205_v14 = vcombine.high %v34_v7, %v42_v10  ;;  %v1204_v16 = vcombine.low %v34_v7, %v42_v10  ;;  %v44_v18 = vld [vmem:[#allocation2 + $0x60] sm:$0x77]  ;;  %v37_v22 = vld [vmem:[#allocation2 + $0x28] sm:$0xff]  ;;  %v1349_v43 = vshrl.u32 %v52_v42, 7 }
  0x16   :  { %1216 = vmatprep.subr.msk.bf16.mxu0 %vm200_vm0, %v1201_v4  ;;  %v202_v13 = vsel %vm200_vm0, %v1200_v6, 0  ;;  %v1207_v15 = vcombine.high %v35_v11, %v43_v12  ;;  %1218 = vmatprep.subr.msk.bf16.mxu1 %vm200_vm0, %v1203_v8  ;;  %v208_v19 = vsel %vm200_vm0, %v1202_v9, 0  ;;  %v31_v20 = vld [vmem:[%s1650_s0] sm:$0x1]  ;;  %v1206_v21 = vcombine.low %v35_v11, %v43_v12  ;;  %v45_v23 = vld [vmem:[#allocation2 + $0x68] sm:$0x77] }
  0x17   :  { %250 = vmatpush1.bf16.msra.mxu0 %v202_v13  ;;  %291 = vmatpush1.bf16.msra.mxu1 %v208_v19  ;;  %v214_v24 = vsel %vm200_vm0, %v1204_v16, 0  ;;  %v1209_v26 = vcombine.high %v36_v17, %v44_v18  ;;  %v1211_v27 = vcombine.high %v37_v22, %v45_v23  ;;  %v1208_v28 = vcombine.low %v36_v17, %v44_v18  ;;  %v38_v30 = vld [vmem:[#allocation2 + $0x30] sm:$0xff]  ;;  %v39_v32 = vld [vmem:[#allocation2 + $0x38] sm:$0xff]  ;;  %v48_v47 = vld [vmem:[%s1652_s2] sm:$0xff] }
  0x18   :  { %1220 = vmatprep.subr.msk.bf16.mxu0 %vm200_vm0, %v1205_v14  ;;  %1222 = vmatprep.subr.msk.bf16.mxu1 %vm200_vm0, %v1207_v15  ;;  %v220_v25 = vsel %vm200_vm0, %v1206_v21, 0  ;;  %v1210_v29 = vcombine.low %v37_v22, %v45_v23  ;;  %v46_v31 = vld [vmem:[#allocation2 + $0x70] sm:$0x77]  ;;  %v47_v33 = vld [vmem:[#allocation2 + $0x78] sm:$0x77]  ;;  %v54_v46 = vsub.s32 0, %v1349_v43 }
  0x19   :  { %v226_v34 = vsel %vm200_vm0, %v1208_v28, 0  ;;  %v1213_v36 = vcombine.high %v38_v30, %v46_v31  ;;  %v1215_v37 = vcombine.high %v39_v32, %v47_v33  ;;  %v1212_v38 = vcombine.low %v38_v30, %v46_v31  ;;  %v1365_v59 = vld [vmem:[%s1652_s2 + $0x8] sm:$0xff] }
  0x1a   :  { %1217 = vmatmul.mubr.msk.bf16.vlgmr.msra.gmra.mrb[0].mxu0 %vm196_vm1, %v31_v20  ;;  %1219 = vmatmul.mubr.msk.bf16.vlgmr.msra.gmra.mrb[0].mxu1 %vm196_vm1, %v31_v20  ;;  %v232_v35 = vsel %vm200_vm0, %v1210_v29, 0  ;;  %v1214_v39 = vcombine.low %v39_v32, %v47_v33  ;;  %v1276_v44 = vmov 1966171168   ;;  %v62_v48 = vsub.s32 2, %v1349_v43 }
  0x1b   :  { %332 = vmatpush1.bf16.msra.mxu0 %v214_v24  ;;  %373 = vmatpush1.bf16.msra.mxu1 %v220_v25  ;;  %v238_v40 = vsel %vm200_vm0, %v1212_v38, 0  ;;  %v711_v45 = vunpack.c.l.s4 %v1276_v44  ;;  %v58_v49 = vsub.s32 1, %v1349_v43  ;;  %v66_v50 = vsub.s32 3, %v1349_v43 }
  0x1c   :  { %363 = vmatprep.mubr.bf16.mxu0 %v1275_v0  ;;  %404 = vmatprep.mubr.bf16.mxu1 %v1275_v0  ;;  %v244_v41 = vsel %vm200_vm0, %v1214_v39, 0  ;;  %v70_v52 = vsub.s32 4, %v1349_v43  ;;  %v78_v53 = vsub.s32 6, %v1349_v43  ;;  %v55_v54 = vrot.slane %v48_v47, %v54_v46 }
  0x1d   :  { %1224 = vmatprep.subr.msk.bf16.mxu0 %vm200_vm0, %v1209_v26  ;;  %1226 = vmatprep.subr.msk.bf16.mxu1 %vm200_vm0, %v1211_v27  ;;  %v712_v51 = vunpack.c.0.s8 %v711_v45  ;;  %v74_v55 = vsub.s32 5, %v1349_v43  ;;  %v82_v56 = vsub.s32 7, %v1349_v43  ;;  %v63_v57 = vrot.slane %v48_v47, %v62_v48 }
  0x1e   :  { %v59_v58 = vrot.slane %v48_v47, %v58_v49  ;;  %v67_v60 = vrot.slane %v48_v47, %v66_v50  ;;  %vm577_vm2 = vcmask 1041408   ;;  %v1370_v63 = vrot.slane %v48_v47, %v70_v52 }
  0x1f   :  { %v1368_v62 = vsub.s32 %v712_v51, %v1349_v43  ;;  %v1380_v4 = vrot.slane %v48_v47, %v74_v55  ;;  %v1384_v5 = vrot.slane %v48_v47, %v82_v56  ;;  %v1387_v6 = vrot.slane %v1365_v59, %v54_v46 }
  0x20   :  { %v1394_v11 = vrot.slane %v1365_v59, %v62_v48  ;;  %v1397_v12 = vrot.slane %v1365_v59, %v58_v49  ;;  %v1406_v18 = vrot.slane %v1365_v59, %v66_v50 }
  0x22   :  { %1221 = vmatmul.mubr.msk.bf16.vlgmr.msra.gmra.mrb[4].mxu0 %vm196_vm1, %v31_v20  ;;  %1223 = vmatmul.mubr.msk.bf16.vlgmr.msra.gmra.mrb[4].mxu1 %vm196_vm1, %v31_v20 }
  0x23   :  { %414 = vmatpush1.bf16.msra.mxu0 %v226_v34  ;;  %455 = vmatpush1.bf16.msra.mxu1 %v232_v35 }
  0x24   :  { %445 = vmatprep.mubr.bf16.mxu0 %v1275_v0  ;;  %486 = vmatprep.mubr.bf16.mxu1 %v1275_v0 }
  0x25   :  { %1228 = vmatprep.subr.msk.bf16.mxu0 %vm200_vm0, %v1213_v36  ;;  %1230 = vmatprep.subr.msk.bf16.mxu1 %vm200_vm0, %v1215_v37 }
  0x2a   :  { %1225 = vmatmul.mubr.msk.bf16.vlgmr.msra.gmra.mrb[8].mxu0 %vm196_vm1, %v31_v20  ;;  %1227 = vmatmul.mubr.msk.bf16.vlgmr.msra.gmra.mrb[8].mxu1 %vm196_vm1, %v31_v20 }
  0x2b   :  { %496 = vmatpush1.bf16.msra.mxu0 %v238_v40  ;;  %537 = vmatpush1.bf16.msra.mxu1 %v244_v41  ;;  %v1422_v40 = vrot.slane %v1365_v59, %v70_v52 }
  0x2c   :  { %527 = vmatprep.mubr.bf16.mxu0 %v1275_v0  ;;  %568 = vmatprep.mubr.bf16.mxu1 %v1275_v0  ;;  %v1374_v0 = vrot.slane %v48_v47, %v78_v53 }
  0x32   :  { %1229 = vmatmul.mubr.msk.bf16.vlgmr.msra.gmra.mrb[12].mxu0 %vm196_vm1, %v31_v20  ;;  %1231 = vmatmul.mubr.msk.bf16.vlgmr.msra.gmra.mrb[12].mxu1 %vm196_vm1, %v31_v20 }
  0xed   :  { %v283_v61 = vpop.f32.mrb[0].mxu0  ;;  %v324_v2 = vpop.f32.mrb[0].mxu1 }
  0xee   :  { %v1376_v1 = vadd.f32 %v283_v61, %v55_v54  ;;  %v285_v3 = vpop.f32.mrb[1].mxu0  ;;  %v1389_v7 = vadd.f32 %v324_v2, %v63_v57  ;;  %v326_v9 = vpop.f32.mrb[1].mxu1 }
  0xef   :  { %v1391_v8 = vadd.f32 %v285_v3, %v59_v58  ;;  %v287_v10 = vpop.f32.mrb[2].mxu0  ;;  %v1403_v15 = vadd.f32 %v326_v9, %v67_v60  ;;  %v328_v16 = vpop.f32.mrb[2].mxu1 }
  0xf0   :  { %v578_v13 = vsel %vm577_vm2, %v1376_v1, 0.0  ;;  %v809_v14 = vmul.f32 %v1376_v1, %v1376_v1  ;;  %v288_v17 = vpop.f32.mrb[3].mxu0  ;;  %v592_v20 = vsel %vm577_vm2, %v1389_v7, 0.0  ;;  %v811_v21 = vmul.f32 %v1389_v7, %v1389_v7  ;;  %v329_v23 = vpop.f32.mrb[3].mxu1 }
  0xf1   :  { %v579_v19 = vrot.slane %v578_v13, 4  ;;  %v585_v22 = vsel %vm577_vm2, %v1391_v8, 0.0  ;;  %v593_v25 = vrot.slane %v592_v20, 4  ;;  %v810_v27 = vmul.f32 %v1391_v8, %v1391_v8 }
  0xf2   :  { %v825_v24 = vsel %vm577_vm2, %v809_v14, 0.0  ;;  %v586_v26 = vrot.slane %v585_v22, 4  ;;  %v839_v30 = vsel %vm577_vm2, %v811_v21, 0.0  ;;  %v1235_v31 = vpack.c.bf16 %v1391_v8, %v1376_v1 }
  0xf3   :  { %v580_v28 = vadd.f32 %v579_v19, %v578_v13  ;;  %v826_v29 = vrot.slane %v825_v24, 4  ;;  %v594_v32 = vadd.f32 %v593_v25, %v592_v20  ;;  %v840_v33 = vrot.slane %v839_v30, 4 }
  0xf4   :  { %v587_v34 = vadd.f32 %v586_v26, %v585_v22  ;;  %v832_v35 = vsel %vm577_vm2, %v810_v27, 0.0  ;;  %v599_v45 = vsel %vm577_vm2, %v1403_v15, 0.0  ;;  %v812_v61 = vmul.f32 %v1403_v15, %v1403_v15 }
  0xf5   :  { %v581_v36 = vrot.slane %v580_v28, 2  ;;  %v827_v37 = vadd.f32 %v826_v29, %v825_v24  ;;  %v833_v38 = vrot.slane %v832_v35, 4  ;;  %v365_v39 = vpop.f32.mrb[4].mxu0  ;;  %v595_v41 = vrot.slane %v594_v32, 2  ;;  %v406_v46 = vpop.f32.mrb[4].mxu1 }
  0xf6   :  { %v841_v42 = vadd.f32 %v840_v33, %v839_v30  ;;  %v588_v44 = vrot.slane %v587_v34, 2  ;;  %v1426_v47 = vpop.f32.mrb[5].mxu0  ;;  %v600_v51 = vrot.slane %v599_v45, 4  ;;  %v1428_v54 = vpop.f32.mrb[5].mxu1  ;;  %v846_v19 = vsel %vm577_vm2, %v812_v61, 0.0 }
  0xf7   :  { %v582_v48 = vadd.f32 %v581_v36, %v580_v28  ;;  %v828_v49 = vrot.slane %v827_v37, 2  ;;  %v834_v50 = vadd.f32 %v833_v38, %v832_v35  ;;  %v369_v57 = vpop.f32.mrb[6].mxu0  ;;  %v596_v58 = vadd.f32 %v595_v41, %v594_v32  ;;  %v410_v1 = vpop.f32.mrb[6].mxu1 }
  0xf8   :  { %v842_v60 = vrot.slane %v841_v42, 2  ;;  %v589_v52 = vadd.f32 %v588_v44, %v587_v34  ;;  %v370_v2 = vpop.f32.mrb[7].mxu0  ;;  %v601_v10 = vadd.f32 %v600_v51, %v599_v45  ;;  %v411_v13 = vpop.f32.mrb[7].mxu1  ;;  %v1434_v26 = vrot.slane %v1235_v31, %v1368_v62 }
  0xf9   :  { %v583_v3 = vrot.slane %v582_v48, 1  ;;  %v829_v8 = vadd.f32 %v828_v49, %v827_v37  ;;  %v835_v9 = vrot.slane %v834_v50, 2  ;;  %v597_v14 = vrot.slane %v596_v58, 1 }
  0xfa   :  { %v843_v16 = vadd.f32 %v842_v60, %v841_v42  ;;  %v590_v17 = vrot.slane %v589_v52, 1  ;;  %v602_v23 = vrot.slane %v601_v10, 2  ;;  %v847_v27 = vrot.slane %v846_v19, 4 }
  0xfb   :  { %v584_v20 = vadd.f32 %v583_v3, %v582_v48  ;;  %v830_v21 = vrot.slane %v829_v8, 1  ;;  %v836_v22 = vadd.f32 %v835_v9, %v834_v50  ;;  %v598_v24 = vadd.f32 %v597_v14, %v596_v58 }
  0xfc   :  { %v591_v25 = vadd.f32 %v590_v17, %v589_v52  ;;  %v603_v30 = vadd.f32 %v602_v23, %v601_v10  ;;  %v1236_v32 = vpack.c.bf16 %v1403_v15, %v1389_v7  ;;  %v844_v34 = vrot.slane %v843_v16, 1 }
  0xfd   :  { %v831_v28 = vadd.f32 %v830_v21, %v829_v8  ;;  %v837_v29 = vrot.slane %v836_v22, 1  ;;  %v1438_v33 = vpop.f32.mrb[8].mxu0  ;;  %v848_v36 = vadd.f32 %v847_v27, %v846_v19  ;;  %v1441_v37 = vadd.f32 %v365_v39, %v1370_v63  ;;  %v1443_v38 = vpop.f32.mrb[8].mxu1 }
  0xfe   :  { %v706_v35 = vcombine.low %v584_v20, %v591_v25  ;;  %v1445_v41 = vpop.f32.mrb[9].mxu0  ;;  %v604_v42 = vrot.slane %v603_v30, 1  ;;  %v1448_v44 = vrot.slane %v1236_v32, %v1368_v62  ;;  %v1451_v45 = vadd.f32 %v406_v46, %v1374_v0  ;;  %v1453_v7 = vpop.f32.mrb[9].mxu1 }
  0xff   :  { %v838_v31 = vadd.f32 %v837_v29, %v836_v22  ;;  %v451_v15 = vpop.f32.mrb[10].mxu0  ;;  %v849_v48 = vrot.slane %v848_v36, 2  ;;  %v606_v63 = vsel %vm577_vm2, %v1441_v37, 0.0  ;;  %v813_v39 = vmul.f32 %v1441_v37, %v1441_v37  ;;  %v492_v49 = vpop.f32.mrb[10].mxu1 }
 0x100   :  { %v452_v50 = vpop.f32.mrb[11].mxu0  ;;  %v1462_v51 = vrot.slane %v1365_v59, %v78_v53  ;;  %v605_v0 = vadd.f32 %v604_v42, %v603_v30  ;;  %v1121_v46 = vcombine.low %v1434_v26, %v1448_v44  ;;  %v607_v58 = vrot.slane %v606_v63, 4  ;;  %v493_v60 = vpop.f32.mrb[11].mxu1 }
 0x101   :  { %v953_v57 = vcombine.low %v831_v28, %v838_v31  ;;  %v850_v52 = vadd.f32 %v849_v48, %v848_v36  ;;  %v853_v61 = vsel %vm577_vm2, %v813_v39, 0.0  ;;  %v620_v1 = vsel %vm577_vm2, %v1451_v45, 0.0 }
 0x102   :  { %v815_v2 = vmul.f32 %v1451_v45, %v1451_v45  ;;  %v845_v3 = vadd.f32 %v844_v34, %v843_v16  ;;  %v1472_v53 = vrot.slane %v706_v35, %v1368_v62  ;;  %v707_v8 = vcombine.low %v598_v24, %v605_v0 }
 0x103   :  { %v608_v9 = vadd.f32 %v607_v58, %v606_v63  ;;  %v851_v10 = vrot.slane %v850_v52, 1  ;;  %v854_v13 = vrot.slane %v853_v61, 4  ;;  %v621_v14 = vrot.slane %v620_v1, 4 }
 0x104   :  { %v867_v17 = vsel %vm577_vm2, %v815_v2, 0.0  ;;  %v1476_v19 = vrot.slane %v707_v8, %v1368_v62  ;;  %v368_v22 = vadd.f32 %v1426_v47, %v1380_v4  ;;  %v1483_v16 = vrot.slane %v953_v57, %v1368_v62 }
 0x105   :  { %v609_v20 = vrot.slane %v608_v9, 2  ;;  %v868_v21 = vrot.slane %v867_v17, 4  ;;  %v1480_v23 = vpop.f32.mrb[12].mxu0  ;;  %v852_v24 = vadd.f32 %v851_v10, %v850_v52  ;;  %v855_v25 = vadd.f32 %v854_v13, %v853_v61  ;;  %v1485_v27 = vpop.f32.mrb[12].mxu1 }
 0x106   :  { %v622_v26 = vadd.f32 %v621_v14, %v620_v1  ;;  %v1487_v28 = vpop.f32.mrb[13].mxu0  ;;  %v738_v29 = vcombine.low %v1472_v53, %v1476_v19  ;;  %v613_v34 = vsel %vm577_vm2, %v368_v22, 0.0  ;;  %v1492_v4 = vpop.f32.mrb[13].mxu1  ;;  %v814_v39 = vmul.f32 %v368_v22, %v368_v22 }
 0x107   :  { %v610_v30 = vadd.f32 %v609_v20, %v608_v9  ;;  %v869_v32 = vadd.f32 %v868_v21, %v867_v17  ;;  %v533_v47 = vpop.f32.mrb[14].mxu0  ;;  %v954_v35 = vcombine.low %v845_v3, %v852_v24  ;;  %v856_v36 = vrot.slane %v855_v25, 2  ;;  %v574_v44 = vpop.f32.mrb[14].mxu1 }
 0x108   :  { %v623_v31 = vrot.slane %v622_v26, 2  ;;  %v614_v42 = vrot.slane %v613_v34, 4  ;;  %v534_v15 = vpop.f32.mrb[15].mxu0  ;;  %v409_v49 = vadd.f32 %v1428_v54, %v1384_v5  ;;  %v575_v50 = vpop.f32.mrb[15].mxu1  ;;  %v860_v61 = vsel %vm577_vm2, %v814_v39, 0.0 }
 0x109   :  { %v611_v48 = vrot.slane %v610_v30, 1  ;;  %v870_v63 = vrot.slane %v869_v32, 2  ;;  %v1497_v57 = vrot.slane %v954_v35, %v1368_v62  ;;  %v857_v0 = vadd.f32 %v856_v36, %v855_v25 }
 0x10a   :  { %v624_v58 = vadd.f32 %v623_v31, %v622_v26  ;;  %v615_v60 = vadd.f32 %v614_v42, %v613_v34  ;;  %v1237_v1 = vpack.c.bf16 %v368_v22, %v1441_v37  ;;  %v1504_v2 = vrot.slane %v1365_v59, %v74_v55 }
 0x10b   :  { %v871_v52 = vadd.f32 %v870_v63, %v869_v32  ;;  %v985_v5 = vcombine.low %v1483_v16, %v1497_v57  ;;  %v858_v54 = vrot.slane %v857_v0, 1  ;;  %v1129_v9 = vrot.slane %v1121_v46, %v1368_v62 }
 0x10c   :  { %v625_v3 = vrot.slane %v624_v58, 1  ;;  %v616_v8 = vrot.slane %v615_v60, 2  ;;  %v861_v13 = vrot.slane %v860_v61, 4  ;;  %v627_v14 = vsel %vm577_vm2, %v409_v49, 0.0 }
 0x10d   :  { %v872_v10 = vrot.slane %v871_v52, 1  ;;  %v612_v17 = vadd.f32 %v611_v48, %v610_v30  ;;  %v859_v20 = vadd.f32 %v858_v54, %v857_v0  ;;  %v1113_v21 = vrot.slane %v1237_v1, %v1368_v62 }
 0x10e   :  { %v617_v37 = vadd.f32 %v616_v8, %v615_v60  ;;  %v626_v22 = vadd.f32 %v625_v3, %v624_v58  ;;  %v862_v55 = vadd.f32 %v861_v13, %v860_v61  ;;  %v628_v24 = vrot.slane %v627_v14, 4 }
 0x10f   :  { %v816_v25 = vmul.f32 %v409_v49, %v409_v49  ;;  %v1238_v32 = vpack.c.bf16 %v409_v49, %v1451_v45  ;;  %v1514_v34 = vadd.f32 %v1438_v33, %v1387_v6  ;;  %v1518_v46 = vadd.f32 %v1443_v38, %v1394_v11 }
 0x110   :  { %v618_v26 = vrot.slane %v617_v37, 1  ;;  %v1520_v30 = vadd.f32 %v872_v10, %v871_v52  ;;  %v863_v47 = vrot.slane %v862_v55, 2  ;;  %v629_v35 = vadd.f32 %v628_v24, %v627_v14 }
 0x111   :  { %v874_v36 = vsel %vm577_vm2, %v816_v25, 0.0  ;;  %v1120_v44 = vrot.slane %v1238_v32, %v1368_v62  ;;  %v634_v45 = vsel %vm577_vm2, %v1514_v34, 0.0  ;;  %v817_v11 = vmul.f32 %v1514_v34, %v1514_v34 }
 0x112   :  { %v619_v31 = vadd.f32 %v618_v26, %v617_v37  ;;  %v875_v42 = vrot.slane %v874_v36, 4  ;;  %v864_v15 = vadd.f32 %v863_v47, %v862_v55  ;;  %v630_v6 = vrot.slane %v629_v35, 2 }
 0x113   :  { %v635_v33 = vrot.slane %v634_v45, 4  ;;  %v1122_v63 = vcombine.low %v1113_v21, %v1120_v44  ;;  %v648_v39 = vsel %vm577_vm2, %v1518_v46, 0.0  ;;  %v881_v58 = vsel %vm577_vm2, %v817_v11, 0.0 }
 0x114   :  { %v708_v38 = vcombine.low %v612_v17, %v619_v31  ;;  %v876_v48 = vadd.f32 %v875_v42, %v874_v36  ;;  %v865_v49 = vrot.slane %v864_v15, 1  ;;  %v631_v50 = vadd.f32 %v630_v6, %v629_v35 }
 0x115   :  { %v636_v0 = vadd.f32 %v635_v33, %v634_v45  ;;  %v1136_v52 = vrot.slane %v1122_v63, %v1368_v62  ;;  %v882_v61 = vrot.slane %v881_v58, 4  ;;  %v450_v1 = vadd.f32 %v1445_v41, %v1397_v12 }
 0x116   :  { %v877_v60 = vrot.slane %v876_v48, 2  ;;  %v866_v54 = vadd.f32 %v865_v49, %v864_v15  ;;  %v632_v3 = vrot.slane %v631_v50, 1  ;;  %v649_v10 = vrot.slane %v648_v39, 4 }
 0x117   :  { %v637_v8 = vrot.slane %v636_v0, 2  ;;  %v1137_v14 = vcombine.low %v1129_v9, %v1136_v52  ;;  %v883_v17 = vadd.f32 %v882_v61, %v881_v58  ;;  %v819_v37 = vmul.f32 %v1518_v46, %v1518_v46 }
 0x118   :  { %v878_v13 = vadd.f32 %v877_v60, %v876_v48  ;;  %v955_v21 = vcombine.low %v859_v20, %v866_v54  ;;  %v633_v55 = vadd.f32 %v632_v3, %v631_v50  ;;  %v650_v25 = vadd.f32 %v649_v10, %v648_v39 }
 0x119   :  { %v638_v24 = vadd.f32 %v637_v8, %v636_v0  ;;  %1189 = vst [vmem:[%s1653_s3] sm:$0xff] %v1137_v14  ;;  %v884_v12 = vrot.slane %v883_v17, 2  ;;  %v895_v41 = vsel %vm577_vm2, %v819_v37, 0.0  ;;  %v641_v32 = vsel %vm577_vm2, %v450_v1, 0.0 }
 0x11a   :  { %v879_v26 = vrot.slane %v878_v13, 1  ;;  %v730_v9 = vrot.slane %v708_v38, %v1368_v62  ;;  %v709_v47 = vcombine.low %v626_v22, %v633_v55  ;;  %v651_v36 = vrot.slane %v650_v25, 2 }
 0x11b   :  { %v639_v35 = vrot.slane %v638_v24, 1  ;;  %v885_v20 = vadd.f32 %v884_v12, %v883_v17  ;;  %v896_v42 = vrot.slane %v895_v41, 4  ;;  %v642_v44 = vrot.slane %v641_v32, 4 }
 0x11c   :  { %v880_v31 = vadd.f32 %v879_v26, %v878_v13  ;;  %v977_v45 = vrot.slane %v955_v21, %v1368_v62  ;;  %v737_v15 = vrot.slane %v709_v47, %v1368_v62  ;;  %v652_v6 = vadd.f32 %v651_v36, %v650_v25 }
 0x11d   :  { %v818_v33 = vmul.f32 %v450_v1, %v450_v1  ;;  %v886_v48 = vrot.slane %v885_v20, 1  ;;  %v897_v63 = vadd.f32 %v896_v42, %v895_v41  ;;  %v643_v39 = vadd.f32 %v642_v44, %v641_v32 }
 0x11e   :  { %v956_v11 = vcombine.low %v1520_v30, %v880_v31  ;;  %v746_v22 = vrot.slane %v738_v29, %v1368_v62  ;;  %v739_v38 = vcombine.low %v730_v9, %v737_v15  ;;  %v1239_v50 = vpack.c.bf16 %v450_v1, %v1514_v34 }
 0x11f   :  { %v888_v49 = vsel %vm577_vm2, %v818_v33, 0.0  ;;  %v993_v0 = vrot.slane %v985_v5, %v1368_v62  ;;  %v1556_v58 = vadd.f32 %v639_v35, %v638_v24  ;;  %v644_v60 = vrot.slane %v643_v39, 2 }
 0x120   :  { %v984_v30 = vrot.slane %v956_v11, %v1368_v62  ;;  %v753_v52 = vrot.slane %v739_v38, %v1368_v62  ;;  %v1559_v61 = vadd.f32 %v886_v48, %v885_v20  ;;  %v653_v53 = vrot.slane %v652_v6, 1 }
 0x121   :  { %v889_v19 = vrot.slane %v888_v49, 4  ;;  %v898_v54 = vrot.slane %v897_v63, 2  ;;  %v645_v3 = vadd.f32 %v644_v60, %v643_v39  ;;  %v491_v34 = vadd.f32 %v1453_v7, %v1406_v18 }
 0x122   :  { %v986_v29 = vcombine.low %v977_v45, %v984_v30  ;;  %v754_v1 = vcombine.low %v746_v22, %v753_v52  ;;  %v1564_v57 = vrot.slane %v1239_v50, %v1368_v62  ;;  %v1568_v5 = vadd.f32 %v1480_v23, %v1422_v40 }
 0x123   :  { %v890_v16 = vadd.f32 %v889_v19, %v888_v49  ;;  %v646_v10 = vrot.slane %v645_v3, 1  ;;  %v655_v13 = vsel %vm577_vm2, %v491_v34, 0.0  ;;  %v1574_v14 = vadd.f32 %v1485_v27, %v1462_v51 }
 0x124   :  { %v1000_v8 = vrot.slane %v986_v29, %v1368_v62  ;;  %806 = vst [vmem:[%s1654_s4] ss:$2 sm:$0xff] %v754_v1  ;;  %v656_v7 = vrot.slane %v655_v13, 4  ;;  %v820_v17 = vmul.f32 %v491_v34, %v491_v34  ;;  %v1240_v37 = vpack.c.bf16 %v491_v34, %v1518_v46 }
 0x125   :  { %v891_v18 = vrot.slane %v890_v16, 2  ;;  %v899_v23 = vadd.f32 %v898_v54, %v897_v63  ;;  %v647_v21 = vadd.f32 %v646_v10, %v645_v3  ;;  %v662_v55 = vsel %vm577_vm2, %v1568_v5, 0.0 }
 0x126   :  { %v1001_v40 = vcombine.low %v993_v0, %v1000_v8  ;;  %v657_v25 = vadd.f32 %v656_v7, %v655_v13  ;;  %v902_v51 = vsel %vm577_vm2, %v820_v17, 0.0  ;;  %v1584_v27 = vrot.slane %v1240_v37, %v1368_v62 }
 0x127   :  { %v892_v24 = vadd.f32 %v891_v18, %v890_v16  ;;  %v755_v26 = vcombine.low %v1556_v58, %v647_v21  ;;  %v903_v46 = vrot.slane %v902_v51, 4  ;;  %v663_v12 = vrot.slane %v662_v55, 4 }
 0x128   :  { %1233 = vst [vmem:[%s1654_s4 + $0x1] ss:$2 sm:$0xff] %v1001_v40  ;;  %v821_v41 = vmul.f32 %v1568_v5, %v1568_v5  ;;  %v658_v9 = vrot.slane %v657_v25, 2  ;;  %v1170_v47 = vcombine.low %v1564_v57, %v1584_v27  ;;  %v676_v35 = vsel %vm577_vm2, %v1574_v14, 0.0 }
 0x129   :  { %v893_v32 = vrot.slane %v892_v24, 1  ;;  %v654_v36 = vadd.f32 %v653_v53, %v652_v6  ;;  %v904_v31 = vadd.f32 %v903_v46, %v902_v51  ;;  %v664_v20 = vadd.f32 %v663_v12, %v662_v55 }
 0x12a   :  { %v909_v42 = vsel %vm577_vm2, %v821_v41, 0.0  ;;  %v900_v44 = vrot.slane %v899_v23, 1  ;;  %v659_v15 = vadd.f32 %v658_v9, %v657_v25  ;;  %v677_v63 = vrot.slane %v676_v35, 4 }
 0x12b   :  { %v894_v45 = vadd.f32 %v893_v32, %v892_v24  ;;  %v910_v33 = vrot.slane %v909_v42, 4  ;;  %v905_v11 = vrot.slane %v904_v31, 2  ;;  %v665_v48 = vrot.slane %v664_v20, 2 }
 0x12c   :  { %v823_v39 = vmul.f32 %v1574_v14, %v1574_v14  ;;  %v660_v38 = vrot.slane %v659_v15, 1  ;;  %v532_v6 = vadd.f32 %v1487_v28, %v1504_v2  ;;  %v901_v52 = vadd.f32 %v900_v44, %v899_v23 }
 0x12d   :  { %v1002_v22 = vcombine.low %v1559_v61, %v894_v45  ;;  %v911_v49 = vadd.f32 %v910_v33, %v909_v42  ;;  %v906_v50 = vadd.f32 %v905_v11, %v904_v31  ;;  %v666_v58 = vadd.f32 %v665_v48, %v664_v20 }
 0x12e   :  { %v923_v0 = vsel %vm577_vm2, %v823_v39, 0.0  ;;  %v661_v30 = vadd.f32 %v660_v38, %v659_v15  ;;  %v678_v19 = vadd.f32 %v677_v63, %v676_v35  ;;  %v669_v29 = vsel %vm577_vm2, %v532_v6, 0.0 }
 0x12f   :  { %v924_v60 = vrot.slane %v923_v0, 4  ;;  %v907_v53 = vrot.slane %v906_v50, 1  ;;  %v1605_v54 = vrot.slane %v755_v26, %v1368_v62  ;;  %v912_v3 = vrot.slane %v911_v49, 2 }
 0x130   :  { %v756_v61 = vcombine.low %v654_v36, %v661_v30  ;;  %v670_v34 = vrot.slane %v669_v29, 4  ;;  %v1608_v1 = vrot.slane %v1002_v22, %v1368_v62  ;;  %v822_v2 = vmul.f32 %v532_v6, %v532_v6 }
 0x131   :  { %v908_v28 = vadd.f32 %v907_v53, %v906_v50  ;;  %v115_v16 = vrot.slane %v1365_v59, %v82_v56  ;;  %v667_v10 = vrot.slane %v666_v58, 1  ;;  %v925_v13 = vadd.f32 %v924_v60, %v923_v0 }
 0x132   :  { %v1614_v8 = vrot.slane %v756_v61, %v1368_v62  ;;  %v671_v18 = vadd.f32 %v670_v34, %v669_v29  ;;  %v679_v17 = vrot.slane %v678_v19, 2  ;;  %v916_v37 = vsel %vm577_vm2, %v822_v2, 0.0 }
 0x133   :  { %v1003_v7 = vcombine.low %v901_v52, %v908_v28  ;;  %v1241_v40 = vpack.c.bf16 %v532_v6, %v1568_v5  ;;  %v913_v21 = vadd.f32 %v912_v3, %v911_v49  ;;  %v917_v56 = vrot.slane %v916_v37, 4 }
 0x134   :  { %v787_v23 = vcombine.low %v1605_v54, %v1614_v8  ;;  %v672_v55 = vrot.slane %v671_v18, 2  ;;  %v926_v59 = vrot.slane %v925_v13, 2  ;;  %v573_v25 = vadd.f32 %v1492_v4, %v115_v16 }
 0x135   :  { %v1019_v43 = vrot.slane %v1003_v7, %v1368_v62  ;;  %v668_v26 = vadd.f32 %v667_v10, %v666_v58  ;;  %v680_v46 = vadd.f32 %v679_v17, %v678_v19  ;;  %v918_v12 = vadd.f32 %v917_v56, %v916_v37 }
 0x136   :  { %v673_v24 = vadd.f32 %v672_v55, %v671_v18  ;;  %v914_v41 = vrot.slane %v913_v21, 1  ;;  %v683_v5 = vsel %vm577_vm2, %v573_v25, 0.0  ;;  %v824_v9 = vmul.f32 %v573_v25, %v573_v25 }
 0x137   :  { %v1034_v51 = vcombine.low %v1608_v1, %v1019_v43  ;;  %v919_v35 = vrot.slane %v918_v12, 2  ;;  %v1162_v36 = vrot.slane %v1241_v40, %v1368_v62  ;;  %v684_v31 = vrot.slane %v683_v5, 4 }
 0x138   :  { %v674_v32 = vrot.slane %v673_v24, 1  ;;  %v1242_v20 = vpack.c.bf16 %v573_v25, %v1574_v14  ;;  %v927_v42 = vadd.f32 %v926_v59, %v925_v13  ;;  %v930_v4 = vsel %vm577_vm2, %v824_v9, 0.0 }
 0x139   :  { %v920_v45 = vadd.f32 %v919_v35, %v918_v12  ;;  %v685_v15 = vadd.f32 %v684_v31, %v683_v5  ;;  %v931_v33 = vrot.slane %v930_v4, 4  ;;  %v915_v48 = vadd.f32 %v914_v41, %v913_v21 }
 0x13a   :  { %v675_v44 = vadd.f32 %v674_v32, %v673_v24  ;;  %v1169_v11 = vrot.slane %v1242_v20, %v1368_v62  ;;  %v681_v63 = vrot.slane %v680_v46, 1  ;;  %v1178_v14 = vrot.slane %v1170_v47, %v1368_v62 }
 0x13b   :  { %v921_v22 = vrot.slane %v920_v45, 1  ;;  %v686_v38 = vrot.slane %v685_v15, 2  ;;  %v932_v49 = vadd.f32 %v931_v33, %v930_v4  ;;  %v928_v50 = vrot.slane %v927_v42, 1 }
 0x13c   :  { %v757_v39 = vcombine.low %v668_v26, %v675_v44  ;;  %v1171_v6 = vcombine.low %v1162_v36, %v1169_v11  ;;  %v682_v52 = vadd.f32 %v681_v63, %v680_v46  ;;  %v795_v10 = vrot.slane %v787_v23, %v1368_v62 }
 0x13d   :  { %v922_v0 = vadd.f32 %v921_v22, %v920_v45  ;;  %v687_v30 = vadd.f32 %v686_v38, %v685_v15  ;;  %v933_v58 = vrot.slane %v932_v49, 2  ;;  %v929_v61 = vadd.f32 %v928_v50, %v927_v42 }
 0x13e   :  { %v1185_v60 = vrot.slane %v1171_v6, %v1368_v62  ;;  %v779_v57 = vrot.slane %v757_v39, %v1368_v62  ;;  %v1042_v7 = vrot.slane %v1034_v51, %v1368_v62 }
 0x13f   :  { %v1004_v53 = vcombine.low %v915_v48, %v922_v0  ;;  %v688_v19 = vrot.slane %v687_v30, 1  ;;  %v934_v29 = vadd.f32 %v933_v58, %v932_v49 }
 0x140   :  { %v1186_v54 = vcombine.low %v1178_v14, %v1185_v60 }
 0x141   :  { %v689_v3 = vadd.f32 %v688_v19, %v687_v30  ;;  %v935_v34 = vrot.slane %v934_v29, 1  ;;  %v1026_v1 = vrot.slane %v1004_v53, %v1368_v62 }
 0x142   :  { %1190 = vst [vmem:[%s1653_s3 + $0x8] sm:$0xff] %v1186_v54 }
 0x143   :  { %v758_v27 = vcombine.low %v682_v52, %v689_v3  ;;  %v936_v47 = vadd.f32 %v935_v34, %v934_v29 }
 0x145   :  { %v786_v28 = vrot.slane %v758_v27, %v1368_v62  ;;  %v1005_v2 = vcombine.low %v929_v61, %v936_v47 }
 0x147   :  { %v788_v16 = vcombine.low %v779_v57, %v786_v28  ;;  %v1033_v8 = vrot.slane %v1005_v2, %v1368_v62 }
 0x149   :  { %v802_v13 = vrot.slane %v788_v16, %v1368_v62  ;;  %v1035_v18 = vcombine.low %v1026_v1, %v1033_v8 }
 0x14b   :  { %v803_v17 = vcombine.low %v795_v10, %v802_v13  ;;  %v1049_v37 = vrot.slane %v1035_v18, %v1368_v62 }
 0x14d   :  { %1232 = vst [vmem:[%s1654_s4 + $0x10] ss:$2 sm:$0xff] %v803_v17  ;;  %v1050_v40 = vcombine.low %v1042_v7, %v1049_v37 }
 0x14f   :  { %1234 = vst [vmem:[%s1654_s4 + $0x11] ss:$2 sm:$0xff] %v1050_v40 }
 0x150   :  { %1199 = vsyncpa [#allocation3], 1 }

// kernel: generator_info_forward.5
= control target key start
LH: loop header
LB: loop body
LE: loop exit
PB: predicated region body
PF: predicated region fallthrough
CT: control target
= control target key end

     0   :  { %s2662_s18 = smov 0   ;;  %s2664_s19 = smov 0   ;;  %s3078_s0 = inlined_call_operand.vmem [shape: bf16[2,4,4,128], index: 0, kind: input, shape index: {}]   ;;  %s3079_s1 = inlined_call_operand.vmem [shape: f32[2,128], index: 1, kind: input, shape index: {}]   ;;  %s3080_s2 = inlined_call_operand.vmem [shape: bf16[3,384,64], index: 2, kind: input, shape index: {}]   ;;  %s3081_s3 = inlined_call_operand.vmem [shape: f32[1,64], index: 3, kind: input, shape index: {}]   ;;  %s3082_s4 = inlined_call_operand.vmem [shape: bf16[2,8,8,64], index: 4, kind: output, shape index: {0}]   ;;  %s3083_s5 = inlined_call_operand.vmem [shape: f32[2,2,2,64], index: 5, kind: output, shape index: {1}]  }
   0x1   :  { %s2666_s20 = smov 0   ;;  %s2668_s21 = smov 0  }
   0x2   :  { %s2670_s22 = smov 0  }
   0x3 LB: > { %s25_s23 = sadd.s32 1, %s2619_s20  ;;  %s28_s24 = sadd.s32 1, %s2623_s21  ;;  %s2627_s22 = sphi %s2670_s22, %s16_s22   ;;  %s2623_s21 = sphi %s2668_s21, %s3087_s21   ;;  %s2619_s20 = sphi %s2666_s20, %s3086_s20   ;;  %s2615_s19 = sphi %s2664_s19, %s3085_s19   ;;  %s2611_s18 = sphi %s2662_s18, %s3084_s18  }
   0x4   : > { %p26_p0 = scmp.ge.s32.totalorder %s25_s23, 2  ;;  %p1937_p1 = scmp.ge.s32.totalorder %s2627_s22, 1 }
   0x5   : > { %p206_p2 = scmp.lt.s32.totalorder %s2627_s22, 5 }
   0x6   : > { %s3089_s23 = smov (%p26_p0, %s25_s23), 0  ;;  %s3091_s24 = smov (!%p26_p0, %s28_s24), %s2623_s21 }
   0x7   : > { %p207_p3 = pnand %p1937_p1, %p206_p2  ;;  %p30_p4 = scmp.ge.s32.totalorder %s3091_s24, 2 }
   0x8   : > { %p246_p5 = scmp.lt.s32.totalorder (!%p207_p3), %s2615_s19, 1  ;;  %v300_v0 = vlaneseq (!%p207_p3)  ;;  %v2629_v1 = vmov (!%p207_p3), 0.0   ;;  %vm2630_vm0 = vmmov (!%p207_p3), 0   ;;  %v1945_v4 = vld [vmem:[%s3079_s1] ss:$0 sm:$0xff] (!%p207_p3)  ;;  %vm331_vm9 = vcmask (!%p207_p3), 1041408  }
   0x9   : > { %s3093_s24 = smov (%p30_p4, %s3091_s24), 0  ;;  %210 = sbr.rel (%p207_p3) target bundleno = 594 (0x252), region = 36 }
   0xa   : > { %2340 = vmatprep.subr.bf16.mxu0 (!%p207_p3), %v2629_v1  ;;  %2346 = vmatprep.subr.bf16.mxu1 (!%p207_p3), %v2629_v1  ;;  %v301_v2 = vshrl.u32 (!%p207_p3), %v300_v0, 7  ;;  %v304_v3 = vand.u32 (!%p207_p3), 127, %v300_v0  ;;  %v1946_v15 = vld [vmem:[%s3079_s1 + $0x1] ss:$0 sm:$0xff] (!%p207_p3)  ;;  %vm327_vm12 = vcmask (!%p207_p3), 31744   ;;  %v2489_v39 = vld [vmem:[%s3080_s2 + $0x148] sm:$0xff] (!%p207_p3)  }
   0xb   : > { %2342 = vmatprep.mubr.msk.bf16.mxu0 (!%p207_p3), %vm2630_vm0, %v2629_v1  ;;  %2348 = vmatprep.mubr.msk.bf16.mxu1 (!%p207_p3), %vm2630_vm0, %v2629_v1  ;;  %v2487_v37 = vld [vmem:[%s3080_s2 + $0x140] sm:$0xff] (!%p207_p3)   ;;  %v2491_v41 = vld [vmem:[%s3080_s2 + $0x108] sm:$0xff] (!%p207_p3)   ;;  %v2492_v42 = vld [vmem:[%s3080_s2 + $0x150] sm:$0xff] (!%p207_p3)   ;;  %v2631_v53 = vmov (!%p207_p3), 0   ;;  %s2215_s9 = sshll.u32 (!%p207_p3), %s2611_s18, 5  ;;  %vm1749_vm13 = vcmask (!%p207_p3), 523264  }
   0xc   : > { %v302_v5 = vadd.s32 (!%p207_p3), 8, %v301_v2  ;;  %v305_v6 = vmul.u32 (!%p207_p3), 2, %v304_v3  ;;  %vm314_vm1 = vcmp.ge.s32.totalorder (!%p207_p3), %v301_v2, 1  ;;  %v2488_v38 = vld [vmem:[%s3080_s2 + $0x100] sm:$0xff] (!%p207_p3)   ;;  %v2493_v43 = vld [vmem:[%s3080_s2 + $0xc8] sm:$0xff] (!%p207_p3)   ;;  %v2494_v44 = vld [vmem:[%s3080_s2 + $0x110] sm:$0xff] (!%p207_p3)  }
   0xd   : > { %v2490_v40 = vld [vmem:[%s3080_s2 + $0xc0] sm:$0xff] (!%p207_p3)   ;;  %v2495_v45 = vld [vmem:[%s3080_s2 + $0x158] sm:$0xff] (!%p207_p3)   ;;  %v2496_v46 = vld [vmem:[%s3080_s2 + $0xd0] sm:$0xff] (!%p207_p3)   ;;  %512 = vst [vmem:[#allocation2] sm:$0xf] (!%p207_p3), %v2631_v53  ;;  %s2813_s10 = scalar_lea.vmem (!%p207_p3), [#allocation2], %s2215_s9 }
   0xe   : > { %v306_v9 = vadd.s32 (!%p207_p3), 1, %v305_v6  ;;  %v309_v12 = vadd.s32 (!%p207_p3), 2, %v305_v6  ;;  %vm317_vm7 = vcmp.le.s32.totalorder (!%p207_p3), %v302_v5, 8  ;;  %v2497_v47 = vld [vmem:[%s3080_s2 + $0x118] sm:$0xff] (!%p207_p3)   ;;  %v2498_v48 = vld [vmem:[%s3080_s2 + $0x160] sm:$0xff] (!%p207_p3)   ;;  %v2501_v51 = vld [vmem:[%s3080_s2 + $0x168] sm:$0xff] (!%p207_p3)  }
   0xf   : > { %v2499_v49 = vld [vmem:[%s3080_s2 + $0xd8] sm:$0xff] (!%p207_p3)   ;;  %v2500_v50 = vld [vmem:[%s3080_s2 + $0x120] sm:$0xff] (!%p207_p3)   ;;  %513 = vst [vmem:[#allocation2 + $0x4] sm:$0x1] (!%p207_p3), %v2631_v53  ;;  %515 = vst [vmem:[#allocation2 + $0x48] sm:$0xf] (!%p207_p3), %v2631_v53 }
  0x10   : > { %s3095_s19 = smov (!%p246_p5, %s2615_s19), 1  ;;  %vm307_vm2 = vcmp.eq.s32.totalorder %v301_v2, %v306_v9  ;;  %vm308_vm3 = vcmp.eq.s32.totalorder %v302_v5, %v306_v9  ;;  %vm310_vm4 = vcmp.eq.s32.totalorder %v301_v2, %v309_v12  ;;  %vm311_vm5 = vcmp.eq.s32.totalorder %v302_v5, %v309_v12  ;;  %v2502_v52 = vld [vmem:[%s3080_s2 + $0xe0] sm:$0xff]   ;;  %516 = vst [vmem:[#allocation2 + $0x4c] sm:$0x1] %v2631_v53  ;;  %v2503_v54 = vld [vmem:[%s3080_s2 + $0x128] sm:$0xff]   ;;  %v2504_v55 = vld [vmem:[%s3080_s2 + $0x170] sm:$0xff]  }
  0x11   : > { %s2205_s25 = sshll.u32 %s3095_s19, 3  ;;  %vm312_vm6 = vmor %vm307_vm2, %vm310_vm4  ;;  %v2505_v56 = vld [vmem:[%s3080_s2 + $0xe8] sm:$0xff]   ;;  %v2506_v57 = vld [vmem:[%s3080_s2 + $0x130] sm:$0xff]   ;;  %vm1787_vm14 = vcmask 519168   ;;  %p263_p7 = scmp.lt.s32.totalorder %s2611_s18, 1  ;;  %vm1763_vm15 = vcmask 516096  }
  0x12   : > { %s250_s30 = scalar_lea.vmem %s3078_s0, %s2205_s25  ;;  %vm313_vm8 = vmor %vm308_vm3, %vm311_vm5  ;;  %v2507_v58 = vld [vmem:[%s3080_s2 + $0x178] sm:$0xff]   ;;  %v2508_v59 = vld [vmem:[%s3080_s2 + $0xf0] sm:$0xff]  }
  0x13   : > { %v272_v7 = vld [vmem:[%s250_s30] sm:$0x3]  ;;  %v273_v8 = vld [vmem:[%s250_s30 + $0x2] sm:$0x3]  ;;  %v274_v13 = vld [vmem:[%s250_s30 + $0x4] sm:$0x3] }
  0x14   : > { %v276_v10 = vunpack.c.l.bf16 %v272_v7  ;;  %v277_v11 = vunpack.c.l.bf16 %v273_v8  ;;  %v275_v14 = vld [vmem:[%s250_s30 + $0x6] sm:$0x3]  ;;  %v278_v16 = vunpack.c.l.bf16 %v274_v13  ;;  %vm320_vm10 = vmand %vm314_vm1, %vm312_vm6  ;;  %v2509_v60 = vld [vmem:[%s3080_s2 + $0x138] sm:$0xff]   ;;  %s1940_s30 = sshll.u32 %s2611_s18, 2  ;;  %s3099_s18 = smov (!%p263_p7, %s2611_s18), 1 }
  0x15   : > { %v279_v17 = vunpack.c.l.bf16 %v275_v14  ;;  %vm321_vm11 = vmand %vm317_vm7, %vm313_vm8  ;;  %v1947_v28 = vsel %vm320_vm10, 1.0, %v2629_v1  ;;  %v2803_v61 = vld [vmem:[%s3080_s2 + $0x80] sm:$0xff]   ;;  %v2515_v62 = vld [vmem:[%s3080_s2 + $0xf8] sm:$0xff]   ;;  %p254_p6 = scmp.lt.s32.totalorder %s1940_s30, 7 }
  0x16   : > { %v284_v18 = vmul.f32 %v1945_v4, %v276_v10  ;;  %v285_v19 = vmul.f32 %v1945_v4, %v277_v11  ;;  %v286_v20 = vmul.f32 %v1945_v4, %v278_v16  ;;  %v1948_v29 = vsel %vm321_vm11, 1.0, %v2629_v1  ;;  %v2523_v63 = vld [vmem:[%s3080_s2 + $0x40] sm:$0xff]  }
  0x17   : > { %v287_v21 = vmul.f32 %v1945_v4, %v279_v17  ;;  %v326_v34 = vpack.c.bf16 %v1948_v29, %v1947_v28  ;;  %s3097_s30 = smov (!%p254_p6, %s1940_s30), 7 }
  0x18   : > { %v292_v22 = vadd.f32 %v1946_v15, %v284_v18  ;;  %v293_v23 = vadd.f32 %v1946_v15, %v285_v19  ;;  %v294_v24 = vadd.f32 %v1946_v15, %v286_v20  ;;  %s257_s6 = sadd.s32 %s2205_s25, %s3097_s30  ;;  %s1943_s25 = sshll.u32 %s3095_s19, 1 }
  0x19   : > { %v295_v25 = vadd.f32 %v1946_v15, %v287_v21  ;;  %s1942_s9 = sshll.u32 %s257_s6, 2  ;;  %s266_s14 = sadd.s32 %s1943_s25, %s3099_s18 }
  0x1a   : > { %v296_v26 = vpack.c.bf16 %v292_v22, %v292_v22  ;;  %v297_v27 = vpack.c.bf16 %v293_v23, %v293_v23  ;;  %v298_v30 = vpack.c.bf16 %v294_v24, %v294_v24  ;;  %s3039_s13 = scalar_lea.vmem %s3082_s4, %s1942_s9 }
  0x1b   : > { %v299_v31 = vpack.c.bf16 %v295_v25, %v295_v25 }
  0x1c   : > { %v333_v32 = vsel %vm331_vm9, %v296_v26, 0  ;;  %v377_v33 = vsel %vm331_vm9, %v297_v27, 0  ;;  %v421_v35 = vsel %vm331_vm9, %v298_v30, 0 }
  0x1d   : > { %2341 = vmatpush3.bf16.msra.mxu0 %v333_v32  ;;  %2347 = vmatpush3.bf16.msra.mxu1 %v377_v33  ;;  %v465_v36 = vsel %vm331_vm9, %v299_v31, 0 }
  0x1e   : > { %2352 = vmatprep.subr.bf16.mxu0 %v2629_v1  ;;  %2358 = vmatprep.subr.bf16.mxu1 %v2629_v1 }
  0x20   : > { %2343 = vmatmul.mubr.msk.bf16.vlgmr.msra.gmra.mrb[0].mxu0 %vm327_vm12, %v326_v34  ;;  %2349 = vmatmul.mubr.msk.bf16.vlgmr.msra.gmra.mrb[0].mxu1 %vm327_vm12, %v326_v34 }
  0x21   : > { %2353 = vmatpush3.bf16.msra.mxu0 %v421_v35  ;;  %2359 = vmatpush3.bf16.msra.mxu1 %v465_v36 }
  0x22   : > { %2354 = vmatprep.mubr.msk.bf16.mxu0 %vm2630_vm0, %v2629_v1  ;;  %2360 = vmatprep.mubr.msk.bf16.mxu1 %vm2630_vm0, %v2629_v1 }
  0x23   : > { %2364 = vmatprep.subr.bf16.mxu1 %v2487_v37  ;;  %2226 = vmatprep.subr.bf16.mxu0 %v2488_v38 }
  0x28   : > { %2355 = vmatmul.mubr.msk.bf16.vlgmr.msra.gmra.mrb[4].mxu0 %vm327_vm12, %v326_v34  ;;  %2361 = vmatmul.mubr.msk.bf16.vlgmr.msra.gmra.mrb[4].mxu1 %vm327_vm12, %v326_v34 }
  0x29   : > { %2365 = vmatpush3.bf16.msra.mxu1 %v2487_v37  ;;  %2227 = vmatpush3.bf16.msra.mxu0 %v2490_v40 }
  0x2a   : > { %2366 = vmatprep.subr.bf16.mxu1 %v2489_v39  ;;  %2228 = vmatprep.subr.bf16.mxu0 %v2491_v41 }
  0x2d   : > { %2367 = vmatpush3.bf16.msra.mxu1 %v2489_v39  ;;  %2229 = vmatpush3.bf16.msra.mxu0 %v2493_v43 }
  0x2e   : > { %2368 = vmatprep.subr.bf16.mxu1 %v2492_v42  ;;  %2230 = vmatprep.subr.bf16.mxu0 %v2494_v44 }
  0x31   : > { %2369 = vmatpush3.bf16.msra.mxu1 %v2492_v42  ;;  %2231 = vmatpush3.bf16.msra.mxu0 %v2496_v46 }
  0x32   : > { %2370 = vmatprep.subr.bf16.mxu1 %v2495_v45  ;;  %2232 = vmatprep.subr.bf16.mxu0 %v2497_v47 }
  0x35   : > { %2371 = vmatpush3.bf16.msra.mxu1 %v2495_v45  ;;  %2233 = vmatpush3.bf16.msra.mxu0 %v2499_v49 }
  0x36   : > { %2372 = vmatprep.subr.bf16.mxu1 %v2498_v48  ;;  %2234 = vmatprep.subr.bf16.mxu0 %v2500_v50 }
  0x39   : > { %2373 = vmatpush3.bf16.msra.mxu1 %v2498_v48  ;;  %2235 = vmatpush3.bf16.msra.mxu0 %v2502_v52 }
  0x3a   : > { %2374 = vmatprep.subr.bf16.mxu1 %v2501_v51  ;;  %2236 = vmatprep.subr.bf16.mxu0 %v2503_v54 }
  0x3d   : > { %2375 = vmatpush3.bf16.msra.mxu1 %v2501_v51  ;;  %2237 = vmatpush3.bf16.msra.mxu0 %v2505_v56 }
  0x3e   : > { %2376 = vmatprep.subr.bf16.mxu1 %v2504_v55  ;;  %2238 = vmatprep.subr.bf16.mxu0 %v2506_v57 }
  0x41   : > { %2377 = vmatpush3.bf16.msra.mxu1 %v2504_v55  ;;  %2239 = vmatpush3.bf16.msra.mxu0 %v2508_v59 }
  0x42   : > { %2378 = vmatprep.subr.bf16.mxu1 %v2507_v58  ;;  %2240 = vmatprep.subr.bf16.mxu0 %v2509_v60 }
  0x45   : > { %2379 = vmatpush3.bf16.msra.mxu1 %v2507_v58  ;;  %2241 = vmatpush3.bf16.msra.mxu0 %v2515_v62 }
  0x46   : > { %2384 = vmatprep.subr.bf16.mxu1 %v2803_v61  ;;  %2264 = vmatprep.subr.bf16.mxu0 %v2523_v63 }
  0xf3   : > { %v369_v0 = vpop.f32.mrb[0].mxu0  ;;  %v413_v1 = vpop.f32.mrb[0].mxu1 }
  0xf4   : > { %v2206_v2 = vpack.c.bf16 %v369_v0, %v369_v0  ;;  %v2208_v3 = vpack.c.bf16 %v413_v1, %v413_v1  ;;  %v2344_v4 = vpop.f32.mrb[1].mxu0  ;;  %v2350_v5 = vpop.f32.mrb[1].mxu1  ;;  %v2524_v1 = vld [vmem:[%s3080_s2 + $0x88] sm:$0xff]  }
  0xf5   : > { %v372_v6 = vpop.f32.mrb[2].mxu0  ;;  %v416_v7 = vpop.f32.mrb[2].mxu1 }
  0xf6   : > { %546 = vst [vmem:[#allocation2 + $0x8] sm:$0xf] %v2206_v2  ;;  %548 = vst [vmem:[#allocation2 + $0x10] sm:$0xf] %v2206_v2  ;;  %v2207_v8 = vpack.c.bf16 %v372_v6, %v372_v6  ;;  %v2209_v9 = vpack.c.bf16 %v416_v7, %v416_v7  ;;  %v2345_v10 = vpop.f32.mrb[3].mxu0  ;;  %v2351_v11 = vpop.f32.mrb[3].mxu1 }
  0xf7   : > { %550 = vst [vmem:[#allocation2 + $0x18] sm:$0xf] %v2208_v3  ;;  %552 = vst [vmem:[#allocation2 + $0x20] sm:$0xf] %v2208_v3 }
  0xf8   : > { %547 = vst [vmem:[#allocation2 + $0xc] sm:$0x1] %v2207_v8  ;;  %549 = vst [vmem:[#allocation2 + $0x14] sm:$0x1] %v2207_v8 }
  0xf9   : > { %551 = vst [vmem:[#allocation2 + $0x1c] sm:$0x1] %v2209_v9  ;;  %553 = vst [vmem:[#allocation2 + $0x24] sm:$0x1] %v2209_v9 }
  0xfb   : > { %v457_v12 = vpop.f32.mrb[4].mxu0  ;;  %v501_v13 = vpop.f32.mrb[4].mxu1 }
  0xfc   : > { %v2210_v14 = vpack.c.bf16 %v457_v12, %v457_v12  ;;  %v2212_v15 = vpack.c.bf16 %v501_v13, %v501_v13  ;;  %v2356_v16 = vpop.f32.mrb[5].mxu0  ;;  %v2362_v17 = vpop.f32.mrb[5].mxu1 }
  0xfd   : > { %v460_v18 = vpop.f32.mrb[6].mxu0  ;;  %v504_v19 = vpop.f32.mrb[6].mxu1 }
  0xfe   : > { %554 = vst [vmem:[#allocation2 + $0x28] sm:$0xf] %v2210_v14  ;;  %556 = vst [vmem:[#allocation2 + $0x30] sm:$0xf] %v2210_v14  ;;  %v2211_v20 = vpack.c.bf16 %v460_v18, %v460_v18  ;;  %v2213_v21 = vpack.c.bf16 %v504_v19, %v504_v19  ;;  %v2357_v22 = vpop.f32.mrb[7].mxu0  ;;  %v2363_v23 = vpop.f32.mrb[7].mxu1 }
  0xff   : > { %558 = vst [vmem:[#allocation2 + $0x38] sm:$0xf] %v2212_v15  ;;  %560 = vst [vmem:[#allocation2 + $0x40] sm:$0xf] %v2212_v15  ;;  %v2530_v15 = vld [vmem:[%s3080_s2 + $0x90] sm:$0xff]   ;;  %v2526_v19 = vld [vmem:[%s3080_s2] sm:$0xff]  }
 0x100   : > { %555 = vst [vmem:[#allocation2 + $0x2c] sm:$0x1] %v2211_v20  ;;  %557 = vst [vmem:[#allocation2 + $0x34] sm:$0x1] %v2211_v20  ;;  %v2529_v22 = vld [vmem:[%s3080_s2 + $0x48] sm:$0xff]  }
 0x101   : > { %559 = vst [vmem:[#allocation2 + $0x3c] sm:$0x1] %v2213_v21  ;;  %561 = vst [vmem:[#allocation2 + $0x44] sm:$0x1] %v2213_v21 }
 0x108   : > { %v2816_v24 = vld [vmem:[%s2813_s10 + $0x8] sm:$0xf]  ;;  %v2819_v25 = vld [vmem:[%s2813_s10 + $0x10] sm:$0xf]  ;;  %v1978_v26 = vld [vmem:[%s2813_s10 + $0xc] sm:$0x1] }
 0x109   : > { %v1979_v27 = vld [vmem:[%s2813_s10 + $0x14] sm:$0x1]  ;;  %v1982_v28 = vld [vmem:[%s2813_s10 + $0x8] sm:$0xe]  ;;  %v1983_v29 = vld [vmem:[%s2813_s10 + $0x10] sm:$0xe]  ;;  %v1986_v35 = vcombine.low %v2816_v24, %v1978_v26  ;;  %v2042_v20 = vcombine.low %v2816_v24, %v2819_v25 }
 0x10a   : > { %v1990_v30 = vcombine.low %v1982_v28, %v1978_v26  ;;  %v1991_v31 = vcombine.low %v1983_v29, %v1979_v27  ;;  %v1980_v32 = vld [vmem:[%s2813_s10 + $0x1c] sm:$0x1]  ;;  %v1981_v33 = vld [vmem:[%s2813_s10 + $0x24] sm:$0x1]  ;;  %v1984_v34 = vld [vmem:[%s2813_s10 + $0x18] sm:$0xe]  ;;  %v1987_v36 = vcombine.low %v2819_v25, %v1979_v27 }
 0x10b   : > { %v1985_v37 = vld [vmem:[%s2813_s10 + $0x20] sm:$0xe]  ;;  %v1992_v38 = vcombine.low %v1984_v34, %v1980_v32  ;;  %v2835_v40 = vld [vmem:[%s2813_s10 + $0x8] sm:$0xf]  ;;  %v570_v44 = vld [vmem:[%s2813_s10 + $0x4] sm:$0x1] }
 0x10c   : > { %v2832_v39 = vld [vmem:[%s2813_s10] sm:$0xf]  ;;  %v774_v41 = vrot.slane %v1990_v30, 1  ;;  %v775_v42 = vrot.slane %v1991_v31, 1  ;;  %v1993_v43 = vcombine.low %v1985_v37, %v1981_v33  ;;  %v571_v45 = vld [vmem:[%s2813_s10 + $0xc] sm:$0x1] }
 0x10d   : > { %v776_v46 = vrot.slane %v1992_v38, 1  ;;  %v574_v47 = vld [vmem:[%s2813_s10] sm:$0xe]  ;;  %v575_v48 = vld [vmem:[%s2813_s10 + $0x8] sm:$0xe]  ;;  %v1964_v49 = vcombine.low %v2832_v39, %v570_v44  ;;  %v1965_v50 = vcombine.low %v2835_v40, %v571_v45  ;;  %v735_v57 = vshrl.u32 %v1986_v35, 16 }
 0x10e   : > { %v2044_v51 = vcombine.low %v774_v41, %v775_v42  ;;  %v777_v52 = vrot.slane %v1993_v43, 1  ;;  %v1968_v53 = vcombine.low %v574_v47, %v570_v44  ;;  %v1969_v54 = vcombine.low %v575_v48, %v571_v45  ;;  %v2844_v55 = vld [vmem:[%s2813_s10 + $0x18] sm:$0xf]  ;;  %v2847_v56 = vld [vmem:[%s2813_s10 + $0x20] sm:$0xf]  ;;  %v2531_v24 = vld [vmem:[%s3080_s2 + $0x8] sm:$0xff]  }
 0x10f   : > { %v737_v58 = vshll.u32 %v1986_v35, 16  ;;  %v744_v59 = vshll.u32 %v1987_v36, 16  ;;  %v1988_v60 = vcombine.low %v2844_v55, %v1980_v32  ;;  %v1989_v2 = vcombine.low %v2847_v56, %v1981_v33  ;;  %v2533_v28 = vld [vmem:[%s3080_s2 + $0x98] sm:$0xff]   ;;  %v2532_v30 = vld [vmem:[%s3080_s2 + $0x50] sm:$0xff]   ;;  %v2537_v33 = vld [vmem:[%s3080_s2 + $0xa0] sm:$0xff]  }
 0x110   : > { %2380 = vmatprep.mubr.bf16.mxu1 %v2044_v51  ;;  %v2047_v62 = vcombine.low %v776_v46, %v777_v52  ;;  %v638_v63 = vrot.slane %v1968_v53, 1  ;;  %v639_v0 = vrot.slane %v1969_v54, 1  ;;  %v742_v4 = vshrl.u32 %v1987_v36, 16  ;;  %v2535_v34 = vld [vmem:[%s3080_s2 + $0x10] sm:$0xff]   ;;  %v2536_v36 = vld [vmem:[%s3080_s2 + $0x58] sm:$0xff]   ;;  %v2540_v38 = vld [vmem:[%s3080_s2 + $0xa8] sm:$0xff]  }
 0x111   : > { %v739_v3 = vrot.slane %v737_v58, 1  ;;  %v746_v5 = vrot.slane %v744_v59, 1  ;;  %v751_v6 = vshll.u32 %v1988_v60, 16  ;;  %v758_v8 = vshll.u32 %v1989_v2, 16  ;;  %v2538_v41 = vld [vmem:[%s3080_s2 + $0x18] sm:$0xff]   ;;  %v2539_v42 = vld [vmem:[%s3080_s2 + $0x60] sm:$0xff]  }
 0x112   : > { %2381 = vmatmul.mubr.bf16.vlgmr.msra.gmra.mrb[8].mxu1 %v2047_v62  ;;  %v2074_v7 = vcombine.low %v638_v63, %v639_v0  ;;  %v749_v11 = vshrl.u32 %v1988_v60, 16  ;;  %v756_v13 = vshrl.u32 %v1989_v2, 16  ;;  %v601_v16 = vshll.u32 %v1964_v49, 16  ;;  %v2541_v43 = vld [vmem:[%s3080_s2 + $0x20] sm:$0xff]   ;;  %v2543_v44 = vld [vmem:[%s3080_s2 + $0xb0] sm:$0xff]   ;;  %v2542_v46 = vld [vmem:[%s3080_s2 + $0x68] sm:$0xff]  }
 0x113   : > { %2385 = vmatpush3.bf16.msra.mxu1 %v2803_v61  ;;  %v740_v9 = vor.u32 %v739_v3, %v735_v57  ;;  %v747_v10 = vor.u32 %v746_v5, %v742_v4  ;;  %v753_v12 = vrot.slane %v751_v6, 1  ;;  %v760_v14 = vrot.slane %v758_v8, 1  ;;  %v572_v45 = vld [vmem:[%s2813_s10 + $0x14] sm:$0x1]  ;;  %v573_v47 = vld [vmem:[%s2813_s10 + $0x1c] sm:$0x1] }
 0x114   : > { %2400 = vmatprep.mubr.bf16.mxu1 %v2074_v7  ;;  %2386 = vmatprep.subr.bf16.mxu1 %v2524_v1  ;;  %v608_v17 = vshll.u32 %v1965_v50, 16  ;;  %v603_v23 = vrot.slane %v601_v16, 1  ;;  %v599_v25 = vshrl.u32 %v1964_v49, 16  ;;  %v606_v29 = vshrl.u32 %v1965_v50, 16  ;;  %v2907_v48 = vld [vmem:[%s2813_s10 + $0x10] sm:$0xf] }
 0x115   : > { %v2043_v18 = vcombine.low %v740_v9, %v747_v10  ;;  %v754_v61 = vor.u32 %v753_v12, %v749_v11  ;;  %v761_v21 = vor.u32 %v760_v14, %v756_v13  ;;  %v2045_v35 = vcombine.low %v2844_v55, %v2847_v56  ;;  %v2910_v49 = vld [vmem:[%s2813_s10 + $0x18] sm:$0xf]  ;;  %v576_v50 = vld [vmem:[%s2813_s10 + $0x10] sm:$0xe]  ;;  %v2108_v52 = vld [vmem:[%s2813_s10 + $0x14] sm:$0x1] }
 0x116   : > { %v610_v26 = vrot.slane %v608_v17, 1  ;;  %v604_v31 = vor.u32 %v603_v23, %v599_v25  ;;  %v577_v51 = vld [vmem:[%s2813_s10 + $0x18] sm:$0xe]  ;;  %v2109_v53 = vld [vmem:[%s2813_s10 + $0x1c] sm:$0x1]  ;;  %v1966_v56 = vcombine.low %v2907_v48, %v572_v45  ;;  %v1967_v57 = vcombine.low %v2910_v49, %v573_v47  ;;  %v2544_v62 = vld [vmem:[%s3080_s2 + $0x28] sm:$0xff]  }
 0x117   : > { %1023 = vmatprep.mubr.bf16.mxu0 %v2043_v18  ;;  %2387 = vmatpush3.bf16.msra.mxu1 %v2524_v1  ;;  %v2046_v27 = vcombine.low %v754_v61, %v761_v21  ;;  %v2112_v54 = vld [vmem:[%s2813_s10 + $0x10] sm:$0xe]  ;;  %v2113_v55 = vld [vmem:[%s2813_s10 + $0x18] sm:$0xe]  ;;  %v1970_v59 = vcombine.low %v576_v50, %v572_v45  ;;  %v1971_v60 = vcombine.low %v577_v51, %v573_v47  ;;  %v2551_v2 = vld [vmem:[%s3080_s2 + $0x200] sm:$0xff]  }
 0x118   : > { %1024 = vmatmul.mubr.bf16.vlgmr.msra.gmra.mrb[8].mxu0 %v2042_v20  ;;  %2388 = vmatprep.subr.bf16.mxu1 %v2530_v15  ;;  %v611_v32 = vor.u32 %v610_v26, %v606_v29  ;;  %v2546_v58 = vld [vmem:[%s3080_s2 + $0xb8] sm:$0xff]   ;;  %v2120_v63 = vcombine.low %v2112_v54, %v2108_v52  ;;  %v2121_v0 = vcombine.low %v2113_v55, %v2109_v53  ;;  %v2545_v1 = vld [vmem:[%s3080_s2 + $0x70] sm:$0xff]   ;;  %v615_v3 = vshll.u32 %v1966_v56, 16  ;;  %v2559_v18 = vld [vmem:[%s3080_s2 + $0x208] sm:$0xff]  }
 0x119   : > { %2265 = vmatpush3.bf16.msra.mxu0 %v2526_v19  ;;  %1031 = vmatprep.mubr.bf16.mxu0 %v2046_v27  ;;  %v622_v4 = vshll.u32 %v1967_v57, 16  ;;  %v640_v5 = vrot.slane %v1970_v59, 1  ;;  %v641_v6 = vrot.slane %v1971_v60, 1  ;;  %v2933_v7 = vld [vmem:[%s2813_s10 + $0x10] sm:$0xf]  ;;  %v2548_v12 = vld [vmem:[%s3080_s2 + $0x78] sm:$0xff]   ;;  %v2072_v29 = vcombine.low %v2832_v39, %v2835_v40 }
 0x11a   : > { %2266 = vmatprep.subr.bf16.mxu0 %v2529_v22  ;;  %v2073_v37 = vcombine.low %v604_v31, %v611_v32  ;;  %v2936_v8 = vld [vmem:[%s2813_s10 + $0x18] sm:$0xf]  ;;  %v2547_v9 = vld [vmem:[%s3080_s2 + $0x30] sm:$0xff]   ;;  %v1419_v10 = vrot.slane %v2120_v63, 1  ;;  %v1420_v11 = vrot.slane %v2121_v0, 1  ;;  %v2116_v13 = vcombine.low %v2933_v7, %v2108_v52  ;;  %v2558_v22 = vld [vmem:[%s3080_s2 + $0x1c0] sm:$0xff]  }
 0x11b   : > { %2389 = vmatpush3.bf16.msra.mxu1 %v2530_v15  ;;  %v2117_v14 = vcombine.low %v2936_v8, %v2109_v53  ;;  %v617_v15 = vrot.slane %v615_v3, 1  ;;  %v624_v16 = vrot.slane %v622_v4, 1  ;;  %v2077_v17 = vcombine.low %v640_v5, %v641_v6  ;;  %v2552_v19 = vld [vmem:[%s3080_s2 + $0x38] sm:$0xff]   ;;  %v2562_v25 = vld [vmem:[%s3080_s2 + $0x180] sm:$0xff]   ;;  %v2565_v39 = vld [vmem:[%s3080_s2 + $0x188] sm:$0xff]  }
 0x11c   : > { %2390 = vmatprep.subr.bf16.mxu1 %v2533_v28  ;;  %v2174_v61 = vcombine.low %v1419_v10, %v1420_v11  ;;  %v613_v20 = vshrl.u32 %v1966_v56, 16  ;;  %v620_v21 = vshrl.u32 %v1967_v57, 16  ;;  %v1382_v27 = vshll.u32 %v2116_v13, 16  ;;  %v2572_v47 = vld [vmem:[%s3080_s2 + $0x198] sm:$0xff]   ;;  %v2110_v50 = vld [vmem:[%s2813_s10 + $0x24] sm:$0x1] }
 0x11d   : > { %2267 = vmatpush3.bf16.msra.mxu0 %v2531_v24  ;;  %v2564_v24 = vld [vmem:[%s3080_s2 + $0x210] sm:$0xff]   ;;  %v1380_v40 = vshrl.u32 %v2116_v13, 16  ;;  %v2111_v51 = vld [vmem:[%s2813_s10 + $0x2c] sm:$0x1]  ;;  %v2106_v52 = vld [vmem:[%s2813_s10 + $0x20] sm:$0xf] }
 0x11e   : > { %2268 = vmatprep.subr.bf16.mxu0 %v2532_v30  ;;  %v618_v23 = vor.u32 %v617_v15, %v613_v20  ;;  %v625_v26 = vor.u32 %v624_v16, %v620_v21  ;;  %v2563_v30 = vld [vmem:[%s3080_s2 + $0x1c8] sm:$0xff]   ;;  %v1384_v32 = vrot.slane %v1382_v27, 1  ;;  %v2575_v54 = vld [vmem:[%s3080_s2 + $0x1a0] sm:$0xff]   ;;  %v2580_v60 = vld [vmem:[%s3080_s2 + $0x238] sm:$0xff]  }
 0x11f   : > { %2391 = vmatpush3.bf16.msra.mxu1 %v2533_v28  ;;  %v1389_v28 = vshll.u32 %v2117_v14, 16  ;;  %v2107_v53 = vld [vmem:[%s2813_s10 + $0x28] sm:$0xf]  ;;  %v2114_v55 = vld [vmem:[%s2813_s10 + $0x20] sm:$0xe]  ;;  %v2581_v6 = vld [vmem:[%s3080_s2 + $0x1b0] sm:$0xff]  }
 0x120   : > { %1032 = vmatmul.mubr.bf16.gmra.mrb[12].mxu0 %v2045_v35  ;;  %2392 = vmatprep.subr.bf16.mxu1 %v2537_v33  ;;  %v2076_v31 = vcombine.low %v618_v23, %v625_v26  ;;  %v1387_v35 = vshrl.u32 %v2117_v14, 16  ;;  %v2115_v56 = vld [vmem:[%s2813_s10 + $0x28] sm:$0xe]  ;;  %v2119_v59 = vcombine.low %v2107_v53, %v2111_v51  ;;  %v2585_v13 = vld [vmem:[%s3080_s2 + $0x1b8] sm:$0xff]   ;;  %s1944_s10 = sshll.u32 %s266_s14, 1 }
 0x121   : > { %2269 = vmatpush3.bf16.msra.mxu0 %v2535_v34  ;;  %1277 = vmatprep.mubr.bf16.mxu0 %v2073_v37  ;;  %v2568_v34 = vld [vmem:[%s3080_s2 + $0x218] sm:$0xff]   ;;  %v1385_v37 = vor.u32 %v1384_v32, %v1380_v40  ;;  %v2576_v57 = vld [vmem:[%s3080_s2 + $0x1e8] sm:$0xff]   ;;  %v2123_v63 = vcombine.low %v2115_v56, %v2111_v51  ;;  %s268_s17 = scalar_lea.vmem %s3083_s5, %s1944_s10 }
 0x122   : > { %2270 = vmatprep.subr.bf16.mxu0 %v2536_v36  ;;  %v2567_v36 = vld [vmem:[%s3080_s2 + $0x1d0] sm:$0xff]   ;;  %v2578_v0 = vld [vmem:[%s3080_s2 + $0x1a8] sm:$0xff]   ;;  %v1403_v3 = vshll.u32 %v2119_v59, 16  ;;  %v1401_v15 = vshrl.u32 %v2119_v59, 16 }
 0x123   : > { %2393 = vmatpush3.bf16.msra.mxu1 %v2537_v33  ;;  %v1391_v33 = vrot.slane %v1389_v28, 1  ;;  %v1422_v5 = vrot.slane %v2123_v63, 1 }
 0x124   : > { %2394 = vmatprep.subr.bf16.mxu1 %v2540_v38  ;;  %v1405_v11 = vrot.slane %v1403_v3, 1 }
 0x125   : > { %2271 = vmatpush3.bf16.msra.mxu0 %v2538_v41  ;;  %v2571_v41 = vld [vmem:[%s3080_s2 + $0x220] sm:$0xff]  }
 0x126   : > { %2272 = vmatprep.subr.bf16.mxu0 %v2539_v42  ;;  %v2569_v42 = vld [vmem:[%s3080_s2 + $0x190] sm:$0xff]  }
 0x127   : > { %2395 = vmatpush3.bf16.msra.mxu1 %v2540_v38  ;;  %v1392_v38 = vor.u32 %v1391_v33, %v1387_v35 }
 0x128   : > { %2396 = vmatprep.subr.bf16.mxu1 %v2543_v44 }
 0x129   : > { %2273 = vmatpush3.bf16.msra.mxu0 %v2541_v43  ;;  %v2075_v43 = vcombine.low %v2907_v48, %v2910_v49  ;;  %v2173_v45 = vcombine.low %v1385_v37, %v1392_v38  ;;  %v2573_v48 = vld [vmem:[%s3080_s2 + $0x1e0] sm:$0xff]   ;;  %v2577_v49 = vld [vmem:[%s3080_s2 + $0x230] sm:$0xff]  }
 0x12a   : > { %2274 = vmatprep.subr.bf16.mxu0 %v2542_v46  ;;  %v2574_v46 = vld [vmem:[%s3080_s2 + $0x228] sm:$0xff]  }
 0x12b   : > { %2397 = vmatpush3.bf16.msra.mxu1 %v2543_v44  ;;  %v2570_v44 = vld [vmem:[%s3080_s2 + $0x1d8] sm:$0xff]  }
 0x12c   : > { %2398 = vmatprep.subr.bf16.mxu1 %v2546_v58 }
 0x12d   : > { %2275 = vmatpush3.bf16.msra.mxu0 %v2544_v62  ;;  %v2122_v62 = vcombine.low %v2114_v55, %v2110_v50 }
 0x12e   : > { %2276 = vmatprep.subr.bf16.mxu0 %v2545_v1  ;;  %v2579_v1 = vld [vmem:[%s3080_s2 + $0x1f0] sm:$0xff]  }
 0x12f   : > { %2399 = vmatpush3.bf16.msra.mxu1 %v2546_v58  ;;  %v2118_v58 = vcombine.low %v2106_v52, %v2110_v50  ;;  %v1421_v4 = vrot.slane %v2122_v62, 1 }
 0x130   : > { %2404 = vmatprep.subr.bf16.mxu1 %v2551_v2 }
 0x131   : > { %2277 = vmatpush3.bf16.msra.mxu0 %v2547_v9  ;;  %v2582_v9 = vld [vmem:[%s3080_s2 + $0x1f8] sm:$0xff]   ;;  %v1394_v14 = vshrl.u32 %v2118_v58, 16 }
 0x132   : > { %2278 = vmatprep.subr.bf16.mxu0 %v2548_v12  ;;  %2401 = vmatmul.mubr.bf16.vlgmr.msra.gmra.mrb[8].mxu1 %v2077_v17  ;;  %v2177_v12 = vcombine.low %v1421_v4, %v1422_v5  ;;  %v1406_v17 = vor.u32 %v1405_v11, %v1401_v15 }
 0x133   : > { %2405 = vmatpush3.bf16.msra.mxu1 %v2551_v2  ;;  %2420 = vmatprep.mubr.bf16.mxu1 %v2174_v61  ;;  %v1396_v2 = vshll.u32 %v2118_v58, 16  ;;  %v2175_v61 = vcombine.low %v2106_v52, %v2107_v53 }
 0x134   : > { %2406 = vmatprep.subr.bf16.mxu1 %v2559_v18 }
 0x135   : > { %2279 = vmatpush3.bf16.msra.mxu0 %v2552_v19  ;;  %v1398_v10 = vrot.slane %v1396_v2, 1 }
 0x136   : > { %2302 = vmatprep.subr.bf16.mxu0 %v2558_v22 }
 0x137   : > { %2407 = vmatpush3.bf16.msra.mxu1 %v2559_v18  ;;  %v1399_v16 = vor.u32 %v1398_v10, %v1394_v14  ;;  %v2172_v18 = vcombine.low %v2933_v7, %v2936_v8 }
 0x138   : > { %1278 = vmatmul.mubr.bf16.vlgmr.msra.gmra.mrb[16].mxu0 %v2072_v29  ;;  %2408 = vmatprep.subr.bf16.mxu1 %v2564_v24 }
 0x139   : > { %1285 = vmatprep.mubr.bf16.mxu0 %v2076_v31  ;;  %2303 = vmatpush3.bf16.msra.mxu0 %v2562_v25  ;;  %v2176_v19 = vcombine.low %v1399_v16, %v1406_v17 }
 0x13a   : > { %2304 = vmatprep.subr.bf16.mxu0 %v2563_v30 }
 0x13b   : > { %2409 = vmatpush3.bf16.msra.mxu1 %v2564_v24 }
 0x13c   : > { %2410 = vmatprep.subr.bf16.mxu1 %v2568_v34 }
 0x13d   : > { %2305 = vmatpush3.bf16.msra.mxu0 %v2565_v39 }
 0x13e   : > { %2306 = vmatprep.subr.bf16.mxu0 %v2567_v36 }
 0x13f   : > { %2411 = vmatpush3.bf16.msra.mxu1 %v2568_v34 }
 0x140   : > { %1286 = vmatmul.mubr.bf16.gmra.mrb[20].mxu0 %v2075_v43  ;;  %2412 = vmatprep.subr.bf16.mxu1 %v2571_v41 }
 0x141   : > { %2307 = vmatpush3.bf16.msra.mxu0 %v2569_v42  ;;  %1668 = vmatprep.mubr.bf16.mxu0 %v2173_v45 }
 0x142   : > { %2308 = vmatprep.subr.bf16.mxu0 %v2570_v44 }
 0x143   : > { %2413 = vmatpush3.bf16.msra.mxu1 %v2571_v41 }
 0x144   : > { %2414 = vmatprep.subr.bf16.mxu1 %v2574_v46 }
 0x145   : > { %2309 = vmatpush3.bf16.msra.mxu0 %v2572_v47 }
 0x146   : > { %2310 = vmatprep.subr.bf16.mxu0 %v2573_v48 }
 0x147   : > { %2415 = vmatpush3.bf16.msra.mxu1 %v2574_v46 }
 0x148   : > { %2416 = vmatprep.subr.bf16.mxu1 %v2577_v49 }
 0x149   : > { %2311 = vmatpush3.bf16.msra.mxu0 %v2575_v54 }
 0x14a   : > { %2312 = vmatprep.subr.bf16.mxu0 %v2576_v57  ;;  %v2202_v57 = vld [vmem:[%s3081_s3] ss:$0 sm:$0xff] }
 0x14b   : > { %2417 = vmatpush3.bf16.msra.mxu1 %v2577_v49 }
 0x14c   : > { %2418 = vmatprep.subr.bf16.mxu1 %v2580_v60 }
 0x14d   : > { %2313 = vmatpush3.bf16.msra.mxu0 %v2578_v0 }
 0x14e   : > { %2314 = vmatprep.subr.bf16.mxu0 %v2579_v1 }
 0x14f   : > { %2419 = vmatpush3.bf16.msra.mxu1 %v2580_v60 }
 0x151   : > { %2315 = vmatpush3.bf16.msra.mxu0 %v2581_v6 }
 0x152   : > { %2316 = vmatprep.subr.bf16.mxu0 %v2582_v9  ;;  %2421 = vmatmul.mubr.bf16.vlgmr.msra.gmra.mrb[8].mxu1 %v2177_v12 }
 0x155   : > { %2317 = vmatpush3.bf16.msra.mxu0 %v2585_v13 }
 0x158   : > { %1669 = vmatmul.mubr.bf16.vlgmr.msra.gmra.mrb[24].mxu0 %v2172_v18 }
 0x159   : > { %1676 = vmatprep.mubr.bf16.mxu0 %v2176_v19 }
 0x160   : > { %1677 = vmatmul.mubr.bf16.gmra.mrb[28].mxu0 %v2175_v61 }
 0x1eb   : > { %v2242_v20 = vpop.f32.mrb[8].mxu0 }
 0x1ec   : > { %v2243_v21 = vpop.f32.mrb[9].mxu0 }
 0x1ed   : > { %v2244_v22 = vadd.f32 %v2243_v21, %v2242_v20  ;;  %v2245_v23 = vpop.f32.mrb[10].mxu0 }
 0x1ee   : > { %v2246_v26 = vpop.f32.mrb[11].mxu0 }
 0x1ef   : > { %v2247_v27 = vadd.f32 %v2246_v26, %v2245_v23 }
 0x1f3   : > { %v2248_v28 = vpop.f32.mrb[12].mxu0 }
 0x1f4   : > { %v2249_v24 = vpop.f32.mrb[13].mxu0 }
 0x1f5   : > { %v2250_v25 = vadd.f32 %v2249_v24, %v2248_v28  ;;  %v2251_v29 = vpop.f32.mrb[14].mxu0 }
 0x1f6   : > { %v2252_v30 = vpop.f32.mrb[15].mxu0 }
 0x1f7   : > { %v2253_v31 = vadd.f32 %v2252_v30, %v2251_v29 }
 0x20b   : > { %v2280_v32 = vpop.f32.mrb[16].mxu0 }
 0x20c   : > { %v2281_v7 = vpop.f32.mrb[17].mxu0 }
 0x20d   : > { %v2282_v8 = vadd.f32 %v2281_v7, %v2280_v32  ;;  %v2283_v33 = vpop.f32.mrb[18].mxu0 }
 0x20e   : > { %v2284_v34 = vpop.f32.mrb[19].mxu0 }
 0x20f   : > { %v2427_v39 = vadd.f32 %v2282_v8, %v2244_v22  ;;  %v2285_v40 = vadd.f32 %v2284_v34, %v2283_v33 }
 0x211   : > { %v2433_v35 = vadd.f32 %v2285_v40, %v2247_v27 }
 0x213   : > { %v2286_v36 = vpop.f32.mrb[20].mxu0 }
 0x214   : > { %v2287_v37 = vpop.f32.mrb[21].mxu0 }
 0x215   : > { %v2288_v38 = vadd.f32 %v2287_v37, %v2286_v36  ;;  %v2289_v41 = vpop.f32.mrb[22].mxu0 }
 0x216   : > { %v2290_v42 = vpop.f32.mrb[23].mxu0 }
 0x217   : > { %v2424_v43 = vadd.f32 %v2288_v38, %v2250_v25  ;;  %v2291_v44 = vadd.f32 %v2290_v42, %v2289_v41 }
 0x219   : > { %v2430_v45 = vadd.f32 %v2291_v44, %v2253_v31 }
 0x225   : > { %v2422_v46 = vpop.f32.mrb[8].mxu1 }
 0x226   : > { %v1719_v47 = vpop.f32.mrb[9].mxu1 }
 0x227   : > { %v2423_v48 = vpop.f32.mrb[10].mxu1 }
 0x228   : > { %v1722_v49 = vpop.f32.mrb[11].mxu1 }
 0x22b   : > { %v2318_v50 = vpop.f32.mrb[24].mxu0 }
 0x22c   : > { %v2319_v51 = vpop.f32.mrb[25].mxu0 }
 0x22d   : > { %v2320_v52 = vadd.f32 %v2319_v51, %v2318_v50  ;;  %v2321_v53 = vpop.f32.mrb[26].mxu0 }
 0x22e   : > { %v2322_v54 = vpop.f32.mrb[27].mxu0 }
 0x22f   : > { %v2428_v55 = vadd.f32 %v2427_v39, %v2320_v52  ;;  %v2323_v56 = vadd.f32 %v2322_v54, %v2321_v53 }
 0x231   : > { %v2429_v58 = vadd.f32 %v2428_v55, %v1719_v47  ;;  %v2434_v59 = vadd.f32 %v2433_v35, %v2323_v56 }
 0x233   : > { %v1745_v60 = vadd.f32 %v2429_v58, %v2202_v57  ;;  %v2435_v62 = vadd.f32 %v2434_v59, %v1722_v49  ;;  %v2324_v63 = vpop.f32.mrb[28].mxu0 }
 0x234   : > { %v2325_v0 = vpop.f32.mrb[29].mxu0 }
 0x235   : > { %v1765_v1 = vmul.f32 %v1745_v60, %v1745_v60  ;;  %v1783_v2 = vpack.c.bf16 %v1745_v60, %v1745_v60  ;;  %v1746_v3 = vadd.f32 %v2435_v62, %v2202_v57  ;;  %v2327_v4 = vpop.f32.mrb[30].mxu0  ;;  %v2326_v5 = vadd.f32 %v2325_v0, %v2324_v63 }
 0x236   : > { %v2328_v6 = vpop.f32.mrb[31].mxu0  ;;  %v1750_v9 = vsel %vm1749_vm13, %v1745_v60, 0.0 }
 0x237   : > { %1788 = vst.msk [vmem:[%s3039_s13] sm:$0xf] %vm1787_vm14, %v1783_v2  ;;  %v1751_v10 = vsel %vm1749_vm13, %v1746_v3, 0.0  ;;  %v1766_v11 = vmul.f32 %v1746_v3, %v1746_v3  ;;  %v1784_v12 = vpack.c.bf16 %v1746_v3, %v1746_v3  ;;  %v2425_v14 = vadd.f32 %v2424_v43, %v2326_v5 }
 0x238   : > { %v1752_v13 = vadd.f32 %v1751_v10, %v1750_v9  ;;  %v2329_v15 = vadd.f32 %v2328_v6, %v2327_v4  ;;  %v1769_v16 = vsel %vm1749_vm13, %v1765_v1, 0.0 }
 0x239   : > { %v1770_v17 = vsel %vm1749_vm13, %v1766_v11, 0.0  ;;  %1789 = vst.msk [vmem:[%s3039_s13 + $0x4] sm:$0xf] %vm1787_vm14, %v1784_v12  ;;  %v2426_v19 = vadd.f32 %v2425_v14, %v2422_v46 }
 0x23a   : > { %v1771_v18 = vadd.f32 %v1770_v17, %v1769_v16  ;;  %v2431_v61 = vadd.f32 %v2430_v45, %v2329_v15 }
 0x23b   : > { %v1747_v20 = vadd.f32 %v2426_v19, %v2202_v57 }
 0x23c   : > { %v2432_v21 = vadd.f32 %v2431_v61, %v2423_v48 }
 0x23d   : > { %v1753_v22 = vsel %vm1749_vm13, %v1747_v20, 0.0  ;;  %v1767_v23 = vmul.f32 %v1747_v20, %v1747_v20  ;;  %v1785_v26 = vpack.c.bf16 %v1747_v20, %v1747_v20 }
 0x23e   : > { %v1748_v27 = vadd.f32 %v2432_v21, %v2202_v57  ;;  %v1754_v28 = vadd.f32 %v1753_v22, %v1752_v13 }
 0x23f   : > { %v1772_v24 = vsel %vm1749_vm13, %v1767_v23, 0.0  ;;  %1790 = vst.msk [vmem:[%s3039_s13 + $0x8] sm:$0xf] %vm1787_vm14, %v1785_v26 }
 0x240   : > { %v1755_v25 = vsel %vm1749_vm13, %v1748_v27, 0.0  ;;  %v1768_v29 = vmul.f32 %v1748_v27, %v1748_v27  ;;  %v1786_v30 = vpack.c.bf16 %v1748_v27, %v1748_v27  ;;  %v1773_v31 = vadd.f32 %v1772_v24, %v1771_v18 }
 0x241   : > { %v1756_v32 = vadd.f32 %v1755_v25, %v1754_v28 }
 0x242   : > { %v1774_v7 = vsel %vm1749_vm13, %v1768_v29, 0.0  ;;  %1791 = vst.msk [vmem:[%s3039_s13 + $0xc] sm:$0xf] %vm1787_vm14, %v1786_v30 }
 0x243   : > { %v1757_v8 = vrot.slane %v1756_v32, 4  ;;  %v1775_v33 = vadd.f32 %v1774_v7, %v1773_v31 }
 0x245   : > { %v1758_v34 = vadd.f32 %v1757_v8, %v1756_v32  ;;  %v1776_v39 = vrot.slane %v1775_v33, 4 }
 0x247   : > { %v1759_v40 = vrot.slane %v1758_v34, 2  ;;  %v1777_v35 = vadd.f32 %v1776_v39, %v1775_v33 }
 0x249   : > { %v1760_v36 = vadd.f32 %v1759_v40, %v1758_v34  ;;  %v1778_v37 = vrot.slane %v1777_v35, 2 }
 0x24b   : > { %v1761_v38 = vrot.slane %v1760_v36, 1  ;;  %v1779_v41 = vadd.f32 %v1778_v37, %v1777_v35 }
 0x24d   : > { %v1762_v42 = vadd.f32 %v1761_v38, %v1760_v36  ;;  %v1780_v43 = vrot.slane %v1779_v41, 1 }
 0x24f   : > { %1764 = vst.msk [vmem:[%s268_s17] sm:$0x1] %vm1763_vm15, %v1762_v42  ;;  %v1781_v44 = vadd.f32 %v1780_v43, %v1779_v41 }
 0x251   : > { %1782 = vst.msk [vmem:[%s268_s17 + $0x1] sm:$0x1] %vm1763_vm15, %v1781_v44 }
 0x252 PF: > { %s16_s22 = sadd.s32 1, %s2627_s22   ;;  %s3084_s18 = smov %s2619_s20 }
 0x253   : > { %p13_p8 = scmp.ge.s32.totalorder %s16_s22, 6   ;;  %s3085_s19 = smov %s2623_s21 }
 0x254   : > { %s3086_s20 = smov %s3089_s23  ;;  %s3087_s21 = smov %s3093_s24 }
 0x255   :  { %15 = sbr.rel (!%p13_p8) target bundleno = 3 (0x3), region = 85 }

// kernel: generator_info_forward.6
= control target key start
LH: loop header
LB: loop body
LE: loop exit
PB: predicated region body
PF: predicated region fallthrough
CT: control target
= control target key end

     0   :  { %s3548_s18 = smov 0   ;;  %s3550_s19 = smov 0   ;;  %s4687_s0 = inlined_call_operand.vmem [shape: bf16[2,8,8,64], index: 0, kind: input, shape index: {}]   ;;  %s4688_s1 = inlined_call_operand.vmem [shape: f32[2,64], index: 1, kind: input, shape index: {}]   ;;  %s4689_s2 = inlined_call_operand.vmem [shape: bf16[3,192,32], index: 2, kind: input, shape index: {}]   ;;  %s4690_s3 = inlined_call_operand.vmem [shape: f32[1,32], index: 3, kind: input, shape index: {}]   ;;  %s4691_s4 = inlined_call_operand.vmem [shape: bf16[2,16,16,32], index: 4, kind: output, shape index: {0}]   ;;  %s4692_s5 = inlined_call_operand.vmem [shape: f32[2,2,2,32], index: 5, kind: output, shape index: {1}]  }
   0x1   :  { %s3552_s20 = smov 0   ;;  %s3554_s21 = smov 0  }
   0x2   :  { %s3556_s22 = smov 0  }
   0x3 LB: > { %s25_s23 = sadd.s32 1, %s3505_s20  ;;  %s28_s24 = sadd.s32 1, %s3509_s21  ;;  %s3513_s22 = sphi %s3556_s22, %s16_s22   ;;  %s3509_s21 = sphi %s3554_s21, %s4784_s21   ;;  %s3505_s20 = sphi %s3552_s20, %s4783_s20   ;;  %s3501_s19 = sphi %s3550_s19, %s4782_s19   ;;  %s3497_s18 = sphi %s3548_s18, %s4781_s18  }
   0x4   : > { %p26_p0 = scmp.ge.s32.totalorder %s25_s23, 2  ;;  %p2835_p1 = scmp.ge.s32.totalorder %s3513_s22, 1 }
   0x5   : > { %p206_p2 = scmp.lt.s32.totalorder %s3513_s22, 5 }
   0x6   : > { %s4786_s23 = smov (%p26_p0, %s25_s23), 0  ;;  %s4788_s24 = smov (!%p26_p0, %s28_s24), %s3509_s21 }
   0x7   : > { %p207_p3 = pnand %p2835_p1, %p206_p2  ;;  %p30_p4 = scmp.ge.s32.totalorder %s4788_s24, 2 }
   0x9   : > { %s4790_s24 = smov (%p30_p4, %s4788_s24), 0  ;;  %210 = sbr.rel (%p207_p3) target bundleno = 755 (0x2f3), region = 36 }
  0x10   : > { %p247_p5 = scmp.lt.s32.totalorder %s3501_s19, 1  ;;  %v346_v0 = vlaneseq  ;;  %v3586_v3 = vld [vmem:[%s4688_s1] ss:$0 sm:$0xff]  ;;  %vm384_vm1 = vcmask 64512   ;;  %v3596_v7 = vld [vmem:[%s4688_s1 + $0x1] ss:$0 sm:$0xff] }
  0x11   : > { %vm391_vm3 = vcmask 1043456   ;;  %v3515_v26 = vmov 0.0   ;;  %s3517_s7 = smov 64   ;;  %s2838_s15 = sshll.u32 %s3497_s18, 3 }
  0x12   : > { %s4792_s19 = smov (!%p247_p5, %s3501_s19), 1  ;;  %v347_v1 = vshrl.u32 %v346_v0, 7  ;;  %v351_v2 = vand.u32 127, %v346_v0  ;;  %p255_p6 = scmp.lt.s32.totalorder %s2838_s15, 15 }
  0x13   : > { %s3159_s25 = sshll.u32 %s4792_s19, 5  ;;  %p265_p7 = scmp.lt.s32.totalorder %s3497_s18, 1 }
  0x14   : > { %v348_v4 = vadd.s32 8, %v347_v1  ;;  %v352_v5 = vmul.u32 2, %v351_v2  ;;  %v349_v6 = vadd.s32 16, %v347_v1  ;;  %s251_s30 = scalar_lea.vmem %s4687_s0, %s3159_s25  ;;  %vm364_vm0 = vcmp.ge.s32.totalorder %v347_v1, 1  ;;  %s4794_s15 = smov (!%p255_p6, %s2838_s15), 15 }
  0x15   : > { %v3202_v8 = vld [vmem:[%s251_s30] sm:$0xff]   ;;  %v3217_v11 = vld [vmem:[%s251_s30 + $0x8] sm:$0xff]   ;;  %v3218_v12 = vld [vmem:[%s251_s30 + $0x10] sm:$0xff]   ;;  %s2839_s16 = sshll.u32 %s4794_s15, 1 }
  0x16   : > { %v353_v9 = vadd.s32 1, %v352_v5  ;;  %v357_v10 = vadd.s32 2, %v352_v5  ;;  %vm369_vm2 = vcmp.le.s32.totalorder %v349_v6, 16  ;;  %v3203_v13 = vunpack.c.l.bf16 %v3202_v8  ;;  %v3598_v17 = vld [vmem:[%s251_s30 + $0x18] sm:$0xff]   ;;  %s3184_s30 = smul.u32 96, %s3497_s18  ;;  %s259_s17 = sadd.s32 %s3159_s25, %s2839_s16 }
  0x17   : > { %v3204_v14 = vunpack.c.h.bf16 %v3202_v8  ;;  %v3207_v15 = vunpack.c.l.bf16 %v3217_v11  ;;  %v3208_v16 = vunpack.c.h.bf16 %v3217_v11  ;;  %v3211_v22 = vunpack.c.l.bf16 %v3218_v12  ;;  %s2841_s28 = sshll.u32 %s259_s17, 2  ;;  %s4796_s18 = smov (!%p265_p7, %s3497_s18), 1 }
  0x18   : > { %vm354_vm4 = vcmp.eq.s32.totalorder %v347_v1, %v353_v9  ;;  %vm355_vm5 = vcmp.eq.s32.totalorder %v348_v4, %v353_v9  ;;  %vm358_vm6 = vcmp.eq.s32.totalorder %v347_v1, %v357_v10  ;;  %vm359_vm7 = vcmp.eq.s32.totalorder %v348_v4, %v357_v10  ;;  %s3831_s6 = scalar_lea.vmem [#allocation2], %s3184_s30  ;;  %s4531_s30 = scalar_lea.vmem %s4691_s4, %s2841_s28 }
  0x19   : > { %v294_v18 = vmul.f32 %v3203_v13, %v3586_v3  ;;  %v295_v19 = vmul.f32 %v3204_v14, %v3586_v3  ;;  %vm361_vm8 = vmor %vm354_vm4, %vm358_vm6  ;;  %vm356_vm9 = vcmp.eq.s32.totalorder %v349_v6, %v353_v9  ;;  %vm360_vm10 = vcmp.eq.s32.totalorder %v349_v6, %v357_v10  ;;  %v3417_v13 = vld [vmem:[%s4689_s2 + $0x60] sm:$0xff]  }
  0x1a   : > { %vm362_vm11 = vmor %vm355_vm5, %vm359_vm7  ;;  %v296_v20 = vmul.f32 %v3207_v15, %v3586_v3  ;;  %v297_v21 = vmul.f32 %v3208_v16, %v3586_v3  ;;  %v3212_v23 = vunpack.c.h.bf16 %v3218_v12  ;;  %v3215_v28 = vunpack.c.l.bf16 %v3598_v17  ;;  %v3418_v14 = vld [vmem:[%s4689_s2] sm:$0xff]   ;;  %v3419_v15 = vld [vmem:[%s4689_s2 + $0x68] sm:$0xff]  }
  0x1b   : > { %v306_v24 = vadd.f32 %v3596_v7, %v294_v18  ;;  %v307_v25 = vadd.f32 %v3596_v7, %v295_v19  ;;  %vm373_vm12 = vmand %vm364_vm0, %vm361_vm8  ;;  %v2847_v27 = vsel %vm362_vm11, 1.0, %v3515_v26  ;;  %v298_v32 = vmul.f32 %v3211_v22, %v3586_v3  ;;  %v3420_v16 = vld [vmem:[%s4689_s2 + $0x8] sm:$0xff]   ;;  %v3422_v18 = vld [vmem:[%s4689_s2 + $0x10] sm:$0xff]  }
  0x1c   : > { %v2846_v29 = vsel %vm373_vm12, 1.0, %v3515_v26  ;;  %vm363_vm13 = vmor %vm356_vm9, %vm360_vm10  ;;  %v308_v30 = vadd.f32 %v3596_v7, %v296_v20  ;;  %v309_v31 = vadd.f32 %v3596_v7, %v297_v21  ;;  %v299_v47 = vmul.f32 %v3212_v23, %v3586_v3  ;;  %v3423_v19 = vld [vmem:[%s4689_s2 + $0x78] sm:$0xff]   ;;  %v3425_v21 = vld [vmem:[%s4689_s2 + $0x80] sm:$0xff]  }
  0x1d   : > { %vm314_vm14 = vcmp.gt.f32.partialorder %v306_v24, 0.0  ;;  %v322_v33 = vmul.f32 0.2, %v306_v24  ;;  %vm315_vm15 = vcmp.gt.f32.partialorder %v307_v25, 0.0  ;;  %v323_v34 = vmul.f32 0.2, %v307_v25  ;;  %vm375_vm4 = vmand %vm369_vm2, %vm363_vm13 }
  0x1e   : > { %v3612_v35 = vpack.c.bf16 %v2847_v27, %v2846_v29  ;;  %v2848_v36 = vsel %vm375_vm4, 1.0, %v3515_v26  ;;  %vm316_vm0 = vcmp.gt.f32.partialorder %v308_v30, 0.0  ;;  %v324_v37 = vmul.f32 0.2, %v308_v30  ;;  %v3424_v20 = vld [vmem:[%s4689_s2 + $0x18] sm:$0xff]   ;;  %v3426_v22 = vld [vmem:[%s4689_s2 + $0x20] sm:$0xff]  }
  0x1f   : > { %v330_v38 = vsel %vm314_vm14, %v306_v24, %v322_v33  ;;  %v331_v39 = vsel %vm315_vm15, %v307_v25, %v323_v34  ;;  %v3614_v40 = vpack.c.bf16 %v2848_v36, %v2848_v36  ;;  %vm317_vm5 = vcmp.gt.f32.partialorder %v309_v31, 0.0  ;;  %v3427_v23 = vld [vmem:[%s4689_s2 + $0x88] sm:$0xff]   ;;  %v3429_v25 = vld [vmem:[%s4689_s2 + $0x90] sm:$0xff]  }
  0x20   : > { %v338_v41 = vpack.c.bf16 %v330_v38, %v330_v38  ;;  %v339_v42 = vpack.c.bf16 %v331_v39, %v331_v39  ;;  %3246 = vmatprep.mubr.msk.bf16.mxu0 %vm384_vm1, %v3612_v35  ;;  %3252 = vmatprep.mubr.msk.bf16.mxu1 %vm384_vm1, %v3612_v35  ;;  %v332_v43 = vsel %vm316_vm0, %v308_v30, %v324_v37  ;;  %v325_v44 = vmul.f32 0.2, %v309_v31  ;;  %v3428_v24 = vld [vmem:[%s4689_s2 + $0x28] sm:$0xff]   ;;  %v3430_v26 = vld [vmem:[%s4689_s2 + $0x30] sm:$0xff]   ;;  %v3431_v39 = vld [vmem:[%s4689_s2 + $0x98] sm:$0xff]  }
  0x21   : > { %v340_v45 = vpack.c.bf16 %v332_v43, %v332_v43  ;;  %v310_v46 = vadd.f32 %v3596_v7, %v298_v32  ;;  %v300_v48 = vmul.f32 %v3215_v28, %v3586_v3  ;;  %v3216_v52 = vunpack.c.h.bf16 %v3598_v17  ;;  %v3421_v17 = vld [vmem:[%s4689_s2 + $0x70] sm:$0xff]   ;;  %v3433_v43 = vld [vmem:[%s4689_s2 + $0xa0] sm:$0xff]  }
  0x22   : > { %3316 = vmatprep.subr.msk.bf16.mxu0 %vm391_vm3, %v338_v41  ;;  %3317 = vmatprep.subr.msk.bf16.mxu1 %vm391_vm3, %v339_v42  ;;  %v393_v49 = vsel %vm391_vm3, %v338_v41, 0  ;;  %v444_v50 = vsel %vm391_vm3, %v339_v42, 0  ;;  %v333_v51 = vsel %vm317_vm5, %v309_v31, %v325_v44  ;;  %v311_v56 = vadd.f32 %v3596_v7, %v299_v47  ;;  %v3434_v44 = vld [vmem:[%s4689_s2 + $0x40] sm:$0xff]  }
  0x23   : > { %3245 = vmatpush3.bf16.msra.mxu0 %v393_v49  ;;  %3251 = vmatpush3.bf16.msra.mxu1 %v444_v50  ;;  %v341_v53 = vpack.c.bf16 %v333_v51, %v333_v51  ;;  %v495_v54 = vsel %vm391_vm3, %v340_v45, 0  ;;  %vm318_vm2 = vcmp.gt.f32.partialorder %v310_v46, 0.0  ;;  %v326_v55 = vmul.f32 0.2, %v310_v46 }
  0x24   : > { %3318 = vmatprep.subr.msk.bf16.mxu0 %vm391_vm3, %v340_v45  ;;  %v312_v57 = vadd.f32 %v3596_v7, %v300_v48  ;;  %v301_v58 = vmul.f32 %v3216_v52, %v3586_v3  ;;  %vm319_vm6 = vcmp.gt.f32.partialorder %v311_v56, 0.0  ;;  %v327_v62 = vmul.f32 0.2, %v311_v56 }
  0x25   : > { %3319 = vmatprep.subr.msk.bf16.mxu1 %vm391_vm3, %v341_v53  ;;  %v546_v59 = vsel %vm391_vm3, %v341_v53, 0  ;;  %v334_v60 = vsel %vm318_vm2, %v310_v46, %v326_v55  ;;  %vm816_vm9 = vcmask 519168   ;;  %v4693_v12 = vmov 0  }
  0x26   : > { %3247 = vmatmul.mubr.msk.bf16.vlgmr.msra.gmra.mrb[0].mxu0 %vm384_vm1, %v3614_v40  ;;  %3253 = vmatmul.mubr.msk.bf16.vlgmr.msra.gmra.mrb[0].mxu1 %vm384_vm1, %v3614_v40  ;;  %v342_v61 = vpack.c.bf16 %v334_v60, %v334_v60  ;;  %vm320_vm7 = vcmp.gt.f32.partialorder %v312_v57, 0.0  ;;  %v328_v63 = vmul.f32 0.2, %v312_v57  ;;  %v313_v0 = vadd.f32 %v3596_v7, %v301_v58  ;;  %817 = vst.msk [vmem:[#allocation2] sm:$0xf] %vm816_vm9, %v4693_v12  ;;  %v3436_v58 = vld [vmem:[%s4689_s2 + $0x48] sm:$0xff]  }
  0x27   : > { %3257 = vmatpush3.bf16.msra.mxu0 %v495_v54  ;;  %3263 = vmatpush3.bf16.msra.mxu1 %v546_v59  ;;  %v335_v1 = vsel %vm319_vm6, %v311_v56, %v327_v62  ;;  %818 = vst.msk [vmem:[#allocation2 + $0x4] sm:$0xf] %vm816_vm9, %v4693_v12  ;;  %822 = vst.msk [vmem:[#allocation2 + $0xcc] sm:$0xf] %vm816_vm9, %v4693_v12  ;;  %v3438_v62 = vld [vmem:[%s4689_s2 + $0x50] sm:$0xff]   ;;  %vm1224_vm10 = vcmask 523264  }
  0x28   : > { %3258 = vmatprep.mubr.msk.bf16.mxu0 %vm384_vm1, %v3612_v35  ;;  %3264 = vmatprep.mubr.msk.bf16.mxu1 %vm384_vm1, %v3612_v35  ;;  %v343_v2 = vpack.c.bf16 %v335_v1, %v335_v1  ;;  %v336_v3 = vsel %vm320_vm7, %v312_v57, %v328_v63  ;;  %vm321_vm8 = vcmp.gt.f32.partialorder %v313_v0, 0.0  ;;  %v329_v4 = vmul.f32 0.2, %v313_v0  ;;  %823 = vst.msk [vmem:[#allocation2 + $0xd0] sm:$0xf] %vm816_vm9, %v4693_v12  ;;  %v3435_v57 = vld [vmem:[%s4689_s2 + $0xa8] sm:$0xff]  }
  0x29   : > { %3320 = vmatprep.subr.msk.bf16.mxu0 %vm391_vm3, %v342_v61  ;;  %v344_v5 = vpack.c.bf16 %v336_v3, %v336_v3  ;;  %v597_v8 = vsel %vm391_vm3, %v342_v61, 0  ;;  %v3437_v61 = vld [vmem:[%s4689_s2 + $0xb0] sm:$0xff]   ;;  %vm1062_vm11 = vsmask.f32 7424  ;;  %vm2509_vm12 = vcmask 261120  }
  0x2a   : > { %3321 = vmatprep.subr.msk.bf16.mxu1 %vm391_vm3, %v343_v2  ;;  %v337_v6 = vsel %vm321_vm8, %v313_v0, %v329_v4  ;;  %v648_v7 = vsel %vm391_vm3, %v343_v2, 0  ;;  %vm2667_vm13 = vcmask 257024   ;;  %vm2547_vm14 = vcmask 253952  }
  0x2b   : > { %v345_v9 = vpack.c.bf16 %v337_v6, %v337_v6  ;;  %v699_v10 = vsel %vm391_vm3, %v344_v5, 0 }
  0x2d   : > { %v750_v11 = vsel %vm391_vm3, %v345_v9, 0 }
  0x2e   : > { %3259 = vmatmul.mubr.msk.bf16.vlgmr.msra.gmra.mrb[4].mxu0 %vm384_vm1, %v3614_v40  ;;  %3265 = vmatmul.mubr.msk.bf16.vlgmr.msra.gmra.mrb[4].mxu1 %vm384_vm1, %v3614_v40 }
  0x2f   : > { %3269 = vmatpush3.bf16.msra.mxu0 %v597_v8  ;;  %3275 = vmatpush3.bf16.msra.mxu1 %v648_v7 }
  0x30   : > { %3270 = vmatprep.mubr.msk.bf16.mxu0 %vm384_vm1, %v3612_v35  ;;  %3276 = vmatprep.mubr.msk.bf16.mxu1 %vm384_vm1, %v3612_v35 }
  0x31   : > { %3322 = vmatprep.subr.msk.bf16.mxu0 %vm391_vm3, %v344_v5  ;;  %3323 = vmatprep.subr.msk.bf16.mxu1 %vm391_vm3, %v345_v9  ;;  %vm819_vm3 = vcmask 516096  }
  0x32   : > { %820 = vst.msk [vmem:[#allocation2 + $0x8] sm:$0x1] %vm819_vm3, %v4693_v12  ;;  %824 = vst.msk [vmem:[#allocation2 + $0xd4] sm:$0x1] %vm819_vm3, %v4693_v12 }
  0x36   : > { %3271 = vmatmul.mubr.msk.bf16.vlgmr.msra.gmra.mrb[8].mxu0 %vm384_vm1, %v3614_v40  ;;  %3277 = vmatmul.mubr.msk.bf16.vlgmr.msra.gmra.mrb[8].mxu1 %vm384_vm1, %v3614_v40 }
  0x37   : > { %3281 = vmatpush3.bf16.msra.mxu0 %v699_v10  ;;  %3287 = vmatpush3.bf16.msra.mxu1 %v750_v11  ;;  %v3439_v11 = vld [vmem:[%s4689_s2 + $0xb8] sm:$0xff]  }
  0x38   : > { %3282 = vmatprep.mubr.msk.bf16.mxu0 %vm384_vm1, %v3612_v35  ;;  %3288 = vmatprep.mubr.msk.bf16.mxu1 %vm384_vm1, %v3612_v35 }
  0x39   : > { %1678 = vmatprep.subr.bf16.mxu0 %v4693_v12  ;;  %1871 = vmatprep.subr.bf16.mxu1 %v4693_v12 }
  0x3e   : > { %3283 = vmatmul.mubr.msk.bf16.vlgmr.msra.gmra.mrb[12].mxu0 %vm384_vm1, %v3614_v40  ;;  %3289 = vmatmul.mubr.msk.bf16.vlgmr.msra.gmra.mrb[12].mxu1 %vm384_vm1, %v3614_v40  ;;  %v3432_v40 = vld [vmem:[%s4689_s2 + $0x38] sm:$0xff]   ;;  %vm1199_vm1 = vcmask 1046528  }
  0x3f   : > { %1679 = vmatpush1.bf16.msra.mxu0 %v3417_v13  ;;  %1872 = vmatpush1.bf16.msra.mxu1 %v3418_v14  ;;  %v3440_v13 = vld [vmem:[%s4689_s2 + $0x58] sm:$0xff]  }
  0x40   : > { %1680 = vmatprep.subr.bf16.mxu0 %v4693_v12  ;;  %1873 = vmatprep.subr.bf16.mxu1 %v4693_v12 }
  0x43   : > { %1681 = vmatpush1.bf16.msra.mxu0 %v3419_v15  ;;  %1874 = vmatpush1.bf16.msra.mxu1 %v3420_v16 }
  0x44   : > { %1682 = vmatprep.subr.bf16.mxu0 %v4693_v12  ;;  %1875 = vmatprep.subr.bf16.mxu1 %v4693_v12 }
  0x47   : > { %1683 = vmatpush1.bf16.msra.mxu0 %v3421_v17  ;;  %1876 = vmatpush1.bf16.msra.mxu1 %v3422_v18 }
  0x48   : > { %1684 = vmatprep.subr.bf16.mxu0 %v4693_v12  ;;  %1877 = vmatprep.subr.bf16.mxu1 %v4693_v12 }
  0x4b   : > { %1685 = vmatpush1.bf16.msra.mxu0 %v3423_v19  ;;  %1878 = vmatpush1.bf16.msra.mxu1 %v3424_v20 }
  0x4c   : > { %1686 = vmatprep.subr.bf16.mxu0 %v4693_v12  ;;  %1879 = vmatprep.subr.bf16.mxu1 %v4693_v12 }
  0x4f   : > { %1687 = vmatpush1.bf16.msra.mxu0 %v3425_v21  ;;  %1880 = vmatpush1.bf16.msra.mxu1 %v3426_v22 }
  0x50   : > { %1688 = vmatprep.subr.bf16.mxu0 %v4693_v12  ;;  %1881 = vmatprep.subr.bf16.mxu1 %v4693_v12 }
  0x53   : > { %1689 = vmatpush1.bf16.msra.mxu0 %v3427_v23  ;;  %1882 = vmatpush1.bf16.msra.mxu1 %v3428_v24 }
  0x54   : > { %1690 = vmatprep.subr.bf16.mxu0 %v4693_v12  ;;  %1883 = vmatprep.subr.bf16.mxu1 %v4693_v12 }
  0x57   : > { %1691 = vmatpush1.bf16.msra.mxu0 %v3429_v25  ;;  %1884 = vmatpush1.bf16.msra.mxu1 %v3430_v26 }
  0x58   : > { %1692 = vmatprep.subr.bf16.mxu0 %v4693_v12  ;;  %1885 = vmatprep.subr.bf16.mxu1 %v4693_v12 }
  0x5b   : > { %1693 = vmatpush1.bf16.msra.mxu0 %v3431_v39  ;;  %1886 = vmatpush1.bf16.msra.mxu1 %v3432_v40 }
  0x5c   : > { %1694 = vmatprep.subr.bf16.mxu0 %v4693_v12  ;;  %1887 = vmatprep.subr.bf16.mxu1 %v4693_v12 }
  0x5f   : > { %1695 = vmatpush1.bf16.msra.mxu0 %v3433_v43  ;;  %1888 = vmatpush1.bf16.msra.mxu1 %v3434_v44 }
  0x60   : > { %1696 = vmatprep.subr.bf16.mxu0 %v4693_v12  ;;  %1889 = vmatprep.subr.bf16.mxu1 %v4693_v12 }
  0x63   : > { %1697 = vmatpush1.bf16.msra.mxu0 %v3435_v57  ;;  %1890 = vmatpush1.bf16.msra.mxu1 %v3436_v58 }
  0x64   : > { %1698 = vmatprep.subr.bf16.mxu0 %v4693_v12  ;;  %1891 = vmatprep.subr.bf16.mxu1 %v4693_v12 }
  0x67   : > { %1699 = vmatpush1.bf16.msra.mxu0 %v3437_v61  ;;  %1892 = vmatpush1.bf16.msra.mxu1 %v3438_v62 }
  0x68   : > { %1700 = vmatprep.subr.bf16.mxu0 %v4693_v12  ;;  %1893 = vmatprep.subr.bf16.mxu1 %v4693_v12 }
  0x6b   : > { %1701 = vmatpush1.bf16.msra.mxu0 %v3439_v11  ;;  %1894 = vmatpush1.bf16.msra.mxu1 %v3440_v13 }
  0x6c   : > { %2373 = vmatprep.subr.bf16.mxu0 %v4693_v12  ;;  %3292 = vmatprep.subr.bf16.mxu1 %v4693_v12 }
  0xf9   : > { %v3248_v27 = vpop.f32.mrb[0].mxu0  ;;  %v3254_v28 = vpop.f32.mrb[0].mxu1 }
  0xfa   : > { %v3162_v29 = vpack.c.bf16 %v3248_v27, %v3248_v27  ;;  %v3165_v30 = vpack.c.bf16 %v3254_v28, %v3254_v28  ;;  %v429_v31 = vpop.f32.mrb[1].mxu0  ;;  %v480_v32 = vpop.f32.mrb[1].mxu1 }
  0xfb   : > { %v3160_v33 = vpack.c.bf16 %v429_v31, %v429_v31  ;;  %v3163_v34 = vpack.c.bf16 %v480_v32, %v480_v32  ;;  %v3249_v35 = vpop.f32.mrb[2].mxu0  ;;  %v3255_v36 = vpop.f32.mrb[2].mxu1 }
  0xfc   : > { %916 = vst.msk [vmem:[#allocation2 + $0x14] sm:$0x1] %vm819_vm3, %v3162_v29  ;;  %919 = vst.msk [vmem:[#allocation2 + $0x20] sm:$0x1] %vm819_vm3, %v3162_v29  ;;  %v432_v37 = vpop.f32.mrb[3].mxu0  ;;  %v483_v38 = vpop.f32.mrb[3].mxu1 }
  0xfd   : > { %922 = vst.msk [vmem:[#allocation2 + $0x2c] sm:$0x1] %vm819_vm3, %v3165_v30  ;;  %925 = vst.msk [vmem:[#allocation2 + $0x38] sm:$0x1] %vm819_vm3, %v3165_v30  ;;  %v3161_v41 = vpack.c.bf16 %v432_v37, %v432_v37  ;;  %v3164_v42 = vpack.c.bf16 %v483_v38, %v483_v38 }
  0xfe   : > { %914 = vst.msk [vmem:[#allocation2 + $0xc] sm:$0xf] %vm816_vm9, %v3160_v33  ;;  %917 = vst.msk [vmem:[#allocation2 + $0x18] sm:$0xf] %vm816_vm9, %v3160_v33 }
  0xff   : > { %920 = vst.msk [vmem:[#allocation2 + $0x24] sm:$0xf] %vm816_vm9, %v3163_v34  ;;  %923 = vst.msk [vmem:[#allocation2 + $0x30] sm:$0xf] %vm816_vm9, %v3163_v34 }
 0x100   : > { %915 = vst.msk [vmem:[#allocation2 + $0x10] sm:$0xf] %vm816_vm9, %v3161_v41  ;;  %918 = vst.msk [vmem:[#allocation2 + $0x1c] sm:$0xf] %vm816_vm9, %v3161_v41 }
 0x101   : > { %921 = vst.msk [vmem:[#allocation2 + $0x28] sm:$0xf] %vm816_vm9, %v3164_v42  ;;  %924 = vst.msk [vmem:[#allocation2 + $0x34] sm:$0xf] %vm816_vm9, %v3164_v42  ;;  %v3260_v45 = vpop.f32.mrb[4].mxu0  ;;  %v3266_v46 = vpop.f32.mrb[4].mxu1 }
 0x102   : > { %v3168_v47 = vpack.c.bf16 %v3260_v45, %v3260_v45  ;;  %v3171_v48 = vpack.c.bf16 %v3266_v46, %v3266_v46  ;;  %v531_v49 = vpop.f32.mrb[5].mxu0  ;;  %v582_v50 = vpop.f32.mrb[5].mxu1 }
 0x103   : > { %v3166_v51 = vpack.c.bf16 %v531_v49, %v531_v49  ;;  %v3169_v52 = vpack.c.bf16 %v582_v50, %v582_v50  ;;  %v3261_v53 = vpop.f32.mrb[6].mxu0  ;;  %v3267_v54 = vpop.f32.mrb[6].mxu1 }
 0x104   : > { %928 = vst.msk [vmem:[#allocation2 + $0x44] sm:$0x1] %vm819_vm3, %v3168_v47  ;;  %931 = vst.msk [vmem:[#allocation2 + $0x50] sm:$0x1] %vm819_vm3, %v3168_v47  ;;  %v534_v55 = vpop.f32.mrb[7].mxu0  ;;  %v585_v56 = vpop.f32.mrb[7].mxu1 }
 0x105   : > { %934 = vst.msk [vmem:[#allocation2 + $0x5c] sm:$0x1] %vm819_vm3, %v3171_v48  ;;  %937 = vst.msk [vmem:[#allocation2 + $0x68] sm:$0x1] %vm819_vm3, %v3171_v48  ;;  %v3167_v59 = vpack.c.bf16 %v534_v55, %v534_v55  ;;  %v3170_v60 = vpack.c.bf16 %v585_v56, %v585_v56 }
 0x106   : > { %926 = vst.msk [vmem:[#allocation2 + $0x3c] sm:$0xf] %vm816_vm9, %v3166_v51  ;;  %929 = vst.msk [vmem:[#allocation2 + $0x48] sm:$0xf] %vm816_vm9, %v3166_v51 }
 0x107   : > { %932 = vst.msk [vmem:[#allocation2 + $0x54] sm:$0xf] %vm816_vm9, %v3169_v52  ;;  %935 = vst.msk [vmem:[#allocation2 + $0x60] sm:$0xf] %vm816_vm9, %v3169_v52 }
 0x108   : > { %927 = vst.msk [vmem:[#allocation2 + $0x40] sm:$0xf] %vm816_vm9, %v3167_v59  ;;  %930 = vst.msk [vmem:[#allocation2 + $0x4c] sm:$0xf] %vm816_vm9, %v3167_v59 }
 0x109   : > { %933 = vst.msk [vmem:[#allocation2 + $0x58] sm:$0xf] %vm816_vm9, %v3170_v60  ;;  %936 = vst.msk [vmem:[#allocation2 + $0x64] sm:$0xf] %vm816_vm9, %v3170_v60  ;;  %v3272_v63 = vpop.f32.mrb[8].mxu0  ;;  %v3278_v0 = vpop.f32.mrb[8].mxu1 }
 0x10a   : > { %v3174_v1 = vpack.c.bf16 %v3272_v63, %v3272_v63  ;;  %v3177_v2 = vpack.c.bf16 %v3278_v0, %v3278_v0  ;;  %v633_v3 = vpop.f32.mrb[9].mxu0  ;;  %v684_v4 = vpop.f32.mrb[9].mxu1 }
 0x10b   : > { %v3172_v5 = vpack.c.bf16 %v633_v3, %v633_v3  ;;  %v3175_v6 = vpack.c.bf16 %v684_v4, %v684_v4  ;;  %v3273_v8 = vpop.f32.mrb[10].mxu0  ;;  %v3279_v7 = vpop.f32.mrb[10].mxu1 }
 0x10c   : > { %940 = vst.msk [vmem:[#allocation2 + $0x74] sm:$0x1] %vm819_vm3, %v3174_v1  ;;  %943 = vst.msk [vmem:[#allocation2 + $0x80] sm:$0x1] %vm819_vm3, %v3174_v1  ;;  %v636_v9 = vpop.f32.mrb[11].mxu0  ;;  %v687_v10 = vpop.f32.mrb[11].mxu1 }
 0x10d   : > { %946 = vst.msk [vmem:[#allocation2 + $0x8c] sm:$0x1] %vm819_vm3, %v3177_v2  ;;  %949 = vst.msk [vmem:[#allocation2 + $0x98] sm:$0x1] %vm819_vm3, %v3177_v2  ;;  %v3173_v14 = vpack.c.bf16 %v636_v9, %v636_v9  ;;  %v3176_v15 = vpack.c.bf16 %v687_v10, %v687_v10 }
 0x10e   : > { %938 = vst.msk [vmem:[#allocation2 + $0x6c] sm:$0xf] %vm816_vm9, %v3172_v5  ;;  %941 = vst.msk [vmem:[#allocation2 + $0x78] sm:$0xf] %vm816_vm9, %v3172_v5 }
 0x10f   : > { %944 = vst.msk [vmem:[#allocation2 + $0x84] sm:$0xf] %vm816_vm9, %v3175_v6  ;;  %947 = vst.msk [vmem:[#allocation2 + $0x90] sm:$0xf] %vm816_vm9, %v3175_v6 }
 0x110   : > { %939 = vst.msk [vmem:[#allocation2 + $0x70] sm:$0xf] %vm816_vm9, %v3173_v14  ;;  %942 = vst.msk [vmem:[#allocation2 + $0x7c] sm:$0xf] %vm816_vm9, %v3173_v14 }
 0x111   : > { %945 = vst.msk [vmem:[#allocation2 + $0x88] sm:$0xf] %vm816_vm9, %v3176_v15  ;;  %948 = vst.msk [vmem:[#allocation2 + $0x94] sm:$0xf] %vm816_vm9, %v3176_v15  ;;  %v3284_v16 = vpop.f32.mrb[12].mxu0  ;;  %v3290_v17 = vpop.f32.mrb[12].mxu1 }
 0x112   : > { %v3180_v18 = vpack.c.bf16 %v3284_v16, %v3284_v16  ;;  %v3183_v19 = vpack.c.bf16 %v3290_v17, %v3290_v17  ;;  %v735_v20 = vpop.f32.mrb[13].mxu0  ;;  %v786_v21 = vpop.f32.mrb[13].mxu1 }
 0x113   : > { %v3178_v22 = vpack.c.bf16 %v735_v20, %v735_v20  ;;  %v3181_v23 = vpack.c.bf16 %v786_v21, %v786_v21  ;;  %v3285_v24 = vpop.f32.mrb[14].mxu0  ;;  %v3291_v25 = vpop.f32.mrb[14].mxu1 }
 0x114   : > { %952 = vst.msk [vmem:[#allocation2 + $0xa4] sm:$0x1] %vm819_vm3, %v3180_v18  ;;  %955 = vst.msk [vmem:[#allocation2 + $0xb0] sm:$0x1] %vm819_vm3, %v3180_v18  ;;  %v738_v26 = vpop.f32.mrb[15].mxu0  ;;  %v789_v27 = vpop.f32.mrb[15].mxu1 }
 0x115   : > { %958 = vst.msk [vmem:[#allocation2 + $0xbc] sm:$0x1] %vm819_vm3, %v3183_v19  ;;  %961 = vst.msk [vmem:[#allocation2 + $0xc8] sm:$0x1] %vm819_vm3, %v3183_v19  ;;  %v3179_v28 = vpack.c.bf16 %v738_v26, %v738_v26  ;;  %v3182_v29 = vpack.c.bf16 %v789_v27, %v789_v27 }
 0x116   : > { %950 = vst.msk [vmem:[#allocation2 + $0x9c] sm:$0xf] %vm816_vm9, %v3178_v22  ;;  %953 = vst.msk [vmem:[#allocation2 + $0xa8] sm:$0xf] %vm816_vm9, %v3178_v22 }
 0x117   : > { %956 = vst.msk [vmem:[#allocation2 + $0xb4] sm:$0xf] %vm816_vm9, %v3181_v23  ;;  %959 = vst.msk [vmem:[#allocation2 + $0xc0] sm:$0xf] %vm816_vm9, %v3181_v23 }
 0x118   : > { %951 = vst.msk [vmem:[#allocation2 + $0xa0] sm:$0xf] %vm816_vm9, %v3179_v28  ;;  %954 = vst.msk [vmem:[#allocation2 + $0xac] sm:$0xf] %vm816_vm9, %v3179_v28 }
 0x119   : > { %957 = vst.msk [vmem:[#allocation2 + $0xb8] sm:$0xf] %vm816_vm9, %v3182_v29  ;;  %960 = vst.msk [vmem:[#allocation2 + $0xc4] sm:$0xf] %vm816_vm9, %v3182_v29 }
 0x120   : > { %v2918_v30 = vld [vmem:[%s3831_s6 + $0xc] sm:$0xf]  ;;  %v2919_v31 = vld [vmem:[%s3831_s6 + $0x10] sm:$0xf]  ;;  %v966_v36 = vld [vmem:[%s3831_s6] sm:$0xf] }
 0x121   : > { %v2942_v32 = vld [vmem:[%s3831_s6 + $0xc] sm:$0xe]  ;;  %v3836_v33 = vcombine.low %v2918_v30, %v2919_v31  ;;  %v3368_v34 = vld [vmem:[%s3831_s6 + $0x14] ss:$0 sps:$4 sm:$0x11]  }
 0x122   : > { %v2966_v35 = vcombine.low %v2942_v32, %v2919_v31  ;;  %v967_v37 = vld [vmem:[%s3831_s6 + $0x4] sm:$0xf]  ;;  %v1510_v38 = vrot.slane %v3368_v34, 1  ;;  %v990_v39 = vld [vmem:[%s3831_s6] sm:$0xe]  ;;  %v1381_v48 = vshll.u32 %v3368_v34, 16 }
 0x123   : > { %4720 = vst [vmem:[#allocation3_spill] sm:$0xff] %v3836_v33  ;;  %v3842_v40 = vcombine.low %v966_v36, %v967_v37  ;;  %v3371_v41 = vld [vmem:[%s3831_s6 + $0x8] ss:$0 sps:$4 sm:$0x11]   ;;  %v2908_v43 = vcombine.low %v990_v39, %v967_v37  ;;  %v1376_v44 = vshll.u32 %v3836_v33, 16  ;;  %v1374_v47 = vshrl.u32 %v3836_v33, 16 }
 0x124   : > { %v1509_v42 = vrot.slane %v2966_v35, 1  ;;  %v2920_v45 = vld [vmem:[%s3831_s6 + $0x18] sm:$0xf]  ;;  %v1201_v46 = vrot.slane %v3371_v41, 1  ;;  %v3850_v50 = vld [vmem:[%s3831_s6 + $0x1c] sm:$0xf] }
 0x125   : > { %4721 = vst [vmem:[#allocation4_spill] sm:$0xff] %v3842_v40  ;;  %v1066_v49 = vshll.u32 %v3842_v40, 16  ;;  %v1200_v52 = vrot.slane %v2908_v43, 1  ;;  %v1378_v53 = vrot.slane %v1376_v44, 1  ;;  %v1071_v54 = vshll.u32 %v3371_v41, 16 }
 0x126   : > { %v1511_v51 = vsel %vm1199_vm1, %v1509_v42, %v1510_v38  ;;  %v1064_v55 = vshrl.u32 %v3842_v40, 16  ;;  %v3856_v57 = vcombine.low %v2920_v45, %v3850_v50  ;;  %v3859_v58 = vld [vmem:[%s3831_s6 + $0x20] ss:$0 sps:$4 sm:$0x11]   ;;  %v1383_v61 = vrot.slane %v1381_v48, 1 }
 0x127   : > { %3010 = vmatprep.mubr.msk.bf16.mxu0 %vm1224_vm10, %v1511_v51  ;;  %v1068_v56 = vrot.slane %v1066_v49, 1  ;;  %v1202_v59 = vsel %vm1199_vm1, %v1200_v52, %v1201_v46  ;;  %v1379_v60 = vor.u32 %v1378_v53, %v1374_v47  ;;  %v1073_v62 = vrot.slane %v1071_v54, 1  ;;  %v2922_v63 = vld [vmem:[%s3831_s6 + $0x24] sm:$0xf]  ;;  %v3864_v0 = vld [vmem:[%s3831_s6 + $0x28] sm:$0xf] }
 0x128   : > { %4722 = vst [vmem:[#allocation5_spill] sm:$0xff] %v3856_v57  ;;  %3030 = vmatprep.mubr.msk.bf16.mxu1 %vm1224_vm10, %v1202_v59  ;;  %v1386_v2 = vshrl.u32 %v3856_v57, 16  ;;  %v1388_v3 = vshll.u32 %v3856_v57, 16  ;;  %v1393_v4 = vshll.u32 %v3859_v58, 16  ;;  %v3872_v6 = vcombine.low %v2922_v63, %v3864_v0  ;;  %v968_v7 = vld [vmem:[%s3831_s6 + $0xc] sm:$0xf] }
 0x129   : > { %v1069_v1 = vor.u32 %v1068_v56, %v1064_v55  ;;  %v1384_v5 = vsel %vm1062_vm11, %v1379_v60, %v1383_v61  ;;  %v3875_v8 = vld [vmem:[%s3831_s6 + $0x2c] ss:$0 sps:$4 sm:$0x11]   ;;  %v3882_v14 = vld [vmem:[%s3831_s6 + $0x10] sm:$0xf] }
 0x12a   : > { %4723 = vst [vmem:[#allocation6_spill] sm:$0xff] %v3872_v6  ;;  %1469 = vrot.lane.b32.xlu0 %v1384_v5, %s3517_s7  ;;  %v1390_v11 = vrot.slane %v1388_v3, 1  ;;  %v1395_v13 = vrot.slane %v1393_v4, 1  ;;  %v1398_v15 = vshrl.u32 %v3872_v6, 16  ;;  %v1400_v16 = vshll.u32 %v3872_v6, 16 }
 0x12b   : > { %v1074_v10 = vsel %vm1062_vm11, %v1069_v1, %v1073_v62  ;;  %v1405_v17 = vshll.u32 %v3875_v8, 16  ;;  %v3889_v18 = vcombine.low %v968_v7, %v3882_v14  ;;  %v3892_v19 = vld [vmem:[%s3831_s6 + $0x14] ss:$0 sps:$4 sm:$0x11]   ;;  %v2924_v21 = vld [vmem:[%s3831_s6 + $0x30] sm:$0xf] }
 0x12c   : > { %1159 = vrot.lane.b32.xlu1 %v1074_v10, %s3517_s7  ;;  %v1391_v20 = vor.u32 %v1390_v11, %v1386_v2  ;;  %v3896_v22 = vld [vmem:[%s3831_s6 + $0x34] sm:$0xf]  ;;  %v1402_v23 = vrot.slane %v1400_v16, 1  ;;  %v970_v27 = vld [vmem:[%s3831_s6 + $0x18] sm:$0xf]  ;;  %v1083_v29 = vshll.u32 %v3892_v19, 16 }
 0x12d   : > { %4724 = vst [vmem:[#allocation7_spill] sm:$0xff] %v3889_v18  ;;  %v1407_v24 = vrot.slane %v1405_v17, 1  ;;  %v1076_v25 = vshrl.u32 %v3889_v18, 16  ;;  %v1078_v26 = vshll.u32 %v3889_v18, 16  ;;  %v3904_v30 = vcombine.low %v2924_v21, %v3896_v22  ;;  %v3910_v32 = vld [vmem:[%s3831_s6 + $0x1c] sm:$0xf] }
 0x12e   : > { %v1396_v28 = vsel %vm1062_vm11, %v1391_v20, %v1395_v13  ;;  %v3907_v31 = vld [vmem:[%s3831_s6 + $0x38] ss:$0 sps:$4 sm:$0x11]   ;;  %v1403_v34 = vor.u32 %v1402_v23, %v1398_v15  ;;  %v3914_v36 = vcombine.low %v970_v27, %v3910_v32  ;;  %v3917_v37 = vld [vmem:[%s3831_s6 + $0x20] ss:$0 sps:$4 sm:$0x11]  }
 0x12f   : > { %4725 = vst [vmem:[#allocation8_spill] sm:$0xff] %v3904_v30  ;;  %1471 = vrot.lane.b32.xlu0 %v1396_v28, %s3517_s7  ;;  %v1080_v35 = vrot.slane %v1078_v26, 1  ;;  %v1085_v38 = vrot.slane %v1083_v29, 1  ;;  %v1410_v39 = vshrl.u32 %v3904_v30, 16  ;;  %v1412_v41 = vshll.u32 %v3904_v30, 16 }
 0x130   : > { %4726 = vst [vmem:[#allocation9_spill] sm:$0xff] %v3914_v36  ;;  %v1417_v42 = vshll.u32 %v3907_v31, 16  ;;  %v2926_v43 = vld [vmem:[%s3831_s6 + $0x3c] sm:$0xf]  ;;  %v1408_v44 = vsel %vm1062_vm11, %v1403_v34, %v1407_v24  ;;  %v1088_v46 = vshrl.u32 %v3914_v36, 16  ;;  %v1090_v47 = vshll.u32 %v3914_v36, 16 }
 0x131   : > { %v1081_v45 = vor.u32 %v1080_v35, %v1076_v25  ;;  %v3927_v48 = vld [vmem:[%s3831_s6 + $0x40] sm:$0xf]  ;;  %1473 = vrot.lane.b32.xlu1 %v1408_v44, %s3517_s7  ;;  %v1414_v49 = vrot.slane %v1412_v41, 1  ;;  %v1095_v52 = vshll.u32 %v3917_v37, 16  ;;  %v972_v59 = vld [vmem:[%s3831_s6 + $0x24] sm:$0xf] }
 0x132   : > { %v1419_v51 = vrot.slane %v1417_v42, 1  ;;  %v3932_v53 = vcombine.low %v2926_v43, %v3927_v48  ;;  %v3935_v54 = vld [vmem:[%s3831_s6 + $0x44] ss:$0 sps:$4 sm:$0x11]   ;;  %v1092_v56 = vrot.slane %v1090_v47, 1 }
 0x133   : > { %v1086_v55 = vsel %vm1062_vm11, %v1081_v45, %v1085_v38  ;;  %v3940_v60 = vld [vmem:[%s3831_s6 + $0x28] sm:$0xf]  ;;  %v1415_v62 = vor.u32 %v1414_v49, %v1410_v39  ;;  %v1097_v63 = vrot.slane %v1095_v52, 1  ;;  %v1429_v4 = vshll.u32 %v3935_v54, 16  ;;  %v3956_v15 = vld [vmem:[%s3831_s6 + $0x4c] sm:$0xf] }
 0x134   : > { %4727 = vst [vmem:[#allocation10_spill] sm:$0xff] %v3932_v53  ;;  %1161 = vrot.lane.b32.xlu0 %v1086_v55, %s3517_s7  ;;  %v1422_v1 = vshrl.u32 %v3932_v53, 16  ;;  %v1424_v2 = vshll.u32 %v3932_v53, 16  ;;  %v1093_v3 = vor.u32 %v1092_v56, %v1088_v46  ;;  %v3948_v5 = vcombine.low %v972_v59, %v3940_v60  ;;  %v3951_v7 = vld [vmem:[%s3831_s6 + $0x2c] ss:$0 sps:$4 sm:$0x11]  }
 0x135   : > { %v2928_v10 = vld [vmem:[%s3831_s6 + $0x48] sm:$0xf]  ;;  %v1420_v11 = vsel %vm1062_vm11, %v1415_v62, %v1419_v51  ;;  %v1431_v20 = vrot.slane %v1429_v4, 1  ;;  %v3964_v24 = vld [vmem:[%s3831_s6 + $0x50] ss:$0 sps:$4 sm:$0x11]  }
 0x136   : > { %4728 = vst [vmem:[#allocation11_spill] sm:$0xff] %v3948_v5  ;;  %v1426_v13 = vrot.slane %v1424_v2, 1  ;;  %1475 = vrot.lane.b32.xlu1 %v1420_v11, %s3517_s7  ;;  %v1098_v17 = vsel %vm1062_vm11, %v1093_v3, %v1097_v63  ;;  %v1100_v21 = vshrl.u32 %v3948_v5, 16  ;;  %v1102_v23 = vshll.u32 %v3948_v5, 16  ;;  %v974_v28 = vld [vmem:[%s3831_s6 + $0x30] sm:$0xf] }
 0x137   : > { %v1107_v26 = vshll.u32 %v3951_v7, 16  ;;  %v3969_v27 = vcombine.low %v2928_v10, %v3956_v15  ;;  %v3973_v29 = vld [vmem:[%s3831_s6 + $0x34] sm:$0xf]  ;;  %v1441_v38 = vshll.u32 %v3964_v24, 16  ;;  %v3991_v55 = vld [vmem:[%s3831_s6 + $0x58] sm:$0xf] }
 0x138   : > { %1163 = vrot.lane.b32.xlu0 %v1098_v17, %s3517_s7  ;;  %v1427_v25 = vor.u32 %v1426_v13, %v1422_v1  ;;  %v1104_v35 = vrot.slane %v1102_v23, 1  ;;  %v3978_v39 = vcombine.low %v974_v28, %v3973_v29  ;;  %v2930_v41 = vld [vmem:[%s3831_s6 + $0x54] sm:$0xf]  ;;  %v3985_v46 = vld [vmem:[%s3831_s6 + $0x38] ss:$0 sps:$4 sm:$0x11]  }
 0x139   : > { %4729 = vst [vmem:[#allocation12_spill] sm:$0xff] %v3969_v27  ;;  %v1109_v43 = vrot.slane %v1107_v26, 1  ;;  %v1434_v44 = vshrl.u32 %v3969_v27, 16  ;;  %v1436_v45 = vshll.u32 %v3969_v27, 16  ;;  %v1443_v49 = vrot.slane %v1441_v38, 1 }
 0x13a   : > { %4730 = vst [vmem:[#allocation13_spill] sm:$0xff] %v3978_v39  ;;  %v1432_v42 = vsel %vm1062_vm11, %v1427_v25, %v1431_v20  ;;  %v1105_v47 = vor.u32 %v1104_v35, %v1100_v21  ;;  %v1112_v51 = vshrl.u32 %v3978_v39, 16  ;;  %v1114_v52 = vshll.u32 %v3978_v39, 16  ;;  %v976_v63 = vld [vmem:[%s3831_s6 + $0x3c] sm:$0xf] }
 0x13b   : > { %1477 = vrot.lane.b32.xlu1 %v1432_v42, %s3517_s7  ;;  %v1438_v56 = vrot.slane %v1436_v45, 1  ;;  %v1119_v59 = vshll.u32 %v3985_v46, 16  ;;  %v3995_v62 = vcombine.low %v2930_v41, %v3991_v55  ;;  %v4000_v3 = vld [vmem:[%s3831_s6 + $0x5c] ss:$0 sps:$4 sm:$0x11]  }
 0x13c   : > { %v1110_v1 = vsel %vm1062_vm11, %v1105_v47, %v1109_v43  ;;  %v1116_v2 = vrot.slane %v1114_v52, 1  ;;  %v4003_v4 = vld [vmem:[%s3831_s6 + $0x40] sm:$0xf]  ;;  %v1453_v21 = vshll.u32 %v4000_v3, 16  ;;  %v4018_v38 = vld [vmem:[%s3831_s6 + $0x64] sm:$0xf] }
 0x13d   : > { %4731 = vst [vmem:[#allocation14_spill] sm:$0xff] %v3995_v62  ;;  %1165 = vrot.lane.b32.xlu0 %v1110_v1, %s3517_s7  ;;  %v1439_v10 = vor.u32 %v1438_v56, %v1434_v44  ;;  %v1121_v11 = vrot.slane %v1119_v59, 1  ;;  %v1446_v13 = vshrl.u32 %v3995_v62, 16  ;;  %v1448_v17 = vshll.u32 %v3995_v62, 16  ;;  %v2932_v26 = vld [vmem:[%s3831_s6 + $0x60] sm:$0xf] }
 0x13e   : > { %v1117_v20 = vor.u32 %v1116_v2, %v1112_v51  ;;  %v4010_v23 = vcombine.low %v976_v63, %v4003_v4  ;;  %v4013_v25 = vld [vmem:[%s3831_s6 + $0x44] ss:$0 sps:$4 sm:$0x11]   ;;  %v1455_v43 = vrot.slane %v1453_v21, 1  ;;  %v4031_v52 = vcombine.low %v2932_v26, %v4018_v38  ;;  %v978_v56 = vld [vmem:[%s3831_s6 + $0x48] sm:$0xf] }
 0x13f   : > { %v1444_v28 = vsel %vm1062_vm11, %v1439_v10, %v1443_v49  ;;  %v1450_v35 = vrot.slane %v1448_v17, 1  ;;  %v4026_v47 = vld [vmem:[%s3831_s6 + $0x68] ss:$0 sps:$4 sm:$0x11]   ;;  %v1131_v51 = vshll.u32 %v4013_v25, 16 }
 0x140   : > { %4732 = vst [vmem:[#allocation15_spill] sm:$0xff] %v4010_v23  ;;  %1479 = vrot.lane.b32.xlu1 %v1444_v28, %s3517_s7  ;;  %v1122_v42 = vsel %vm1062_vm11, %v1117_v20, %v1121_v11  ;;  %v1124_v44 = vshrl.u32 %v4010_v23, 16  ;;  %v1126_v45 = vshll.u32 %v4010_v23, 16  ;;  %4733 = vst [vmem:[#allocation16_spill] sm:$0xff] %v4031_v52  ;;  %v4035_v59 = vld [vmem:[%s3831_s6 + $0x4c] sm:$0xf] }
 0x141   : > { %1167 = vrot.lane.b32.xlu0 %v1122_v42, %s3517_s7  ;;  %v1451_v49 = vor.u32 %v1450_v35, %v1446_v13  ;;  %v1465_v2 = vshll.u32 %v4026_v47, 16  ;;  %v4040_v10 = vcombine.low %v978_v56, %v4035_v59  ;;  %v3040_v11 = vld [vmem:[%s3831_s6 + $0x18] sm:$0xf]  ;;  %v1133_v17 = vrot.slane %v1131_v51, 1  ;;  %v4053_v56 = vld [vmem:[%s3831_s6 + $0x1c] sm:$0xf] }
 0x142   : > { %v1128_v1 = vrot.slane %v1126_v45, 1  ;;  %v1458_v20 = vshrl.u32 %v4031_v52, 16  ;;  %v1460_v21 = vshll.u32 %v4031_v52, 16  ;;  %v4047_v26 = vld [vmem:[%s3831_s6 + $0x50] ss:$0 sps:$4 sm:$0x11]   ;;  %v4057_v51 = vcombine.low %v3040_v11, %v4053_v56 }
 0x143   : > { %4734 = vst [vmem:[#allocation17_spill] sm:$0xff] %v4040_v10  ;;  %v1456_v13 = vsel %vm1062_vm11, %v1451_v49, %v1455_v43  ;;  %v1467_v35 = vrot.slane %v1465_v2, 1  ;;  %v1136_v42 = vshrl.u32 %v4040_v10, 16  ;;  %v1138_v45 = vshll.u32 %v4040_v10, 16  ;;  %v980_v12 = vld [vmem:[%s3831_s6 + $0x54] sm:$0xf] }
 0x144   : > { %1481 = vrot.lane.b32.xlu1 %v1456_v13, %s3517_s7  ;;  %v1129_v28 = vor.u32 %v1128_v1, %v1124_v44  ;;  %v1462_v43 = vrot.slane %v1460_v21, 1  ;;  %v1143_v49 = vshll.u32 %v4047_v26, 16  ;;  %4735 = vst [vmem:[#allocation18_spill] sm:$0xff] %v4057_v51  ;;  %v4062_v1 = vld [vmem:[%s3831_s6 + $0x20] ss:$0 sps:$4 sm:$0x11]  }
 0x145   : > { %v1140_v44 = vrot.slane %v1138_v45, 1  ;;  %v4065_v2 = vld [vmem:[%s3831_s6 + $0x58] sm:$0xf]  ;;  %v2069_v41 = vshrl.u32 %v4057_v51, 16  ;;  %v2071_v34 = vshll.u32 %v4057_v51, 16  ;;  %v2076_v16 = vshll.u32 %v4062_v1, 16 }
 0x146   : > { %v1134_v63 = vsel %vm1062_vm11, %v1129_v28, %v1133_v17  ;;  %v1463_v13 = vor.u32 %v1462_v43, %v1458_v20  ;;  %v1145_v21 = vrot.slane %v1143_v49, 1  ;;  %v4072_v17 = vcombine.low %v980_v12, %v4065_v2  ;;  %v4075_v28 = vld [vmem:[%s3831_s6 + $0x5c] ss:$0 sps:$4 sm:$0x11]   ;;  %v3042_v45 = vld [vmem:[%s3831_s6 + $0x24] sm:$0xf] }
 0x147   : > { %1169 = vrot.lane.b32.xlu0 %v1134_v63, %s3517_s7  ;;  %v1141_v11 = vor.u32 %v1140_v44, %v1136_v42  ;;  %v2073_v20 = vrot.slane %v2071_v34, 1  ;;  %v4080_v43 = vld [vmem:[%s3831_s6 + $0x28] sm:$0xf]  ;;  %v2078_v44 = vrot.slane %v2076_v16, 1  ;;  %v4097_v49 = vld [vmem:[%s3831_s6 + $0x34] sm:$0xf] }
 0x148   : > { %4736 = vst [vmem:[#allocation19_spill] sm:$0xff] %v4072_v17  ;;  %v1468_v63 = vsel %vm1062_vm11, %v1463_v13, %v1467_v35  ;;  %v1148_v12 = vshrl.u32 %v4072_v17, 16  ;;  %v1150_v61 = vshll.u32 %v4072_v17, 16  ;;  %v4088_v9 = vld [vmem:[%s3831_s6 + $0x2c] ss:$0 sps:$4 sm:$0x11]   ;;  %v4093_v13 = vcombine.low %v3042_v45, %v4080_v43 }
 0x149   : > { %1483 = vrot.lane.b32.xlu1 %v1468_v63, %s3517_s7  ;;  %v1146_v42 = vsel %vm1062_vm11, %v1141_v11, %v1145_v21  ;;  %v2074_v34 = vor.u32 %v2073_v20, %v2069_v41  ;;  %v1155_v35 = vshll.u32 %v4075_v28, 16  ;;  %v3044_v63 = vld [vmem:[%s3831_s6 + $0x30] sm:$0xf]  ;;  %v2088_v11 = vshll.u32 %v4088_v9, 16  ;;  %v4115_v62 = vld [vmem:[%s3831_s6 + $0x4c] sm:$0xf] }
 0x14a   : > { %4737 = vst [vmem:[#allocation20_spill] sm:$0xff] %v4093_v13  ;;  %v1152_v21 = vrot.slane %v1150_v61, 1  ;;  %v4102_v51 = vcombine.low %v3044_v63, %v4097_v49  ;;  %v2081_v45 = vshrl.u32 %v4093_v13, 16  ;;  %v2083_v17 = vshll.u32 %v4093_v13, 16  ;;  %v3046_v13 = vld [vmem:[%s3831_s6 + $0x3c] sm:$0xf] }
 0x14b   : > { %1171 = vrot.lane.b32.xlu0 %v1146_v42, %s3517_s7  ;;  %v3048_v42 = vld [vmem:[%s3831_s6 + $0x48] sm:$0xf]  ;;  %v2079_v41 = vsel %vm1062_vm11, %v2074_v34, %v2078_v44  ;;  %v1157_v20 = vrot.slane %v1155_v35, 1  ;;  %v4109_v52 = vld [vmem:[%s3831_s6 + $0x38] ss:$0 sps:$4 sm:$0x11]  }
 0x14c   : > { %4738 = vst [vmem:[#allocation21_spill] sm:$0xff] %v4102_v51  ;;  %v1153_v61 = vor.u32 %v1152_v21, %v1148_v12  ;;  %v2090_v16 = vrot.slane %v2088_v11, 1  ;;  %v2093_v63 = vshrl.u32 %v4102_v51, 16  ;;  %v2095_v10 = vshll.u32 %v4102_v51, 16  ;;  %v4127_v11 = vld [vmem:[%s3831_s6 + $0x40] sm:$0xf] }
 0x14d   : > { %2164 = vrot.lane.b32.xlu1 %v2079_v41, %s3517_s7  ;;  %v2085_v44 = vrot.slane %v2083_v17, 1  ;;  %v2100_v34 = vshll.u32 %v4109_v52, 16  ;;  %v4119_v35 = vcombine.low %v3048_v42, %v4115_v62  ;;  %v4124_v21 = vld [vmem:[%s3831_s6 + $0x50] ss:$0 sps:$4 sm:$0x11]  }
 0x14e   : > { %v1158_v23 = vsel %vm1062_vm11, %v1153_v61, %v1157_v20  ;;  %v2097_v12 = vrot.slane %v2095_v10, 1  ;;  %v2124_v39 = vshll.u32 %v4124_v21, 16  ;;  %v4134_v20 = vcombine.low %v3046_v13, %v4127_v11  ;;  %v4137_v10 = vld [vmem:[%s3831_s6 + $0x44] ss:$0 sps:$4 sm:$0x11]  }
 0x14f   : > { %4739 = vst [vmem:[#allocation22_spill] sm:$0xff] %v4119_v35  ;;  %1173 = vrot.lane.b32.xlu0 %v1158_v23, %s3517_s7  ;;  %v2086_v41 = vor.u32 %v2085_v44, %v2081_v45  ;;  %v2102_v17 = vrot.slane %v2100_v34, 1  ;;  %v2117_v51 = vshrl.u32 %v4119_v35, 16  ;;  %v2119_v27 = vshll.u32 %v4119_v35, 16  ;;  %v3050_v61 = vld [vmem:[%s3831_s6 + $0x54] sm:$0xf] }
 0x150   : > { %v2098_v42 = vor.u32 %v2097_v12, %v2093_v63  ;;  %4740 = vst [vmem:[#allocation23_spill] sm:$0xff] %v4134_v20  ;;  %v4142_v44 = vld [vmem:[%s3831_s6 + $0x58] sm:$0xf]  ;;  %v2126_v12 = vrot.slane %v2124_v39, 1  ;;  %v2105_v13 = vshrl.u32 %v4134_v20, 16  ;;  %v2107_v35 = vshll.u32 %v4134_v20, 16 }
 0x151   : > { %v2091_v23 = vsel %vm1062_vm11, %v2086_v41, %v2090_v16  ;;  %v2121_v45 = vrot.slane %v2119_v27, 1  ;;  %v4150_v53 = vld [vmem:[%s3831_s6 + $0x5c] ss:$0 sps:$4 sm:$0x11]   ;;  %v2112_v16 = vshll.u32 %v4137_v10, 16  ;;  %v4155_v41 = vcombine.low %v3050_v61, %v4142_v44 }
 0x152   : > { %2166 = vrot.lane.b32.xlu1 %v2091_v23, %s3517_s7  ;;  %v2103_v63 = vsel %vm1062_vm11, %v2098_v42, %v2102_v17  ;;  %v3052_v23 = vld [vmem:[%s3831_s6 + $0x60] sm:$0xf]  ;;  %v4159_v34 = vld [vmem:[%s3831_s6 + $0x64] sm:$0xf]  ;;  %v2109_v17 = vrot.slane %v2107_v35, 1  ;;  %v2136_v42 = vshll.u32 %v4150_v53, 16 }
 0x153   : > { %2168 = vrot.lane.b32.xlu0 %v2103_v63, %s3517_s7  ;;  %v2122_v27 = vor.u32 %v2121_v45, %v2117_v51  ;;  %4741 = vst [vmem:[#allocation24_spill] sm:$0xff] %v4155_v41  ;;  %v4164_v20 = vcombine.low %v3052_v23, %v4159_v34  ;;  %v3054_v63 = vld [vmem:[%s3831_s6 + $0x6c] sm:$0xf]  ;;  %v2114_v45 = vrot.slane %v2112_v16, 1  ;;  %v2129_v61 = vshrl.u32 %v4155_v41, 16 }
 0x154   : > { %v2131_v5 = vshll.u32 %v4155_v41, 16  ;;  %v4171_v30 = vld [vmem:[%s3831_s6 + $0x68] ss:$0 sps:$4 sm:$0x11]   ;;  %v2110_v35 = vor.u32 %v2109_v17, %v2105_v13  ;;  %v2138_v39 = vrot.slane %v2136_v42, 1 }
 0x155   : > { %4742 = vst [vmem:[#allocation25_spill] sm:$0xff] %v4164_v20  ;;  %v2127_v51 = vsel %vm1062_vm11, %v2122_v27, %v2126_v12  ;;  %v2141_v23 = vshrl.u32 %v4164_v20, 16  ;;  %v2143_v36 = vshll.u32 %v4164_v20, 16  ;;  %v4177_v6 = vld [vmem:[%s3831_s6 + $0x70] sm:$0xf]  ;;  %v2148_v27 = vshll.u32 %v4171_v30, 16 }
 0x156   : > { %2172 = vrot.lane.b32.xlu1 %v2127_v51, %s3517_s7  ;;  %4743 = vst [vmem:[#allocation26_spill] sm:$0xff] %v4177_v6  ;;  %v2133_v12 = vrot.slane %v2131_v5, 1  ;;  %v4181_v16 = vcombine.low %v3054_v63, %v4177_v6  ;;  %v2943_v41 = vld [vmem:[%s3831_s6 + $0x18] sm:$0xe]  ;;  %v2115_v18 = vsel %vm1062_vm11, %v2110_v35, %v2114_v45  ;;  %v991_v51 = vld [vmem:[%s3831_s6 + $0xc] sm:$0xe] }
 0x157   : > { %v2145_v13 = vrot.slane %v2143_v36, 1  ;;  %v4186_v17 = vld [vmem:[%s3831_s6 + $0x74] ss:$0 sps:$4 sm:$0x11]   ;;  %v2967_v42 = vcombine.low %v2943_v41, %v3850_v50  ;;  %2170 = vrot.lane.b32.xlu0 %v2115_v18, %s3517_s7  ;;  %v2150_v20 = vrot.slane %v2148_v27, 1  ;;  %v2909_v35 = vcombine.low %v991_v51, %v3882_v14 }
 0x158   : > { %4744 = vst [vmem:[#allocation27_spill] sm:$0xff] %v4181_v16  ;;  %v2134_v5 = vor.u32 %v2133_v12, %v2129_v61  ;;  %v2153_v63 = vshrl.u32 %v4181_v16, 16  ;;  %v2155_v57 = vshll.u32 %v4181_v16, 16  ;;  %v2944_v40 = vld [vmem:[%s3831_s6 + $0x24] sm:$0xe]  ;;  %v2160_v45 = vshll.u32 %v4186_v17, 16 }
 0x159   : > { %v2146_v33 = vor.u32 %v2145_v13, %v2141_v23  ;;  %v1512_v36 = vrot.slane %v2967_v42, 1  ;;  %v992_v50 = vld [vmem:[%s3831_s6 + $0x18] sm:$0xe]  ;;  %v2945_v41 = vld [vmem:[%s3831_s6 + $0x30] sm:$0xe]  ;;  %v2968_v61 = vcombine.low %v2944_v40, %v3864_v0  ;;  %v4745_v14 = vrot.slane %v3859_v58, 1 }
 0x15a   : > { %v2139_v18 = vsel %vm1062_vm11, %v2134_v5, %v2138_v39  ;;  %v2157_v6 = vrot.slane %v2155_v57, 1  ;;  %v2910_v12 = vcombine.low %v992_v50, %v3910_v32  ;;  %v993_v27 = vld [vmem:[%s3831_s6 + $0x24] sm:$0xe]  ;;  %v2946_v16 = vld [vmem:[%s3831_s6 + $0x3c] sm:$0xe]  ;;  %v2162_v13 = vrot.slane %v2160_v45, 1 }
 0x15b   : > { %2174 = vrot.lane.b32.xlu1 %v2139_v18, %s3517_s7  ;;  %v2151_v23 = vsel %vm1062_vm11, %v2146_v33, %v2150_v20  ;;  %v4208_v42 = vsel %vm1199_vm1, %v1512_v36, %v4745_v14  ;;  %v1203_v57 = vrot.slane %v2909_v35, 1  ;;  %v994_v39 = vld [vmem:[%s3831_s6 + $0x30] sm:$0xe]  ;;  %v1515_v0 = vrot.slane %v2968_v61, 1  ;;  %v2947_v5 = vld [vmem:[%s3831_s6 + $0x48] sm:$0xe] }
 0x15c   : > { %2176 = vrot.lane.b32.xlu0 %v2151_v23, %s3517_s7  ;;  %v2158_v40 = vor.u32 %v2157_v6, %v2153_v63  ;;  %v1206_v32 = vrot.slane %v2910_v12, 1  ;;  %v2969_v51 = vcombine.low %v2945_v41, %v3896_v22  ;;  %v4746_v50 = vrot.slane %v3892_v19, 1  ;;  %v995_v36 = vld [vmem:[%s3831_s6 + $0x3c] sm:$0xe]  ;;  %v2948_v6 = vld [vmem:[%s3831_s6 + $0x54] sm:$0xe] }
 0x15d   : > { %v2911_v58 = vcombine.low %v993_v27, %v3940_v60  ;;  %v2970_v20 = vcombine.low %v2946_v16, %v3927_v48  ;;  %v2912_v45 = vcombine.low %v994_v39, %v3973_v29  ;;  %v4747_v22 = vrot.slane %v3875_v8, 1  ;;  %v996_v61 = vld [vmem:[%s3831_s6 + $0x48] sm:$0xe]  ;;  %v997_v14 = vld [vmem:[%s3831_s6 + $0x54] sm:$0xe] }
 0x15e   : > { %v4217_v33 = vsel %vm1199_vm1, %v1203_v57, %v4746_v50  ;;  %v2163_v63 = vsel %vm1062_vm11, %v2158_v40, %v2162_v13  ;;  %v4748_v35 = vrot.slane %v3917_v37, 1  ;;  %v1518_v60 = vrot.slane %v2969_v51, 1  ;;  %v2949_v13 = vld [vmem:[%s3831_s6 + $0x60] sm:$0xe]  ;;  %v3064_v51 = vld [vmem:[%s3831_s6 + $0x18] sm:$0xe] }
 0x15f   : > { %v4228_v19 = vsel %vm1199_vm1, %v1515_v0, %v4747_v22  ;;  %2178 = vrot.lane.b32.xlu1 %v2163_v63, %s3517_s7  ;;  %v1209_v48 = vrot.slane %v2911_v58, 1  ;;  %v1521_v29 = vrot.slane %v2970_v20, 1  ;;  %v1212_v16 = vrot.slane %v2912_v45, 1  ;;  %v3068_v20 = vld [vmem:[%s3831_s6 + $0x48] sm:$0xe] }
 0x160   : > { %v4233_v41 = vsel %vm1199_vm1, %v1206_v32, %v4748_v35  ;;  %v2971_v18 = vcombine.low %v2947_v5, %v3956_v15  ;;  %v4749_v8 = vrot.slane %v3907_v31, 1  ;;  %v2913_v37 = vcombine.low %v995_v36, %v4003_v4  ;;  %v3065_v45 = vld [vmem:[%s3831_s6 + $0x24] sm:$0xe]  ;;  %v3069_v22 = vld [vmem:[%s3831_s6 + $0x54] sm:$0xe] }
 0x161   : > { %v2972_v27 = vcombine.low %v2948_v6, %v3991_v55  ;;  %v1528_v23 = vrot.slane %v4000_v3, 1  ;;  %v4750_v57 = vrot.slane %v3951_v7, 1  ;;  %v4751_v31 = vrot.slane %v3935_v54, 1 }
 0x162   : > { %v4241_v12 = vsel %vm1199_vm1, %v1518_v60, %v4749_v8  ;;  %v4752_v4 = vrot.slane %v3985_v46, 1  ;;  %v1524_v3 = vrot.slane %v2971_v18, 1  ;;  %v1215_v40 = vrot.slane %v2913_v37, 1  ;;  %v3067_v37 = vld [vmem:[%s3831_s6 + $0x3c] sm:$0xe] }
 0x163   : > { %v4251_v15 = vsel %vm1199_vm1, %v1209_v48, %v4750_v57  ;;  %v4256_v39 = vsel %vm1199_vm1, %v1521_v29, %v4751_v31  ;;  %v1527_v0 = vrot.slane %v2972_v27, 1  ;;  %v2914_v32 = vcombine.low %v996_v61, %v4035_v59  ;;  %v3066_v29 = vld [vmem:[%s3831_s6 + $0x30] sm:$0xe] }
 0x164   : > { %v4261_v55 = vsel %vm1199_vm1, %v1212_v16, %v4752_v4  ;;  %v1219_v7 = vrot.slane %v4047_v26, 1  ;;  %v4753_v5 = vrot.slane %v3964_v24, 1  ;;  %v2973_v50 = vcombine.low %v2949_v13, %v4018_v38 }
 0x165   : > { %v1531_v46 = vrot.slane %v4026_v47, 1  ;;  %v2915_v58 = vcombine.low %v997_v14, %v4065_v2  ;;  %v4754_v59 = vrot.slane %v4013_v25, 1  ;;  %v4282_v24 = vsel %vm1199_vm1, %v1527_v0, %v1528_v23  ;;  %v3071_v14 = vld [vmem:[%s3831_s6 + $0x6c] sm:$0xe] }
 0x166   : > { %v4269_v54 = vsel %vm1199_vm1, %v1524_v3, %v4753_v5  ;;  %v1218_v36 = vrot.slane %v2914_v32, 1  ;;  %v1222_v6 = vrot.slane %v4075_v28, 1  ;;  %v1530_v38 = vrot.slane %v2973_v50, 1  ;;  %v3070_v28 = vld [vmem:[%s3831_s6 + $0x60] sm:$0xe]  ;;  %s2842_s6 = sshll.u32 %s4792_s19, 1 }
 0x167   : > { %v4279_v26 = vsel %vm1199_vm1, %v1215_v40, %v4754_v59  ;;  %v1221_v63 = vrot.slane %v2915_v58, 1  ;;  %v3088_v47 = vcombine.low %v3064_v51, %v4053_v56  ;;  %v2205_v2 = vrot.slane %v4062_v1, 1  ;;  %v3443_v50 = vld [vmem:[%s4689_s2 + $0xc0] sm:$0xff]   ;;  %v3444_v59 = vld [vmem:[%s4689_s2 + $0xc8] sm:$0xff]   ;;  %s268_s7 = sadd.s32 %s2842_s6, %s4796_s18 }
 0x168   : > { %v4289_v35 = vsel %vm1199_vm1, %v1218_v36, %v1219_v7  ;;  %v3092_v25 = vcombine.low %v3068_v20, %v4115_v62  ;;  %v2217_v60 = vrot.slane %v4124_v21, 1  ;;  %v3089_v48 = vcombine.low %v3065_v45, %v4080_v43  ;;  %v4757_v20 = vld [vmem:[#allocation4_spill] sm:$0xff]  ;;  %s2843_s8 = sshll.u32 %s268_s7, 1 }
 0x169   : > { %v4297_v16 = vsel %vm1199_vm1, %v1530_v38, %v1531_v46  ;;  %v4300_v56 = vsel %vm1199_vm1, %v1221_v63, %v1222_v6  ;;  %v2204_v1 = vrot.slane %v3088_v47, 1  ;;  %v2208_v18 = vrot.slane %v4088_v9, 1  ;;  %v3447_v38 = vld [vmem:[%s4689_s2 + $0xd0] sm:$0xff]   ;;  %v4760_v47 = vld [vmem:[#allocation7_spill] sm:$0xff]  ;;  %s270_s11 = scalar_lea.vmem %s4692_s5, %s2843_s8 }
 0x16a   : > { %v2216_v61 = vrot.slane %v3092_v25, 1  ;;  %v2207_v8 = vrot.slane %v3089_v48, 1  ;;  %v3093_v62 = vcombine.low %v3069_v22, %v4142_v44  ;;  %v2220_v21 = vrot.slane %v4150_v53, 1  ;;  %v3450_v22 = vld [vmem:[%s4689_s2 + $0xd8] sm:$0xff]   ;;  %v4761_v48 = vld [vmem:[#allocation6_spill] sm:$0xff] }
 0x16b   : > { %v4307_v43 = vsel %vm1199_vm1, %v2204_v1, %v2205_v2  ;;  %v3090_v27 = vcombine.low %v3066_v29, %v4097_v49  ;;  %v2211_v23 = vrot.slane %v4109_v52, 1  ;;  %v3094_v13 = vcombine.low %v3070_v28, %v4159_v34  ;;  %v4755_v34 = vld [vmem:[#allocation26_spill] sm:$0xff]  ;;  %v3454_v1 = vld [vmem:[%s4689_s2 + $0xe8] sm:$0xff]  }
 0x16c   : > { %v4314_v57 = vsel %vm1199_vm1, %v2216_v61, %v2217_v60  ;;  %v4317_v9 = vsel %vm1199_vm1, %v2207_v8, %v2208_v18  ;;  %v2219_v44 = vrot.slane %v3093_v62, 1  ;;  %v2223_v53 = vrot.slane %v4171_v30, 1  ;;  %v4763_v8 = vld [vmem:[#allocation8_spill] sm:$0xff] }
 0x16d   : > { %v2210_v31 = vrot.slane %v3090_v27, 1  ;;  %v2222_v4 = vrot.slane %v3094_v13, 1  ;;  %v3091_v3 = vcombine.low %v3067_v37, %v4127_v11  ;;  %v2214_v49 = vrot.slane %v4137_v10, 1  ;;  %v3458_v27 = vld [vmem:[%s4689_s2 + $0xf8] sm:$0xff]   ;;  %v4765_v13 = vld [vmem:[#allocation10_spill] sm:$0xff] }
 0x16e   : > { %v4323_v52 = vsel %vm1199_vm1, %v2219_v44, %v2220_v21  ;;  %v3095_v40 = vcombine.low %v3071_v14, %v4755_v34  ;;  %v2226_v0 = vrot.slane %v4186_v17, 1  ;;  %v4756_v17 = vld [vmem:[#allocation3_spill] sm:$0xff]  ;;  %v4758_v6 = vmov 0  }
 0x16f   : > { %v4328_v32 = vsel %vm1199_vm1, %v2210_v31, %v2211_v23  ;;  %v4331_v7 = vsel %vm1199_vm1, %v2222_v4, %v2223_v53  ;;  %v2213_v30 = vrot.slane %v3091_v3, 1  ;;  %v3464_v31 = vld [vmem:[%s4689_s2 + $0x108] sm:$0xff]  }
 0x170   : > { %v2225_v51 = vrot.slane %v3095_v40, 1 }
 0x171   : > { %v4334_v5 = vsel %vm1199_vm1, %v2213_v30, %v2214_v49  ;;  %v4767_v49 = vld [vmem:[#allocation12_spill] sm:$0xff] }
 0x172   : > { %v4337_v11 = vsel %vm1199_vm1, %v2225_v51, %v2226_v0  ;;  %v3468_v0 = vld [vmem:[%s4689_s2 + $0x118] sm:$0xff]  }
 0x19c   : > { %v1470_v10 = vpop.permute.xlu0 %1469 }
 0x19d   : > { %v1534_v46 = vsel %vm1224_vm10, %v4756_v17, %v1470_v10 }
 0x19e   : > { %v1160_v58 = vpop.permute.xlu1 %1159  ;;  %1711 = vmatmul.mubr.bf16.vlgmr.msra.gmra.mrb[16].mxu0 %v1534_v46 }
 0x19f   : > { %v1226_v45 = vsel %vm1224_vm10, %v4757_v20, %v1160_v58  ;;  %3011 = vmatprep.mubr.msk.bf16.mxu0 %vm1224_vm10, %v4208_v42  ;;  %2374 = vmatpush1.bf16.msra.mxu0 %v3443_v50  ;;  %v4759_v42 = vld [vmem:[#allocation5_spill] sm:$0xff]  ;;  %v4771_v58 = vld [vmem:[#allocation16_spill] sm:$0xff] }
 0x1a0   : > { %1904 = vmatmul.mubr.bf16.vlgmr.msra.gmra.mrb[16].mxu1 %v1226_v45  ;;  %2375 = vmatprep.subr.bf16.mxu0 %v4758_v6 }
 0x1a1   : > { %3031 = vmatprep.mubr.msk.bf16.mxu1 %vm1224_vm10, %v4217_v33  ;;  %v1472_v36 = vpop.permute.xlu0 %1471  ;;  %3304 = vmatpush1.bf16.msra.mxu1 %v3443_v50  ;;  %v4770_v50 = vld [vmem:[#allocation17_spill] sm:$0xff] }
 0x1a2   : > { %3293 = vmatprep.subr.bf16.mxu1 %v4758_v6  ;;  %v1537_v63 = vsel %vm1224_vm10, %v4759_v42, %v1472_v36 }
 0x1a3   : > { %2376 = vmatpush1.bf16.msra.mxu0 %v3444_v59  ;;  %v1474_v25 = vpop.permute.xlu1 %1473 }
 0x1a4   : > { %2377 = vmatprep.subr.bf16.mxu0 %v4758_v6  ;;  %v1540_v29 = vsel %vm1224_vm10, %v4761_v48, %v1474_v25  ;;  %v4777_v25 = vld [vmem:[#allocation21_spill] sm:$0xff]  ;;  %v4779_v48 = vld [vmem:[#allocation23_spill] sm:$0xff] }
 0x1a5   : > { %3305 = vmatpush1.bf16.msra.mxu1 %v3444_v59  ;;  %v4772_v59 = vld [vmem:[#allocation19_spill] sm:$0xff] }
 0x1a6   : > { %v1162_v33 = vpop.permute.xlu0 %1161  ;;  %1719 = vmatmul.mubr.bf16.gmra.mrb[20].mxu0 %v1537_v63  ;;  %3294 = vmatprep.subr.bf16.mxu1 %v4758_v6 }
 0x1a7   : > { %v1229_v2 = vsel %vm1224_vm10, %v4760_v47, %v1162_v33  ;;  %3012 = vmatprep.mubr.msk.bf16.mxu0 %vm1224_vm10, %v4228_v19  ;;  %2378 = vmatpush1.bf16.msra.mxu0 %v3447_v38  ;;  %v3451_v19 = vld [vmem:[%s4689_s2 + $0xe0] sm:$0xff]  }
 0x1a8   : > { %1912 = vmatmul.mubr.bf16.gmra.mrb[20].mxu1 %v1229_v2  ;;  %2379 = vmatprep.subr.bf16.mxu0 %v4758_v6  ;;  %v1476_v18 = vpop.permute.xlu1 %1475  ;;  %v4775_v33 = vld [vmem:[#allocation20_spill] sm:$0xff] }
 0x1a9   : > { %3032 = vmatprep.mubr.msk.bf16.mxu1 %vm1224_vm10, %v4233_v41  ;;  %3306 = vmatpush1.bf16.msra.mxu1 %v3447_v38  ;;  %v4762_v41 = vld [vmem:[#allocation9_spill] sm:$0xff]  ;;  %v1543_v62 = vsel %vm1224_vm10, %v4763_v8, %v1476_v18  ;;  %v4774_v38 = vld [vmem:[#allocation22_spill] sm:$0xff]  ;;  %v4776_v2 = vld [vmem:[#allocation24_spill] sm:$0xff] }
 0x1aa   : > { %3295 = vmatprep.subr.bf16.mxu1 %v4758_v6  ;;  %v1164_v60 = vpop.permute.xlu0 %1163 }
 0x1ab   : > { %2380 = vmatpush1.bf16.msra.mxu0 %v3450_v22  ;;  %v1232_v28 = vsel %vm1224_vm10, %v4762_v41, %v1164_v60  ;;  %v4778_v60 = vld [vmem:[#allocation25_spill] sm:$0xff] }
 0x1ac   : > { %2381 = vmatprep.subr.bf16.mxu0 %v4758_v6 }
 0x1ad   : > { %3307 = vmatpush1.bf16.msra.mxu1 %v3450_v22  ;;  %v1478_v37 = vpop.permute.xlu1 %1477 }
 0x1ae   : > { %1727 = vmatmul.mubr.bf16.gmra.mrb[24].mxu0 %v1540_v29  ;;  %3296 = vmatprep.subr.bf16.mxu1 %v4758_v6  ;;  %v1546_v14 = vsel %vm1224_vm10, %v4765_v13, %v1478_v37 }
 0x1af   : > { %3013 = vmatprep.mubr.msk.bf16.mxu0 %vm1224_vm10, %v4241_v12  ;;  %2382 = vmatpush1.bf16.msra.mxu0 %v3451_v19  ;;  %v1166_v61 = vpop.permute.xlu0 %1165  ;;  %v3457_v12 = vld [vmem:[%s4689_s2 + $0xf0] sm:$0xff]  }
 0x1b0   : > { %1920 = vmatmul.mubr.bf16.gmra.mrb[24].mxu1 %v1232_v28  ;;  %2383 = vmatprep.subr.bf16.mxu0 %v4758_v6 }
 0x1b1   : > { %3033 = vmatprep.mubr.msk.bf16.mxu1 %vm1224_vm10, %v4251_v15  ;;  %3308 = vmatpush1.bf16.msra.mxu1 %v3451_v19  ;;  %v4764_v15 = vld [vmem:[#allocation11_spill] sm:$0xff] }
 0x1b2   : > { %3297 = vmatprep.subr.bf16.mxu1 %v4758_v6  ;;  %v1235_v21 = vsel %vm1224_vm10, %v4764_v15, %v1166_v61  ;;  %v1480_v44 = vpop.permute.xlu1 %1479 }
 0x1b3   : > { %2384 = vmatpush1.bf16.msra.mxu0 %v3454_v1  ;;  %v1168_v23 = vpop.permute.xlu0 %1167  ;;  %v1549_v34 = vsel %vm1224_vm10, %v4767_v49, %v1480_v44 }
 0x1b4   : > { %2385 = vmatprep.subr.bf16.mxu0 %v4758_v6 }
 0x1b5   : > { %3309 = vmatpush1.bf16.msra.mxu1 %v3454_v1 }
 0x1b6   : > { %1735 = vmatmul.mubr.bf16.gmra.mrb[28].mxu0 %v1543_v62  ;;  %3298 = vmatprep.subr.bf16.mxu1 %v4758_v6  ;;  %v1482_v4 = vpop.permute.xlu1 %1481 }
 0x1b7   : > { %3014 = vmatprep.mubr.msk.bf16.mxu0 %vm1224_vm10, %v4256_v39  ;;  %2386 = vmatpush1.bf16.msra.mxu0 %v3457_v12  ;;  %v3461_v39 = vld [vmem:[%s4689_s2 + $0x100] sm:$0xff]  }
 0x1b8   : > { %1928 = vmatmul.mubr.bf16.gmra.mrb[28].mxu1 %v1235_v21  ;;  %2387 = vmatprep.subr.bf16.mxu0 %v4758_v6 }
 0x1b9   : > { %3034 = vmatprep.mubr.msk.bf16.mxu1 %vm1224_vm10, %v4261_v55  ;;  %3310 = vmatpush1.bf16.msra.mxu1 %v3457_v12  ;;  %v4766_v55 = vld [vmem:[#allocation13_spill] sm:$0xff]  ;;  %v1170_v3 = vpop.permute.xlu0 %1169 }
 0x1ba   : > { %3299 = vmatprep.subr.bf16.mxu1 %v4758_v6  ;;  %v1238_v53 = vsel %vm1224_vm10, %v4766_v55, %v1168_v23 }
 0x1bb   : > { %2388 = vmatpush1.bf16.msra.mxu0 %v3458_v27  ;;  %v1484_v30 = vpop.permute.xlu1 %1483 }
 0x1bc   : > { %2389 = vmatprep.subr.bf16.mxu0 %v4758_v6  ;;  %v1555_v20 = vsel %vm1224_vm10, %v4771_v58, %v1484_v30 }
 0x1bd   : > { %3311 = vmatpush1.bf16.msra.mxu1 %v3458_v27  ;;  %v1172_v51 = vpop.permute.xlu0 %1171 }
 0x1be   : > { %1743 = vmatmul.mubr.bf16.gmra.mrb[32].mxu0 %v1546_v14  ;;  %3300 = vmatprep.subr.bf16.mxu1 %v4758_v6  ;;  %v1244_v17 = vsel %vm1224_vm10, %v4770_v50, %v1172_v51 }
 0x1bf   : > { %3015 = vmatprep.mubr.msk.bf16.mxu0 %vm1224_vm10, %v4269_v54  ;;  %2390 = vmatpush1.bf16.msra.mxu0 %v3461_v39  ;;  %v3465_v54 = vld [vmem:[%s4689_s2 + $0x110] sm:$0xff]  }
 0x1c0   : > { %1936 = vmatmul.mubr.bf16.gmra.mrb[32].mxu1 %v1238_v53  ;;  %2391 = vmatprep.subr.bf16.mxu0 %v4758_v6 }
 0x1c1   : > { %3035 = vmatprep.mubr.msk.bf16.mxu1 %vm1224_vm10, %v4279_v26  ;;  %3312 = vmatpush1.bf16.msra.mxu1 %v3461_v39  ;;  %v4768_v26 = vld [vmem:[#allocation15_spill] sm:$0xff]  ;;  %v1174_v46 = vpop.permute.xlu0 %1173 }
 0x1c2   : > { %3301 = vmatprep.subr.bf16.mxu1 %v4758_v6  ;;  %v1241_v40 = vsel %vm1224_vm10, %v4768_v26, %v1170_v3  ;;  %v1247_v36 = vsel %vm1224_vm10, %v4772_v59, %v1174_v46 }
 0x1c3   : > { %2392 = vmatpush1.bf16.msra.mxu0 %v3464_v31 }
 0x1c4   : > { %2393 = vmatprep.subr.bf16.mxu0 %v4758_v6 }
 0x1c5   : > { %3313 = vmatpush1.bf16.msra.mxu1 %v3464_v31  ;;  %v2169_v63 = vpop.permute.xlu0 %2168 }
 0x1c6   : > { %1751 = vmatmul.mubr.bf16.gmra.mrb[36].mxu0 %v1549_v34  ;;  %3302 = vmatprep.subr.bf16.mxu1 %v4758_v6 }
 0x1c7   : > { %3016 = vmatprep.mubr.msk.bf16.mxu0 %vm1224_vm10, %v4282_v24  ;;  %2394 = vmatpush1.bf16.msra.mxu0 %v3465_v54  ;;  %v4769_v24 = vld [vmem:[#allocation14_spill] sm:$0xff] }
 0x1c8   : > { %1944 = vmatmul.mubr.bf16.gmra.mrb[36].mxu1 %v1241_v40  ;;  %2395 = vmatprep.subr.bf16.mxu0 %v4758_v6  ;;  %v1552_v10 = vsel %vm1224_vm10, %v4769_v24, %v1482_v4 }
 0x1c9   : > { %3036 = vmatprep.mubr.msk.bf16.mxu1 %vm1224_vm10, %v4289_v35  ;;  %3314 = vmatpush1.bf16.msra.mxu1 %v3465_v54  ;;  %v2165_v35 = vpop.permute.xlu1 %2164  ;;  %v2171_v47 = vpop.permute.xlu0 %2170 }
 0x1ca   : > { %3303 = vmatprep.subr.bf16.mxu1 %v4758_v6  ;;  %v4773_v6 = vld [vmem:[#allocation18_spill] sm:$0xff]  ;;  %v2238_v29 = vsel %vm1224_vm10, %v4779_v48, %v2171_v47 }
 0x1cb   : > { %2396 = vmatpush1.bf16.msra.mxu0 %v3468_v0 }
 0x1cd   : > { %3315 = vmatpush1.bf16.msra.mxu1 %v3468_v0  ;;  %v2167_v45 = vpop.permute.xlu1 %2166 }
 0x1ce   : > { %1759 = vmatmul.mubr.bf16.gmra.mrb[40].mxu0 %v1552_v10 }
 0x1cf   : > { %3017 = vmatprep.mubr.msk.bf16.mxu0 %vm1224_vm10, %v4297_v16 }
 0x1d0   : > { %1952 = vmatmul.mubr.bf16.gmra.mrb[40].mxu1 %v1244_v17 }
 0x1d1   : > { %3037 = vmatprep.mubr.msk.bf16.mxu1 %vm1224_vm10, %v4300_v56  ;;  %v2173_v16 = vpop.permute.xlu1 %2172  ;;  %v2229_v56 = vsel %vm1224_vm10, %v4773_v6, %v2165_v35 }
 0x1d2   : > { %v2241_v42 = vsel %vm1224_vm10, %v4774_v38, %v2173_v16 }
 0x1d6   : > { %1767 = vmatmul.mubr.bf16.gmra.mrb[44].mxu0 %v1555_v20 }
 0x1d7   : > { %3132 = vmatprep.mubr.msk.bf16.mxu0 %vm1224_vm10, %v4307_v43  ;;  %v2175_v43 = vpop.permute.xlu1 %2174 }
 0x1d8   : > { %1960 = vmatmul.mubr.bf16.gmra.mrb[44].mxu1 %v1247_v36  ;;  %v2244_v22 = vsel %vm1224_vm10, %v4776_v2, %v2175_v43 }
 0x1d9   : > { %3136 = vmatprep.mubr.msk.bf16.mxu1 %vm1224_vm10, %v4314_v57  ;;  %v2232_v57 = vsel %vm1224_vm10, %v4775_v33, %v2167_v45 }
 0x1de   : > { %2406 = vmatmul.mubr.bf16.vlgmr.msra.gmra.mrb[48].mxu0 %v2229_v56 }
 0x1df   : > { %3133 = vmatprep.mubr.msk.bf16.mxu0 %vm1224_vm10, %v4317_v9  ;;  %v2177_v9 = vpop.permute.xlu0 %2176 }
 0x1e0   : > { %2438 = vmatmul.mubr.bf16.vlgmr.msra.gmra.mrb[48].mxu1 %v2241_v42  ;;  %v2247_v19 = vsel %vm1224_vm10, %v4778_v60, %v2177_v9 }
 0x1e1   : > { %3137 = vmatprep.mubr.msk.bf16.mxu1 %vm1224_vm10, %v4323_v52  ;;  %v2235_v52 = vsel %vm1224_vm10, %v4777_v25, %v2169_v63 }
 0x1e6   : > { %2414 = vmatmul.mubr.bf16.gmra.mrb[52].mxu0 %v2232_v57 }
 0x1e7   : > { %3134 = vmatprep.mubr.msk.bf16.mxu0 %vm1224_vm10, %v4328_v32  ;;  %v2179_v32 = vpop.permute.xlu1 %2178 }
 0x1e8   : > { %2446 = vmatmul.mubr.bf16.gmra.mrb[52].mxu1 %v2244_v22 }
 0x1e9   : > { %3138 = vmatprep.mubr.msk.bf16.mxu1 %vm1224_vm10, %v4331_v7  ;;  %v4780_v7 = vld [vmem:[#allocation27_spill] sm:$0xff] }
 0x1ea   : > { %v2250_v41 = vsel %vm1224_vm10, %v4780_v7, %v2179_v32 }
 0x1ee   : > { %2422 = vmatmul.mubr.bf16.gmra.mrb[56].mxu0 %v2235_v52 }
 0x1ef   : > { %3135 = vmatprep.mubr.msk.bf16.mxu0 %vm1224_vm10, %v4334_v5 }
 0x1f0   : > { %2454 = vmatmul.mubr.bf16.gmra.mrb[56].mxu1 %v2247_v19 }
 0x1f1   : > { %3139 = vmatprep.mubr.msk.bf16.mxu1 %vm1224_vm10, %v4337_v11 }
 0x1f6   : > { %2430 = vmatmul.mubr.bf16.gmra.mrb[60].mxu0 %v2238_v29 }
 0x1f8   : > { %2462 = vmatmul.mubr.bf16.gmra.mrb[60].mxu1 %v2250_v41 }
 0x271   : > { %v1712_v28 = vpop.f32.mrb[16].mxu0 }
 0x272   : > { %v1714_v18 = vpop.f32.mrb[17].mxu0 }
 0x273   : > { %v1905_v1 = vpop.f32.mrb[16].mxu1  ;;  %v1715_v5 = vpop.f32.mrb[18].mxu0 }
 0x274   : > { %v4489_v61 = vadd.f32 %v1905_v1, %v1712_v28  ;;  %v1907_v12 = vpop.f32.mrb[17].mxu1  ;;  %v1717_v62 = vpop.f32.mrb[19].mxu0 }
 0x275   : > { %v1908_v8 = vpop.f32.mrb[18].mxu1 }
 0x276   : > { %v4491_v15 = vadd.f32 %v1908_v8, %v1715_v5  ;;  %v1910_v11 = vpop.f32.mrb[19].mxu1 }
 0x279   : > { %v1720_v21 = vpop.f32.mrb[20].mxu0 }
 0x27a   : > { %v1722_v37 = vpop.f32.mrb[21].mxu0 }
 0x27b   : > { %v1913_v27 = vpop.f32.mrb[20].mxu1  ;;  %v1723_v23 = vpop.f32.mrb[22].mxu0 }
 0x27c   : > { %v4493_v39 = vadd.f32 %v1913_v27, %v1720_v21  ;;  %v1915_v13 = vpop.f32.mrb[21].mxu1  ;;  %v1725_v14 = vpop.f32.mrb[23].mxu0 }
 0x27d   : > { %v1916_v44 = vpop.f32.mrb[22].mxu1 }
 0x27e   : > { %v4495_v55 = vadd.f32 %v1916_v44, %v1723_v23  ;;  %v1918_v53 = vpop.f32.mrb[23].mxu1 }
 0x281   : > { %v1728_v31 = vpop.f32.mrb[24].mxu0 }
 0x282   : > { %v1730_v4 = vpop.f32.mrb[25].mxu0 }
 0x283   : > { %v1921_v3 = vpop.f32.mrb[24].mxu1  ;;  %v1731_v54 = vpop.f32.mrb[26].mxu0  ;;  %v4523_v4 = vld [vmem:[%s4690_s3] ss:$0 sm:$0xff] }
 0x284   : > { %v4497_v49 = vadd.f32 %v1921_v3, %v1728_v31  ;;  %v1923_v34 = vpop.f32.mrb[25].mxu1  ;;  %v1733_v26 = vpop.f32.mrb[27].mxu0 }
 0x285   : > { %v1924_v40 = vpop.f32.mrb[26].mxu1 }
 0x286   : > { %v4499_v0 = vadd.f32 %v1924_v40, %v1731_v54  ;;  %v1926_v30 = vpop.f32.mrb[27].mxu1 }
 0x289   : > { %v1736_v51 = vpop.f32.mrb[28].mxu0 }
 0x28a   : > { %v1738_v24 = vpop.f32.mrb[29].mxu0 }
 0x28b   : > { %v1929_v10 = vpop.f32.mrb[28].mxu1  ;;  %v1739_v50 = vpop.f32.mrb[30].mxu0 }
 0x28c   : > { %v4501_v17 = vadd.f32 %v1929_v10, %v1736_v51  ;;  %v1931_v35 = vpop.f32.mrb[29].mxu1  ;;  %v1741_v46 = vpop.f32.mrb[31].mxu0 }
 0x28d   : > { %v1932_v58 = vpop.f32.mrb[30].mxu1 }
 0x28e   : > { %v4503_v20 = vadd.f32 %v1932_v58, %v1739_v50  ;;  %v1934_v45 = vpop.f32.mrb[31].mxu1 }
 0x291   : > { %v1744_v59 = vpop.f32.mrb[32].mxu0 }
 0x292   : > { %v1746_v36 = vpop.f32.mrb[33].mxu0 }
 0x293   : > { %v1937_v16 = vpop.f32.mrb[32].mxu1  ;;  %v1747_v6 = vpop.f32.mrb[34].mxu0 }
 0x294   : > { %v1938_v56 = vadd.f32 %v1937_v16, %v1744_v59  ;;  %v1939_v38 = vpop.f32.mrb[33].mxu1  ;;  %v1749_v42 = vpop.f32.mrb[35].mxu0 }
 0x295   : > { %v1940_v63 = vpop.f32.mrb[34].mxu1 }
 0x296   : > { %v1941_v43 = vadd.f32 %v1940_v63, %v1747_v6  ;;  %v1942_v33 = vpop.f32.mrb[35].mxu1 }
 0x299   : > { %v1752_v57 = vpop.f32.mrb[36].mxu0 }
 0x29a   : > { %v1754_v47 = vpop.f32.mrb[37].mxu0 }
 0x29b   : > { %v1945_v2 = vpop.f32.mrb[36].mxu1  ;;  %v1755_v22 = vpop.f32.mrb[38].mxu0 }
 0x29c   : > { %v4505_v9 = vadd.f32 %v1945_v2, %v1752_v57  ;;  %v1947_v25 = vpop.f32.mrb[37].mxu1  ;;  %v1757_v52 = vpop.f32.mrb[39].mxu0 }
 0x29d   : > { %v1948_v60 = vpop.f32.mrb[38].mxu1 }
 0x29e   : > { %v4507_v19 = vadd.f32 %v1948_v60, %v1755_v22  ;;  %v1950_v32 = vpop.f32.mrb[39].mxu1 }
 0x2a1   : > { %v1760_v48 = vpop.f32.mrb[40].mxu0 }
 0x2a2   : > { %v1762_v29 = vpop.f32.mrb[41].mxu0 }
 0x2a3   : > { %v1953_v7 = vpop.f32.mrb[40].mxu1  ;;  %v1763_v41 = vpop.f32.mrb[42].mxu0 }
 0x2a4   : > { %v4510_v28 = vadd.f32 %v1953_v7, %v1760_v48  ;;  %v1955_v1 = vpop.f32.mrb[41].mxu1  ;;  %v1765_v18 = vpop.f32.mrb[43].mxu0 }
 0x2a5   : > { %v1956_v12 = vpop.f32.mrb[42].mxu1 }
 0x2a6   : > { %v4512_v5 = vadd.f32 %v1956_v12, %v1763_v41  ;;  %v1958_v8 = vpop.f32.mrb[43].mxu1 }
 0x2a9   : > { %v1768_v62 = vpop.f32.mrb[44].mxu0 }
 0x2aa   : > { %v1770_v11 = vpop.f32.mrb[45].mxu0 }
 0x2ab   : > { %v1961_v21 = vpop.f32.mrb[44].mxu1  ;;  %v1771_v37 = vpop.f32.mrb[46].mxu0 }
 0x2ac   : > { %v4514_v27 = vadd.f32 %v1961_v21, %v1768_v62  ;;  %v1963_v23 = vpop.f32.mrb[45].mxu1  ;;  %v1773_v13 = vpop.f32.mrb[47].mxu0 }
 0x2ad   : > { %v1964_v14 = vpop.f32.mrb[46].mxu1 }
 0x2ae   : > { %v4516_v44 = vadd.f32 %v1964_v14, %v1771_v37  ;;  %v1966_v53 = vpop.f32.mrb[47].mxu1 }
 0x2b1   : > { %v2407_v31 = vpop.f32.mrb[48].mxu0 }
 0x2b2   : > { %v2470_v3 = vadd.f32 %v2407_v31, %v4489_v61  ;;  %v2409_v54 = vpop.f32.mrb[49].mxu0 }
 0x2b3   : > { %v2439_v34 = vpop.f32.mrb[48].mxu1  ;;  %v2410_v26 = vpop.f32.mrb[50].mxu0 }
 0x2b4   : > { %v2493_v40 = vadd.f32 %v4523_v4, %v2470_v3  ;;  %v2478_v30 = vadd.f32 %v2439_v34, %v1938_v56  ;;  %v2441_v51 = vpop.f32.mrb[49].mxu1  ;;  %v2471_v24 = vadd.f32 %v2410_v26, %v4491_v15  ;;  %v2412_v10 = vpop.f32.mrb[51].mxu0 }
 0x2b5   : > { %v2442_v61 = vpop.f32.mrb[50].mxu1 }
 0x2b6   : > { %v3185_v50 = vpack.c.bf16 %v2493_v40, %v2493_v40  ;;  %v4534_v35 = vadd.f32 %v4523_v4, %v2478_v30  ;;  %v2444_v46 = vpop.f32.mrb[51].mxu1  ;;  %v2549_v58 = vmul.f32 %v2493_v40, %v2493_v40  ;;  %v2494_v45 = vadd.f32 %v4523_v4, %v2471_v24 }
 0x2b7   : > { %v2479_v15 = vadd.f32 %v2442_v61, %v1941_v43  ;;  %v2510_v59 = vsel %vm2509_vm12, %v2493_v40, 0.0 }
 0x2b8   : > { %2668 = vst.msk [vmem:[%s4531_s30] sm:$0xf] %vm2667_vm13, %v3185_v50  ;;  %v3193_v36 = vpack.c.bf16 %v4534_v35, %v4534_v35  ;;  %v2511_v16 = vsel %vm2509_vm12, %v2494_v45, 0.0  ;;  %v2550_v6 = vmul.f32 %v2494_v45, %v2494_v45  ;;  %v3186_v56 = vpack.c.bf16 %v2494_v45, %v2494_v45 }
 0x2b9   : > { %v4544_v38 = vadd.f32 %v4523_v4, %v2479_v15  ;;  %v2415_v42 = vpop.f32.mrb[52].mxu0  ;;  %v2512_v63 = vadd.f32 %v2511_v16, %v2510_v59  ;;  %v2565_v57 = vsel %vm2509_vm12, %v2549_v58, 0.0 }
 0x2ba   : > { %2676 = vst.msk [vmem:[%s4531_s30 + $0x20] sm:$0xf] %vm2667_vm13, %v3193_v36  ;;  %v2472_v43 = vadd.f32 %v2415_v42, %v4493_v39  ;;  %v2417_v33 = vpop.f32.mrb[53].mxu0  ;;  %v2566_v47 = vsel %vm2509_vm12, %v2550_v6, 0.0  ;;  %2669 = vst.msk [vmem:[%s4531_s30 + $0x4] sm:$0xf] %vm2667_vm13, %v3186_v56 }
 0x2bb   : > { %v3194_v2 = vpack.c.bf16 %v4544_v38, %v4544_v38  ;;  %v2447_v22 = vpop.f32.mrb[52].mxu1  ;;  %v2418_v25 = vpop.f32.mrb[54].mxu0  ;;  %v2567_v52 = vadd.f32 %v2566_v47, %v2565_v57 }
 0x2bc   : > { %v2495_v60 = vadd.f32 %v4523_v4, %v2472_v43  ;;  %v2480_v32 = vadd.f32 %v2447_v22, %v4505_v9  ;;  %v2449_v48 = vpop.f32.mrb[53].mxu1  ;;  %v2473_v39 = vadd.f32 %v2418_v25, %v4495_v55  ;;  %v2420_v29 = vpop.f32.mrb[55].mxu0 }
 0x2bd   : > { %2677 = vst.msk [vmem:[%s4531_s30 + $0x24] sm:$0xf] %vm2667_vm13, %v3194_v2  ;;  %v2450_v7 = vpop.f32.mrb[54].mxu1 }
 0x2be   : > { %v2513_v41 = vsel %vm2509_vm12, %v2495_v60, 0.0  ;;  %v2551_v1 = vmul.f32 %v2495_v60, %v2495_v60  ;;  %v3187_v18 = vpack.c.bf16 %v2495_v60, %v2495_v60  ;;  %v4562_v12 = vadd.f32 %v4523_v4, %v2480_v32  ;;  %v2452_v8 = vpop.f32.mrb[55].mxu1 }
 0x2bf   : > { %v2514_v62 = vadd.f32 %v2513_v41, %v2512_v63  ;;  %v2496_v11 = vadd.f32 %v4523_v4, %v2473_v39  ;;  %v2481_v9 = vadd.f32 %v2450_v7, %v4507_v19 }
 0x2c0   : > { %v2568_v55 = vsel %vm2509_vm12, %v2551_v1, 0.0  ;;  %2670 = vst.msk [vmem:[%s4531_s30 + $0x8] sm:$0xf] %vm2667_vm13, %v3187_v18  ;;  %v3195_v21 = vpack.c.bf16 %v4562_v12, %v4562_v12 }
 0x2c1   : > { %v2569_v37 = vadd.f32 %v2568_v55, %v2567_v52  ;;  %v2515_v23 = vsel %vm2509_vm12, %v2496_v11, 0.0  ;;  %v2552_v13 = vmul.f32 %v2496_v11, %v2496_v11  ;;  %v3188_v14 = vpack.c.bf16 %v2496_v11, %v2496_v11  ;;  %v2423_v53 = vpop.f32.mrb[56].mxu0 }
 0x2c2   : > { %2678 = vst.msk [vmem:[%s4531_s30 + $0x28] sm:$0xf] %vm2667_vm13, %v3195_v21  ;;  %v2516_v31 = vadd.f32 %v2515_v23, %v2514_v62  ;;  %v4575_v3 = vadd.f32 %v4523_v4, %v2481_v9  ;;  %v2474_v19 = vadd.f32 %v2423_v53, %v4497_v49  ;;  %v2425_v54 = vpop.f32.mrb[57].mxu0 }
 0x2c3   : > { %v2570_v34 = vsel %vm2509_vm12, %v2552_v13, 0.0  ;;  %2671 = vst.msk [vmem:[%s4531_s30 + $0xc] sm:$0xf] %vm2667_vm13, %v3188_v14  ;;  %v2455_v26 = vpop.f32.mrb[56].mxu1  ;;  %v2426_v40 = vpop.f32.mrb[58].mxu0  ;;  %v2525_v54 = vsel %vm2509_vm12, %v4534_v35, 0.0 }
 0x2c4   : > { %v2571_v30 = vadd.f32 %v2570_v34, %v2569_v37  ;;  %v3196_v51 = vpack.c.bf16 %v4575_v3, %v4575_v3  ;;  %v2457_v24 = vpop.f32.mrb[57].mxu1  ;;  %v2428_v10 = vpop.f32.mrb[59].mxu0  ;;  %v2497_v61 = vadd.f32 %v4523_v4, %v2474_v19  ;;  %v2482_v50 = vadd.f32 %v2455_v26, %v4510_v28 }
 0x2c5   : > { %v2475_v49 = vadd.f32 %v2426_v40, %v4499_v0  ;;  %v2458_v46 = vpop.f32.mrb[58].mxu1  ;;  %v2558_v34 = vmul.f32 %v4544_v38, %v4544_v38  ;;  %v2559_v10 = vmul.f32 %v4562_v12, %v4562_v12 }
 0x2c6   : > { %2679 = vst.msk [vmem:[%s4531_s30 + $0x2c] sm:$0xf] %vm2667_vm13, %v3196_v51  ;;  %v2483_v58 = vadd.f32 %v2458_v46, %v4512_v5  ;;  %v2460_v45 = vpop.f32.mrb[59].mxu1  ;;  %v2517_v15 = vsel %vm2509_vm12, %v2497_v61, 0.0  ;;  %v2553_v59 = vmul.f32 %v2497_v61, %v2497_v61  ;;  %v3189_v36 = vpack.c.bf16 %v2497_v61, %v2497_v61 }
 0x2c7   : > { %v4591_v16 = vadd.f32 %v4523_v4, %v2482_v50  ;;  %v2518_v6 = vadd.f32 %v2517_v15, %v2516_v31  ;;  %v2498_v56 = vadd.f32 %v4523_v4, %v2475_v49  ;;  %v2582_v50 = vsel %vm2509_vm12, %v2558_v34, 0.0 }
 0x2c8   : > { %v4595_v0 = vadd.f32 %v4523_v4, %v2483_v58  ;;  %v2572_v28 = vsel %vm2509_vm12, %v2553_v59, 0.0  ;;  %2672 = vst.msk [vmem:[%s4531_s30 + $0x10] sm:$0xf] %vm2667_vm13, %v3189_v36  ;;  %v2529_v49 = vsel %vm2509_vm12, %v4562_v12, 0.0  ;;  %v2560_v46 = vmul.f32 %v4575_v3, %v4575_v3 }
 0x2c9   : > { %v3197_v5 = vpack.c.bf16 %v4591_v16, %v4591_v16  ;;  %v2431_v42 = vpop.f32.mrb[60].mxu0  ;;  %v2573_v63 = vadd.f32 %v2572_v28, %v2571_v30  ;;  %v2519_v43 = vsel %vm2509_vm12, %v2498_v56, 0.0  ;;  %v2554_v33 = vmul.f32 %v2498_v56, %v2498_v56 }
 0x2ca   : > { %v3190_v57 = vpack.c.bf16 %v2498_v56, %v2498_v56  ;;  %v2433_v47 = vpop.f32.mrb[61].mxu0  ;;  %v2520_v2 = vadd.f32 %v2519_v43, %v2518_v6  ;;  %v3198_v60 = vpack.c.bf16 %v4595_v0, %v4595_v0  ;;  %v2476_v32 = vadd.f32 %v2431_v42, %v4501_v17 }
 0x2cb   : > { %2680 = vst.msk [vmem:[%s4531_s30 + $0x30] sm:$0xf] %vm2667_vm13, %v3197_v5  ;;  %v2463_v22 = vpop.f32.mrb[60].mxu1  ;;  %v2434_v25 = vpop.f32.mrb[62].mxu0  ;;  %v2574_v52 = vsel %vm2509_vm12, %v2554_v33, 0.0  ;;  %v2584_v15 = vsel %vm2509_vm12, %v2559_v10, 0.0  ;;  %v2561_v59 = vmul.f32 %v4591_v16, %v4591_v16  ;;  %v2562_v28 = vmul.f32 %v4595_v0, %v4595_v0 }
 0x2cc   : > { %2673 = vst.msk [vmem:[%s4531_s30 + $0x14] sm:$0xf] %vm2667_vm13, %v3190_v57  ;;  %v2484_v48 = vadd.f32 %v2463_v22, %v4514_v27  ;;  %v2465_v39 = vpop.f32.mrb[61].mxu1  ;;  %v2436_v29 = vpop.f32.mrb[63].mxu0  ;;  %v2575_v7 = vadd.f32 %v2574_v52, %v2573_v63  ;;  %v2477_v41 = vadd.f32 %v2434_v25, %v4503_v20  ;;  %2681 = vst.msk [vmem:[%s4531_s30 + $0x34] sm:$0xf] %vm2667_vm13, %v3198_v60 }
 0x2cd   : > { %v2466_v1 = vpop.f32.mrb[62].mxu1  ;;  %v2499_v18 = vadd.f32 %v4523_v4, %v2476_v32  ;;  %v2557_v20 = vmul.f32 %v4534_v35, %v4534_v35  ;;  %v2586_v56 = vsel %vm2509_vm12, %v2560_v46, 0.0  ;;  %v2533_v12 = vsel %vm2509_vm12, %v4591_v16, 0.0 }
 0x2ce   : > { %v2507_v8 = vadd.f32 %v4523_v4, %v2484_v48  ;;  %v2485_v62 = vadd.f32 %v2466_v1, %v4516_v44  ;;  %v2468_v11 = vpop.f32.mrb[63].mxu1  ;;  %v2500_v17 = vadd.f32 %v4523_v4, %v2477_v41  ;;  %v2588_v63 = vsel %vm2509_vm12, %v2561_v59, 0.0 }
 0x2cf   : > { %v2521_v27 = vsel %vm2509_vm12, %v2499_v18, 0.0  ;;  %v2555_v9 = vmul.f32 %v2499_v18, %v2499_v18  ;;  %v3191_v55 = vpack.c.bf16 %v2499_v18, %v2499_v18  ;;  %v2580_v24 = vsel %vm2509_vm12, %v2557_v20, 0.0 }
 0x2d0   : > { %v2522_v21 = vadd.f32 %v2521_v27, %v2520_v2  ;;  %v3199_v37 = vpack.c.bf16 %v2507_v8, %v2507_v8  ;;  %v2523_v23 = vsel %vm2509_vm12, %v2500_v17, 0.0  ;;  %v2556_v44 = vmul.f32 %v2500_v17, %v2500_v17 }
 0x2d1   : > { %v2576_v13 = vsel %vm2509_vm12, %v2555_v9, 0.0  ;;  %2674 = vst.msk [vmem:[%s4531_s30 + $0x18] sm:$0xf] %vm2667_vm13, %v3191_v55  ;;  %v3192_v14 = vpack.c.bf16 %v2500_v17, %v2500_v17  ;;  %v2508_v53 = vadd.f32 %v4523_v4, %v2485_v62  ;;  %v2527_v4 = vsel %vm2509_vm12, %v4544_v38, 0.0 }
 0x2d2   : > { %v2577_v31 = vadd.f32 %v2576_v13, %v2575_v7  ;;  %2682 = vst.msk [vmem:[%s4531_s30 + $0x38] sm:$0xf] %vm2667_vm13, %v3199_v37  ;;  %v2524_v19 = vadd.f32 %v2523_v23, %v2522_v21  ;;  %v2578_v26 = vsel %vm2509_vm12, %v2556_v44, 0.0  ;;  %v2531_v38 = vsel %vm2509_vm12, %v4575_v3, 0.0 }
 0x2d3   : > { %2675 = vst.msk [vmem:[%s4531_s30 + $0x1c] sm:$0xf] %vm2667_vm13, %v3192_v14  ;;  %v3200_v40 = vpack.c.bf16 %v2508_v53, %v2508_v53  ;;  %v2535_v3 = vsel %vm2509_vm12, %v4595_v0, 0.0  ;;  %v2563_v43 = vmul.f32 %v2507_v8, %v2507_v8  ;;  %v2590_v47 = vsel %vm2509_vm12, %v2562_v28, 0.0 }
 0x2d4   : > { %v2526_v30 = vadd.f32 %v2525_v54, %v2524_v19  ;;  %v2579_v51 = vadd.f32 %v2578_v26, %v2577_v31  ;;  %v2537_v2 = vsel %vm2509_vm12, %v2507_v8, 0.0  ;;  %v2564_v16 = vmul.f32 %v2508_v53, %v2508_v53 }
 0x2d5   : > { %2683 = vst.msk [vmem:[%s4531_s30 + $0x3c] sm:$0xf] %vm2667_vm13, %v3200_v40  ;;  %v2592_v52 = vsel %vm2509_vm12, %v2563_v43, 0.0  ;;  %v2539_v60 = vsel %vm2509_vm12, %v2508_v53, 0.0 }
 0x2d6   : > { %v2528_v35 = vadd.f32 %v2527_v4, %v2526_v30  ;;  %v2581_v61 = vadd.f32 %v2580_v24, %v2579_v51  ;;  %v2594_v0 = vsel %vm2509_vm12, %v2564_v16, 0.0 }
 0x2d8   : > { %v2530_v58 = vadd.f32 %v2529_v49, %v2528_v35  ;;  %v2583_v45 = vadd.f32 %v2582_v50, %v2581_v61 }
 0x2da   : > { %v2585_v36 = vadd.f32 %v2584_v15, %v2583_v45  ;;  %v2532_v6 = vadd.f32 %v2531_v38, %v2530_v58 }
 0x2dc   : > { %v2534_v5 = vadd.f32 %v2533_v12, %v2532_v6  ;;  %v2587_v42 = vadd.f32 %v2586_v56, %v2585_v36 }
 0x2de   : > { %v2536_v33 = vadd.f32 %v2535_v3, %v2534_v5  ;;  %v2589_v57 = vadd.f32 %v2588_v63, %v2587_v42 }
 0x2e0   : > { %v2538_v22 = vadd.f32 %v2537_v2, %v2536_v33  ;;  %v2591_v25 = vadd.f32 %v2590_v47, %v2589_v57 }
 0x2e2   : > { %v2540_v32 = vadd.f32 %v2539_v60, %v2538_v22  ;;  %v2593_v48 = vadd.f32 %v2592_v52, %v2591_v25 }
 0x2e4   : > { %v2541_v39 = vrot.slane %v2540_v32, 4  ;;  %v2595_v29 = vadd.f32 %v2594_v0, %v2593_v48 }
 0x2e6   : > { %v2542_v7 = vadd.f32 %v2541_v39, %v2540_v32  ;;  %v2596_v41 = vrot.slane %v2595_v29, 4 }
 0x2e8   : > { %v2543_v1 = vrot.slane %v2542_v7, 2  ;;  %v2597_v18 = vadd.f32 %v2596_v41, %v2595_v29 }
 0x2ea   : > { %v2544_v8 = vadd.f32 %v2543_v1, %v2542_v7  ;;  %v2598_v62 = vrot.slane %v2597_v18, 2 }
 0x2ec   : > { %v2545_v11 = vrot.slane %v2544_v8, 1  ;;  %v2599_v17 = vadd.f32 %v2598_v62, %v2597_v18 }
 0x2ee   : > { %v2546_v27 = vadd.f32 %v2545_v11, %v2544_v8  ;;  %v2600_v9 = vrot.slane %v2599_v17, 1 }
 0x2f0   : > { %2548 = vst.msk [vmem:[%s270_s11] sm:$0x1] %vm2547_vm14, %v2546_v27  ;;  %v2601_v55 = vadd.f32 %v2600_v9, %v2599_v17 }
 0x2f2   : > { %2602 = vst.msk [vmem:[%s270_s11 + $0x1] sm:$0x1] %vm2547_vm14, %v2601_v55 }
 0x2f3 PF: > { %s16_s22 = sadd.s32 1, %s3513_s22   ;;  %s4781_s18 = smov %s3505_s20 }
 0x2f4   : > { %p13_p8 = scmp.ge.s32.totalorder %s16_s22, 6   ;;  %s4782_s19 = smov %s3509_s21 }
 0x2f5   : > { %s4783_s20 = smov %s4786_s23  ;;  %s4784_s21 = smov %s4790_s24 }
 0x2f6   :  { %15 = sbr.rel (!%p13_p8) target bundleno = 3 (0x3), region = 85 }

// kernel: generator_info_forward.7
= control target key start
LH: loop header
LB: loop body
LE: loop exit
PB: predicated region body
PF: predicated region fallthrough
CT: control target
= control target key end

     0   :  { %11 = vsyncpa [#allocation4], 0  ;;  %s5489_s0 = inlined_call_operand.vmem [shape: bf16[2,16,16,32], index: 0, kind: input, shape index: {}]   ;;  %s5490_s1 = inlined_call_operand.vmem [shape: f32[2,32], index: 1, kind: input, shape index: {}]   ;;  %s5491_s2 = inlined_call_operand.vmem [shape: bf16[3,96,3], index: 2, kind: input, shape index: {}]   ;;  %s5492_s3 = inlined_call_operand.vmem [shape: f32[1,3], index: 3, kind: input, shape index: {}]   ;;  %s5493_s4 = inlined_call_operand.vmem [shape: f32[2,16,16,3], index: 4, kind: output, shape index: {0}]   ;;  %s5494_s5 = inlined_call_operand.hbm [shape: f32[2,2,2,3], index: 5, kind: output, shape index: {1}]  }
   0x1   :  { %13 = vsyncpa [#allocation4 + $0x1], 0  ;;  %s4401_s18 = smov 0   ;;  %s4403_s19 = smov 0  }
   0x2   :  { %s4405_s20 = smov 0   ;;  %s4407_s21 = smov 0  }
   0x3   :  { %s4409_s22 = smov 0   ;;  %s4411_s23 = smov 0  }
   0x4   :  { %s4413_s24 = smov 0   ;;  %s4415_s25 = smov 0  }
   0x5 LB: > { %s3318_s26 = sadd.s32 4294967295, %s4364_s25   ;;  %s3319_s27 = sadd.s32 4294967294, %s4364_s25   ;;  %s4364_s25 = sphi %s4415_s25, %s19_s25   ;;  %s4360_s24 = sphi %s4413_s24, %s5503_s24   ;;  %s4356_s23 = sphi %s4411_s23, %s5502_s23   ;;  %s4352_s22 = sphi %s4409_s22, %s5501_s22   ;;  %s4348_s21 = sphi %s4407_s21, %s5500_s21   ;;  %s4344_s20 = sphi %s4405_s20, %s5499_s20   ;;  %s4340_s19 = sphi %s4403_s19, %s5498_s19   ;;  %s4336_s18 = sphi %s4401_s18, %s5497_s18  }
   0x6   : > { %s28_s28 = sadd.s32 1, %s4356_s23  ;;  %s31_s29 = sadd.s32 1, %s4360_s24 }
   0x7   : > { %p29_p0 = scmp.ge.s32.totalorder %s28_s28, 2  ;;  %p167_p1 = scmp.ne.s32.totalorder %s4344_s20, %s4340_s19 }
   0x8   : > { %p168_p2 = scmp.eq.s32.totalorder %s3318_s26, 3  ;;  %p173_p5 = scmp.ne.s32.totalorder %s4340_s19, %s4336_s18 }
   0x9   : > { %s5505_s28 = smov (%p29_p0, %s28_s28), 0  ;;  %s5507_s29 = smov (!%p29_p0, %s31_s29), %s4360_s24 }
   0xa   : > { %s153_s30 = ssub.s32 %s4356_s23, %s5505_s28  ;;  %p4452_p3 = por %p168_p2, %p167_p1 }
   0xb   : > { %p33_p4 = scmp.ge.s32.totalorder %s5507_s29, 2  ;;  %p174_p6 = scmp.eq.s32.totalorder %s3319_s27, 3 }
   0xc   : > { %p3322_p7 = scmp.ge.s32.totalorder %s4364_s25, 1  ;;  %p209_p9 = scmp.lt.s32.totalorder %s4364_s25, 5 }
   0xd   : > { %s5509_s29 = smov (%p33_p4, %s5507_s29), 0  ;;  %p4461_p8 = por %p174_p6, %p173_p5 }
   0xe   : > { %s152_s8 = ssub.s32 %s4360_s24, %s5509_s29  ;;  %s157_s9 = sadd.s32 1, %s4344_s20 }
   0xf   : > { %s154_s10 = sor.u32 %s153_s30, %s152_s8  ;;  %p210_p10 = pnand %p3322_p7, %p209_p9 }
  0x10   : > { %p155_p11 = scmp.eq.s32.totalorder %s154_s10, 0  ;;  %p247_p12 = scmp.lt.s32.totalorder (!%p210_p10), %s4352_s22, 1  ;;  %v514_v0 = vlaneseq (!%p210_p10)  ;;  %v4480_v3 = vld [vmem:[%s5490_s1] ss:$0 sm:$0xff] (!%p210_p10)  ;;  %vm544_vm1 = vcmask (!%p210_p10), 130048   ;;  %v4366_v15 = vmov (!%p210_p10), 0.0  }
  0x11   : > { %213 = sbr.rel (%p210_p10) target bundleno = 807 (0x327), region = 36  ;;  %v4494_v14 = vld [vmem:[%s5490_s1 + $0x1] ss:$0 sm:$0xff] (!%p210_p10)  ;;  %s4368_s30 = smov (!%p210_p10), 64  }
  0x12   : > { %s4470_s11 = scalar_select %p155_p11, %s4344_s20, %s157_s9  }
  0x13   : > { %v515_v1 = vshrl.u32 (!%p210_p10), %v514_v0, 7  ;;  %v519_v2 = vand.u32 (!%p210_p10), 127, %v514_v0  ;;  %s3679_s14 = smul.u32 (!%p210_p10), 96, %s4348_s21  ;;  %s3326_s9 = sshll.u32 (!%p210_p10), %s4348_s21, 3 }
  0x14   : > { %p255_p13 = scmp.lt.s32.totalorder (!%p210_p10), %s3326_s9, 15  ;;  %s4370_s16 = smov (!%p210_p10), [#allocation3]  }
  0x15   : > { %v516_v4 = vadd.s32 (!%p210_p10), 8, %v515_v1  ;;  %v520_v5 = vadd.s32 (!%p210_p10), 1, %v519_v2  ;;  %vm524_vm0 = vcmp.ge.s32.totalorder (!%p210_p10), %v515_v1, 1  ;;  %v517_v6 = vadd.s32 (!%p210_p10), 16, %v515_v1  ;;  %s4713_s27 = scalar_lea.vmem (!%p210_p10), [#allocation2], %s3679_s14  ;;  %s4369_s14 = smov (!%p210_p10), 32  }
  0x17   : > { %vm521_vm2 = vcmp.eq.s32.totalorder (!%p210_p10), %v515_v1, %v520_v5  ;;  %vm522_vm3 = vcmp.eq.s32.totalorder (!%p210_p10), %v516_v4, %v520_v5  ;;  %vm523_vm4 = vcmp.eq.s32.totalorder (!%p210_p10), %v517_v6, %v520_v5  ;;  %vm529_vm5 = vcmp.le.s32.totalorder (!%p210_p10), %v517_v6, 16 }
  0x18   : > { %s4474_s12 = scalar_select %p247_p12, %s4352_s22, 1  ;;  %vm533_vm6 = vmand %vm524_vm0, %vm521_vm2  ;;  %v3333_v17 = vsel %vm522_vm3, 1.0, %v4366_v15 }
  0x19   : > { %v3332_v16 = vsel %vm533_vm6, 1.0, %v4366_v15  ;;  %vm535_vm7 = vmand %vm529_vm5, %vm523_vm4  ;;  %s5511_s9 = smov (!%p255_p13, %s3326_s9), 15 }
  0x1a   : > { %s3630_s13 = sshll.u32 %s4474_s12, 7  ;;  %v4501_v25 = vpack.c.bf16 %v3333_v17, %v3332_v16  ;;  %v3334_v26 = vsel %vm535_vm7, 1.0, %v4366_v15  ;;  %s3328_s10 = sshll.u32 %s4474_s12, 5 }
  0x1b   : > { %s4485_s26 = scalar_lea.vmem %s5489_s0, %s3630_s13  ;;  %v4513_v33 = vpack.c.bf16 %v3334_v26, %v3334_v26 }
  0x1c   : > { %v3681_v7 = vld [vmem:[%s4485_s26] sm:$0xff]   ;;  %v3744_v8 = vld [vmem:[%s4485_s26 + $0x8] sm:$0xff]   ;;  %v3745_v9 = vld [vmem:[%s4485_s26 + $0x10] sm:$0xff]   ;;  %3851 = vmatprep.mubr.msk.bf16.mxu0 %vm544_vm1, %v4501_v25  ;;  %3857 = vmatprep.mubr.msk.bf16.mxu1 %vm544_vm1, %v4501_v25 }
  0x1d   : > { %v3682_v10 = vunpack.c.l.bf16 %v3681_v7  ;;  %v3683_v11 = vunpack.c.h.bf16 %v3681_v7  ;;  %v3686_v12 = vunpack.c.l.bf16 %v3744_v8  ;;  %v3687_v13 = vunpack.c.h.bf16 %v3744_v8  ;;  %v3746_v24 = vld [vmem:[%s4485_s26 + $0x18] sm:$0xff]   ;;  %v3747_v39 = vld [vmem:[%s4485_s26 + $0x20] sm:$0xff]   ;;  %v3748_v40 = vld [vmem:[%s4485_s26 + $0x28] sm:$0xff]  }
  0x1e   : > { %v3690_v18 = vunpack.c.l.bf16 %v3745_v9  ;;  %v3691_v19 = vunpack.c.h.bf16 %v3745_v9  ;;  %v3694_v36 = vunpack.c.l.bf16 %v3746_v24  ;;  %v3695_v51 = vunpack.c.h.bf16 %v3746_v24  ;;  %v4521_v53 = vld [vmem:[%s4485_s26 + $0x30] sm:$0xff]   ;;  %v3751_v15 = vld [vmem:[%s4485_s26 + $0x40] sm:$0xff]  }
  0x1f   : > { %v334_v20 = vmul.f32 %v3682_v10, %v4480_v3  ;;  %v335_v21 = vmul.f32 %v3683_v11, %v4480_v3  ;;  %v336_v22 = vmul.f32 %v3686_v12, %v4480_v3  ;;  %v337_v23 = vmul.f32 %v3687_v13, %v4480_v3  ;;  %v3750_v13 = vld [vmem:[%s4485_s26 + $0x38] sm:$0xff]  }
  0x20   : > { %v338_v27 = vmul.f32 %v3690_v18, %v4480_v3  ;;  %v339_v28 = vmul.f32 %v3691_v19, %v4480_v3  ;;  %v340_v52 = vmul.f32 %v3694_v36, %v4480_v3  ;;  %v3698_v55 = vunpack.c.l.bf16 %v3747_v39 }
  0x21   : > { %v370_v29 = vadd.f32 %v4494_v14, %v334_v20  ;;  %v371_v30 = vadd.f32 %v4494_v14, %v335_v21  ;;  %v372_v31 = vadd.f32 %v4494_v14, %v336_v22  ;;  %v373_v32 = vadd.f32 %v4494_v14, %v337_v23  ;;  %v3752_v20 = vld [vmem:[%s4485_s26 + $0x48] sm:$0xff]  }
  0x22   : > { %v374_v34 = vadd.f32 %v4494_v14, %v338_v27  ;;  %v375_v35 = vadd.f32 %v4494_v14, %v339_v28  ;;  %v3699_v56 = vunpack.c.h.bf16 %v3747_v39  ;;  %v3702_v57 = vunpack.c.l.bf16 %v3748_v40 }
  0x23   : > { %vm402_vm8 = vcmp.gt.f32.partialorder %v370_v29, 0.0  ;;  %vm403_vm9 = vcmp.gt.f32.partialorder %v371_v30, 0.0  ;;  %v434_v37 = vmul.f32 0.2, %v370_v29  ;;  %v435_v38 = vmul.f32 0.2, %v371_v30 }
  0x24   : > { %vm404_vm10 = vcmp.gt.f32.partialorder %v372_v31, 0.0  ;;  %vm405_vm11 = vcmp.gt.f32.partialorder %v373_v32, 0.0  ;;  %v436_v41 = vmul.f32 0.2, %v372_v31  ;;  %v437_v42 = vmul.f32 0.2, %v373_v32 }
  0x25   : > { %v466_v43 = vsel %vm402_vm8, %v370_v29, %v434_v37  ;;  %v467_v44 = vsel %vm403_vm9, %v371_v30, %v435_v38  ;;  %vm406_vm12 = vcmp.gt.f32.partialorder %v374_v34, 0.0  ;;  %vm407_vm13 = vcmp.gt.f32.partialorder %v375_v35, 0.0 }
  0x26   : > { %v498_v45 = vpack.c.bf16 %v467_v44, %v466_v43  ;;  %v468_v46 = vsel %vm404_vm10, %v372_v31, %v436_v41  ;;  %v469_v47 = vsel %vm405_vm11, %v373_v32, %v437_v42  ;;  %v438_v48 = vmul.f32 0.2, %v374_v34 }
  0x27   : > { %v499_v49 = vpack.c.bf16 %v469_v47, %v468_v46  ;;  %v439_v50 = vmul.f32 0.2, %v375_v35  ;;  %v341_v59 = vmul.f32 %v3695_v51, %v4480_v3  ;;  %v376_v60 = vadd.f32 %v4494_v14, %v340_v52 }
  0x28   : > { %3849 = vmatprep.subr.bf16.mxu0 %v498_v45  ;;  %v470_v54 = vsel %vm406_vm12, %v374_v34, %v438_v48  ;;  %v3703_v61 = vunpack.c.h.bf16 %v3748_v40  ;;  %v342_v63 = vmul.f32 %v3698_v55, %v4480_v3  ;;  %v343_v0 = vmul.f32 %v3699_v56, %v4480_v3 }
  0x29   : > { %3855 = vmatprep.subr.bf16.mxu1 %v499_v49  ;;  %3850 = vmatpush3.bf16.msra.mxu0 %v498_v45  ;;  %v471_v58 = vsel %vm407_vm13, %v375_v35, %v439_v50  ;;  %v344_v1 = vmul.f32 %v3702_v57, %v4480_v3  ;;  %v377_v2 = vadd.f32 %v4494_v14, %v341_v59  ;;  %vm408_vm14 = vcmp.gt.f32.partialorder %v376_v60, 0.0  ;;  %v3753_v57 = vld [vmem:[%s4485_s26 + $0x50] sm:$0xff]  }
  0x2a   : > { %3856 = vmatpush3.bf16.msra.mxu1 %v499_v49  ;;  %v500_v62 = vpack.c.bf16 %v471_v58, %v470_v54  ;;  %v440_v4 = vmul.f32 0.2, %v376_v60  ;;  %v345_v5 = vmul.f32 %v3703_v61, %v4480_v3  ;;  %v378_v6 = vadd.f32 %v4494_v14, %v342_v63  ;;  %v3754_v58 = vld [vmem:[%s4485_s26 + $0x58] sm:$0xff]  }
  0x2b   : > { %v379_v7 = vadd.f32 %v4494_v14, %v343_v0  ;;  %v380_v8 = vadd.f32 %v4494_v14, %v344_v1  ;;  %v3706_v9 = vunpack.c.l.bf16 %v4521_v53  ;;  %vm409_vm15 = vcmp.gt.f32.partialorder %v377_v2, 0.0 }
  0x2c   : > { %3852 = vmatmul.mubr.msk.bf16.vlgmr.msra.gmra.mrb[0].mxu0 %vm544_vm1, %v4513_v33  ;;  %3861 = vmatprep.subr.bf16.mxu0 %v500_v62  ;;  %v441_v10 = vmul.f32 0.2, %v377_v2  ;;  %v472_v11 = vsel %vm408_vm14, %v376_v60, %v440_v4  ;;  %v381_v12 = vadd.f32 %v4494_v14, %v345_v5  ;;  %vm410_vm0 = vcmp.gt.f32.partialorder %v378_v6, 0.0  ;;  %v3755_v4 = vld [vmem:[%s4485_s26 + $0x60] sm:$0xff]  }
  0x2d   : > { %3858 = vmatmul.mubr.msk.bf16.vlgmr.msra.gmra.mrb[0].mxu1 %vm544_vm1, %v4513_v33  ;;  %3862 = vmatpush3.bf16.msra.mxu0 %v500_v62  ;;  %vm411_vm2 = vcmp.gt.f32.partialorder %v379_v7, 0.0  ;;  %v442_v16 = vmul.f32 0.2, %v378_v6  ;;  %v443_v17 = vmul.f32 0.2, %v379_v7  ;;  %vm412_vm3 = vcmp.gt.f32.partialorder %v380_v8, 0.0 }
  0x2e   : > { %3863 = vmatprep.mubr.msk.bf16.mxu0 %vm544_vm1, %v4501_v25  ;;  %3869 = vmatprep.mubr.msk.bf16.mxu1 %vm544_vm1, %v4501_v25  ;;  %v473_v18 = vsel %vm409_vm15, %v377_v2, %v441_v10  ;;  %vm413_vm4 = vcmp.gt.f32.partialorder %v381_v12, 0.0  ;;  %v444_v19 = vmul.f32 0.2, %v380_v8  ;;  %v445_v24 = vmul.f32 0.2, %v381_v12 }
  0x2f   : > { %v501_v21 = vpack.c.bf16 %v473_v18, %v472_v11  ;;  %v474_v22 = vsel %vm410_vm0, %v378_v6, %v442_v16  ;;  %v475_v23 = vsel %vm411_vm2, %v379_v7, %v443_v17  ;;  %v3707_v28 = vunpack.c.h.bf16 %v4521_v53 }
  0x30   : > { %v502_v26 = vpack.c.bf16 %v475_v23, %v474_v22  ;;  %v476_v27 = vsel %vm412_vm3, %v380_v8, %v444_v19  ;;  %v346_v29 = vmul.f32 %v3706_v9, %v4480_v3  ;;  %v477_v30 = vsel %vm413_vm4, %v381_v12, %v445_v24 }
  0x31   : > { %3867 = vmatprep.subr.bf16.mxu1 %v501_v21  ;;  %v3710_v31 = vunpack.c.l.bf16 %v3750_v13  ;;  %v3711_v32 = vunpack.c.h.bf16 %v3750_v13  ;;  %v3714_v34 = vunpack.c.l.bf16 %v3751_v15  ;;  %v503_v35 = vpack.c.bf16 %v477_v30, %v476_v27 }
  0x32   : > { %3868 = vmatpush3.bf16.msra.mxu1 %v501_v21  ;;  %3873 = vmatprep.subr.bf16.mxu0 %v502_v26  ;;  %v347_v36 = vmul.f32 %v3707_v28, %v4480_v3  ;;  %v382_v37 = vadd.f32 %v4494_v14, %v346_v29  ;;  %v3715_v38 = vunpack.c.h.bf16 %v3751_v15  ;;  %v3718_v42 = vunpack.c.l.bf16 %v3752_v20  ;;  %v3756_v29 = vld [vmem:[%s4485_s26 + $0x68] sm:$0xff]  }
  0x33   : > { %v348_v39 = vmul.f32 %v3710_v31, %v4480_v3  ;;  %v349_v40 = vmul.f32 %v3711_v32, %v4480_v3  ;;  %v350_v41 = vmul.f32 %v3714_v34, %v4480_v3  ;;  %3879 = vmatprep.subr.bf16.mxu1 %v503_v35  ;;  %v3719_v49 = vunpack.c.h.bf16 %v3752_v20 }
  0x34   : > { %3864 = vmatmul.mubr.msk.bf16.vlgmr.msra.gmra.mrb[4].mxu0 %vm544_vm1, %v4513_v33  ;;  %v383_v43 = vadd.f32 %v4494_v14, %v347_v36  ;;  %vm414_vm5 = vcmp.gt.f32.partialorder %v382_v37, 0.0  ;;  %v446_v44 = vmul.f32 0.2, %v382_v37  ;;  %v351_v45 = vmul.f32 %v3715_v38, %v4480_v3 }
  0x35   : > { %3874 = vmatpush3.bf16.msra.mxu0 %v502_v26  ;;  %3870 = vmatmul.mubr.msk.bf16.vlgmr.msra.gmra.mrb[4].mxu1 %vm544_vm1, %v4513_v33  ;;  %v384_v46 = vadd.f32 %v4494_v14, %v348_v39  ;;  %v385_v47 = vadd.f32 %v4494_v14, %v349_v40  ;;  %v386_v48 = vadd.f32 %v4494_v14, %v350_v41  ;;  %v3722_v6 = vunpack.c.l.bf16 %v3753_v57  ;;  %v3757_v40 = vld [vmem:[%s4485_s26 + $0x70] sm:$0xff]  }
  0x36   : > { %3875 = vmatprep.mubr.msk.bf16.mxu0 %vm544_vm1, %v4501_v25  ;;  %3880 = vmatpush3.bf16.msra.mxu1 %v503_v35  ;;  %vm415_vm6 = vcmp.gt.f32.partialorder %v383_v43, 0.0  ;;  %v447_v50 = vmul.f32 0.2, %v383_v43  ;;  %v478_v51 = vsel %vm414_vm5, %v382_v37, %v446_v44  ;;  %v387_v52 = vadd.f32 %v4494_v14, %v351_v45 }
  0x37   : > { %3881 = vmatprep.mubr.msk.bf16.mxu1 %vm544_vm1, %v4501_v25  ;;  %vm416_vm7 = vcmp.gt.f32.partialorder %v384_v46, 0.0  ;;  %vm417_vm8 = vcmp.gt.f32.partialorder %v385_v47, 0.0  ;;  %v448_v53 = vmul.f32 0.2, %v384_v46  ;;  %v449_v54 = vmul.f32 0.2, %v385_v47 }
  0x38   : > { %v479_v55 = vsel %vm415_vm6, %v383_v43, %v447_v50  ;;  %vm418_vm9 = vcmp.gt.f32.partialorder %v386_v48, 0.0  ;;  %vm419_vm10 = vcmp.gt.f32.partialorder %v387_v52, 0.0  ;;  %v450_v56 = vmul.f32 0.2, %v386_v48 }
  0x39   : > { %v504_v59 = vpack.c.bf16 %v479_v55, %v478_v51  ;;  %v480_v60 = vsel %vm416_vm7, %v384_v46, %v448_v53  ;;  %v481_v61 = vsel %vm417_vm8, %v385_v47, %v449_v54  ;;  %v451_v62 = vmul.f32 0.2, %v387_v52  ;;  %v3758_v51 = vld [vmem:[%s4485_s26 + $0x78] sm:$0xff]   ;;  %s244_s26 = sand.u32 1, %s4340_s19  }
  0x3a   : > { %v505_v63 = vpack.c.bf16 %v481_v61, %v480_v60  ;;  %v482_v0 = vsel %vm418_vm9, %v386_v48, %v450_v56  ;;  %v352_v1 = vmul.f32 %v3718_v42, %v4480_v3  ;;  %v353_v2 = vmul.f32 %v3719_v49, %v4480_v3  ;;  %s3323_s8 = sshll.u32 %s244_s26, 1 }
  0x3b   : > { %3885 = vmatprep.subr.bf16.mxu0 %v504_v59  ;;  %v483_v5 = vsel %vm419_vm10, %v387_v52, %v451_v62  ;;  %v3723_v7 = vunpack.c.h.bf16 %v3753_v57  ;;  %v3726_v8 = vunpack.c.l.bf16 %v3754_v58  ;;  %v3727_v12 = vunpack.c.h.bf16 %v3754_v58 }
  0x3c   : > { %3876 = vmatmul.mubr.msk.bf16.vlgmr.msra.gmra.mrb[8].mxu0 %vm544_vm1, %v4513_v33  ;;  %3891 = vmatprep.subr.bf16.mxu1 %v505_v63  ;;  %v506_v9 = vpack.c.bf16 %v483_v5, %v482_v0  ;;  %v388_v10 = vadd.f32 %v4494_v14, %v352_v1  ;;  %v389_v11 = vadd.f32 %v4494_v14, %v353_v2  ;;  %v3730_v17 = vunpack.c.l.bf16 %v3755_v4 }
  0x3d   : > { %3886 = vmatpush3.bf16.msra.mxu0 %v504_v59  ;;  %3882 = vmatmul.mubr.msk.bf16.vlgmr.msra.gmra.mrb[8].mxu1 %vm544_vm1, %v4513_v33  ;;  %v354_v13 = vmul.f32 %v3722_v6, %v4480_v3  ;;  %v355_v15 = vmul.f32 %v3723_v7, %v4480_v3  ;;  %v356_v16 = vmul.f32 %v3726_v8, %v4480_v3  ;;  %v3731_v27 = vunpack.c.h.bf16 %v3755_v4 }
  0x3e   : > { %3887 = vmatprep.mubr.msk.bf16.mxu0 %vm544_vm1, %v4501_v25  ;;  %3892 = vmatpush3.bf16.msra.mxu1 %v505_v63  ;;  %vm420_vm11 = vcmp.gt.f32.partialorder %v388_v10, 0.0  ;;  %vm421_vm12 = vcmp.gt.f32.partialorder %v389_v11, 0.0  ;;  %v452_v18 = vmul.f32 0.2, %v388_v10  ;;  %v453_v19 = vmul.f32 0.2, %v389_v11 }
  0x3f   : > { %3893 = vmatprep.mubr.msk.bf16.mxu1 %vm544_vm1, %v4501_v25  ;;  %3897 = vmatprep.subr.bf16.mxu0 %v506_v9  ;;  %v390_v20 = vadd.f32 %v4494_v14, %v354_v13  ;;  %v391_v21 = vadd.f32 %v4494_v14, %v355_v15  ;;  %v357_v22 = vmul.f32 %v3727_v12, %v4480_v3  ;;  %v3734_v39 = vunpack.c.l.bf16 %v3756_v29 }
  0x40   : > { %v392_v23 = vadd.f32 %v4494_v14, %v356_v16  ;;  %v484_v24 = vsel %vm420_vm11, %v388_v10, %v452_v18  ;;  %v485_v26 = vsel %vm421_vm12, %v389_v11, %v453_v19  ;;  %v358_v28 = vmul.f32 %v3730_v17, %v4480_v3 }
  0x41   : > { %v507_v30 = vpack.c.bf16 %v485_v26, %v484_v24  ;;  %vm422_vm13 = vcmp.gt.f32.partialorder %v390_v20, 0.0  ;;  %vm423_vm14 = vcmp.gt.f32.partialorder %v391_v21, 0.0  ;;  %v454_v31 = vmul.f32 0.2, %v390_v20 }
  0x42   : > { %v455_v32 = vmul.f32 0.2, %v391_v21  ;;  %v393_v34 = vadd.f32 %v4494_v14, %v357_v22  ;;  %vm424_vm15 = vcmp.gt.f32.partialorder %v392_v23, 0.0  ;;  %v456_v35 = vmul.f32 0.2, %v392_v23 }
  0x43   : > { %3903 = vmatprep.subr.bf16.mxu1 %v507_v30  ;;  %v486_v36 = vsel %vm422_vm13, %v390_v20, %v454_v31  ;;  %v359_v37 = vmul.f32 %v3731_v27, %v4480_v3  ;;  %v394_v38 = vadd.f32 %v4494_v14, %v358_v28  ;;  %v3735_v48 = vunpack.c.h.bf16 %v3756_v29 }
  0x44   : > { %3888 = vmatmul.mubr.msk.bf16.vlgmr.msra.gmra.mrb[12].mxu0 %vm544_vm1, %v4513_v33  ;;  %v487_v41 = vsel %vm423_vm14, %v391_v21, %v455_v32  ;;  %vm425_vm0 = vcmp.gt.f32.partialorder %v393_v34, 0.0  ;;  %v457_v42 = vmul.f32 0.2, %v393_v34  ;;  %v488_v43 = vsel %vm424_vm15, %v392_v23, %v456_v35 }
  0x45   : > { %3898 = vmatpush3.bf16.msra.mxu0 %v506_v9  ;;  %3899 = vmatprep.mubr.msk.bf16.mxu0 %vm544_vm1, %v4501_v25  ;;  %v508_v44 = vpack.c.bf16 %v487_v41, %v486_v36  ;;  %v395_v45 = vadd.f32 %v4494_v14, %v359_v37  ;;  %vm426_vm2 = vcmp.gt.f32.partialorder %v394_v38, 0.0  ;;  %v458_v46 = vmul.f32 0.2, %v394_v38 }
  0x46   : > { %3894 = vmatmul.mubr.msk.bf16.vlgmr.msra.gmra.mrb[12].mxu1 %vm544_vm1, %v4513_v33  ;;  %v489_v47 = vsel %vm425_vm0, %v393_v34, %v457_v42  ;;  %v360_v49 = vmul.f32 %v3734_v39, %v4480_v3  ;;  %v3738_v50 = vunpack.c.l.bf16 %v3757_v40  ;;  %v361_v55 = vmul.f32 %v3735_v48, %v4480_v3 }
  0x47   : > { %3904 = vmatpush3.bf16.msra.mxu1 %v507_v30  ;;  %3905 = vmatprep.mubr.msk.bf16.mxu1 %vm544_vm1, %v4501_v25  ;;  %v509_v52 = vpack.c.bf16 %v489_v47, %v488_v43  ;;  %vm427_vm3 = vcmp.gt.f32.partialorder %v395_v45, 0.0  ;;  %v459_v53 = vmul.f32 0.2, %v395_v45  ;;  %v490_v54 = vsel %vm426_vm2, %v394_v38, %v458_v46 }
  0x48   : > { %3909 = vmatprep.subr.bf16.mxu0 %v508_v44  ;;  %v396_v56 = vadd.f32 %v4494_v14, %v360_v49  ;;  %v3739_v57 = vunpack.c.h.bf16 %v3757_v40  ;;  %v362_v58 = vmul.f32 %v3738_v50, %v4480_v3  ;;  %v3742_v60 = vunpack.c.l.bf16 %v3758_v51 }
  0x49   : > { %3915 = vmatprep.subr.bf16.mxu1 %v509_v52  ;;  %v491_v59 = vsel %vm427_vm3, %v395_v45, %v459_v53  ;;  %v3743_v61 = vunpack.c.h.bf16 %v3758_v51  ;;  %v397_v63 = vadd.f32 %v4494_v14, %v361_v55  ;;  %vm1354_vm10 = vcmask 253952  }
  0x4a   : > { %v510_v62 = vpack.c.bf16 %v491_v59, %v490_v54  ;;  %vm428_vm4 = vcmp.gt.f32.partialorder %v396_v56, 0.0  ;;  %v460_v0 = vmul.f32 0.2, %v396_v56  ;;  %v363_v1 = vmul.f32 %v3739_v57, %v4480_v3 }
  0x4b   : > { %v398_v2 = vadd.f32 %v4494_v14, %v362_v58  ;;  %v364_v4 = vmul.f32 %v3742_v60, %v4480_v3  ;;  %v365_v5 = vmul.f32 %v3743_v61, %v4480_v3  ;;  %vm429_vm5 = vcmp.gt.f32.partialorder %v397_v63, 0.0 }
  0x4c   : > { %3900 = vmatmul.mubr.msk.bf16.vlgmr.msra.gmra.mrb[16].mxu0 %vm544_vm1, %v4513_v33  ;;  %v461_v6 = vmul.f32 0.2, %v397_v63  ;;  %v492_v7 = vsel %vm428_vm4, %v396_v56, %v460_v0  ;;  %v399_v8 = vadd.f32 %v4494_v14, %v363_v1  ;;  %vm1351_vm11 = vcmask 257024  }
  0x4d   : > { %3910 = vmatpush3.bf16.msra.mxu0 %v508_v44  ;;  %3911 = vmatprep.mubr.msk.bf16.mxu0 %vm544_vm1, %v4501_v25  ;;  %vm430_vm6 = vcmp.gt.f32.partialorder %v398_v2, 0.0  ;;  %v462_v9 = vmul.f32 0.2, %v398_v2  ;;  %v400_v10 = vadd.f32 %v4494_v14, %v364_v4  ;;  %v401_v11 = vadd.f32 %v4494_v14, %v365_v5 }
  0x4e   : > { %3906 = vmatmul.mubr.msk.bf16.vlgmr.msra.gmra.mrb[16].mxu1 %vm544_vm1, %v4513_v33  ;;  %3921 = vmatprep.subr.bf16.mxu0 %v510_v62  ;;  %v493_v3 = vsel %vm429_vm5, %v397_v63, %v461_v6  ;;  %vm431_vm7 = vcmp.gt.f32.partialorder %v399_v8, 0.0  ;;  %v463_v13 = vmul.f32 0.2, %v399_v8  ;;  %v4367_v14 = vmov 0  }
  0x4f   : > { %3916 = vmatpush3.bf16.msra.mxu1 %v509_v52  ;;  %3917 = vmatprep.mubr.msk.bf16.mxu1 %vm544_vm1, %v4501_v25  ;;  %v511_v12 = vpack.c.bf16 %v493_v3, %v492_v7  ;;  %v494_v15 = vsel %vm430_vm6, %v398_v2, %v462_v9  ;;  %vm432_vm8 = vcmp.gt.f32.partialorder %v400_v10, 0.0  ;;  %vm433_vm9 = vcmp.gt.f32.partialorder %v401_v11, 0.0  ;;  %1352 = vst.msk [vmem:[#allocation2] sm:$0xf] %vm1351_vm11, %v4367_v14 }
  0x50   : > { %v464_v16 = vmul.f32 0.2, %v400_v10  ;;  %v465_v17 = vmul.f32 0.2, %v401_v11  ;;  %v495_v18 = vsel %vm431_vm7, %v399_v8, %v463_v13  ;;  %1353 = vst.msk [vmem:[#allocation2 + $0x4] sm:$0xf] %vm1351_vm11, %v4367_v14 }
  0x51   : > { %3927 = vmatprep.subr.bf16.mxu1 %v511_v12  ;;  %v512_v19 = vpack.c.bf16 %v495_v18, %v494_v15  ;;  %1355 = vst.msk [vmem:[#allocation2 + $0x8] sm:$0x1] %vm1354_vm10, %v4367_v14  ;;  %1359 = vst.msk [vmem:[#allocation2 + $0xd4] sm:$0x1] %vm1354_vm10, %v4367_v14  ;;  %vm1685_vm12 = vsmask.f32 7424 }
  0x52   : > { %v496_v20 = vsel %vm432_vm8, %v400_v10, %v464_v16  ;;  %v497_v21 = vsel %vm433_vm9, %v401_v11, %v465_v17  ;;  %1357 = vst.msk [vmem:[#allocation2 + $0xcc] sm:$0xf] %vm1351_vm11, %v4367_v14  ;;  %1358 = vst.msk [vmem:[#allocation2 + $0xd0] sm:$0xf] %vm1351_vm11, %v4367_v14  ;;  %vm1863_vm13 = vcmask 261120   ;;  %vm1880_vm14 = vcmask 523264  }
  0x53   : > { %v513_v22 = vpack.c.bf16 %v497_v21, %v496_v20  ;;  %vm2266_vm15 = vcmask 785408   ;;  %vm3054_vm0 = vcmask 23552   ;;  %vm3092_vm2 = vcmask 16384  }
  0x54   : > { %3912 = vmatmul.mubr.msk.bf16.vlgmr.msra.gmra.mrb[20].mxu0 %vm544_vm1, %v4513_v33 }
  0x55   : > { %3922 = vmatpush3.bf16.msra.mxu0 %v510_v62  ;;  %3923 = vmatprep.mubr.msk.bf16.mxu0 %vm544_vm1, %v4501_v25 }
  0x56   : > { %3918 = vmatmul.mubr.msk.bf16.vlgmr.msra.gmra.mrb[20].mxu1 %vm544_vm1, %v4513_v33  ;;  %3933 = vmatprep.subr.bf16.mxu0 %v512_v19 }
  0x57   : > { %3928 = vmatpush3.bf16.msra.mxu1 %v511_v12  ;;  %3929 = vmatprep.mubr.msk.bf16.mxu1 %vm544_vm1, %v4501_v25 }
  0x58   : > { %3939 = vmatprep.subr.bf16.mxu1 %v513_v22 }
  0x5c   : > { %3924 = vmatmul.mubr.msk.bf16.vlgmr.msra.gmra.mrb[24].mxu0 %vm544_vm1, %v4513_v33 }
  0x5d   : > { %3934 = vmatpush3.bf16.msra.mxu0 %v512_v19  ;;  %3935 = vmatprep.mubr.msk.bf16.mxu0 %vm544_vm1, %v4501_v25 }
  0x5e   : > { %3930 = vmatmul.mubr.msk.bf16.vlgmr.msra.gmra.mrb[24].mxu1 %vm544_vm1, %v4513_v33 }
  0x5f   : > { %3940 = vmatpush3.bf16.msra.mxu1 %v513_v22  ;;  %3941 = vmatprep.mubr.msk.bf16.mxu1 %vm544_vm1, %v4501_v25 }
  0x64   : > { %3936 = vmatmul.mubr.msk.bf16.vlgmr.msra.gmra.mrb[28].mxu0 %vm544_vm1, %v4513_v33 }
  0x66   : > { %3942 = vmatmul.mubr.msk.bf16.vlgmr.msra.gmra.mrb[28].mxu1 %vm544_vm1, %v4513_v33  ;;  %vm1822_vm1 = vcmask 1046528  }
  0xff   : > { %v3853_v25 = vpop.f32.mrb[0].mxu0 }
 0x100   : > { %v3633_v23 = vpack.c.bf16 %v3853_v25, %v3853_v25  ;;  %v3859_v24 = vpop.f32.mrb[0].mxu1  ;;  %v585_v26 = vpop.f32.mrb[1].mxu0 }
 0x101   : > { %v3636_v33 = vpack.c.bf16 %v3859_v24, %v3859_v24  ;;  %v3631_v27 = vpack.c.bf16 %v585_v26, %v585_v26  ;;  %v633_v28 = vpop.f32.mrb[1].mxu1  ;;  %v3854_v29 = vpop.f32.mrb[2].mxu0 }
 0x102   : > { %1539 = vst.msk [vmem:[#allocation2 + $0x14] sm:$0x1] %vm1354_vm10, %v3633_v23  ;;  %v3634_v30 = vpack.c.bf16 %v633_v28, %v633_v28  ;;  %v3860_v31 = vpop.f32.mrb[2].mxu1  ;;  %v588_v32 = vpop.f32.mrb[3].mxu0 }
 0x103   : > { %1542 = vst.msk [vmem:[#allocation2 + $0x20] sm:$0x1] %vm1354_vm10, %v3636_v33  ;;  %v3632_v34 = vpack.c.bf16 %v588_v32, %v588_v32  ;;  %v636_v35 = vpop.f32.mrb[3].mxu1 }
 0x104   : > { %1537 = vst.msk [vmem:[#allocation2 + $0xc] sm:$0xf] %vm1351_vm11, %v3631_v27  ;;  %1540 = vst.msk [vmem:[#allocation2 + $0x18] sm:$0xf] %vm1351_vm11, %v3634_v30  ;;  %v3635_v36 = vpack.c.bf16 %v636_v35, %v636_v35 }
 0x105   : > { %1538 = vst.msk [vmem:[#allocation2 + $0x10] sm:$0xf] %vm1351_vm11, %v3632_v34 }
 0x106   : > { %1541 = vst.msk [vmem:[#allocation2 + $0x1c] sm:$0xf] %vm1351_vm11, %v3635_v36 }
 0x107   : > { %v3865_v37 = vpop.f32.mrb[4].mxu0 }
 0x108   : > { %v3639_v38 = vpack.c.bf16 %v3865_v37, %v3865_v37  ;;  %v681_v39 = vpop.f32.mrb[5].mxu0  ;;  %v3871_v40 = vpop.f32.mrb[4].mxu1 }
 0x109   : > { %v3637_v41 = vpack.c.bf16 %v681_v39, %v681_v39  ;;  %v3866_v42 = vpop.f32.mrb[6].mxu0  ;;  %v3642_v43 = vpack.c.bf16 %v3871_v40, %v3871_v40  ;;  %v729_v44 = vpop.f32.mrb[5].mxu1 }
 0x10a   : > { %1545 = vst.msk [vmem:[#allocation2 + $0x2c] sm:$0x1] %vm1354_vm10, %v3639_v38  ;;  %v684_v45 = vpop.f32.mrb[7].mxu0  ;;  %v3640_v46 = vpack.c.bf16 %v729_v44, %v729_v44  ;;  %v3872_v47 = vpop.f32.mrb[6].mxu1  ;;  %v4220_v42 = vld [vmem:[%s5491_s2] sm:$0xff]  }
 0x10b   : > { %1543 = vst.msk [vmem:[#allocation2 + $0x24] sm:$0xf] %vm1351_vm11, %v3637_v41  ;;  %v3638_v48 = vpack.c.bf16 %v684_v45, %v684_v45  ;;  %v732_v49 = vpop.f32.mrb[7].mxu1  ;;  %3973 = vmatprep.subr.bf16.mxu0 %v4220_v42 }
 0x10c   : > { %1548 = vst.msk [vmem:[#allocation2 + $0x38] sm:$0x1] %vm1354_vm10, %v3642_v43  ;;  %v3641_v50 = vpack.c.bf16 %v732_v49, %v732_v49  ;;  %v4221_v43 = vld [vmem:[%s5491_s2 + $0x8] sm:$0xff]   ;;  %3974 = vmatpush3.bf16.msra.mxu0 %v4220_v42 }
 0x10d   : > { %1546 = vst.msk [vmem:[#allocation2 + $0x30] sm:$0xf] %vm1351_vm11, %v3640_v46  ;;  %1544 = vst.msk [vmem:[#allocation2 + $0x28] sm:$0xf] %vm1351_vm11, %v3638_v48  ;;  %3975 = vmatprep.subr.bf16.mxu0 %v4221_v43 }
 0x10e   : > { %1547 = vst.msk [vmem:[#allocation2 + $0x34] sm:$0xf] %vm1351_vm11, %v3641_v50 }
 0x10f   : > { %v3877_v51 = vpop.f32.mrb[8].mxu0 }
 0x110   : > { %v3645_v52 = vpack.c.bf16 %v3877_v51, %v3877_v51  ;;  %v777_v53 = vpop.f32.mrb[9].mxu0  ;;  %v3883_v54 = vpop.f32.mrb[8].mxu1  ;;  %3976 = vmatpush3.bf16.msra.mxu0 %v4221_v43 }
 0x111   : > { %v3643_v55 = vpack.c.bf16 %v777_v53, %v777_v53  ;;  %v3878_v56 = vpop.f32.mrb[10].mxu0  ;;  %v3648_v57 = vpack.c.bf16 %v3883_v54, %v3883_v54  ;;  %v825_v58 = vpop.f32.mrb[9].mxu1 }
 0x112   : > { %1551 = vst.msk [vmem:[#allocation2 + $0x44] sm:$0x1] %vm1354_vm10, %v3645_v52  ;;  %v780_v59 = vpop.f32.mrb[11].mxu0  ;;  %v3646_v60 = vpack.c.bf16 %v825_v58, %v825_v58  ;;  %v3884_v61 = vpop.f32.mrb[10].mxu1 }
 0x113   : > { %1549 = vst.msk [vmem:[#allocation2 + $0x3c] sm:$0xf] %vm1351_vm11, %v3643_v55  ;;  %v3644_v62 = vpack.c.bf16 %v780_v59, %v780_v59  ;;  %v828_v63 = vpop.f32.mrb[11].mxu1 }
 0x114   : > { %1554 = vst.msk [vmem:[#allocation2 + $0x50] sm:$0x1] %vm1354_vm10, %v3648_v57  ;;  %v3647_v0 = vpack.c.bf16 %v828_v63, %v828_v63 }
 0x115   : > { %1552 = vst.msk [vmem:[#allocation2 + $0x48] sm:$0xf] %vm1351_vm11, %v3646_v60  ;;  %1550 = vst.msk [vmem:[#allocation2 + $0x40] sm:$0xf] %vm1351_vm11, %v3644_v62 }
 0x116   : > { %1553 = vst.msk [vmem:[#allocation2 + $0x4c] sm:$0xf] %vm1351_vm11, %v3647_v0 }
 0x117   : > { %v3889_v1 = vpop.f32.mrb[12].mxu0 }
 0x118   : > { %v3651_v2 = vpack.c.bf16 %v3889_v1, %v3889_v1  ;;  %v873_v4 = vpop.f32.mrb[13].mxu0 }
 0x119   : > { %v3895_v5 = vpop.f32.mrb[12].mxu1  ;;  %v3649_v6 = vpack.c.bf16 %v873_v4, %v873_v4  ;;  %v3890_v7 = vpop.f32.mrb[14].mxu0 }
 0x11a   : > { %1557 = vst.msk [vmem:[#allocation2 + $0x5c] sm:$0x1] %vm1354_vm10, %v3651_v2  ;;  %v3654_v8 = vpack.c.bf16 %v3895_v5, %v3895_v5  ;;  %v921_v9 = vpop.f32.mrb[13].mxu1  ;;  %v876_v10 = vpop.f32.mrb[15].mxu0 }
 0x11b   : > { %1555 = vst.msk [vmem:[#allocation2 + $0x54] sm:$0xf] %vm1351_vm11, %v3649_v6  ;;  %v3652_v3 = vpack.c.bf16 %v921_v9, %v921_v9  ;;  %v3896_v11 = vpop.f32.mrb[14].mxu1  ;;  %v3650_v12 = vpack.c.bf16 %v876_v10, %v876_v10  ;;  %v4222_v10 = vld [vmem:[%s5491_s2 + $0x10] sm:$0xff]  }
 0x11c   : > { %1560 = vst.msk [vmem:[#allocation2 + $0x68] sm:$0x1] %vm1354_vm10, %v3654_v8  ;;  %v924_v13 = vpop.f32.mrb[15].mxu1  ;;  %3977 = vmatprep.subr.bf16.mxu0 %v4222_v10 }
 0x11d   : > { %1558 = vst.msk [vmem:[#allocation2 + $0x60] sm:$0xf] %vm1351_vm11, %v3652_v3  ;;  %1556 = vst.msk [vmem:[#allocation2 + $0x58] sm:$0xf] %vm1351_vm11, %v3650_v12  ;;  %v3653_v15 = vpack.c.bf16 %v924_v13, %v924_v13  ;;  %3978 = vmatpush3.bf16.msra.mxu0 %v4222_v10  ;;  %v4223_v3 = vld [vmem:[%s5491_s2 + $0x18] sm:$0xff]  }
 0x11e   : > { %3979 = vmatprep.subr.bf16.mxu0 %v4223_v3 }
 0x11f   : > { %1559 = vst.msk [vmem:[#allocation2 + $0x64] sm:$0xf] %vm1351_vm11, %v3653_v15  ;;  %v3901_v16 = vpop.f32.mrb[16].mxu0 }
 0x120   : > { %v3657_v17 = vpack.c.bf16 %v3901_v16, %v3901_v16  ;;  %v969_v18 = vpop.f32.mrb[17].mxu0 }
 0x121   : > { %v3907_v19 = vpop.f32.mrb[16].mxu1  ;;  %v3655_v20 = vpack.c.bf16 %v969_v18, %v969_v18  ;;  %v3902_v21 = vpop.f32.mrb[18].mxu0  ;;  %3980 = vmatpush3.bf16.msra.mxu0 %v4223_v3 }
 0x122   : > { %1563 = vst.msk [vmem:[#allocation2 + $0x74] sm:$0x1] %vm1354_vm10, %v3657_v17  ;;  %v3660_v22 = vpack.c.bf16 %v3907_v19, %v3907_v19  ;;  %v1017_v14 = vpop.f32.mrb[17].mxu1  ;;  %v972_v25 = vpop.f32.mrb[19].mxu0 }
 0x123   : > { %1561 = vst.msk [vmem:[#allocation2 + $0x6c] sm:$0xf] %vm1351_vm11, %v3655_v20  ;;  %v3658_v23 = vpack.c.bf16 %v1017_v14, %v1017_v14  ;;  %v3908_v24 = vpop.f32.mrb[18].mxu1  ;;  %v3656_v26 = vpack.c.bf16 %v972_v25, %v972_v25 }
 0x124   : > { %1566 = vst.msk [vmem:[#allocation2 + $0x80] sm:$0x1] %vm1354_vm10, %v3660_v22  ;;  %v1020_v33 = vpop.f32.mrb[19].mxu1 }
 0x125   : > { %1564 = vst.msk [vmem:[#allocation2 + $0x78] sm:$0xf] %vm1351_vm11, %v3658_v23  ;;  %1562 = vst.msk [vmem:[#allocation2 + $0x70] sm:$0xf] %vm1351_vm11, %v3656_v26  ;;  %v3659_v27 = vpack.c.bf16 %v1020_v33, %v1020_v33 }
 0x127   : > { %1565 = vst.msk [vmem:[#allocation2 + $0x7c] sm:$0xf] %vm1351_vm11, %v3659_v27  ;;  %v3913_v28 = vpop.f32.mrb[20].mxu0 }
 0x128   : > { %v3663_v29 = vpack.c.bf16 %v3913_v28, %v3913_v28  ;;  %v1065_v30 = vpop.f32.mrb[21].mxu0 }
 0x129   : > { %v3919_v31 = vpop.f32.mrb[20].mxu1  ;;  %v3661_v32 = vpack.c.bf16 %v1065_v30, %v1065_v30  ;;  %v3914_v34 = vpop.f32.mrb[22].mxu0 }
 0x12a   : > { %1569 = vst.msk [vmem:[#allocation2 + $0x8c] sm:$0x1] %vm1354_vm10, %v3663_v29  ;;  %v3666_v35 = vpack.c.bf16 %v3919_v31, %v3919_v31  ;;  %v1113_v36 = vpop.f32.mrb[21].mxu1  ;;  %v1068_v37 = vpop.f32.mrb[23].mxu0 }
 0x12b   : > { %1567 = vst.msk [vmem:[#allocation2 + $0x84] sm:$0xf] %vm1351_vm11, %v3661_v32  ;;  %v3664_v38 = vpack.c.bf16 %v1113_v36, %v1113_v36  ;;  %v3920_v39 = vpop.f32.mrb[22].mxu1  ;;  %v3662_v40 = vpack.c.bf16 %v1068_v37, %v1068_v37  ;;  %v4224_v36 = vld [vmem:[%s5491_s2 + $0x20] sm:$0xff]  }
 0x12c   : > { %1572 = vst.msk [vmem:[#allocation2 + $0x98] sm:$0x1] %vm1354_vm10, %v3666_v35  ;;  %v1116_v41 = vpop.f32.mrb[23].mxu1  ;;  %3981 = vmatprep.subr.bf16.mxu0 %v4224_v36 }
 0x12d   : > { %1570 = vst.msk [vmem:[#allocation2 + $0x90] sm:$0xf] %vm1351_vm11, %v3664_v38  ;;  %1568 = vst.msk [vmem:[#allocation2 + $0x88] sm:$0xf] %vm1351_vm11, %v3662_v40  ;;  %v3665_v44 = vpack.c.bf16 %v1116_v41, %v1116_v41  ;;  %3982 = vmatpush3.bf16.msra.mxu0 %v4224_v36 }
 0x12f   : > { %1571 = vst.msk [vmem:[#allocation2 + $0x94] sm:$0xf] %vm1351_vm11, %v3665_v44  ;;  %v3925_v45 = vpop.f32.mrb[24].mxu0 }
 0x130   : > { %v3669_v46 = vpack.c.bf16 %v3925_v45, %v3925_v45  ;;  %v1161_v47 = vpop.f32.mrb[25].mxu0 }
 0x131   : > { %v3931_v48 = vpop.f32.mrb[24].mxu1  ;;  %v3667_v49 = vpack.c.bf16 %v1161_v47, %v1161_v47  ;;  %v3926_v50 = vpop.f32.mrb[26].mxu0 }
 0x132   : > { %1575 = vst.msk [vmem:[#allocation2 + $0xa4] sm:$0x1] %vm1354_vm10, %v3669_v46  ;;  %v3672_v51 = vpack.c.bf16 %v3931_v48, %v3931_v48  ;;  %v1209_v52 = vpop.f32.mrb[25].mxu1  ;;  %v1164_v53 = vpop.f32.mrb[27].mxu0 }
 0x133   : > { %1573 = vst.msk [vmem:[#allocation2 + $0x9c] sm:$0xf] %vm1351_vm11, %v3667_v49  ;;  %v3670_v54 = vpack.c.bf16 %v1209_v52, %v1209_v52  ;;  %v3932_v55 = vpop.f32.mrb[26].mxu1  ;;  %v3668_v56 = vpack.c.bf16 %v1164_v53, %v1164_v53 }
 0x134   : > { %1578 = vst.msk [vmem:[#allocation2 + $0xb0] sm:$0x1] %vm1354_vm10, %v3672_v51  ;;  %v1212_v57 = vpop.f32.mrb[27].mxu1 }
 0x135   : > { %1576 = vst.msk [vmem:[#allocation2 + $0xa8] sm:$0xf] %vm1351_vm11, %v3670_v54  ;;  %1574 = vst.msk [vmem:[#allocation2 + $0xa0] sm:$0xf] %vm1351_vm11, %v3668_v56  ;;  %v3671_v58 = vpack.c.bf16 %v1212_v57, %v1212_v57 }
 0x137   : > { %1577 = vst.msk [vmem:[#allocation2 + $0xac] sm:$0xf] %vm1351_vm11, %v3671_v58  ;;  %v3937_v59 = vpop.f32.mrb[28].mxu0 }
 0x138   : > { %v3675_v60 = vpack.c.bf16 %v3937_v59, %v3937_v59  ;;  %v1257_v61 = vpop.f32.mrb[29].mxu0 }
 0x139   : > { %v3943_v62 = vpop.f32.mrb[28].mxu1  ;;  %v3673_v63 = vpack.c.bf16 %v1257_v61, %v1257_v61  ;;  %v3938_v0 = vpop.f32.mrb[30].mxu0 }
 0x13a   : > { %1581 = vst.msk [vmem:[#allocation2 + $0xbc] sm:$0x1] %vm1354_vm10, %v3675_v60  ;;  %v3678_v1 = vpack.c.bf16 %v3943_v62, %v3943_v62  ;;  %v1305_v2 = vpop.f32.mrb[29].mxu1  ;;  %v1260_v4 = vpop.f32.mrb[31].mxu0 }
 0x13b   : > { %1579 = vst.msk [vmem:[#allocation2 + $0xb4] sm:$0xf] %vm1351_vm11, %v3673_v63  ;;  %v3676_v5 = vpack.c.bf16 %v1305_v2, %v1305_v2  ;;  %v3944_v6 = vpop.f32.mrb[30].mxu1  ;;  %v3674_v7 = vpack.c.bf16 %v1260_v4, %v1260_v4  ;;  %v4225_v63 = vld [vmem:[%s5491_s2 + $0x28] sm:$0xff]  }
 0x13c   : > { %1584 = vst.msk [vmem:[#allocation2 + $0xc8] sm:$0x1] %vm1354_vm10, %v3678_v1  ;;  %v1308_v8 = vpop.f32.mrb[31].mxu1  ;;  %3983 = vmatprep.subr.bf16.mxu0 %v4225_v63 }
 0x13d   : > { %1582 = vst.msk [vmem:[#allocation2 + $0xc0] sm:$0xf] %vm1351_vm11, %v3676_v5  ;;  %1580 = vst.msk [vmem:[#allocation2 + $0xb8] sm:$0xf] %vm1351_vm11, %v3674_v7  ;;  %v3677_v9 = vpack.c.bf16 %v1308_v8, %v1308_v8  ;;  %3984 = vmatpush3.bf16.msra.mxu0 %v4225_v63 }
 0x13f   : > { %1583 = vst.msk [vmem:[#allocation2 + $0xc4] sm:$0xf] %vm1351_vm11, %v3677_v9 }
 0x146   : > { %v4716_v11 = vld [vmem:[%s4713_s27 + $0x1c] sm:$0xf]  ;;  %v1615_v12 = vld [vmem:[%s4713_s27 + $0x18] sm:$0xe]  ;;  %v1590_v16 = vld [vmem:[%s4713_s27 + $0x4] sm:$0xf] }
 0x147   : > { %v4720_v13 = vld [vmem:[%s4713_s27 + $0x20] ss:$0 sps:$4 sm:$0x11]   ;;  %v3436_v15 = vcombine.low %v1615_v12, %v4716_v11  ;;  %v1613_v17 = vld [vmem:[%s4713_s27] sm:$0xe] }
 0x148   : > { %v1830_v19 = vrot.slane %v4720_v13, 1  ;;  %v4151_v20 = vld [vmem:[%s4713_s27 + $0x8] ss:$0 sps:$4 sm:$0x11]   ;;  %v3434_v21 = vcombine.low %v1613_v17, %v1590_v16  ;;  %v4728_v22 = vld [vmem:[%s4713_s27 + $0x40] sm:$0xf] }
 0x149   : > { %v1829_v18 = vrot.slane %v3436_v15, 1  ;;  %v1824_v23 = vrot.slane %v4151_v20, 1  ;;  %v1618_v24 = vld [vmem:[%s4713_s27 + $0x3c] sm:$0xe]  ;;  %v1589_v26 = vld [vmem:[%s4713_s27] sm:$0xf] }
 0x14a   : > { %v1823_v25 = vrot.slane %v3434_v21, 1  ;;  %v4735_v33 = vld [vmem:[%s4713_s27 + $0x44] ss:$0 sps:$4 sm:$0x11]   ;;  %v3439_v27 = vcombine.low %v1618_v24, %v4728_v22  ;;  %v1592_v29 = vld [vmem:[%s4713_s27 + $0x10] sm:$0xf]  ;;  %v4749_v37 = vcombine.low %v1589_v26, %v1590_v16 }
 0x14b   : > { %v1831_v14 = vsel %vm1822_vm1, %v1829_v18, %v1830_v19  ;;  %v1614_v30 = vld [vmem:[%s4713_s27 + $0xc] sm:$0xe]  ;;  %v1839_v32 = vrot.slane %v4735_v33, 1  ;;  %v4744_v34 = vld [vmem:[%s4713_s27 + $0x14] ss:$0 sps:$4 sm:$0x11]  }
 0x14c   : > { %1851 = vrot.lane.b32.xlu0 %v1831_v14, %s4368_s30  ;;  %v1825_v28 = vsel %vm1822_vm1, %v1823_v25, %v1824_v23  ;;  %v1838_v31 = vrot.slane %v3439_v27, 1  ;;  %v3435_v35 = vcombine.low %v1614_v30, %v1592_v29  ;;  %v4752_v38 = vld [vmem:[%s4713_s27 + $0x58] sm:$0xf]  ;;  %v1591_v40 = vld [vmem:[%s4713_s27 + $0xc] sm:$0xf]  ;;  %v1827_v42 = vrot.slane %v4744_v34, 1 }
 0x14d   : > { %1847 = vrot.lane.b32.xlu1 %v1825_v28, %s4368_s30  ;;  %v1620_v43 = vld [vmem:[%s4713_s27 + $0x54] sm:$0xe]  ;;  %v4760_v44 = vld [vmem:[%s4713_s27 + $0x5c] ss:$0 sps:$4 sm:$0x11]   ;;  %v1694_v50 = vshll.u32 %v4151_v20, 16  ;;  %v4776_v56 = vcombine.low %v1591_v40, %v1592_v29 }
 0x14e   : > { %v1840_v39 = vsel %vm1822_vm1, %v1838_v31, %v1839_v32  ;;  %v1826_v41 = vrot.slane %v3435_v35, 1  ;;  %v3441_v45 = vcombine.low %v1620_v43, %v4752_v38  ;;  %v4764_v46 = vld [vmem:[%s4713_s27 + $0x28] sm:$0xf]  ;;  %v1593_v47 = vld [vmem:[%s4713_s27 + $0x18] sm:$0xf]  ;;  %v1845_v52 = vrot.slane %v4760_v44, 1 }
 0x14f   : > { %v1616_v49 = vld [vmem:[%s4713_s27 + $0x24] sm:$0xe]  ;;  %v4772_v53 = vld [vmem:[%s4713_s27 + $0x2c] ss:$0 sps:$4 sm:$0x11]   ;;  %v1689_v55 = vshll.u32 %v4749_v37, 16  ;;  %v4794_v5 = vcombine.low %v1593_v47, %v4716_v11 }
 0x150   : > { %1857 = vrot.lane.b32.xlu0 %v1840_v39, %s4368_s30  ;;  %v1828_v48 = vsel %vm1822_vm1, %v1826_v41, %v1827_v42  ;;  %v1844_v51 = vrot.slane %v3441_v45, 1  ;;  %v3437_v54 = vcombine.low %v1616_v49, %v4764_v46  ;;  %v1598_v57 = vld [vmem:[%s4713_s27 + $0x34] sm:$0xf]  ;;  %v1617_v58 = vld [vmem:[%s4713_s27 + $0x30] sm:$0xe]  ;;  %v1833_v61 = vrot.slane %v4772_v53, 1 }
 0x151   : > { %1849 = vrot.lane.b32.xlu1 %v1828_v48, %s4368_s30  ;;  %v4783_v62 = vld [vmem:[%s4713_s27 + $0x38] ss:$0 sps:$4 sm:$0x11]   ;;  %v3438_v0 = vcombine.low %v1617_v58, %v1598_v57  ;;  %v1687_v1 = vshrl.u32 %v4749_v37, 16  ;;  %v1691_v2 = vrot.slane %v1689_v55, 1  ;;  %v1696_v8 = vrot.slane %v1694_v50, 1 }
 0x152   : > { %v1846_v59 = vsel %vm1822_vm1, %v1844_v51, %v1845_v52  ;;  %v1832_v60 = vrot.slane %v3437_v54, 1  ;;  %v4791_v4 = vld [vmem:[%s4713_s27 + $0x10] sm:$0xf]  ;;  %v1836_v7 = vrot.slane %v4783_v62, 1  ;;  %v3468_v9 = vld [vmem:[%s4713_s27 + $0xc] sm:$0xe] }
 0x153   : > { %v1835_v10 = vrot.slane %v3438_v0, 1  ;;  %v1692_v3 = vor.u32 %v1691_v2, %v1687_v1  ;;  %v4801_v12 = vld [vmem:[%s4713_s27 + $0x14] ss:$0 sps:$4 sm:$0x11]   ;;  %v3492_v15 = vcombine.low %v3468_v9, %v4791_v4  ;;  %v1701_v11 = vshll.u32 %v4776_v56, 16 }
 0x154   : > { %1861 = vrot.lane.b32.xlu0 %v1846_v59, %s4368_s30  ;;  %v1834_v6 = vsel %vm1822_vm1, %v1832_v60, %v1833_v61  ;;  %v1706_v16 = vshll.u32 %v4744_v34, 16  ;;  %v4807_v17 = vld [vmem:[%s4713_s27 + $0x1c] sm:$0xf]  ;;  %v1699_v20 = vshrl.u32 %v4776_v56, 16  ;;  %v3469_v21 = vld [vmem:[%s4713_s27 + $0x18] sm:$0xe] }
 0x155   : > { %1853 = vrot.lane.b32.xlu1 %v1834_v6, %s4368_s30  ;;  %v1697_v18 = vsel %vm1685_vm12, %v1692_v3, %v1696_v8  ;;  %v2145_v19 = vrot.slane %v3492_v15, 1  ;;  %v1837_v14 = vsel %vm1822_vm1, %v1835_v10, %v1836_v7  ;;  %v2146_v25 = vrot.slane %v4801_v12, 1  ;;  %v4816_v24 = vld [vmem:[%s4713_s27 + $0x20] ss:$0 sps:$4 sm:$0x11]   ;;  %v4226_v27 = vld [vmem:[%s5491_s2 + $0x30] sm:$0xff]  }
 0x156   : > { %v1703_v23 = vrot.slane %v1701_v11, 1  ;;  %v3493_v26 = vcombine.low %v3469_v21, %v4807_v17  ;;  %v1597_v28 = vld [vmem:[%s4713_s27 + $0x30] sm:$0xf]  ;;  %v1713_v29 = vshll.u32 %v4794_v5, 16  ;;  %v1718_v30 = vshll.u32 %v4720_v13, 16  ;;  %3945 = vmatprep.subr.bf16.mxu1 %v4226_v27  ;;  %v4228_v15 = vld [vmem:[%s5491_s2 + $0x40] sm:$0xff]  }
 0x157   : > { %v4827_v31 = vld [vmem:[%s4713_s27 + $0x4c] sm:$0xf]  ;;  %v1599_v32 = vld [vmem:[%s4713_s27 + $0x3c] sm:$0xf]  ;;  %v1708_v35 = vrot.slane %v1706_v16, 1  ;;  %v1711_v36 = vshrl.u32 %v4794_v5, 16  ;;  %3946 = vmatpush3.bf16.msra.mxu1 %v4226_v27  ;;  %v4837_v45 = vcombine.low %v1597_v28, %v1598_v57  ;;  %v2147_v47 = vsel %vm1822_vm1, %v2145_v19, %v2146_v25 }
 0x158   : > { %1782 = vrot.lane.b32.xlu0 %v1697_v18, %s4369_s14  ;;  %v1704_v34 = vor.u32 %v1703_v23, %v1699_v20  ;;  %v1619_v39 = vld [vmem:[%s4713_s27 + $0x48] sm:$0xe]  ;;  %v2148_v40 = vrot.slane %v3493_v26, 1  ;;  %v2149_v41 = vrot.slane %v4816_v24, 1  ;;  %v1715_v42 = vrot.slane %v1713_v29, 1  ;;  %v4227_v57 = vld [vmem:[%s5491_s2 + $0x38] sm:$0xff]  }
 0x159   : > { %1855 = vrot.lane.b32.xlu1 %v1837_v14, %s4368_s30  ;;  %v4834_v43 = vld [vmem:[%s4713_s27 + $0x50] ss:$0 sps:$4 sm:$0x11]   ;;  %v3440_v13 = vcombine.low %v1619_v39, %v4827_v31  ;;  %v4842_v49 = vld [vmem:[%s4713_s27 + $0x4c] sm:$0xf]  ;;  %v1720_v54 = vrot.slane %v1718_v30, 1  ;;  %v4859_v61 = vcombine.low %v1599_v32, %v4728_v22  ;;  %3947 = vmatprep.subr.bf16.mxu1 %v4227_v57 }
 0x15a   : > { %v1709_v48 = vsel %vm1685_vm12, %v1704_v34, %v1708_v35  ;;  %v3473_v50 = vld [vmem:[%s4713_s27 + $0x48] sm:$0xe]  ;;  %v3446_v51 = vld [vmem:[%s4713_s27 + $0x18] sm:$0xf]  ;;  %v1716_v52 = vor.u32 %v1715_v42, %v1711_v36  ;;  %v1595_v63 = vld [vmem:[%s4713_s27 + $0x24] sm:$0xf]  ;;  %v2150_v0 = vsel %vm1822_vm1, %v2148_v40, %v2149_v41 }
 0x15b   : > { %v4849_v55 = vld [vmem:[%s4713_s27 + $0x50] ss:$0 sps:$4 sm:$0x11]   ;;  %v1841_v58 = vrot.slane %v3440_v13, 1  ;;  %v3497_v59 = vcombine.low %v3473_v50, %v4842_v49  ;;  %v4856_v60 = vld [vmem:[%s4713_s27 + $0x28] sm:$0xf]  ;;  %3948 = vmatpush3.bf16.msra.mxu1 %v4227_v57  ;;  %v4880_v16 = vcombine.low %v3446_v51, %v4807_v17  ;;  %v4892_v28 = vcombine.low %v1595_v63, %v4764_v46 }
 0x15c   : > { %1784 = vrot.lane.b32.xlu0 %v1709_v48, %s4369_s14  ;;  %v1721_v1 = vsel %vm1685_vm12, %v1716_v52, %v1720_v54  ;;  %v1842_v2 = vrot.slane %v4834_v43, 1  ;;  %v3470_v6 = vld [vmem:[%s4713_s27 + $0x24] sm:$0xe]  ;;  %v4867_v7 = vld [vmem:[%s4713_s27 + $0x2c] ss:$0 sps:$4 sm:$0x11]   ;;  %3949 = vmatprep.subr.bf16.mxu1 %v4228_v15 }
 0x15d   : > { %2169 = vrot.lane.b32.xlu1 %v2147_v47, %s4368_s30  ;;  %v1601_v8 = vld [vmem:[%s4713_s27 + $0x48] sm:$0xf]  ;;  %v2160_v9 = vrot.slane %v3497_v59, 1  ;;  %v2161_v10 = vrot.slane %v4849_v55, 1  ;;  %v3494_v22 = vcombine.low %v3470_v6, %v4856_v60  ;;  %v1737_v3 = vshll.u32 %v4837_v45, 16  ;;  %v4908_v40 = vld [vmem:[%s5491_s2 + $0x60] sm:$0xff]  }
 0x15e   : > { %v3451_v11 = vld [vmem:[%s4713_s27 + $0x34] sm:$0xf]  ;;  %v1735_v18 = vshrl.u32 %v4837_v45, 16  ;;  %v1742_v20 = vshll.u32 %v4783_v62, 16  ;;  %v3471_v21 = vld [vmem:[%s4713_s27 + $0x30] sm:$0xe]  ;;  %v1843_v30 = vsel %vm1822_vm1, %v1841_v58, %v1842_v2  ;;  %v4900_v36 = vcombine.low %v1601_v8, %v4827_v31  ;;  %4001 = vmatprep.subr.bf16.mxu0 %v4908_v40 }
 0x15f   : > { %v1739_v19 = vrot.slane %v1737_v3, 1  ;;  %v2151_v14 = vrot.slane %v3494_v22, 1  ;;  %v2152_v25 = vrot.slane %v4867_v7, 1  ;;  %v4887_v23 = vld [vmem:[%s4713_s27 + $0x38] ss:$0 sps:$4 sm:$0x11]   ;;  %v3495_v26 = vcombine.low %v3471_v21, %v3451_v11  ;;  %3950 = vmatpush3.bf16.msra.mxu1 %v4228_v15 }
 0x160   : > { %1786 = vrot.lane.b32.xlu0 %v1721_v1, %s4369_s14  ;;  %v1749_v27 = vshll.u32 %v4859_v61, 16  ;;  %v1603_v17 = vld [vmem:[%s4713_s27 + $0x54] sm:$0xf]  ;;  %v3444_v29 = vld [vmem:[%s4713_s27 + $0xc] sm:$0xf]  ;;  %v2162_v62 = vsel %vm1822_vm1, %v2160_v9, %v2161_v10  ;;  %v1744_v41 = vrot.slane %v1742_v20, 1 }
 0x161   : > { %2171 = vrot.lane.b32.xlu1 %v2150_v0, %s4368_s30  ;;  %v1740_v32 = vor.u32 %v1739_v19, %v1735_v18  ;;  %v3450_v34 = vld [vmem:[%s4713_s27 + $0x30] sm:$0xf]  ;;  %v3453_v35 = vld [vmem:[%s4713_s27 + $0x40] sm:$0xf]  ;;  %v3472_v46 = vld [vmem:[%s4713_s27 + $0x3c] sm:$0xe]  ;;  %v2153_v48 = vsel %vm1822_vm1, %v2151_v14, %v2152_v25  ;;  %v4925_v63 = vcombine.low %v1603_v17, %v4752_v38  ;;  %v4928_v0 = vcombine.low %v3444_v29, %v4791_v4 }
 0x162   : > { %v1751_v39 = vrot.slane %v1749_v27, 1  ;;  %v1747_v42 = vshrl.u32 %v4859_v61, 16  ;;  %v1754_v13 = vshll.u32 %v4735_v33, 16  ;;  %v2024_v47 = vshll.u32 %v4880_v16, 16  ;;  %v4230_v31 = vld [vmem:[%s5491_s2 + $0x48] sm:$0xff]   ;;  %v4231_v4 = vld [vmem:[%s5491_s2 + $0x50] sm:$0xff]  }
 0x163   : > { %v2154_v50 = vrot.slane %v3495_v26, 1  ;;  %v2155_v51 = vrot.slane %v4887_v23, 1  ;;  %v4919_v52 = vld [vmem:[%s4713_s27 + $0x44] ss:$0 sps:$4 sm:$0x11]   ;;  %v3496_v54 = vcombine.low %v3472_v46, %v3453_v35  ;;  %v1745_v57 = vsel %vm1685_vm12, %v1740_v32, %v1744_v41  ;;  %3951 = vmatprep.subr.bf16.mxu1 %v4230_v31 }
 0x164   : > { %2179 = vrot.lane.b32.xlu0 %v2162_v62, %s4368_s30  ;;  %v1752_v33 = vor.u32 %v1751_v39, %v1747_v42  ;;  %v2026_v58 = vrot.slane %v2024_v47, 1  ;;  %v1725_v59 = vshll.u32 %v4892_v28, 16  ;;  %v4932_v1 = vcombine.low %v3450_v34, %v3451_v11  ;;  %v3452_v2 = vld [vmem:[%s4713_s27 + $0x3c] sm:$0xf]  ;;  %3952 = vmatpush3.bf16.msra.mxu1 %v4230_v31  ;;  %v3566_v21 = vld [vmem:[%s4713_s27 + $0x18] sm:$0xe] }
 0x165   : > { %1859 = vrot.lane.b32.xlu1 %v1843_v30, %s4368_s30  ;;  %v1756_v6 = vrot.slane %v1754_v13, 1  ;;  %v2022_v8 = vshrl.u32 %v4880_v16, 16  ;;  %v2029_v9 = vshll.u32 %v4816_v24, 16  ;;  %v1761_v38 = vshll.u32 %v4900_v36, 16  ;;  %v4944_v11 = vld [vmem:[%s4713_s27 + $0x1c] sm:$0xf]  ;;  %3953 = vmatprep.subr.bf16.mxu1 %v4231_v4 }
 0x166   : > { %v2156_v10 = vsel %vm1822_vm1, %v2154_v50, %v2155_v51  ;;  %v2157_v22 = vrot.slane %v3496_v54, 1  ;;  %v2158_v3 = vrot.slane %v4919_v52, 1  ;;  %v1727_v15 = vrot.slane %v1725_v59, 1  ;;  %v3448_v30 = vld [vmem:[%s4713_s27 + $0x24] sm:$0xf] }
 0x167   : > { %v1757_v18 = vsel %vm1685_vm12, %v1752_v33, %v1756_v6  ;;  %v2027_v19 = vor.u32 %v2026_v58, %v2022_v8  ;;  %v1723_v24 = vshrl.u32 %v4892_v28, 16  ;;  %v1763_v20 = vrot.slane %v1761_v38, 1  ;;  %v4960_v39 = vld [vmem:[%s4713_s27 + $0x20] ss:$0 sps:$4 sm:$0x11]  }
 0x168   : > { %1790 = vrot.lane.b32.xlu0 %v1745_v57, %s4369_s14  ;;  %v1730_v14 = vshll.u32 %v4772_v53, 16  ;;  %v1759_v25 = vshrl.u32 %v4900_v36, 16  ;;  %v1766_v26 = vshll.u32 %v4834_v43, 16  ;;  %v1773_v27 = vshll.u32 %v4925_v63, 16  ;;  %3954 = vmatpush3.bf16.msra.mxu1 %v4231_v4  ;;  %v4233_v43 = vld [vmem:[%s5491_s2 + $0x58] sm:$0xff]  }
 0x169   : > { %2173 = vrot.lane.b32.xlu1 %v2153_v48, %s4368_s30  ;;  %v4955_v17 = vcombine.low %v3452_v2, %v3453_v35  ;;  %v2031_v29 = vrot.slane %v2029_v9, 1  ;;  %v2159_v62 = vsel %vm1822_vm1, %v2157_v22, %v2158_v3  ;;  %v1728_v32 = vor.u32 %v1727_v15, %v1723_v24  ;;  %v3454_v31 = vld [vmem:[%s4713_s27 + $0x48] sm:$0xf]  ;;  %3955 = vmatprep.subr.bf16.mxu1 %v4233_v43  ;;  %v3567_v2 = vld [vmem:[%s4713_s27 + $0x24] sm:$0xe] }
 0x16a   : > { %v1764_v34 = vor.u32 %v1763_v20, %v1759_v25  ;;  %v3590_v53 = vcombine.low %v3566_v21, %v4944_v11  ;;  %v1775_v35 = vrot.slane %v1773_v27, 1  ;;  %v2012_v41 = vshll.u32 %v4928_v0, 16  ;;  %v3545_v59 = vld [vmem:[%s4713_s27 + $0x28] sm:$0xf]  ;;  %v3544_v24 = vld [vmem:[%s4713_s27 + $0x24] sm:$0xf] }
 0x16b   : > { %v2032_v46 = vsel %vm1685_vm12, %v2027_v19, %v2031_v29  ;;  %v2048_v42 = vshll.u32 %v4932_v1, 16  ;;  %v1732_v13 = vrot.slane %v1730_v14, 1  ;;  %v1768_v47 = vrot.slane %v1766_v26, 1  ;;  %v4992_v15 = vld [vmem:[%s4713_s27 + $0x2c] ss:$0 sps:$4 sm:$0x11]  }
 0x16c   : > { %1792 = vrot.lane.b32.xlu0 %v1757_v18, %s4369_s14  ;;  %v4973_v48 = vcombine.low %v3448_v30, %v4856_v60  ;;  %v1771_v50 = vshrl.u32 %v4925_v63, 16  ;;  %v1778_v51 = vshll.u32 %v4760_v44, 16  ;;  %v2765_v33 = vrot.slane %v3590_v53, 1  ;;  %3956 = vmatpush3.bf16.msra.mxu1 %v4233_v43  ;;  %v3542_v44 = vld [vmem:[%s4713_s27 + $0x18] sm:$0xf] }
 0x16d   : > { %2175 = vrot.lane.b32.xlu1 %v2156_v10, %s4368_s30  ;;  %v1733_v54 = vsel %vm1685_vm12, %v1728_v32, %v1732_v13  ;;  %v1769_v57 = vsel %vm1685_vm12, %v1764_v34, %v1768_v47  ;;  %v2766_v58 = vrot.slane %v4960_v39, 1  ;;  %v2014_v60 = vrot.slane %v2012_v41, 1  ;;  %4029 = vmatprep.subr.bf16.mxu1 %v4908_v40  ;;  %v3459_v14 = vld [vmem:[%s4713_s27 + $0x64] sm:$0xf]  ;;  %v3457_v43 = vld [vmem:[%s4713_s27 + $0x58] sm:$0xf] }
 0x16e   : > { %v1776_v6 = vor.u32 %v1775_v35, %v1771_v50  ;;  %v2050_v8 = vrot.slane %v2048_v42, 1  ;;  %v2060_v9 = vshll.u32 %v4955_v17, 16  ;;  %v2010_v38 = vshrl.u32 %v4928_v0, 16  ;;  %v5009_v30 = vld [vmem:[%s4713_s27 + $0x68] ss:$0 sps:$4 sm:$0x11]  }
 0x16f   : > { %v2017_v4 = vshll.u32 %v4801_v12, 16  ;;  %v1780_v10 = vrot.slane %v1778_v51, 1  ;;  %v2046_v22 = vshrl.u32 %v4932_v1, 16  ;;  %v2053_v3 = vshll.u32 %v4887_v23, 16  ;;  %v3475_v23 = vld [vmem:[%s4713_s27 + $0x60] sm:$0xe] }
 0x170   : > { %2107 = vrot.lane.b32.xlu0 %v2032_v46, %s4369_s14  ;;  %v4995_v18 = vcombine.low %v3454_v31, %v4842_v49  ;;  %v2767_v19 = vsel %vm1822_vm1, %v2765_v33, %v2766_v58  ;;  %v3591_v20 = vcombine.low %v3567_v2, %v3545_v59  ;;  %v2036_v21 = vshll.u32 %v4973_v48, 16  ;;  %v3474_v42 = vld [vmem:[%s4713_s27 + $0x54] sm:$0xe]  ;;  %v3458_v58 = vld [vmem:[%s4713_s27 + $0x60] sm:$0xf] }
 0x171   : > { %2177 = vrot.lane.b32.xlu1 %v2159_v62, %s4368_s30  ;;  %v1781_v12 = vsel %vm1685_vm12, %v1776_v6, %v1780_v10  ;;  %v2015_v25 = vor.u32 %v2014_v60, %v2010_v38  ;;  %v2051_v26 = vor.u32 %v2050_v8, %v2046_v22  ;;  %v2062_v27 = vrot.slane %v2060_v9, 1  ;;  %v3456_v50 = vld [vmem:[%s4713_s27 + $0x54] sm:$0xf]  ;;  %v3546_v10 = vld [vmem:[%s4713_s27 + $0x30] sm:$0xf] }
 0x172   : > { %v5004_v29 = vcombine.low %v3542_v44, %v4944_v11  ;;  %v2019_v49 = vrot.slane %v2017_v4, 1  ;;  %v2055_v62 = vrot.slane %v2053_v3, 1  ;;  %v2769_v32 = vrot.slane %v4992_v15, 1  ;;  %v3547_v22 = vld [vmem:[%s4713_s27 + $0x34] sm:$0xf] }
 0x173   : > { %v2058_v34 = vshrl.u32 %v4955_v17, 16  ;;  %v2065_v53 = vshll.u32 %v4919_v52, 16  ;;  %v5015_v46 = vcombine.low %v3544_v24, %v3545_v59  ;;  %v2768_v11 = vrot.slane %v3591_v20, 1 }
 0x174   : > { %1794 = vrot.lane.b32.xlu0 %v1769_v57, %s4369_s14  ;;  %v2038_v35 = vrot.slane %v2036_v21, 1  ;;  %v3499_v41 = vcombine.low %v3475_v23, %v3459_v14  ;;  %v2020_v13 = vsel %vm1685_vm12, %v2015_v25, %v2019_v49  ;;  %v2056_v47 = vsel %vm1685_vm12, %v2051_v26, %v2055_v62  ;;  %v5027_v57 = vld [vmem:[%s4713_s27 + $0x5c] ss:$0 sps:$4 sm:$0x11]   ;;  %v3568_v21 = vld [vmem:[%s4713_s27 + $0x30] sm:$0xe] }
 0x175   : > { %1788 = vrot.lane.b32.xlu1 %v1733_v54, %s4369_s14  ;;  %v2063_v31 = vor.u32 %v2062_v27, %v2058_v34  ;;  %v2072_v51 = vshll.u32 %v4995_v18, 16  ;;  %v2034_v52 = vshrl.u32 %v4973_v48, 16  ;;  %v2041_v54 = vshll.u32 %v4867_v7, 16 }
 0x176   : > { %v2067_v33 = vrot.slane %v2065_v53, 1  ;;  %v3498_v59 = vcombine.low %v3474_v42, %v3457_v43  ;;  %v2632_v2 = vshll.u32 %v5004_v29, 16  ;;  %v2166_v60 = vrot.slane %v3499_v41, 1 }
 0x177   : > { %v2039_v6 = vor.u32 %v2038_v35, %v2034_v52  ;;  %v2167_v8 = vrot.slane %v5009_v30, 1  ;;  %v2644_v9 = vshll.u32 %v5015_v46, 16  ;;  %v2770_v44 = vsel %vm1822_vm1, %v2768_v11, %v2769_v32  ;;  %v3548_v32 = vld [vmem:[%s4713_s27 + $0x3c] sm:$0xf]  ;;  %v5057_v11 = vld [vmem:[%s4713_s27 + $0x40] sm:$0xf] }
 0x178   : > { %1796 = vrot.lane.b32.xlu0 %v1781_v12, %s4369_s14  ;;  %v2068_v38 = vsel %vm1685_vm12, %v2063_v31, %v2067_v33  ;;  %v5035_v4 = vcombine.low %v3456_v50, %v3457_v43  ;;  %v2074_v7 = vrot.slane %v2072_v51, 1  ;;  %v2043_v3 = vrot.slane %v2041_v54, 1  ;;  %v4203_v35 = vld [vmem:[%s4713_s27 + $0x38] ss:$0 sps:$4 sm:$0x11]  }
 0x179   : > { %2789 = vrot.lane.b32.xlu1 %v2767_v19, %s4368_s30  ;;  %v5041_v19 = vcombine.low %v3458_v58, %v3459_v14  ;;  %v2164_v24 = vrot.slane %v5027_v57, 1  ;;  %v2070_v20 = vshrl.u32 %v4995_v18, 16  ;;  %v2163_v12 = vrot.slane %v3498_v59, 1  ;;  %v3552_v52 = vld [vmem:[%s4713_s27 + $0x54] sm:$0xf] }
 0x17a   : > { %v2077_v25 = vshll.u32 %v4849_v55, 16  ;;  %v2634_v26 = vrot.slane %v2632_v2, 1  ;;  %v2637_v27 = vshll.u32 %v4960_v39, 16  ;;  %v2044_v23 = vsel %vm1685_vm12, %v2039_v6, %v2043_v3  ;;  %v5072_v2 = vld [vmem:[%s4713_s27 + $0x58] sm:$0xf] }
 0x17b   : > { %v2168_v49 = vsel %vm1822_vm1, %v2166_v60, %v2167_v8  ;;  %v2646_v62 = vrot.slane %v2644_v9, 1  ;;  %v5050_v14 = vcombine.low %v3546_v10, %v3547_v22  ;;  %v2075_v34 = vor.u32 %v2074_v7, %v2070_v20  ;;  %v3550_v6 = vld [vmem:[%s4713_s27 + $0x48] sm:$0xf]  ;;  %v5078_v9 = vld [vmem:[%s4713_s27 + $0x4c] sm:$0xf] }
 0x17c   : > { %2111 = vrot.lane.b32.xlu0 %v2056_v47, %s4369_s14  ;;  %v2630_v53 = vshrl.u32 %v5004_v29, 16  ;;  %v2649_v43 = vshll.u32 %v4992_v15, 16  ;;  %v2084_v55 = vshll.u32 %v5035_v4, 16  ;;  %v2642_v39 = vshrl.u32 %v5015_v46, 16 }
 0x17d   : > { %2105 = vrot.lane.b32.xlu1 %v2020_v13, %s4369_s14  ;;  %v3592_v41 = vcombine.low %v3568_v21, %v3547_v22  ;;  %v2079_v42 = vrot.slane %v2077_v25, 1  ;;  %v2639_v47 = vrot.slane %v2637_v27, 1  ;;  %v2656_v15 = vshll.u32 %v5050_v14, 16  ;;  %v3569_v25 = vld [vmem:[%s4713_s27 + $0x3c] sm:$0xe] }
 0x17e   : > { %v2635_v13 = vor.u32 %v2634_v26, %v2630_v53  ;;  %v2647_v31 = vor.u32 %v2646_v62, %v2642_v39  ;;  %v2096_v50 = vshll.u32 %v5041_v19, 16  ;;  %v5066_v51 = vcombine.low %v3548_v32, %v5057_v11  ;;  %v3556_v39 = vld [vmem:[%s4713_s27 + $0x6c] sm:$0xf] }
 0x17f   : > { %v2165_v54 = vsel %vm1822_vm1, %v2163_v12, %v2164_v24  ;;  %v2080_v33 = vsel %vm1685_vm12, %v2075_v34, %v2079_v42  ;;  %v2651_v58 = vrot.slane %v2649_v43, 1  ;;  %v2086_v59 = vrot.slane %v2084_v55, 1  ;;  %v4209_v42 = vld [vmem:[%s4713_s27 + $0x5c] ss:$0 sps:$4 sm:$0x11]  }
 0x180   : > { %2113 = vrot.lane.b32.xlu0 %v2068_v38, %s4369_s14  ;;  %v2771_v60 = vrot.slane %v3592_v41, 1  ;;  %v2772_v8 = vrot.slane %v4203_v35, 1  ;;  %v2082_v38 = vshrl.u32 %v5035_v4, 16  ;;  %v2089_v7 = vshll.u32 %v5027_v57, 16 }
 0x181   : > { %2791 = vrot.lane.b32.xlu1 %v2770_v44, %s4368_s30  ;;  %v2640_v44 = vsel %vm1685_vm12, %v2635_v13, %v2639_v47  ;;  %v2661_v10 = vshll.u32 %v4203_v35, 16  ;;  %v2652_v22 = vsel %vm1685_vm12, %v2647_v31, %v2651_v58  ;;  %v2658_v3 = vrot.slane %v2656_v15, 1  ;;  %v5106_v31 = vld [vmem:[%s4713_s27 + $0x70] sm:$0xf] }
 0x182   : > { %v2098_v24 = vrot.slane %v2096_v50, 1  ;;  %v2668_v20 = vshll.u32 %v5066_v51, 16  ;;  %v2087_v21 = vor.u32 %v2086_v59, %v2082_v38  ;;  %v2101_v12 = vshll.u32 %v5009_v30, 16  ;;  %v3554_v50 = vld [vmem:[%s4713_s27 + $0x60] sm:$0xf] }
 0x183   : > { %v5088_v26 = vcombine.low %v3552_v52, %v5072_v2  ;;  %v5091_v27 = vcombine.low %v3550_v6, %v5078_v9  ;;  %v2654_v57 = vshrl.u32 %v5050_v14, 16  ;;  %v2773_v30 = vsel %vm1822_vm1, %v2771_v60, %v2772_v8  ;;  %v5113_v52 = vld [vmem:[%s4713_s27 + $0x64] sm:$0xf]  ;;  %v3571_v38 = vld [vmem:[%s4713_s27 + $0x54] sm:$0xe] }
 0x184   : > { %2183 = vrot.lane.b32.xlu0 %v2168_v49, %s4368_s30  ;;  %v4206_v49 = vld [vmem:[%s4713_s27 + $0x44] ss:$0 sps:$4 sm:$0x11]   ;;  %v2091_v62 = vrot.slane %v2089_v7, 1  ;;  %v2663_v32 = vrot.slane %v2661_v10, 1  ;;  %v3593_v43 = vcombine.low %v3569_v25, %v5057_v11  ;;  %v2670_v55 = vrot.slane %v2668_v20, 1 }
 0x185   : > { %2109 = vrot.lane.b32.xlu1 %v2044_v23, %s4369_s14  ;;  %v2094_v23 = vshrl.u32 %v5041_v19, 16  ;;  %v2659_v34 = vor.u32 %v2658_v3, %v2654_v57  ;;  %v2103_v41 = vrot.slane %v2101_v12, 1  ;;  %v2692_v13 = vshll.u32 %v5088_v26, 16  ;;  %v3570_v7 = vld [vmem:[%s4713_s27 + $0x48] sm:$0xe] }
 0x186   : > { %v2092_v35 = vsel %vm1685_vm12, %v2087_v21, %v2091_v62  ;;  %v2680_v47 = vshll.u32 %v5091_v27, 16  ;;  %v2666_v11 = vshrl.u32 %v5066_v51, 16  ;;  %v2673_v15 = vshll.u32 %v4206_v49, 16 }
 0x187   : > { %v2099_v53 = vor.u32 %v2098_v24, %v2094_v23  ;;  %v2664_v58 = vsel %vm1685_vm12, %v2659_v34, %v2663_v32  ;;  %v2774_v6 = vrot.slane %v3593_v43, 1  ;;  %v2694_v8 = vrot.slane %v2692_v13, 1 }
 0x188   : > { %2115 = vrot.lane.b32.xlu0 %v2080_v33, %s4369_s14  ;;  %v4211_v33 = vld [vmem:[%s4713_s27 + $0x50] ss:$0 sps:$4 sm:$0x11]   ;;  %v2671_v60 = vor.u32 %v2670_v55, %v2666_v11  ;;  %v5121_v10 = vcombine.low %v3556_v39, %v5106_v31  ;;  %v2675_v3 = vrot.slane %v2673_v15, 1  ;;  %v2690_v24 = vshrl.u32 %v5088_v26, 16 }
 0x189   : > { %2181 = vrot.lane.b32.xlu1 %v2165_v54, %s4368_s30  ;;  %v2775_v54 = vrot.slane %v4206_v49, 1  ;;  %v2104_v59 = vsel %vm1685_vm12, %v2099_v53, %v2103_v41  ;;  %v2697_v20 = vshll.u32 %v4209_v42, 16  ;;  %v2678_v21 = vshrl.u32 %v5091_v27, 16  ;;  %v4215_v53 = vld [vmem:[%s4713_s27 + $0x74] ss:$0 sps:$4 sm:$0x11]  }
 0x18a   : > { %v2685_v12 = vshll.u32 %v4211_v33, 16  ;;  %v2676_v57 = vsel %vm1685_vm12, %v2671_v60, %v2675_v3  ;;  %v3595_v23 = vcombine.low %v3571_v38, %v5072_v2  ;;  %v3594_v49 = vcombine.low %v3570_v7, %v5078_v9  ;;  %v4217_v39 = vld [vmem:[%s4713_s27 + $0x68] ss:$0 sps:$4 sm:$0x11]  }
 0x18b   : > { %v2776_v25 = vsel %vm1822_vm1, %v2774_v6, %v2775_v54  ;;  %v2716_v32 = vshll.u32 %v5121_v10, 16  ;;  %v2699_v43 = vrot.slane %v2697_v20, 1  ;;  %v2781_v2 = vrot.slane %v4209_v42, 1  ;;  %v3572_v54 = vld [vmem:[%s4713_s27 + $0x60] sm:$0xe] }
 0x18c   : > { %2727 = vrot.lane.b32.xlu0 %v2652_v22, %s4369_s14  ;;  %v5124_v22 = vcombine.low %v3554_v50, %v5113_v52  ;;  %v2687_v55 = vrot.slane %v2685_v12, 1  ;;  %v2777_v41 = vrot.slane %v3594_v49, 1  ;;  %v2778_v9 = vrot.slane %v4211_v33, 1  ;;  %v3573_v50 = vld [vmem:[%s4713_s27 + $0x6c] sm:$0xe] }
 0x18d   : > { %2725 = vrot.lane.b32.xlu1 %v2640_v44, %s4369_s14  ;;  %v2682_v44 = vrot.slane %v2680_v47, 1  ;;  %v2718_v11 = vrot.slane %v2716_v32, 1  ;;  %v2709_v42 = vshll.u32 %v4217_v39, 16  ;;  %v3597_v38 = vcombine.low %v3573_v50, %v5106_v31 }
 0x18e   : > { %v2704_v34 = vshll.u32 %v5124_v22, 16  ;;  %v2702_v6 = vshrl.u32 %v5124_v22, 16  ;;  %v2779_v60 = vsel %vm1822_vm1, %v2777_v41, %v2778_v9  ;;  %v3596_v7 = vcombine.low %v3572_v54, %v5113_v52 }
 0x18f   : > { %v2683_v62 = vor.u32 %v2682_v44, %v2678_v21  ;;  %v2787_v20 = vrot.slane %v4215_v53, 1  ;;  %v2784_v21 = vrot.slane %v4217_v39, 1 }
 0x190   : > { %2117 = vrot.lane.b32.xlu0 %v2092_v35, %s4369_s14  ;;  %v2780_v35 = vrot.slane %v3595_v23, 1  ;;  %v2706_v15 = vrot.slane %v2704_v34, 1  ;;  %v2783_v23 = vrot.slane %v3596_v7, 1 }
 0x191   : > { %2793 = vrot.lane.b32.xlu1 %v2773_v30, %s4368_s30  ;;  %v2695_v30 = vor.u32 %v2694_v8, %v2690_v24  ;;  %v2688_v47 = vsel %vm1685_vm12, %v2683_v62, %v2687_v55  ;;  %v2711_v24 = vrot.slane %v2709_v42, 1  ;;  %v5204_v42 = vld [vmem:[%s5491_s2 + $0x80] sm:$0xff]  }
 0x192   : > { %v2782_v33 = vsel %vm1822_vm1, %v2780_v35, %v2781_v2  ;;  %v2707_v44 = vor.u32 %v2706_v15, %v2702_v6  ;;  %v2785_v52 = vsel %vm1822_vm1, %v2783_v23, %v2784_v21 }
 0x193   : > { %v2700_v13 = vsel %vm1685_vm12, %v2695_v30, %v2699_v43 }
 0x194   : > { %2119 = vrot.lane.b32.xlu0 %v2104_v59, %s4369_s14  ;;  %v2721_v59 = vshll.u32 %v4215_v53, 16 }
 0x195   : > { %2729 = vrot.lane.b32.xlu1 %v2664_v58, %s4369_s14  ;;  %v2714_v58 = vshrl.u32 %v5121_v10, 16 }
 0x196   : > { %v2723_v3 = vrot.slane %v2721_v59, 1 }
 0x197   : > { %v2719_v8 = vor.u32 %v2718_v11, %v2714_v58 }
 0x198   : > { %2731 = vrot.lane.b32.xlu0 %v2676_v57, %s4369_s14  ;;  %v2786_v57 = vrot.slane %v3597_v38, 1 }
 0x199   : > { %2795 = vrot.lane.b32.xlu1 %v2776_v25, %s4368_s30  ;;  %v2724_v12 = vsel %vm1685_vm12, %v2719_v8, %v2723_v3  ;;  %v2712_v25 = vsel %vm1685_vm12, %v2707_v44, %v2711_v24  ;;  %v5211_v8 = vld [vmem:[%s5491_s2 + $0x88] sm:$0xff]  }
 0x19a   : > { %v2788_v31 = vsel %vm1822_vm1, %v2786_v57, %v2787_v20 }
 0x19c   : > { %2733 = vrot.lane.b32.xlu0 %v2688_v47, %s4369_s14 }
 0x19d   : > { %2735 = vrot.lane.b32.xlu1 %v2700_v13, %s4369_s14  ;;  %v5175_v13 = vld [vmem:[%s5491_s2 + $0x68] sm:$0xff]  }
 0x1a0   : > { %2797 = vrot.lane.b32.xlu0 %v2779_v60, %s4368_s30 }
 0x1a1   : > { %2799 = vrot.lane.b32.xlu1 %v2782_v33, %s4368_s30 }
 0x1a4   : > { %2737 = vrot.lane.b32.xlu0 %v2712_v25, %s4369_s14 }
 0x1a5   : > { %2739 = vrot.lane.b32.xlu1 %v2724_v12, %s4369_s14  ;;  %s3327_s14 = sshll.u32 %s5511_s9, 1  ;;  %s3626_s9 = sshll.u32 %s4352_s22, 1 }
 0x1a6   : > { %s259_s13 = sadd.s32 %s3328_s10, %s3327_s14  ;;  %s3190_s27 = sadd.s32 %s4348_s21, %s3626_s9 }
 0x1a7   : > { %s3329_s15 = sshll.u32 %s259_s13, 3  ;;  %s246_s14 = scalar_lea.vmem [#allocation3], %s3323_s8 }
 0x1a8   : > { %2801 = vrot.lane.b32.xlu0 %v2785_v52, %s4368_s30  ;;  %s5344_s17 = scalar_lea.vmem %s5493_s4, %s3329_s15  ;;  %s3194_s10 = sshll.u32 %s246_s14, 4  ;;  %s5438_s10 = int_to_ptr.vmem [resolvable:$true] %s3194_s10 }
 0x1a9   : > { %2803 = vrot.lane.b32.xlu1 %v2788_v31, %s4368_s30  ;;  %s3627_s30 = sshll.u32 %s3190_s27, 5  ;;  %s3175_s21 = scalar_lea.sflag [#allocation4], %s244_s26 }
 0x1aa   : > { %s5436_s22 = scalar_lea.hbm %s5494_s5, %s3627_s30  ;;  %s4270_s12 = scalar_lea.vmem %s5438_s10, 32 }
 0x1ab   : > { %p4271_p0 = scmp.ne.s32.totalorder %s5438_s10, %s4270_s12 }
 0x1ad   : > { %p4272_p1 = pnand %p4271_p0, %p4452_p3 }
 0x1af   : > { %p4273_p2 = pneg %p4272_p1 }
 0x1be   : > { %v1852_v49 = vpop.permute.xlu0 %1851 }
 0x1bf   : > { %v1848_v30 = vpop.permute.xlu1 %1847 }
 0x1c2   : > { %v5162_v62 = vpop.permute.xlu0 %1857 }
 0x1c3   : > { %v1850_v32 = vpop.permute.xlu1 %1849 }
 0x1c6   : > { %v5164_v34 = vpop.permute.xlu0 %1861 }
 0x1c7   : > { %v1854_v53 = vpop.permute.xlu1 %1853 }
 0x1ca   : > { %v1783_v43 = vpop.permute.xlu0 %1782 }
 0x1cb   : > { %v1856_v55 = vpop.permute.xlu1 %1855  ;;  %v1865_v39 = vsel %vm1863_vm13, %v4749_v37, %v1783_v43 }
 0x1cc   : > { %v1882_v35 = vsel %vm1880_vm14, %v1865_v39, %v1848_v30 }
 0x1cd   : > { %3985 = vmatprep.mubr.msk.bf16.mxu0 %vm2266_vm15, %v1882_v35 }
 0x1ce   : > { %v1785_v41 = vpop.permute.xlu0 %1784 }
 0x1cf   : > { %v2170_v2 = vpop.permute.xlu1 %2169  ;;  %v1867_v9 = vsel %vm1863_vm13, %v4776_v56, %v1785_v41  ;;  %v5186_v56 = vld [vmem:[%s5491_s2 + $0x70] sm:$0xff]  }
 0x1d0   : > { %v1884_v47 = vsel %vm1880_vm14, %v1867_v9, %v1850_v32 }
 0x1d1   : > { %3986 = vmatmul.mubr.msk.bf16.vlgmr.msra.gmra.mrb[32].mxu0 %vm2266_vm15, %v1884_v47 }
 0x1d2   : > { %v1787_v37 = vpop.permute.xlu0 %1786  ;;  %4002 = vmatpush3.bf16.msra.mxu0 %v4908_v40 }
 0x1d3   : > { %v2172_v11 = vpop.permute.xlu1 %2171  ;;  %v1869_v15 = vsel %vm1863_vm13, %v4794_v5, %v1787_v37  ;;  %4003 = vmatprep.subr.bf16.mxu0 %v5175_v13  ;;  %v5197_v5 = vld [vmem:[%s5491_s2 + $0x78] sm:$0xff]  }
 0x1d4   : > { %v1886_v50 = vsel %vm1880_vm14, %v1869_v15, %v1852_v49 }
 0x1d5   : > { %3989 = vmatprep.mubr.msk.bf16.mxu0 %vm2266_vm15, %v1886_v50 }
 0x1d6   : > { %v5190_v58 = vpop.permute.xlu0 %2179  ;;  %4004 = vmatpush3.bf16.msra.mxu0 %v5175_v13 }
 0x1d7   : > { %v1860_v54 = vpop.permute.xlu1 %1859  ;;  %4005 = vmatprep.subr.bf16.mxu0 %v5186_v56 }
 0x1da   : > { %v1791_v6 = vpop.permute.xlu0 %1790  ;;  %4006 = vmatpush3.bf16.msra.mxu0 %v5186_v56 }
 0x1db   : > { %v2174_v59 = vpop.permute.xlu1 %2173  ;;  %4007 = vmatprep.subr.bf16.mxu0 %v5197_v5  ;;  %v1873_v7 = vsel %vm1863_vm13, %v4837_v45, %v1791_v6 }
 0x1dc   : > { %v1890_v12 = vsel %vm1880_vm14, %v1873_v7, %v1856_v55 }
 0x1de   : > { %v1793_v60 = vpop.permute.xlu0 %1792  ;;  %4008 = vmatpush3.bf16.msra.mxu0 %v5197_v5 }
 0x1df   : > { %v2176_v33 = vpop.permute.xlu1 %2175  ;;  %4009 = vmatprep.subr.bf16.mxu0 %v5204_v42  ;;  %v1875_v45 = vsel %vm1863_vm13, %v4859_v61, %v1793_v60 }
 0x1e0   : > { %v1892_v32 = vsel %vm1880_vm14, %v1875_v45, %v5162_v62 }
 0x1e2   : > { %v2108_v38 = vpop.permute.xlu0 %2107  ;;  %4010 = vmatpush3.bf16.msra.mxu0 %v5204_v42 }
 0x1e3   : > { %v2178_v44 = vpop.permute.xlu1 %2177  ;;  %4011 = vmatprep.subr.bf16.mxu0 %v5211_v8  ;;  %v2188_v23 = vsel %vm1863_vm13, %v4880_v16, %v2108_v38 }
 0x1e6   : > { %v1795_v24 = vpop.permute.xlu0 %1794  ;;  %4012 = vmatpush3.bf16.msra.mxu0 %v5211_v8 }
 0x1e7   : > { %v1789_v3 = vpop.permute.xlu1 %1788  ;;  %v1877_v31 = vsel %vm1863_vm13, %v4900_v36, %v1795_v24 }
 0x1e8   : > { %v1871_v20 = vsel %vm1863_vm13, %v4892_v28, %v1789_v3  ;;  %v1894_v61 = vsel %vm1880_vm14, %v1877_v31, %v1860_v54 }
 0x1e9   : > { %v1888_v21 = vsel %vm1880_vm14, %v1871_v20, %v1854_v53  ;;  %v2204_v53 = vsel %vm1880_vm14, %v2188_v23, %v2172_v11 }
 0x1ea   : > { %3990 = vmatmul.mubr.msk.bf16.gmra.mrb[36].mxu0 %vm2266_vm15, %v1888_v21  ;;  %v1797_v57 = vpop.permute.xlu0 %1796 }
 0x1eb   : > { %v2790_v25 = vpop.permute.xlu1 %2789  ;;  %3993 = vmatprep.mubr.msk.bf16.mxu0 %vm2266_vm15, %v1890_v12 }
 0x1ee   : > { %v2112_v52 = vpop.permute.xlu0 %2111 }
 0x1ef   : > { %v2106_v28 = vpop.permute.xlu1 %2105  ;;  %v2192_v62 = vsel %vm1863_vm13, %v4932_v1, %v2112_v52 }
 0x1f0   : > { %v2186_v49 = vsel %vm1863_vm13, %v4928_v0, %v2106_v28  ;;  %v1879_v0 = vsel %vm1863_vm13, %v4925_v63, %v1797_v57  ;;  %v2208_v63 = vsel %vm1880_vm14, %v2192_v62, %v2176_v33 }
 0x1f1   : > { %v2202_v30 = vsel %vm1880_vm14, %v2186_v49, %v2170_v2  ;;  %v1896_v2 = vsel %vm1880_vm14, %v1879_v0, %v5164_v34 }
 0x1f2   : > { %3957 = vmatprep.mubr.msk.bf16.mxu1 %vm2266_vm15, %v2202_v30  ;;  %3994 = vmatmul.mubr.msk.bf16.gmra.mrb[40].mxu0 %vm2266_vm15, %v1892_v32  ;;  %v2114_v36 = vpop.permute.xlu0 %2113 }
 0x1f3   : > { %v2792_v16 = vpop.permute.xlu1 %2791  ;;  %3958 = vmatmul.mubr.msk.bf16.vlgmr.msra.gmra.mrb[32].mxu1 %vm2266_vm15, %v2204_v53  ;;  %3997 = vmatprep.mubr.msk.bf16.mxu0 %vm2266_vm15, %v1894_v61  ;;  %v2194_v39 = vsel %vm1863_vm13, %v4955_v17, %v2114_v36 }
 0x1f4   : > { %4035 = vmatpush3.bf16.msra.mxu1 %v4908_v40 }
 0x1f5   : > { %4030 = vmatprep.subr.bf16.mxu1 %v5175_v13 }
 0x1f6   : > { %v2184_v55 = vpop.permute.xlu0 %2183 }
 0x1f7   : > { %v2110_v43 = vpop.permute.xlu1 %2109 }
 0x1f8   : > { %v2190_v35 = vsel %vm1863_vm13, %v4973_v48, %v2110_v43  ;;  %4036 = vmatpush3.bf16.msra.mxu1 %v5175_v13  ;;  %v2210_v48 = vsel %vm1880_vm14, %v2194_v39, %v2178_v44  ;;  %v5318_v39 = vld [vmem:[%s5492_s3] ss:$0 sm:$0xff] }
 0x1f9   : > { %v2206_v40 = vsel %vm1880_vm14, %v2190_v35, %v2174_v59  ;;  %4031 = vmatprep.subr.bf16.mxu1 %v5186_v56 }
 0x1fa   : > { %3961 = vmatprep.mubr.msk.bf16.mxu1 %vm2266_vm15, %v2206_v40  ;;  %3998 = vmatmul.mubr.msk.bf16.gmra.mrb[44].mxu0 %vm2266_vm15, %v1896_v2  ;;  %v2116_v17 = vpop.permute.xlu0 %2115 }
 0x1fb   : > { %v2182_v1 = vpop.permute.xlu1 %2181  ;;  %3962 = vmatmul.mubr.msk.bf16.gmra.mrb[36].mxu1 %vm2266_vm15, %v2208_v63  ;;  %v2196_v34 = vsel %vm1863_vm13, %v4995_v18, %v2116_v17 }
 0x1fc   : > { %3965 = vmatprep.mubr.msk.bf16.mxu1 %vm2266_vm15, %v2210_v48  ;;  %4037 = vmatpush3.bf16.msra.mxu1 %v5186_v56  ;;  %v2212_v18 = vsel %vm1880_vm14, %v2196_v34, %v5190_v58 }
 0x1fd   : > { %4032 = vmatprep.subr.bf16.mxu1 %v5197_v5 }
 0x1fe   : > { %v2728_v9 = vpop.permute.xlu0 %2727 }
 0x1ff   : > { %v2726_v41 = vpop.permute.xlu1 %2725  ;;  %v2808_v47 = vsel %vm1863_vm13, %v5015_v46, %v2728_v9 }
 0x200   : > { %v2806_v13 = vsel %vm1863_vm13, %v5004_v29, %v2726_v41  ;;  %4038 = vmatpush3.bf16.msra.mxu1 %v5197_v5  ;;  %v2824_v11 = vsel %vm1880_vm14, %v2808_v47, %v2792_v16 }
 0x201   : > { %v2822_v37 = vsel %vm1880_vm14, %v2806_v13, %v2790_v25  ;;  %4033 = vmatprep.subr.bf16.mxu1 %v5204_v42 }
 0x202   : > { %4013 = vmatprep.mubr.msk.bf16.mxu0 %vm2266_vm15, %v2822_v37  ;;  %v2118_v29 = vpop.permute.xlu0 %2117 }
 0x203   : > { %v2794_v15 = vpop.permute.xlu1 %2793  ;;  %3966 = vmatmul.mubr.msk.bf16.gmra.mrb[40].mxu1 %vm2266_vm15, %v2212_v18  ;;  %4014 = vmatmul.mubr.msk.bf16.vlgmr.msra.gmra.mrb[32].mxu0 %vm2266_vm15, %v2824_v11  ;;  %v2198_v46 = vsel %vm1863_vm13, %v5035_v4, %v2118_v29 }
 0x204   : > { %4039 = vmatpush3.bf16.msra.mxu1 %v5204_v42  ;;  %v2214_v56 = vsel %vm1880_vm14, %v2198_v46, %v2182_v1 }
 0x205   : > { %4034 = vmatprep.subr.bf16.mxu1 %v5211_v8  ;;  %3969 = vmatprep.mubr.msk.bf16.mxu1 %vm2266_vm15, %v2214_v56 }
 0x206   : > { %v2120_v54 = vpop.permute.xlu0 %2119 }
 0x207   : > { %v2730_v50 = vpop.permute.xlu1 %2729  ;;  %v2200_v5 = vsel %vm1863_vm13, %v5041_v19, %v2120_v54 }
 0x208   : > { %v2810_v58 = vsel %vm1863_vm13, %v5050_v14, %v2730_v50  ;;  %4040 = vmatpush3.bf16.msra.mxu1 %v5211_v8  ;;  %v2216_v59 = vsel %vm1880_vm14, %v2200_v5, %v2184_v55 }
 0x209   : > { %v2826_v4 = vsel %vm1880_vm14, %v2810_v58, %v2794_v15 }
 0x20a   : > { %4017 = vmatprep.mubr.msk.bf16.mxu0 %vm2266_vm15, %v2826_v4  ;;  %v2732_v42 = vpop.permute.xlu0 %2731 }
 0x20b   : > { %v2796_v6 = vpop.permute.xlu1 %2795  ;;  %3970 = vmatmul.mubr.msk.bf16.gmra.mrb[44].mxu1 %vm2266_vm15, %v2216_v59  ;;  %v2812_v33 = vsel %vm1863_vm13, %v5066_v51, %v2732_v42 }
 0x20c   : > { %v2828_v14 = vsel %vm1880_vm14, %v2812_v33, %v2796_v6 }
 0x20d   : > { %4018 = vmatmul.mubr.msk.bf16.gmra.mrb[36].mxu0 %vm2266_vm15, %v2828_v14 }
 0x20e   : > { %v2734_v60 = vpop.permute.xlu0 %2733 }
 0x20f   : > { %v2736_v19 = vpop.permute.xlu1 %2735  ;;  %v2814_v44 = vsel %vm1863_vm13, %v5091_v27, %v2734_v60 }
 0x210   : > { %v2816_v8 = vsel %vm1863_vm13, %v5088_v26, %v2736_v19 }
 0x212   : > { %v2798_v7 = vpop.permute.xlu0 %2797 }
 0x213   : > { %v2800_v38 = vpop.permute.xlu1 %2799  ;;  %v2830_v24 = vsel %vm1880_vm14, %v2814_v44, %v2798_v7 }
 0x214   : > { %v2832_v3 = vsel %vm1880_vm14, %v2816_v8, %v2800_v38  ;;  %4021 = vmatprep.mubr.msk.bf16.mxu1 %vm2266_vm15, %v2830_v24 }
 0x215   : > { %4022 = vmatmul.mubr.msk.bf16.vlgmr.msra.gmra.mrb[48].mxu1 %vm2266_vm15, %v2832_v3 }
 0x216   : > { %v2738_v20 = vpop.permute.xlu0 %2737 }
 0x217   : > { %v2740_v51 = vpop.permute.xlu1 %2739  ;;  %v2818_v26 = vsel %vm1863_vm13, %v5124_v22, %v2738_v20 }
 0x218   : > { %v2820_v21 = vsel %vm1863_vm13, %v5121_v10, %v2740_v51 }
 0x21a   : > { %v2802_v27 = vpop.permute.xlu0 %2801 }
 0x21b   : > { %v2804_v12 = vpop.permute.xlu1 %2803  ;;  %v2834_v57 = vsel %vm1880_vm14, %v2818_v26, %v2802_v27 }
 0x21c   : > { %v2836_v25 = vsel %vm1880_vm14, %v2820_v21, %v2804_v12  ;;  %4025 = vmatprep.mubr.msk.bf16.mxu1 %vm2266_vm15, %v2834_v57 }
 0x21d   : > { %4026 = vmatmul.mubr.msk.bf16.gmra.mrb[52].mxu1 %vm2266_vm15, %v2836_v25 }
 0x2c5   : > { %v3995_v45 = vpop.f32.mrb[40].mxu0 }
 0x2c6   : > { %v3959_v23 = vpop.f32.mrb[32].mxu1  ;;  %v2498_v31 = vpop.f32.mrb[41].mxu0 }
 0x2c7   : > { %v2317_v28 = vpop.f32.mrb[33].mxu1  ;;  %v3996_v52 = vpop.f32.mrb[42].mxu0 }
 0x2c8   : > { %v3960_v10 = vpop.f32.mrb[34].mxu1  ;;  %v2501_v49 = vpop.f32.mrb[43].mxu0 }
 0x2c9   : > { %v2320_v30 = vpop.f32.mrb[35].mxu1 }
 0x2cd   : > { %v3999_v22 = vpop.f32.mrb[44].mxu0 }
 0x2ce   : > { %v3963_v32 = vpop.f32.mrb[36].mxu1  ;;  %v2514_v53 = vpop.f32.mrb[45].mxu0 }
 0x2cf   : > { %v2333_v61 = vpop.f32.mrb[37].mxu1  ;;  %v4000_v16 = vpop.f32.mrb[46].mxu0 }
 0x2d0   : > { %v3964_v36 = vpop.f32.mrb[38].mxu1  ;;  %v2517_v0 = vpop.f32.mrb[47].mxu0 }
 0x2d1   : > { %v2336_v62 = vpop.f32.mrb[39].mxu1 }
 0x2d6   : > { %v3967_v43 = vpop.f32.mrb[40].mxu1  ;;  %v4015_v55 = vpop.f32.mrb[32].mxu0 }
 0x2d7   : > { %v5320_v35 = vadd.f32 %v3995_v45, %v3967_v43  ;;  %v4041_v40 = vadd.f32 %v4015_v55, %v3959_v23  ;;  %v2349_v2 = vpop.f32.mrb[41].mxu1  ;;  %v2936_v63 = vpop.f32.mrb[33].mxu0 }
 0x2d8   : > { %v5322_v1 = vadd.f32 %v2498_v31, %v2349_v2  ;;  %v4042_v17 = vadd.f32 %v2936_v63, %v2317_v28  ;;  %v3968_v48 = vpop.f32.mrb[42].mxu1  ;;  %v4016_v34 = vpop.f32.mrb[34].mxu0 }
 0x2d9   : > { %v3024_v41 = vadd.f32 %v4041_v40, %v5318_v39  ;;  %v5325_v9 = vadd.f32 %v3996_v52, %v3968_v48  ;;  %v4043_v13 = vadd.f32 %v4016_v34, %v3960_v10  ;;  %v2352_v47 = vpop.f32.mrb[43].mxu1  ;;  %v2939_v11 = vpop.f32.mrb[35].mxu0 }
 0x2da   : > { %v3022_v37 = vadd.f32 %v4042_v17, %v5318_v39  ;;  %v5329_v18 = vadd.f32 %v2501_v49, %v2352_v47  ;;  %v4044_v15 = vadd.f32 %v2939_v11, %v2320_v30 }
 0x2db   : > { %4238 = vtanh.f32 %v3024_v41  ;;  %v3025_v29 = vadd.f32 %v4043_v13, %v5318_v39 }
 0x2dc   : > { %4240 = vtanh.f32 %v3022_v37  ;;  %v3023_v46 = vadd.f32 %v4044_v15, %v5318_v39 }
 0x2dd   : > { %4242 = vtanh.f32 %v3025_v29 }
 0x2de   : > { %4244 = vtanh.f32 %v3023_v46  ;;  %v3971_v56 = vpop.f32.mrb[44].mxu1 }
 0x2df   : > { %v5333_v50 = vadd.f32 %v3999_v22, %v3971_v56  ;;  %v2365_v54 = vpop.f32.mrb[45].mxu1 }
 0x2e0   : > { %v5335_v58 = vadd.f32 %v2514_v53, %v2365_v54  ;;  %v3972_v5 = vpop.f32.mrb[46].mxu1  ;;  %v4019_v6 = vpop.f32.mrb[36].mxu0 }
 0x2e1   : > { %v5337_v4 = vadd.f32 %v4000_v16, %v3972_v5  ;;  %v2368_v59 = vpop.f32.mrb[47].mxu1  ;;  %v4045_v33 = vadd.f32 %v4019_v6, %v3963_v32  ;;  %v2952_v14 = vpop.f32.mrb[37].mxu0 }
 0x2e2   : > { %v5339_v42 = vadd.f32 %v2517_v0, %v2368_v59  ;;  %v4046_v19 = vadd.f32 %v2952_v14, %v2333_v61  ;;  %v4020_v60 = vpop.f32.mrb[38].mxu0 }
 0x2e3   : > { %v3028_v8 = vadd.f32 %v4045_v33, %v5318_v39  ;;  %v4047_v44 = vadd.f32 %v4020_v60, %v3964_v36  ;;  %v2955_v38 = vpop.f32.mrb[39].mxu0 }
 0x2e4   : > { %v3026_v3 = vadd.f32 %v4046_v19, %v5318_v39  ;;  %v4048_v24 = vadd.f32 %v2955_v38, %v2336_v62 }
 0x2e5   : > { %v4239_v7 = vpop.eup %4238  ;;  %4246 = vtanh.f32 %v3028_v8  ;;  %v3029_v20 = vadd.f32 %v4047_v44, %v5318_v39 }
 0x2e6   : > { %v4241_v51 = vpop.eup %4240  ;;  %3150 = vst.msk [vmem:[%s5344_s17 + $0x10] sm:$0xff] %vm3054_vm0, %v4239_v7  ;;  %4248 = vtanh.f32 %v3026_v3  ;;  %v3027_v12 = vadd.f32 %v4048_v24, %v5318_v39  ;;  %v3096_v25 = vmul.f32 %v4239_v7, %v4239_v7  ;;  %v3058_v28 = vsel %vm3054_vm0, %v4239_v7, 0.0 }
 0x2e7   : > { %v4243_v21 = vpop.eup %4242  ;;  %v3094_v26 = vmul.f32 %v4241_v51, %v4241_v51  ;;  %3148 = vst.msk [vmem:[%s5344_s17] sm:$0xff] %vm3054_vm0, %v4241_v51  ;;  %4250 = vtanh.f32 %v3029_v20  ;;  %v3055_v57 = vsel %vm3054_vm0, %v4241_v51, 0.0 }
 0x2e8   : > { %v4245_v27 = vpop.eup %4244  ;;  %3151 = vst.msk [vmem:[%s5344_s17 + $0x18] sm:$0xff] %vm3054_vm0, %v4243_v21  ;;  %4252 = vtanh.f32 %v3027_v12  ;;  %v4023_v31 = vpop.f32.mrb[48].mxu1  ;;  %v3097_v22 = vmul.f32 %v4243_v21, %v4243_v21  ;;  %v3113_v55 = vsel %vm3054_vm0, %v3096_v25, 0.0 }
 0x2e9   : > { %v3056_v45 = vsel %vm3054_vm0, %v4245_v27, 0.0  ;;  %v3095_v23 = vmul.f32 %v4245_v27, %v4245_v27  ;;  %3149 = vst.msk [vmem:[%s5344_s17 + $0x8] sm:$0xff] %vm3054_vm0, %v4245_v27  ;;  %v3009_v10 = vadd.f32 %v4023_v31, %v5320_v35  ;;  %v2968_v49 = vpop.f32.mrb[49].mxu1  ;;  %v3110_v30 = vsel %vm3054_vm0, %v3094_v26, 0.0 }
 0x2ea   : > { %v3057_v52 = vadd.f32 %v3056_v45, %v3055_v57  ;;  %v3007_v53 = vadd.f32 %v2968_v49, %v5322_v1  ;;  %v4024_v61 = vpop.f32.mrb[50].mxu1  ;;  %v3060_v35 = vsel %vm3054_vm0, %v4243_v21, 0.0  ;;  %v3115_v48 = vsel %vm3054_vm0, %v3097_v22, 0.0 }
 0x2eb   : > { %v3111_v32 = vsel %vm3054_vm0, %v3095_v23, 0.0  ;;  %v3032_v0 = vadd.f32 %v5318_v39, %v3009_v10  ;;  %v3010_v62 = vadd.f32 %v4024_v61, %v5325_v9  ;;  %v2971_v43 = vpop.f32.mrb[51].mxu1 }
 0x2ec   : > { %v3059_v16 = vadd.f32 %v3058_v28, %v3057_v52  ;;  %v3112_v36 = vadd.f32 %v3111_v32, %v3110_v30  ;;  %v3030_v40 = vadd.f32 %v5318_v39, %v3007_v53  ;;  %v3008_v2 = vadd.f32 %v2971_v43, %v5329_v18 }
 0x2ed   : > { %4254 = vtanh.f32 %v3032_v0  ;;  %v3033_v1 = vadd.f32 %v5318_v39, %v3010_v62 }
 0x2ee   : > { %v3114_v63 = vadd.f32 %v3113_v55, %v3112_v36  ;;  %v3061_v17 = vadd.f32 %v3060_v35, %v3059_v16  ;;  %4256 = vtanh.f32 %v3030_v40  ;;  %v3031_v34 = vadd.f32 %v5318_v39, %v3008_v2 }
 0x2ef   : > { %v4247_v41 = vpop.eup %4246  ;;  %4258 = vtanh.f32 %v3033_v1 }
 0x2f0   : > { %v3116_v9 = vadd.f32 %v3115_v48, %v3114_v63  ;;  %v4249_v13 = vpop.eup %4248  ;;  %3154 = vst.msk [vmem:[%s5344_s17 + $0x30] sm:$0xff] %vm3054_vm0, %v4247_v41  ;;  %4260 = vtanh.f32 %v3031_v34  ;;  %v4027_v47 = vpop.f32.mrb[52].mxu1  ;;  %v3100_v56 = vmul.f32 %v4247_v41, %v4247_v41  ;;  %v3066_v60 = vsel %vm3054_vm0, %v4247_v41, 0.0 }
 0x2f1   : > { %v4251_v11 = vpop.eup %4250  ;;  %v3062_v37 = vsel %vm3054_vm0, %v4249_v13, 0.0  ;;  %v3098_v18 = vmul.f32 %v4249_v13, %v4249_v13  ;;  %3152 = vst.msk [vmem:[%s5344_s17 + $0x20] sm:$0xff] %vm3054_vm0, %v4249_v13  ;;  %v3013_v15 = vadd.f32 %v4027_v47, %v5333_v50  ;;  %v2984_v29 = vpop.f32.mrb[53].mxu1 }
 0x2f2   : > { %v4253_v46 = vpop.eup %4252  ;;  %v3063_v54 = vadd.f32 %v3062_v37, %v3061_v17  ;;  %3155 = vst.msk [vmem:[%s5344_s17 + $0x38] sm:$0xff] %vm3054_vm0, %v4251_v11  ;;  %v4028_v5 = vpop.f32.mrb[54].mxu1  ;;  %v3011_v44 = vadd.f32 %v2984_v29, %v5335_v58  ;;  %v3101_v24 = vmul.f32 %v4251_v11, %v4251_v11  ;;  %v3121_v12 = vsel %vm3054_vm0, %v3100_v56, 0.0 }
 0x2f3   : > { %v3117_v59 = vsel %vm3054_vm0, %v3098_v18, 0.0  ;;  %v3064_v6 = vsel %vm3054_vm0, %v4253_v46, 0.0  ;;  %v3099_v33 = vmul.f32 %v4253_v46, %v4253_v46  ;;  %3153 = vst.msk [vmem:[%s5344_s17 + $0x28] sm:$0xff] %vm3054_vm0, %v4253_v46  ;;  %v3036_v14 = vadd.f32 %v5318_v39, %v3013_v15  ;;  %v2987_v19 = vpop.f32.mrb[55].mxu1 }
 0x2f4   : > { %v3118_v50 = vadd.f32 %v3117_v59, %v3116_v9  ;;  %v3065_v8 = vadd.f32 %v3064_v6, %v3063_v54  ;;  %v3014_v7 = vadd.f32 %v4028_v5, %v5337_v4  ;;  %v3012_v3 = vadd.f32 %v2987_v19, %v5339_v42 }
 0x2f5   : > { %v3119_v38 = vsel %vm3054_vm0, %v3099_v33, 0.0  ;;  %4262 = vtanh.f32 %v3036_v14  ;;  %v3034_v21 = vadd.f32 %v5318_v39, %v3011_v44  ;;  %v3068_v27 = vsel %vm3054_vm0, %v4251_v11, 0.0 }
 0x2f6   : > { %v3067_v51 = vadd.f32 %v3066_v60, %v3065_v8  ;;  %v3120_v20 = vadd.f32 %v3119_v38, %v3118_v50  ;;  %v3037_v58 = vadd.f32 %v5318_v39, %v3014_v7  ;;  %v3035_v25 = vadd.f32 %v5318_v39, %v3012_v3 }
 0x2f7   : > { %v4255_v26 = vpop.eup %4254  ;;  %4264 = vtanh.f32 %v3034_v21  ;;  %v3123_v52 = vsel %vm3054_vm0, %v3101_v24, 0.0 }
 0x2f8   : > { %v4257_v57 = vpop.eup %4256  ;;  %v3122_v4 = vadd.f32 %v3121_v12, %v3120_v20  ;;  %3158 = vst.msk [vmem:[%s5344_s17 + $0x50] sm:$0xff] %vm3054_vm0, %v4255_v26  ;;  %v3069_v42 = vadd.f32 %v3068_v27, %v3067_v51  ;;  %4266 = vtanh.f32 %v3037_v58  ;;  %v3104_v32 = vmul.f32 %v4255_v26, %v4255_v26 }
 0x2f9   : > { %v4259_v45 = vpop.eup %4258  ;;  %v3070_v23 = vsel %vm3054_vm0, %v4257_v57, 0.0  ;;  %v3102_v31 = vmul.f32 %v4257_v57, %v4257_v57  ;;  %3156 = vst.msk [vmem:[%s5344_s17 + $0x40] sm:$0xff] %vm3054_vm0, %v4257_v57  ;;  %4268 = vtanh.f32 %v3035_v25  ;;  %v3074_v61 = vsel %vm3054_vm0, %v4255_v26, 0.0 }
 0x2fa   : > { %v4261_v28 = vpop.eup %4260  ;;  %v3071_v10 = vadd.f32 %v3070_v23, %v3069_v42  ;;  %3159 = vst.msk [vmem:[%s5344_s17 + $0x58] sm:$0xff] %vm3054_vm0, %v4259_v45  ;;  %v3124_v22 = vadd.f32 %v3123_v52, %v3122_v4  ;;  %v3105_v62 = vmul.f32 %v4259_v45, %v4259_v45  ;;  %v3076_v55 = vsel %vm3054_vm0, %v4259_v45, 0.0 }
 0x2fb   : > { %v3125_v39 = vsel %vm3054_vm0, %v3102_v31, 0.0  ;;  %v3072_v49 = vsel %vm3054_vm0, %v4261_v28, 0.0  ;;  %v3103_v30 = vmul.f32 %v4261_v28, %v4261_v28  ;;  %3157 = vst.msk [vmem:[%s5344_s17 + $0x48] sm:$0xff] %vm3054_vm0, %v4261_v28  ;;  %v3129_v2 = vsel %vm3054_vm0, %v3104_v32, 0.0 }
 0x2fc   : > { %v3073_v53 = vadd.f32 %v3072_v49, %v3071_v10  ;;  %v3126_v16 = vadd.f32 %v3125_v39, %v3124_v22  ;;  %v3131_v1 = vsel %vm3054_vm0, %v3105_v62, 0.0 }
 0x2fd   : > { %v3127_v36 = vsel %vm3054_vm0, %v3103_v30, 0.0 }
 0x2fe   : > { %v3075_v0 = vadd.f32 %v3074_v61, %v3073_v53  ;;  %v3128_v35 = vadd.f32 %v3127_v36, %v3126_v16 }
 0x2ff   : > { %v4263_v43 = vpop.eup %4262 }
 0x300   : > { %3162 = vst.msk [vmem:[%s5344_s17 + $0x70] sm:$0xff] %vm3054_vm0, %v4263_v43  ;;  %v3077_v40 = vadd.f32 %v3076_v55, %v3075_v0  ;;  %v3130_v63 = vadd.f32 %v3129_v2, %v3128_v35  ;;  %v3108_v18 = vmul.f32 %v4263_v43, %v4263_v43  ;;  %v3082_v56 = vsel %vm3054_vm0, %v4263_v43, 0.0 }
 0x301   : > { %v4265_v17 = vpop.eup %4264 }
 0x302   : > { %v4267_v48 = vpop.eup %4266  ;;  %3160 = vst.msk [vmem:[%s5344_s17 + $0x60] sm:$0xff] %vm3054_vm0, %v4265_v17  ;;  %v3078_v34 = vsel %vm3054_vm0, %v4265_v17, 0.0  ;;  %v3106_v41 = vmul.f32 %v4265_v17, %v4265_v17  ;;  %v3132_v9 = vadd.f32 %v3131_v1, %v3130_v63  ;;  %v3137_v14 = vsel %vm3054_vm0, %v3108_v18, 0.0 }
 0x303   : > { %v4269_v13 = vpop.eup %4268  ;;  %3163 = vst.msk [vmem:[%s5344_s17 + $0x78] sm:$0xff] %vm3054_vm0, %v4267_v48  ;;  %v3079_v47 = vadd.f32 %v3078_v34, %v3077_v40  ;;  %v3109_v54 = vmul.f32 %v4267_v48, %v4267_v48  ;;  %v3084_v33 = vsel %vm3054_vm0, %v4267_v48, 0.0 }
 0x304   : > { %3161 = vst.msk [vmem:[%s5344_s17 + $0x68] sm:$0xff] %vm3054_vm0, %v4269_v13  ;;  %v3080_v11 = vsel %vm3054_vm0, %v4269_v13, 0.0  ;;  %v3107_v37 = vmul.f32 %v4269_v13, %v4269_v13  ;;  %v3133_v15 = vsel %vm3054_vm0, %v3106_v41, 0.0  ;;  %s4274_s17 = sshll.u32 %s4370_s16, 4  ;;  %s4275_s17 = int_to_ptr.vmem [resolvable:$false] %s4274_s17 }
 0x305   : > { %v3081_v29 = vadd.f32 %v3080_v11, %v3079_v47  ;;  %v3134_v46 = vadd.f32 %v3133_v15, %v3132_v9  ;;  %v3139_v50 = vsel %vm3054_vm0, %v3109_v54, 0.0  ;;  %s4276_s8 = scalar_lea.vmem %s4275_s17, 64  ;;  %p4277_p4 = scmp.lt.s32.totalorder %s5438_s10, %s4275_s17 }
 0x306   : > { %v3135_v5 = vsel %vm3054_vm0, %v3107_v37, 0.0  ;;  %p4278_p5 = scmp.lt.s32.totalorder %s4276_s8, %s4270_s12 }
 0x307   : > { %v3083_v59 = vadd.f32 %v3082_v56, %v3081_v29  ;;  %v3136_v6 = vadd.f32 %v3135_v5, %v3134_v46 }
 0x308   : > { %p4279_p6 = por %p4278_p5, %p4277_p4 }
 0x309   : > { %v3085_v19 = vadd.f32 %v3084_v33, %v3083_v59  ;;  %v3138_v60 = vadd.f32 %v3137_v14, %v3136_v6 }
 0x30a   : > { %p4280_p7 = pnand %p4279_p6, %p4273_p2 }
 0x30b   : > { %v3086_v8 = vrot.slane %v3085_v19, 4  ;;  %v3140_v44 = vadd.f32 %v3139_v50, %v3138_v60 }
 0x30d   : > { %v3087_v38 = vadd.f32 %v3086_v8, %v3085_v19  ;;  %v3141_v7 = vrot.slane %v3140_v44, 4 }
 0x30f   : > { %v3088_v3 = vrot.slane %v3087_v38, 2  ;;  %v3142_v24 = vadd.f32 %v3141_v7, %v3140_v44 }
 0x311   : > { %v3089_v51 = vadd.f32 %v3088_v3, %v3087_v38  ;;  %v3143_v20 = vrot.slane %v3142_v24, 2 }
 0x313   : > { %v3090_v21 = vrot.slane %v3089_v51, 1  ;;  %v3144_v26 = vadd.f32 %v3143_v20, %v3142_v24 }
 0x315   : > { %v3091_v12 = vadd.f32 %v3090_v21, %v3089_v51  ;;  %v3145_v27 = vrot.slane %v3144_v26, 1 }
 0x317   : > { %3093 = vst.msk [vmem:[%s246_s14] sm:$0x1] %vm3092_vm2, %v3091_v12  ;;  %v3146_v58 = vadd.f32 %v3145_v27, %v3144_v26 }
 0x319   : > { %3147 = vst.msk [vmem:[%s246_s14 + $0x1] sm:$0x1] %vm3092_vm2, %v3146_v58 }
 0x31a   : > { %4283 = shalt.err (!%p4280_p7)
}
 0x31b   : > { %s4284_s26 = scalar_lea.hbm %s5436_s22, 32  ;;  %s4288_s30 = scalar_lea.hbm %s5494_s5, 128 }
 0x31c   : > { %p4285_p9 = scmp.ne.s32.totalorder %s5436_s22, %s4284_s26  ;;  %p4289_p12 = scmp.lt.u32.totalorder %s5436_s22, %s5494_s5 }
 0x31d   : > { %p4290_p13 = scmp.lt.u32.totalorder %s4288_s30, %s4284_s26  ;;  %p4292_p1 = scmp.lt.u32.totalorder %s4284_s26, %s5436_s22 }
 0x31e   : > { %p4286_p10 = pnand %p4285_p9, %p4452_p3 }
 0x31f   : > { %p4291_p0 = por %p4290_p13, %p4289_p12 }
 0x320   : > { %p4287_p11 = pneg %p4286_p10 }
 0x321   : > { %p4293_p2 = por %p4292_p1, %p4291_p0 }
 0x323   : > { %p4294_p4 = pnand %p4293_p2, %p4287_p11 }
 0x325   : > { %4297 = shalt.err (!%p4294_p4)
}
 0x326   : > { %4073 = dma.vmem_to_hbm [thread:$0]  (%p4452_p3), %s5438_s10, 32, %s5436_s22, %s3175_s21  }
 0x327 PF: > { %p4079_p5 = scmp.ge.s32.totalorder %s4364_s25, 2  ;;  %s3219_s15 = sand.u32 1, %s4336_s18  }
 0x328   : > { %s3220_s12 = scalar_lea.sflag [#allocation4], %s3219_s15 }
 0x329   : > { %p4076_p6 = pnand %p4079_p5, %p4461_p8 }
 0x32b   : > { %4331 = dma.done.wait (!%p4076_p6), %s3220_s12, 32  }
 0x32c   : > { %4333 = vsyncadd (!%p4076_p6), %s3220_s12, 4294967264  ;;  %s19_s25 = sadd.s32 1, %s4364_s25   ;;  %s5497_s18 = smov %s4340_s19 }
 0x32d   : > { %p16_p7 = scmp.ge.s32.totalorder %s19_s25, 6   ;;  %s5498_s19 = smov %s4344_s20 }
 0x32e   : > { %s5499_s20 = smov %s4470_s11  ;;  %s5500_s21 = smov %s4356_s23 }
 0x32f   : > { %s5501_s22 = smov %s4360_s24  ;;  %s5502_s23 = smov %s5505_s28 }
 0x330   : > { %s5503_s24 = smov %s5509_s29  ;;  %18 = sbr.rel (!%p16_p7) target bundleno = 5 (0x5), region = 90 }
 0x337   :  { %3225 = vsyncpa [#allocation4], 1 }
 0x338   :  { %3227 = vsyncpa [#allocation4 + $0x1], 1 }

</bundles_post_ra>
